<compile_context>
chip_gen: v7x
topology: tpu7x:2x2x1
jax: 0.10.0
libtpu: 0.0.40
codegen_flags: <defaults>
</compile_context>

<pallas_src>
import jax
import jax.numpy as jnp
from jax.experimental import pallas as pl
from jax.experimental.pallas import tpu as pltpu

EPS = 1e-6  # matches torch.nn.LayerNorm((512,), eps=1e-06)


def ln_linear_gelu_kernel(x_ref, gamma_ref, beta_ref, w_hi_ref, w_lo_ref,
                          b_ref, o_ref):
    # x_ref:     (rows, C)   f32, resident across N-tiles (constant index_map)
    # gamma/beta:(1, C)      f32, resident
    # w_hi_ref:  (1, C, TN)  bf16, current N-tile of the high weight half
    # w_lo_ref:  (1, C, TN)  bf16, current N-tile of the residual weight half
    # b_ref:     (1, TN)     f32
    # o_ref:     (rows, TN)  f32
    x = x_ref[...]

    # --- LayerNorm over channels, single fused stats pass -------------------
    mean = jnp.mean(x, axis=-1, keepdims=True)
    mean_sq = jnp.mean(x * x, axis=-1, keepdims=True)
    var = mean_sq - mean * mean
    y = (x - mean) * jax.lax.rsqrt(var + EPS) * gamma_ref[...] + beta_ref[...]

    # --- Linear: bf16x3 split-precision matmul on the MXU, f32 accumulate ---
    y_hi = y.astype(jnp.bfloat16)
    y_lo = (y - y_hi.astype(jnp.float32)).astype(jnp.bfloat16)
    w_hi = w_hi_ref[0]
    w_lo = w_lo_ref[0]
    z = jnp.dot(y_hi, w_hi, preferred_element_type=jnp.float32)
    z = z + jnp.dot(y_hi, w_lo, preferred_element_type=jnp.float32)
    z = z + jnp.dot(y_lo, w_hi, preferred_element_type=jnp.float32)
    z = z + b_ref[...]

    # --- Exact GELU: 0.5 * z * (1 + erf(z / sqrt(2)))  (approximate='none') --
    inv_sqrt2 = jnp.float32(0.7071067811865476)
    g = 0.5 * z * (1.0 + jax.lax.erf(z * inv_sqrt2))

    o_ref[...] = g.astype(o_ref.dtype)


def _default_tile_n():
    """TN=256 on v7x (2 TCs -> 4 steps/core), TN=512 on v5e/v6e (1 TC)."""
    try:
        kind = jax.devices()[0].device_kind.lower()
        if "7" in kind:
            return 256
    except Exception:
        pass
    return 512


def layernorm_linear_gelu(x, gamma, beta, w, b, *, tn=None):
    """x: (..., C) float32, w: (C, N) float32, b: (N,). Returns (..., N) f32."""
    orig_shape = x.shape
    C = orig_shape[-1]
    N = w.shape[1]
    rows = 1
    for d in orig_shape[:-1]:
        rows *= d

    if tn is None:
        tn = _default_tile_n()
    if N % tn != 0:
        tn = N
    num_n_tiles = N // tn

    x2d = x.reshape(rows, C)
    gamma2d = gamma.reshape(1, C)
    beta2d = beta.reshape(1, C)
    b2d = b.reshape(1, N)

    # "Init-time" weight prep (done once per weight in a real model):
    #   split into bf16 hi + bf16 residual, then lay each out as
    #   (num_tiles, C, tn) so every per-step weight DMA is contiguous.
    w_f32 = w.astype(jnp.float32)
    w_hi = w_f32.astype(jnp.bfloat16)
    w_lo = (w_f32 - w_hi.astype(jnp.float32)).astype(jnp.bfloat16)
    w_hi_t = w_hi.reshape(C, num_n_tiles, tn).transpose(1, 0, 2)
    w_lo_t = w_lo.reshape(C, num_n_tiles, tn).transpose(1, 0, 2)

    cost = pl.CostEstimate(
        flops=3 * 2 * rows * C * N + 8 * rows * C * num_n_tiles,
        transcendentals=rows * N,                       # erf per output element
        bytes_accessed=(rows * C * 4 + 2 * C * N * 2 + N * 4 + 2 * C * 4
                        + rows * N * 4),
    )

    out = pl.pallas_call(
        ln_linear_gelu_kernel,
        out_shape=jax.ShapeDtypeStruct((rows, N), jnp.float32),
        grid=(num_n_tiles,),
        in_specs=[
            # x / gamma / beta: constant block index -> stay resident in VMEM.
            pl.BlockSpec((rows, C), lambda j: (0, 0)),
            pl.BlockSpec((1, C), lambda j: (0, 0)),
            pl.BlockSpec((1, C), lambda j: (0, 0)),
            # Weight halves: one contiguous (C, tn) tile per grid step.
            pl.BlockSpec((1, C, tn), lambda j: (j, 0, 0)),
            pl.BlockSpec((1, C, tn), lambda j: (j, 0, 0)),
            # Bias tile.
            pl.BlockSpec((1, tn), lambda j: (0, j)),
        ],
        out_specs=pl.BlockSpec((rows, tn), lambda j: (0, j)),
        compiler_params=pltpu.CompilerParams(
            # Disjoint output tiles -> parallel (megacore sharding on v7x).
            dimension_semantics=("parallel",),
            vmem_limit_bytes=16 << 20,
        ),
        cost_estimate=cost,
    )(x2d, gamma2d, beta2d, w_hi_t, w_lo_t, b2d)

    return out.reshape(*orig_shape[:-1], N)


if __name__ == "__main__":
    key = jax.random.PRNGKey(0)
    k_x, k_w, k_b = jax.random.split(key, 3)

    C_IN = 512
    C_OUT = 2048
    x = jax.random.normal(k_x, (1, 14, 14, C_IN), dtype=jnp.float32)

    # Deterministic parameter init (LayerNorm affine = identity init like torch).
    gamma = jnp.ones((C_IN,), dtype=jnp.float32)
    beta = jnp.zeros((C_IN,), dtype=jnp.float32)
    w = jax.random.normal(k_w, (C_IN, C_OUT), dtype=jnp.float32) * 0.02
    b = jax.random.normal(k_b, (C_OUT,), dtype=jnp.float32) * 0.02

    out = layernorm_linear_gelu(x, gamma, beta, w, b)
    out = jax.block_until_ready(out)

    # Reference check in plain JAX (fp32, two-pass LN, exact-erf GELU, eps=1e-6).
    xr = x.astype(jnp.float32)
    mean = jnp.mean(xr, axis=-1, keepdims=True)
    var = jnp.mean((xr - mean) ** 2, axis=-1, keepdims=True)
    xn = (xr - mean) / jnp.sqrt(var + EPS)
    yr = xn * gamma + beta
    zr = yr @ w + b
    ref = 0.5 * zr * (1.0 + jax.lax.erf(zr / jnp.sqrt(2.0)))

    assert out.shape == (1, 14, 14, C_OUT)
    assert jnp.max(jnp.abs(out - ref)) < 1e-3

    print("KERNEL_OK")
</pallas_src>

<mosaic_0001>
module attributes {stable_mosaic.version = 11 : i64} {
  func.func @ln_linear_gelu_kernel(%arg0: i32, %arg1: memref<196x512xf32, #tpu.memory_space<vmem>>, %arg2: memref<1x512xf32, #tpu.memory_space<vmem>>, %arg3: memref<1x512xf32, #tpu.memory_space<vmem>>, %arg4: memref<1x512x512xbf16, #tpu.memory_space<vmem>>, %arg5: memref<1x512x512xbf16, #tpu.memory_space<vmem>>, %arg6: memref<1x512xf32, #tpu.memory_space<vmem>>, %arg7: memref<196x512xf32, #tpu.memory_space<vmem>>) attributes {dimension_semantics = [#tpu.dimension_semantics<parallel>], iteration_bounds = array<i64: 4>, scalar_prefetch = 0 : i64, scratch_operands = 0 : i64, tpu.core_type = #tpu.core_type<tc>, window_params = [{pipeline_mode = #tpu.pipeline_mode<synchronous>, transform_indices = @transform_0, window_bounds = array<i64: 196, 512>}, {pipeline_mode = #tpu.pipeline_mode<synchronous>, transform_indices = @transform_1, window_bounds = array<i64: 1, 512>}, {pipeline_mode = #tpu.pipeline_mode<synchronous>, transform_indices = @transform_2, window_bounds = array<i64: 1, 512>}, {transform_indices = @transform_3, window_bounds = array<i64: 1, 512, 512>}, {transform_indices = @transform_4, window_bounds = array<i64: 1, 512, 512>}, {transform_indices = @transform_5, window_bounds = array<i64: 1, 512>}, {transform_indices = @transform_6, window_bounds = array<i64: 196, 512>}]} {
    %c0 = arith.constant 0 : index
    %c0_0 = arith.constant 0 : index
    %0 = vector.load %arg1[%c0, %c0_0] : memref<196x512xf32, #tpu.memory_space<vmem>>, vector<196x512xf32>
    %cst = arith.constant dense<0.000000e+00> : vector<196xf32>
    %1 = vector.multi_reduction <add>, %0, %cst [1] : vector<196x512xf32> to vector<196xf32>
    %2 = vector.shape_cast %1 : vector<196xf32> to vector<196x1xf32>
    %cst_1 = arith.constant 5.120000e+02 : f32
    %3 = vector.broadcast %cst_1 : f32 to vector<196x1xf32>
    %4 = arith.divf %2, %3 : vector<196x1xf32>
    %5 = arith.mulf %0, %0 : vector<196x512xf32>
    %cst_2 = arith.constant dense<0.000000e+00> : vector<196xf32>
    %6 = vector.multi_reduction <add>, %5, %cst_2 [1] : vector<196x512xf32> to vector<196xf32>
    %7 = vector.shape_cast %6 : vector<196xf32> to vector<196x1xf32>
    %cst_3 = arith.constant 5.120000e+02 : f32
    %8 = vector.broadcast %cst_3 : f32 to vector<196x1xf32>
    %9 = arith.divf %7, %8 : vector<196x1xf32>
    %10 = arith.mulf %4, %4 : vector<196x1xf32>
    %11 = arith.subf %9, %10 : vector<196x1xf32>
    %12 = vector.broadcast %4 : vector<196x1xf32> to vector<196x512xf32>
    %13 = arith.subf %0, %12 : vector<196x512xf32>
    %cst_4 = arith.constant 9.99999997E-7 : f32
    %14 = vector.broadcast %cst_4 : f32 to vector<196x1xf32>
    %15 = arith.addf %11, %14 : vector<196x1xf32>
    %16 = math.rsqrt %15 : vector<196x1xf32>
    %17 = vector.broadcast %16 : vector<196x1xf32> to vector<196x512xf32>
    %18 = arith.mulf %13, %17 : vector<196x512xf32>
    %c0_5 = arith.constant 0 : index
    %c0_6 = arith.constant 0 : index
    %19 = vector.load %arg2[%c0_5, %c0_6] : memref<1x512xf32, #tpu.memory_space<vmem>>, vector<1x512xf32>
    %20 = vector.broadcast %19 : vector<1x512xf32> to vector<196x512xf32>
    %21 = arith.mulf %18, %20 : vector<196x512xf32>
    %c0_7 = arith.constant 0 : index
    %c0_8 = arith.constant 0 : index
    %22 = vector.load %arg3[%c0_7, %c0_8] : memref<1x512xf32, #tpu.memory_space<vmem>>, vector<1x512xf32>
    %23 = vector.broadcast %22 : vector<1x512xf32> to vector<196x512xf32>
    %24 = arith.addf %21, %23 : vector<196x512xf32>
    %25 = arith.truncf %24 : vector<196x512xf32> to vector<196x512xbf16>
    %26 = arith.extf %25 : vector<196x512xbf16> to vector<196x512xf32>
    %27 = arith.subf %24, %26 : vector<196x512xf32>
    %28 = arith.truncf %27 : vector<196x512xf32> to vector<196x512xbf16>
    %c0_9 = arith.constant 0 : index
    %c0_10 = arith.constant 0 : index
    %c0_11 = arith.constant 0 : index
    %29 = vector.load %arg4[%c0_9, %c0_10, %c0_11] : memref<1x512x512xbf16, #tpu.memory_space<vmem>>, vector<1x512x512xbf16>
    %30 = vector.shape_cast %29 : vector<1x512x512xbf16> to vector<512x512xbf16>
    %c0_12 = arith.constant 0 : index
    %c0_13 = arith.constant 0 : index
    %c0_14 = arith.constant 0 : index
    %31 = vector.load %arg5[%c0_12, %c0_13, %c0_14] : memref<1x512x512xbf16, #tpu.memory_space<vmem>>, vector<1x512x512xbf16>
    %32 = vector.shape_cast %31 : vector<1x512x512xbf16> to vector<512x512xbf16>
    %cst_15 = arith.constant dense<0.000000e+00> : vector<196x512xf32>
    %33 = tpu.matmul %25, %30, %cst_15 {dimension_numbers = #tpu.dot_dimension_numbers<[1], [0], [0], [1], [0, 0, 1, 1], [], []>} : vector<196x512xbf16>, vector<512x512xbf16>, vector<196x512xf32> -> vector<196x512xf32>
    %cst_16 = arith.constant dense<0.000000e+00> : vector<196x512xf32>
    %34 = tpu.matmul %25, %32, %cst_16 {dimension_numbers = #tpu.dot_dimension_numbers<[1], [0], [0], [1], [0, 0, 1, 1], [], []>} : vector<196x512xbf16>, vector<512x512xbf16>, vector<196x512xf32> -> vector<196x512xf32>
    %35 = arith.addf %33, %34 : vector<196x512xf32>
    %cst_17 = arith.constant dense<0.000000e+00> : vector<196x512xf32>
    %36 = tpu.matmul %28, %30, %cst_17 {dimension_numbers = #tpu.dot_dimension_numbers<[1], [0], [0], [1], [0, 0, 1, 1], [], []>} : vector<196x512xbf16>, vector<512x512xbf16>, vector<196x512xf32> -> vector<196x512xf32>
    %37 = arith.addf %35, %36 : vector<196x512xf32>
    %c0_18 = arith.constant 0 : index
    %c0_19 = arith.constant 0 : index
    %38 = vector.load %arg6[%c0_18, %c0_19] : memref<1x512xf32, #tpu.memory_space<vmem>>, vector<1x512xf32>
    %39 = vector.broadcast %38 : vector<1x512xf32> to vector<196x512xf32>
    %40 = arith.addf %37, %39 : vector<196x512xf32>
    %cst_20 = arith.constant 5.000000e-01 : f32
    %41 = vector.broadcast %cst_20 : f32 to vector<196x512xf32>
    %42 = arith.mulf %41, %40 : vector<196x512xf32>
    %cst_21 = arith.constant 0.707106769 : f32
    %43 = vector.broadcast %cst_21 : f32 to vector<196x512xf32>
    %44 = arith.mulf %40, %43 : vector<196x512xf32>
    %45 = math.erf %44 : vector<196x512xf32>
    %cst_22 = arith.constant 1.000000e+00 : f32
    %46 = vector.broadcast %cst_22 : f32 to vector<196x512xf32>
    %47 = arith.addf %46, %45 : vector<196x512xf32>
    %48 = arith.mulf %42, %47 : vector<196x512xf32>
    %c0_23 = arith.constant 0 : index
    %c0_24 = arith.constant 0 : index
    %49 = vector.load %arg7[%c0_23, %c0_24] : memref<196x512xf32, #tpu.memory_space<vmem>>, vector<196x512xf32>
    tpu.vector_store %arg7[%c0_23, %c0_24], %48 {strides = array<i32>} : memref<196x512xf32, #tpu.memory_space<vmem>>, vector<196x512xf32>,
    return
  }
  func.func @transform_0(%arg0: i32) -> (i32, i32) {
    %c0_i32 = arith.constant 0 : i32
    %c0_i32_0 = arith.constant 0 : i32
    %c0_i32_1 = arith.constant 0 : i32
    return %c0_i32, %c0_i32_0 : i32, i32
  }
  func.func @transform_1(%arg0: i32) -> (i32, i32) {
    %c0_i32 = arith.constant 0 : i32
    %c0_i32_0 = arith.constant 0 : i32
    %c0_i32_1 = arith.constant 0 : i32
    return %c0_i32, %c0_i32_0 : i32, i32
  }
  func.func @transform_2(%arg0: i32) -> (i32, i32) {
    %c0_i32 = arith.constant 0 : i32
    %c0_i32_0 = arith.constant 0 : i32
    %c0_i32_1 = arith.constant 0 : i32
    return %c0_i32, %c0_i32_0 : i32, i32
  }
  func.func @transform_3(%arg0: i32) -> (i32, i32, i32) {
    %c0_i32 = arith.constant 0 : i32
    %c0_i32_0 = arith.constant 0 : i32
    %c0_i32_1 = arith.constant 0 : i32
    return %arg0, %c0_i32, %c0_i32_0 : i32, i32, i32
  }
  func.func @transform_4(%arg0: i32) -> (i32, i32, i32) {
    %c0_i32 = arith.constant 0 : i32
    %c0_i32_0 = arith.constant 0 : i32
    %c0_i32_1 = arith.constant 0 : i32
    return %arg0, %c0_i32, %c0_i32_0 : i32, i32, i32
  }
  func.func @transform_5(%arg0: i32) -> (i32, i32) {
    %c0_i32 = arith.constant 0 : i32
    %c0_i32_0 = arith.constant 0 : i32
    return %c0_i32, %arg0 : i32, i32
  }
  func.func @transform_6(%arg0: i32) -> (i32, i32) {
    %c0_i32 = arith.constant 0 : i32
    %c0_i32_0 = arith.constant 0 : i32
    return %c0_i32, %arg0 : i32, i32
  }
}

</mosaic_0001>

<bundles_post_ra>
// kernel: tpu_custom_call.1
= control target key start
LH: loop header
LB: loop body
LE: loop exit
PB: predicated region body
PF: predicated region fallthrough
CT: control target
= control target key end

     0   :  { %s11963_s0 = inlined_call_operand.hbm [shape: f32[196,512], index: 0, kind: input, shape index: {}]   ;;  %s11964_s1 = inlined_call_operand.hbm [shape: f32[1,512], index: 1, kind: input, shape index: {}]   ;;  %s11965_s2 = inlined_call_operand.hbm [shape: f32[1,512], index: 2, kind: input, shape index: {}]   ;;  %s11966_s3 = inlined_call_operand.hbm [shape: bf16[4,512,512], index: 3, kind: input, shape index: {}]   ;;  %s11967_s4 = inlined_call_operand.hbm [shape: bf16[4,512,512], index: 4, kind: input, shape index: {}]   ;;  %s11968_s5 = inlined_call_operand.hbm [shape: f32[1,2048], index: 5, kind: input, shape index: {}]   ;;  %s11969_s6 = inlined_call_operand.hbm [shape: f32[196,2048], index: 6, kind: output, shape index: {}]  }
   0x1   :  { %12375 = sst [smem:[#allocation239_spill]] %s11964_s1 }
   0x2   :  { %12376 = sst [smem:[#allocation240_spill]] %s11966_s3 }
   0x3   :  { %12377 = sst [smem:[#allocation241_spill]] %s11969_s6 }
   0x4   :  { %11 = vsyncpa [#allocation3], 0 }
   0x5   :  { %12 = vsyncpa [#allocation6], 0 }
   0x6   :  { %13 = vsyncpa [#allocation9], 0 }
   0x7   :  { %15 = vsyncpa [#allocation9 + $0x1], 0 }
   0x8   :  { %16 = vsyncpa [#allocation12], 0 }
   0x9   :  { %18 = vsyncpa [#allocation12 + $0x1], 0 }
   0xa   :  { %19 = vsyncpa [#allocation4], 0 }
   0xb   :  { %21 = vsyncpa [#allocation4 + $0x1], 0  ;;  %s8100_s21 = smov 0   ;;  %s8102_s22 = smov 0  }
   0xc   :  { %s8104_s23 = smov 0   ;;  %s8106_s24 = smov 0  }
   0xd LB: > { %12378 = sst [smem:[#allocation19_spill]] %s8037_s21  ;;  %s8121_s25 = sadd.s32 4294967295, %s8049_s24   ;;  %s8049_s24 = sphi %s8106_s24, %s13139_s24   ;;  %s8045_s23 = sphi %s8104_s23, %s13144_s23   ;;  %s8041_s22 = sphi %s8102_s22, %s13143_s22   ;;  %s8037_s21 = sphi %s8100_s21, %s13142_s21  }
   0xe   : > { %12379 = sst [smem:[#allocation20_spill]] %s8045_s23  ;;  %s6196_s26 = sadd.s32 4294967294, %s8049_s24  }
   0xf   : > { %s8125_s27 = sadd.s32 1, %s8049_s24   ;;  %s97_s28 = sadd.s32 1, %s8045_s23 }
  0x10   : > { %12380 = sst [smem:[#allocation21_spill]] %s8125_s27  ;;  %s94_s29 = ssub.s32 %s8049_s24, %s8125_s27 }
  0x11   : > { %p104_p0 = scmp.ne.s32.totalorder %s8045_s23, %s8041_s22  ;;  %p95_p1 = scmp.eq.s32.totalorder %s94_s29, 0 }
  0x12   : > { %p105_p2 = scmp.eq.s32.totalorder %s8049_s24, 0  ;;  %p110_p3 = scmp.ne.s32.totalorder %s8041_s22, %s8037_s21 }
  0x13   : > { %p11970_p4 = scmp.eq.s32.totalorder %s8121_s25, 0  ;;  %p186_p7 = scmp.eq.s32.totalorder %s8121_s25, 3 }
  0x14   : > { %s8137_s30 = scalar_select %p95_p1, %s8045_s23, %s97_s28  }
  0x15   : > { %p8139_p5 = por %p105_p2, %p104_p0  ;;  %p8145_p6 = por %p11970_p4, %p110_p3 }
  0x16   : > { %12381 = sst [smem:[#allocation22_spill]] %s8137_s30  ;;  %p192_p8 = scmp.eq.s32.totalorder %s6196_s26, 3 }
  0x17   : > { %s12382_s7 = scalar_select %p8139_p5, 1, 0 }
  0x18   : > { %s12383_s8 = scalar_select %p8145_p6, 1, 0 }
  0x19   : > { %p6197_p9 = scmp.ge.s32.totalorder %s8049_s24, 1  ;;  %p199_p10 = scmp.lt.s32.totalorder %s8049_s24, 5 }
  0x1a   : > { %12384 = sst [smem:[#allocation23_spill]] %s12383_s8  ;;  %p8152_p11 = por %p186_p7, %p104_p0 }
  0x1b   : > { %p8156_p12 = por %p192_p8, %p110_p3  ;;  %p8160_p13 = pnand %p6197_p9, %p199_p10 }
  0x1c   : > { %s12385_s9 = scalar_select %p8152_p11, 1, 0 }
  0x1d   : > { %s12387_s10 = scalar_select %p8156_p12, 1, 0 }
  0x1e   : > { %12386 = sst [smem:[#allocation24_spill]] %s12385_s9  ;;  %p6983_p1 = pneg %p8160_p13 }
  0x1f   : > { %12388 = sst [smem:[#allocation25_spill]] %s12387_s10  ;;  %s8051_s12 = smov [#allocation5]  }
  0x20   : > { %s12389_s11 = scalar_select %p8160_p13, 1, 0 }
  0x21   : > { %s225_s13 = sshll.u32 %s8051_s12, 4  ;;  %p8169_p0 = pnand %p6983_p1, %p11970_p4  ;;  %s226_s13 = int_to_ptr.vmem [resolvable:$true] %s225_s13 }
  0x22   : > { %s247_s15 = sand.u32 1, %s8049_s24   ;;  %s8175_s16 = sand.u32 1, %s8045_s23  }
  0x23   : > { %s12390_s14 = scalar_select %p8169_p0, 1, 0 }
  0x24   : > { %s11974_s17 = sshll.u32 %s8175_s16, 10  ;;  %s12391_s1 = sld [smem:[#allocation239_spill]] }
  0x25   : > { %p8186_p7 = pneg %p8169_p0 }
  0x27   : > { %s12392_s29 = scalar_select %p8186_p7, 1, 0 }
  0x2a   : > { %s7797_s20 = scalar_lea.hbm %s12391_s1, 64 }
  0x2b   : > { %p7798_p3 = scmp.ne.s32.totalorder %s12391_s1, %s7797_s20  ;;  %p7804_p10 = scmp.lt.u32.totalorder %s7797_s20, %s12391_s1 }
  0x2d   : > { %p7800_p8 = pnand %p8186_p7, %p7798_p3 }
  0x2f   : > { %p7801_p9 = pneg %p7800_p8 }
  0x31   : > { %p7806_p1 = pnand %p7804_p10, %p7801_p9 }
  0x33   : > { %7809 = shalt.err (!%p7806_p1)
}
  0x34   : > { %s7810_s18 = scalar_lea.vmem %s226_s13, 64  ;;  %p7818_p11 = scmp.lt.s32.totalorder %s226_s13, %s226_s13 }
  0x35   : > { %p7811_p4 = scmp.ne.s32.totalorder %s226_s13, %s7810_s18  ;;  %p7819_p6 = scmp.lt.s32.totalorder %s7810_s18, %s7810_s18 }
  0x37   : > { %p7813_p2 = pnand %p7811_p4, %p8186_p7  ;;  %p7820_p13 = por %p7819_p6, %p7818_p11 }
  0x39   : > { %p7814_p12 = pneg %p7813_p2 }
  0x3b   : > { %p7821_p5 = pnand %p7820_p13, %p7814_p12 }
  0x3d   : > { %7824 = shalt.err (!%p7821_p5)
}
  0x3e   : > { %6989 = dma.hbm_to_vmem [thread:$0]  (!%p8169_p0), %s12391_s1, 64, %s226_s13, [#allocation6]  }
  0x3f   : > { %s11975_s30 = sshll.u32 %s8049_s24, 14  ;;  %s12393_s3 = sld [smem:[#allocation240_spill]] }
  0x40   : > { %s251_s18 = scalar_lea.vmem [#allocation8], %s11974_s17  ;;  %p12394_p4 = scmp.ne.s32.totalorder %s12382_s7, 0 }
  0x41   : > { %s258_s19 = sshll.u32 %s251_s18, 4  ;;  %p12395_p5 = scmp.lt.s32.totalorder %s8049_s24, 4  ;;  %s8212_s19 = int_to_ptr.vmem [resolvable:$true] %s258_s19 }
  0x42   : > { %s8222_s26 = scalar_lea.sflag [#allocation9], %s247_s15 }
  0x43   : > { %p8218_p6 = pnand %p12395_p5, %p12394_p4 }
  0x45   : > { %s8208_s12 = scalar_lea.hbm %s12393_s3, %s11975_s30  ;;  %p8228_p12 = pneg %p8218_p6 }
  0x46   : > { %s12396_s13 = scalar_select %p8218_p6, 1, 0 }
  0x47   : > { %s7825_s20 = scalar_lea.hbm %s8208_s12, 16384  ;;  %s7830_s17 = scalar_lea.hbm %s12393_s3, 65536 }
  0x48   : > { %p7826_p11 = scmp.ne.s32.totalorder %s8208_s12, %s7825_s20  ;;  %p7831_p3 = scmp.lt.u32.totalorder %s8208_s12, %s12393_s3 }
  0x49   : > { %s12397_s28 = scalar_select %p8228_p12, 1, 0 }
  0x4a   : > { %p7828_p13 = pnand %p8228_p12, %p7826_p11  ;;  %p7832_p8 = scmp.lt.u32.totalorder %s7830_s17, %s7825_s20 }
  0x4b   : > { %p7834_p10 = scmp.lt.u32.totalorder %s7825_s20, %s8208_s12 }
  0x4c   : > { %p7829_p2 = pneg %p7828_p13  ;;  %p7833_p9 = por %p7832_p8, %p7831_p3 }
  0x4e   : > { %p7835_p1 = por %p7834_p10, %p7833_p9 }
  0x50   : > { %p7836_p4 = pnand %p7835_p1, %p7829_p2 }
  0x52   : > { %7839 = shalt.err (!%p7836_p4)
}
  0x53   : > { %s7840_s15 = scalar_lea.vmem %s8212_s19, 16384  ;;  %s8052_s7 = smov [#allocation8]  }
  0x54   : > { %p7841_p5 = scmp.ne.s32.totalorder %s8212_s19, %s7840_s15  ;;  %s7845_s18 = sshll.u32 %s8052_s7, 4  ;;  %s7846_s18 = int_to_ptr.vmem [resolvable:$false] %s7845_s18 }
  0x55   : > { %s7847_s1 = scalar_lea.vmem %s7846_s18, 32768  ;;  %p7848_p0 = scmp.lt.s32.totalorder %s8212_s19, %s7846_s18 }
  0x56   : > { %p7843_p11 = pnand %p7841_p5, %p8228_p12  ;;  %p7849_p7 = scmp.lt.s32.totalorder %s7847_s1, %s7840_s15 }
  0x58   : > { %p7844_p13 = pneg %p7843_p11  ;;  %p7850_p3 = por %p7849_p7, %p7848_p0 }
  0x5a   : > { %p7851_p8 = pnand %p7850_p3, %p7844_p13 }
  0x5c   : > { %7854 = shalt.err (!%p7851_p8)
}
  0x5d   : > { %s11992_s17 = smov 256   ;;  %s11993_s30 = smov 16  }
  0x5e   : > { %6996 = dma.hbm_to_vmem [thread:$0]  (!%p8218_p6), %s8208_s12, 16384, %s8212_s19, %s8222_s26, %s11992_s17, %s11992_s17, %s11993_s30  }
  0x5f   : > { %s12398_s20 = sshll.u32 %s8049_s24, 14  ;;  %s12399_s1 = sshll.u32 %s8175_s16, 10 }
  0x60   : > { %s8260_s18 = scalar_lea.hbm %s11967_s4, %s12398_s20  ;;  %s272_s3 = scalar_lea.vmem [#allocation10], %s12399_s1 }
  0x61   : > { %s279_s23 = sshll.u32 %s272_s3, 4  ;;  %s8055_s27 = smov [#allocation2]   ;;  %s8264_s23 = int_to_ptr.vmem [resolvable:$true] %s279_s23 }
  0x62   : > { %s211_s10 = sshll.u32 %s8055_s27, 4  ;;  %s7855_s9 = scalar_lea.hbm %s11963_s0, 12800  ;;  %s212_s10 = int_to_ptr.vmem [resolvable:$true] %s211_s10 }
  0x63   : > { %p7856_p0 = scmp.ne.s32.totalorder %s11963_s0, %s7855_s9  ;;  %p12400_p7 = scmp.ne.s32.totalorder %s12392_s29, 0 }
  0x64   : > { %p7862_p10 = scmp.lt.u32.totalorder %s7855_s9, %s11963_s0 }
  0x65   : > { %p7858_p2 = pnand %p7856_p0, %p12400_p7 }
  0x67   : > { %p7859_p9 = pneg %p7858_p2 }
  0x69   : > { %p7864_p1 = pnand %p7862_p10, %p7859_p9 }
  0x6b   : > { %7867 = shalt.err (!%p7864_p1)
}
  0x6c   : > { %s7868_s3 = scalar_lea.vmem %s212_s10, 12800  ;;  %p7876_p13 = scmp.lt.s32.totalorder %s212_s10, %s212_s10 }
  0x6d   : > { %p7869_p4 = scmp.ne.s32.totalorder %s212_s10, %s7868_s3  ;;  %p7877_p3 = scmp.lt.s32.totalorder %s7868_s3, %s7868_s3 }
  0x6f   : > { %p7871_p5 = pnand %p7869_p4, %p12400_p7  ;;  %p7878_p8 = por %p7877_p3, %p7876_p13 }
  0x71   : > { %p7872_p11 = pneg %p7871_p5 }
  0x73   : > { %p7879_p6 = pnand %p7878_p8, %p7872_p11 }
  0x75   : > { %7882 = shalt.err (!%p7879_p6)
}
  0x76   : > { %s8056_s6 = smov 512   ;;  %s8057_s21 = smov 32  }
  0x77   : > { %p12401_p0 = scmp.ne.s32.totalorder %s12390_s14, 0  ;;  %s8058_s9 = smov [#allocation7]  }
  0x78   : > { %s236_s7 = sshll.u32 %s8058_s9, 4  ;;  %s6208_s15 = sshll.u32 %s8175_s16, 2  ;;  %s237_s7 = int_to_ptr.vmem [resolvable:$true] %s236_s7 }
  0x79   : > { %6986 = dma.hbm_to_vmem [thread:$0]  (!%p12401_p0), %s11963_s0, 12800, %s212_s10, [#allocation3], %s8056_s6, %s8056_s6, %s8057_s21  }
  0x7a   : > { %s7883_s19 = scalar_lea.hbm %s11965_s2, 64 }
  0x7b   : > { %p7884_p6 = scmp.ne.s32.totalorder %s11965_s2, %s7883_s19  ;;  %p7890_p10 = scmp.lt.u32.totalorder %s7883_s19, %s11965_s2 }
  0x7d   : > { %p7886_p2 = pnand %p7884_p6, %p12400_p7 }
  0x7f   : > { %p7887_p9 = pneg %p7886_p2 }
  0x81   : > { %p7892_p1 = pnand %p7890_p10, %p7887_p9 }
  0x83   : > { %7895 = shalt.err (!%p7892_p1)
}
  0x84   : > { %s7896_s10 = scalar_lea.vmem %s237_s7, 64  ;;  %p7904_p13 = scmp.lt.s32.totalorder %s237_s7, %s237_s7 }
  0x85   : > { %p7897_p4 = scmp.ne.s32.totalorder %s237_s7, %s7896_s10  ;;  %p7905_p3 = scmp.lt.s32.totalorder %s7896_s10, %s7896_s10 }
  0x87   : > { %p7899_p5 = pnand %p7897_p4, %p12400_p7  ;;  %p7906_p8 = por %p7905_p3, %p7904_p13 }
  0x89   : > { %p7900_p11 = pneg %p7899_p5 }
  0x8b   : > { %p7907_p12 = pnand %p7906_p8, %p7900_p11 }
  0x8d   : > { %7910 = shalt.err (!%p7907_p12)
}
  0x8e   : > { %6992 = dma.hbm_to_vmem [thread:$0]  (!%p12401_p0), %s11965_s2, 64, %s237_s7, [#allocation6]  }
  0x8f   : > { %s7911_s17 = scalar_lea.hbm %s8260_s18, 16384  ;;  %p12402_p7 = scmp.ne.s32.totalorder %s12397_s28, 0 }
  0x90   : > { %p7912_p6 = scmp.ne.s32.totalorder %s8260_s18, %s7911_s17  ;;  %s7916_s27 = scalar_lea.hbm %s11967_s4, 65536 }
  0x91   : > { %p7917_p12 = scmp.lt.u32.totalorder %s8260_s18, %s11967_s4  ;;  %p7918_p10 = scmp.lt.u32.totalorder %s7916_s27, %s7911_s17 }
  0x92   : > { %p7914_p2 = pnand %p7912_p6, %p12402_p7  ;;  %p7920_p4 = scmp.lt.u32.totalorder %s7911_s17, %s8260_s18 }
  0x93   : > { %p7919_p1 = por %p7918_p10, %p7917_p12 }
  0x94   : > { %p7915_p9 = pneg %p7914_p2 }
  0x95   : > { %p7921_p5 = por %p7920_p4, %p7919_p1 }
  0x97   : > { %p7922_p11 = pnand %p7921_p5, %p7915_p9 }
  0x99   : > { %7925 = shalt.err (!%p7922_p11)
}
  0x9a   : > { %s7926_s9 = scalar_lea.vmem %s8264_s23, 16384  ;;  %s8059_s7 = smov [#allocation10]  }
  0x9b   : > { %p7927_p0 = scmp.ne.s32.totalorder %s8264_s23, %s7926_s9  ;;  %s7931_s1 = sshll.u32 %s8059_s7, 4  ;;  %s7932_s1 = int_to_ptr.vmem [resolvable:$false] %s7931_s1 }
  0x9c   : > { %s7933_s12 = scalar_lea.vmem %s7932_s1, 32768  ;;  %p7934_p8 = scmp.lt.s32.totalorder %s8264_s23, %s7932_s1 }
  0x9d   : > { %p7929_p13 = pnand %p7927_p0, %p12402_p7  ;;  %p7935_p6 = scmp.lt.s32.totalorder %s7933_s12, %s7926_s9 }
  0x9f   : > { %p7930_p3 = pneg %p7929_p13  ;;  %p7936_p2 = por %p7935_p6, %p7934_p8 }
  0xa1   : > { %p7937_p12 = pnand %p7936_p2, %p7930_p3 }
  0xa3   : > { %7940 = shalt.err (!%p7937_p12)
}
  0xa4   : > { %p12403_p9 = scmp.ne.s32.totalorder %s12396_s13, 0  ;;  %s12404_s19 = smov 16  }
  0xa5   : > { %s12405_s20 = smov 256   ;;  %s6480_s3 = sshll.u32 %s8049_s24, 6 }
  0xa6   : > { %6999 = dma.hbm_to_vmem [thread:$0]  (!%p12403_p9), %s8260_s18, 16384, %s8264_s23, %s8222_s26, %s12405_s20, %s12405_s20, %s12404_s19  }
  0xa7   : > { %s293_s10 = scalar_lea.vmem [#allocation11], %s6208_s15  ;;  %s8334_s29 = scalar_lea.hbm %s11968_s5, %s6480_s3 }
  0xa8   : > { %s301_s6 = sshll.u32 %s293_s10, 4  ;;  %s290_s30 = scalar_lea.sflag [#allocation12], %s8175_s16  ;;  %s302_s6 = int_to_ptr.vmem [resolvable:$true] %s301_s6 }
  0xa9   : > { %s7941_s27 = scalar_lea.hbm %s8334_s29, 64  ;;  %s7946_s18 = scalar_lea.hbm %s11968_s5, 256 }
  0xaa   : > { %p7942_p10 = scmp.ne.s32.totalorder %s8334_s29, %s7941_s27  ;;  %p7947_p5 = scmp.lt.u32.totalorder %s8334_s29, %s11968_s5 }
  0xab   : > { %p7948_p11 = scmp.lt.u32.totalorder %s7946_s18, %s7941_s27  ;;  %p7950_p13 = scmp.lt.u32.totalorder %s7941_s27, %s8334_s29 }
  0xac   : > { %p7944_p1 = pnand %p7942_p10, %p12402_p7 }
  0xad   : > { %p7949_p0 = por %p7948_p11, %p7947_p5 }
  0xae   : > { %p7945_p4 = pneg %p7944_p1 }
  0xaf   : > { %p7951_p3 = por %p7950_p13, %p7949_p0 }
  0xb1   : > { %p7952_p8 = pnand %p7951_p3, %p7945_p4 }
  0xb3   : > { %7955 = shalt.err (!%p7952_p8)
}
  0xb4   : > { %s7956_s16 = scalar_lea.vmem %s302_s6, 64  ;;  %s8060_s14 = smov [#allocation11]  }
  0xb5   : > { %p7957_p6 = scmp.ne.s32.totalorder %s302_s6, %s7956_s16  ;;  %s7961_s9 = sshll.u32 %s8060_s14, 4  ;;  %s7962_s9 = int_to_ptr.vmem [resolvable:$false] %s7961_s9 }
  0xb6   : > { %s7963_s7 = scalar_lea.vmem %s7962_s9, 128  ;;  %p7964_p10 = scmp.lt.s32.totalorder %s302_s6, %s7962_s9 }
  0xb7   : > { %p7959_p2 = pnand %p7957_p6, %p12402_p7  ;;  %p7965_p1 = scmp.lt.s32.totalorder %s7963_s7, %s7956_s16 }
  0xb9   : > { %p7960_p12 = pneg %p7959_p2  ;;  %p7966_p9 = por %p7965_p1, %p7964_p10 }
  0xbb   : > { %p7967_p5 = pnand %p7966_p9, %p7960_p12 }
  0xbd   : > { %7970 = shalt.err (!%p7967_p5)
}
  0xbe   : > { %p12406_p11 = scmp.ne.s32.totalorder %s12396_s13, 0  ;;  %p12407_p4 = scmp.ne.s32.totalorder %s12389_s11, 0 }
  0xc0   : > { %7002 = dma.hbm_to_vmem [thread:$0]  (!%p12406_p11), %s8334_s29, 64, %s302_s6, %s290_s30  }
  0xc1   : > { %310 = sbr.rel (%p12407_p4) target bundleno = 1345 (0x541), region = 44 }
  0xc8   : > { %p12408_p0 = scmp.eq.s32.totalorder %s8121_s25, 0 }
  0xca   : > { %8016 = dma.done.wait (%p12408_p0), [#allocation3], 12800   ;;  %p12409_p7 = pmov %p12408_p0 }
  0xcb   : > { %p12410_p13 = pmov %p12408_p0 }
  0xcc   : > { %8018 = vsyncadd (%p12409_p7), [#allocation3], 4294954496 }
  0xcd   : > { %8020 = dma.done.wait (%p12410_p13), [#allocation6], 128   ;;  %p12411_p3 = pmov %p12408_p0 }
  0xce   : > { %s12412_s13 = sld [smem:[#allocation23_spill]]  ;;  %s324_s28 = sand.u32 1, %s8121_s25  }
  0xcf   : > { %8022 = vsyncadd (%p12411_p3), [#allocation6], 4294967168  ;;  %s8366_s1 = sand.u32 1, %s8041_s22   ;;  %s325_s12 = scalar_lea.sflag [#allocation9], %s324_s28 }
  0xd0   : > { %s6215_s11 = sshll.u32 %s8366_s1, 10 }
  0xd1   : > { %s8369_s19 = scalar_lea.vmem [#allocation8], %s6215_s11 }
  0xd4   : > { %p12413_p9 = scmp.ne.s32.totalorder %s12412_s13, 0 }
  0xd6   : > { %8024 = dma.done.wait (%p12413_p9), %s325_s12, 32768  }
  0xd7   : > { %8026 = vsyncadd (%p12413_p9), %s325_s12, 4294934528  ;;  %s6217_s20 = sshll.u32 %s8366_s1, 2  ;;  %s8376_s3 = scalar_lea.vmem [#allocation10], %s6215_s11 }
  0xd8   : > { %s343_s10 = scalar_lea.sflag [#allocation12], %s8366_s1  ;;  %s8379_s6 = scalar_lea.vmem [#allocation11], %s6217_s20 }
  0xd9   : > { %8028 = dma.done.wait (%p12413_p9), %s343_s10, 64  }
  0xda   : > { %8030 = vsyncadd (%p12413_p9), %s343_s10, 4294967232  ;;  %v387_v0 = vld [vmem:[#allocation2] sm:$0xff]  ;;  %v388_v1 = vld [vmem:[#allocation2 + $0x8] sm:$0xff]  ;;  %vm607_vm0 = vcmask 1043456   ;;  %s6962_s21 = smul.u32 800, %s8366_s1  ;;  %s6481_s29 = sshll.u32 %s8121_s25, 9 }
  0xdb   : > { %v389_v2 = vld [vmem:[#allocation2 + $0x10] sm:$0xff]  ;;  %v390_v3 = vld [vmem:[#allocation2 + $0x18] sm:$0xff]  ;;  %v487_v4 = vadd.f32 %v388_v1, %v387_v0  ;;  %v643_v5 = vmul.f32 %v387_v0, %v387_v0  ;;  %v644_v6 = vmul.f32 %v388_v1, %v388_v1  ;;  %v391_v8 = vld [vmem:[#allocation2 + $0x20] sm:$0xff]  ;;  %s13133_s30 = sld [smem:[#allocation24_spill]]  ;;  %s13134_s18 = sld [smem:[#allocation241_spill]] }
  0xdc   : > { %v645_v7 = vmul.f32 %v389_v2, %v389_v2  ;;  %v392_v9 = vld [vmem:[#allocation2 + $0x28] sm:$0xff]  ;;  %v646_v10 = vmul.f32 %v390_v3, %v390_v3  ;;  %v393_v11 = vld [vmem:[#allocation2 + $0x30] sm:$0xff]  ;;  %v394_v12 = vld [vmem:[#allocation2 + $0x38] sm:$0xff]  ;;  %v647_v14 = vmul.f32 %v391_v8, %v391_v8  ;;  %s11285_s17 = scalar_lea.vmem [#allocation13], %s6962_s21  ;;  %s6036_s25 = scalar_lea.sflag [#allocation4], %s8366_s1 }
  0xdd   : > { %v492_v13 = vadd.f32 %v392_v9, %v391_v8  ;;  %v648_v15 = vmul.f32 %v392_v9, %v392_v9  ;;  %v395_v16 = vld [vmem:[#allocation2 + $0x40] sm:$0xff]  ;;  %v488_v17 = vadd.f32 %v487_v4, %v389_v2  ;;  %v743_v18 = vadd.f32 %v644_v6, %v643_v5  ;;  %v396_v21 = vld [vmem:[#allocation2 + $0x48] sm:$0xff]  ;;  %v397_v22 = vld [vmem:[#allocation2 + $0x50] sm:$0xff]  ;;  %s6049_s27 = sshll.u32 %s11285_s17, 4  ;;  %s8061_s16 = smov [#allocation13]   ;;  %s11919_s27 = int_to_ptr.vmem [resolvable:$true] %s6049_s27 }
  0xde   : > { %v649_v19 = vmul.f32 %v393_v11, %v393_v11  ;;  %v650_v20 = vmul.f32 %v394_v12, %v394_v12  ;;  %v497_v25 = vadd.f32 %v396_v21, %v395_v16  ;;  %v399_v26 = vld [vmem:[#allocation2 + $0x60] sm:$0xff]  ;;  %v400_v27 = vld [vmem:[#allocation2 + $0x68] sm:$0xff]  ;;  %v651_v28 = vmul.f32 %v395_v16, %v395_v16  ;;  %v401_v31 = vld [vmem:[#allocation2 + $0x70] sm:$0xff]  ;;  %s7971_s8 = scalar_lea.vmem %s11919_s27, 12800  ;;  %s7975_s14 = sshll.u32 %s8061_s16, 4  ;;  %s7976_s14 = int_to_ptr.vmem [resolvable:$false] %s7975_s14 }
  0xdf   : > { %v493_v23 = vadd.f32 %v492_v13, %v393_v11  ;;  %v748_v24 = vadd.f32 %v648_v15, %v647_v14  ;;  %v489_v29 = vadd.f32 %v488_v17, %v390_v3  ;;  %v744_v30 = vadd.f32 %v743_v18, %v645_v7  ;;  %v398_v38 = vld [vmem:[#allocation2 + $0x58] sm:$0xff]  ;;  %v403_v44 = vld [vmem:[#allocation2 + $0x80] sm:$0xff]  ;;  %v404_v45 = vld [vmem:[#allocation2 + $0x88] sm:$0xff]  ;;  %p7972_p8 = scmp.ne.s32.totalorder %s11919_s27, %s7971_s8  ;;  %s7977_s9 = scalar_lea.vmem %s7976_s14, 25600 }
  0xe0   : > { %v502_v32 = vadd.f32 %v400_v27, %v399_v26  ;;  %v652_v33 = vmul.f32 %v396_v21, %v396_v21  ;;  %v498_v35 = vadd.f32 %v497_v25, %v397_v22  ;;  %v653_v39 = vmul.f32 %v397_v22, %v397_v22  ;;  %v402_v47 = vld [vmem:[#allocation2 + $0x78] sm:$0xff]  ;;  %v407_v52 = vld [vmem:[#allocation2 + $0xa0] sm:$0xff]  ;;  %v408_v53 = vld [vmem:[#allocation2 + $0xa8] sm:$0xff]  ;;  %p7978_p10 = scmp.lt.s32.totalorder %s11919_s27, %s7976_s14  ;;  %p7979_p1 = scmp.lt.s32.totalorder %s7977_s9, %s7971_s8 }
  0xe1   : > { %v749_v34 = vadd.f32 %v748_v24, %v649_v19  ;;  %490 = vadd.xlane.f32.xlu0 %v489_v29  ;;  %v745_v36 = vadd.f32 %v744_v30, %v646_v10  ;;  %v494_v37 = vadd.f32 %v493_v23, %v394_v12  ;;  %v655_v42 = vmul.f32 %v399_v26, %v399_v26  ;;  %v405_v60 = vld [vmem:[#allocation2 + $0x90] sm:$0xff]  ;;  %v411_v6 = vld [vmem:[#allocation2 + $0xc0] sm:$0xff]  ;;  %v412_v7 = vld [vmem:[#allocation2 + $0xc8] sm:$0xff]  ;;  %s11916_s15 = scalar_lea.hbm %s13134_s18, %s6481_s29  ;;  %p13135_p6 = scmp.ne.s32.totalorder %s13133_s30, 0 }
  0xe2   : > { %v753_v40 = vadd.f32 %v652_v33, %v651_v28  ;;  %v503_v41 = vadd.f32 %v502_v32, %v401_v31  ;;  %v656_v43 = vmul.f32 %v400_v27, %v400_v27  ;;  %v657_v48 = vmul.f32 %v401_v31, %v401_v31  ;;  %v409_v1 = vld [vmem:[#allocation2 + $0xb0] sm:$0xff]  ;;  %v406_v8 = vld [vmem:[#allocation2 + $0x98] sm:$0xff]  ;;  %v415_v13 = vld [vmem:[#allocation2 + $0xe0] sm:$0xff]  ;;  %p7980_p5 = por %p7979_p1, %p7978_p10 }
  0xe3   : > { %746 = vadd.xlane.f32.xlu1 %v745_v36  ;;  %v750_v46 = vadd.f32 %v749_v34, %v650_v20  ;;  %v499_v49 = vadd.f32 %v498_v35, %v398_v38  ;;  %v654_v50 = vmul.f32 %v398_v38, %v398_v38  ;;  %v507_v55 = vadd.f32 %v404_v45, %v403_v44  ;;  %v416_v14 = vld [vmem:[#allocation2 + $0xe8] sm:$0xff]  ;;  %v410_v15 = vld [vmem:[#allocation2 + $0xb8] sm:$0xff]  ;;  %v413_v20 = vld [vmem:[#allocation2 + $0xd0] sm:$0xff]  ;;  %p7973_p2 = pnand %p7972_p8, %p13135_p6 }
  0xe4   : > { %v758_v51 = vadd.f32 %v656_v43, %v655_v42  ;;  %v754_v54 = vadd.f32 %v753_v40, %v653_v39  ;;  %v659_v56 = vmul.f32 %v403_v44, %v403_v44  ;;  %v660_v57 = vmul.f32 %v404_v45, %v404_v45  ;;  %v417_v27 = vld [vmem:[#allocation2 + $0xf0] sm:$0xff]  ;;  %v414_v32 = vld [vmem:[#allocation2 + $0xd8] sm:$0xff]  ;;  %v419_v36 = vld [vmem:[#allocation2 + $0x100] sm:$0xff] }
  0xe5   : > { %495 = vadd.xlane.f32.xlu0 %v494_v37  ;;  %v504_v58 = vadd.f32 %v503_v41, %v402_v47  ;;  %v658_v59 = vmul.f32 %v402_v47, %v402_v47  ;;  %v512_v62 = vadd.f32 %v408_v53, %v407_v52  ;;  %v663_v63 = vmul.f32 %v407_v52, %v407_v52  ;;  %v420_v37 = vld [vmem:[#allocation2 + $0x108] sm:$0xff]  ;;  %v418_v39 = vld [vmem:[#allocation2 + $0xf8] sm:$0xff]  ;;  %v423_v42 = vld [vmem:[#allocation2 + $0x120] sm:$0xff]  ;;  %p7974_p12 = pneg %p7973_p2 }
  0xe6   : > { %v759_v61 = vadd.f32 %v758_v51, %v657_v48  ;;  %v664_v0 = vmul.f32 %v408_v53, %v408_v53  ;;  %v755_v2 = vadd.f32 %v754_v54, %v654_v50  ;;  %v508_v3 = vadd.f32 %v507_v55, %v405_v60  ;;  %v424_v43 = vld [vmem:[#allocation2 + $0x128] sm:$0xff]  ;;  %v421_v51 = vld [vmem:[#allocation2 + $0x110] sm:$0xff] }
  0xe7   : > { %751 = vadd.xlane.f32.xlu1 %v750_v46  ;;  %v661_v4 = vmul.f32 %v405_v60, %v405_v60  ;;  %v763_v5 = vadd.f32 %v660_v57, %v659_v56  ;;  %v513_v10 = vadd.f32 %v512_v62, %v409_v1  ;;  %v665_v11 = vmul.f32 %v409_v1, %v409_v1  ;;  %v425_v55 = vld [vmem:[#allocation2 + $0x130] sm:$0xff]  ;;  %v427_v62 = vld [vmem:[#allocation2 + $0x140] sm:$0xff]  ;;  %v426_v1 = vld [vmem:[#allocation2 + $0x138] sm:$0xff]  ;;  %p7981_p11 = pnand %p7980_p5, %p7974_p12 }
  0xe8   : > { %v760_v9 = vadd.f32 %v759_v61, %v658_v59  ;;  %v768_v12 = vadd.f32 %v664_v0, %v663_v63  ;;  %v662_v16 = vmul.f32 %v406_v8, %v406_v8  ;;  %v517_v17 = vadd.f32 %v412_v7, %v411_v6  ;;  %v428_v63 = vld [vmem:[#allocation2 + $0x148] sm:$0xff]  ;;  %v422_v0 = vld [vmem:[#allocation2 + $0x118] sm:$0xff] }
  0xe9   : > { %500 = vadd.xlane.f32.xlu0 %v499_v49  ;;  %v509_v18 = vadd.f32 %v508_v3, %v406_v8  ;;  %v764_v19 = vadd.f32 %v763_v5, %v661_v4  ;;  %v667_v21 = vmul.f32 %v411_v6, %v411_v6  ;;  %v668_v22 = vmul.f32 %v412_v7, %v412_v7  ;;  %v431_v3 = vld [vmem:[#allocation2 + $0x160] sm:$0xff]  ;;  %v432_v7 = vld [vmem:[#allocation2 + $0x168] sm:$0xff] }
  0xea   : > { %v666_v23 = vmul.f32 %v410_v15, %v410_v15  ;;  %v522_v24 = vadd.f32 %v416_v14, %v415_v13  ;;  %v514_v25 = vadd.f32 %v513_v10, %v410_v15  ;;  %v769_v26 = vadd.f32 %v768_v12, %v665_v11  ;;  %v7057_v10 = vld [vmem:[%s8376_s3 + $0x4] ss:$16 sps:$4 sm:$0xff]  }
  0xeb   : > { %505 = vadd.xlane.f32.xlu1 %v504_v58  ;;  %v671_v28 = vmul.f32 %v415_v13, %v415_v13  ;;  %v672_v29 = vmul.f32 %v416_v14, %v416_v14  ;;  %v518_v30 = vadd.f32 %v517_v17, %v413_v20  ;;  %v765_v31 = vadd.f32 %v764_v19, %v662_v16  ;;  %v429_v13 = vld [vmem:[#allocation2 + $0x150] sm:$0xff]  ;;  %v7061_v19 = vld [vmem:[%s8376_s3] ss:$16 sps:$4 sm:$0xff]  }
  0xec   : > { %v669_v33 = vmul.f32 %v413_v20, %v413_v20  ;;  %v773_v34 = vadd.f32 %v668_v22, %v667_v21  ;;  %v523_v35 = vadd.f32 %v522_v24, %v417_v27  ;;  %v770_v38 = vadd.f32 %v769_v26, %v666_v23  ;;  %v7059_v16 = vld [vmem:[%s8376_s3 + $0xc] ss:$16 sps:$4 sm:$0xff]   ;;  %2641 = vmatprep.subr.bf16.mxu0 %v7057_v10  ;;  %v430_v22 = vld [vmem:[#allocation2 + $0x158] sm:$0xff] }
  0xed   : > { %756 = vadd.xlane.f32.xlu0 %v755_v2  ;;  %v673_v40 = vmul.f32 %v417_v27, %v417_v27  ;;  %v778_v41 = vadd.f32 %v672_v29, %v671_v28  ;;  %v519_v44 = vadd.f32 %v518_v30, %v414_v32  ;;  %v670_v45 = vmul.f32 %v414_v32, %v414_v32  ;;  %v433_v23 = vld [vmem:[#allocation2 + $0x170] sm:$0xff]  ;;  %v435_v27 = vld [vmem:[#allocation2 + $0x180] sm:$0xff]  ;;  %v434_v30 = vld [vmem:[#allocation2 + $0x178] sm:$0xff] }
  0xee   : > { %v774_v46 = vadd.f32 %v773_v34, %v669_v33  ;;  %v527_v47 = vadd.f32 %v420_v37, %v419_v36  ;;  %v675_v48 = vmul.f32 %v419_v36, %v419_v36  ;;  %v676_v49 = vmul.f32 %v420_v37, %v420_v37  ;;  %2963 = vmatprep.subr.bf16.mxu1 %v7059_v16  ;;  %v7062_v28 = vld [vmem:[%s8376_s3 + $0x8] ss:$16 sps:$4 sm:$0xff]   ;;  %v436_v33 = vld [vmem:[#allocation2 + $0x188] sm:$0xff] }
  0xef   : > { %761 = vadd.xlane.f32.xlu1 %v760_v9  ;;  %v524_v50 = vadd.f32 %v523_v35, %v418_v39  ;;  %v532_v52 = vadd.f32 %v424_v43, %v423_v42  ;;  %v674_v53 = vmul.f32 %v418_v39, %v418_v39  ;;  %v779_v54 = vadd.f32 %v778_v41, %v673_v40  ;;  %v439_v35 = vld [vmem:[#allocation2 + $0x1a0] sm:$0xff]  ;;  %v7063_v36 = vld [vmem:[%s8376_s3 + $0x24] ss:$16 sps:$4 sm:$0xff]  }
  0xf0   : > { %v679_v56 = vmul.f32 %v423_v42, %v423_v42  ;;  %v680_v57 = vmul.f32 %v424_v43, %v424_v43  ;;  %v775_v58 = vadd.f32 %v774_v46, %v670_v45  ;;  %v528_v59 = vadd.f32 %v527_v47, %v421_v51  ;;  %2642 = vmatpush1.bf16.msra.mxu0 %v7061_v19  ;;  %v440_v40 = vld [vmem:[#allocation2 + $0x1a8] sm:$0xff]  ;;  %v7065_v43 = vld [vmem:[%s8376_s3 + $0x2c] ss:$16 sps:$4 sm:$0xff]  }
  0xf1   : > { %510 = vadd.xlane.f32.xlu0 %v509_v18  ;;  %v677_v60 = vmul.f32 %v421_v51, %v421_v51  ;;  %v783_v61 = vadd.f32 %v676_v49, %v675_v48  ;;  %v533_v2 = vadd.f32 %v532_v52, %v425_v55  ;;  %v780_v4 = vadd.f32 %v779_v54, %v674_v53  ;;  %v437_v45 = vld [vmem:[#allocation2 + $0x190] sm:$0xff]  ;;  %v7067_v51 = vld [vmem:[%s8376_s3 + $0x20] ss:$16 sps:$4 sm:$0xff]  }
  0xf2   : > { %v681_v5 = vmul.f32 %v425_v55, %v425_v55  ;;  %v788_v6 = vadd.f32 %v680_v57, %v679_v56  ;;  %v678_v8 = vmul.f32 %v422_v0, %v422_v0  ;;  %v537_v9 = vadd.f32 %v428_v63, %v427_v62  ;;  %2964 = vmatpush1.bf16.msra.mxu1 %v7062_v28  ;;  %v441_v54 = vld [vmem:[#allocation2 + $0x1b0] sm:$0xff]  ;;  %v438_v57 = vld [vmem:[#allocation2 + $0x198] sm:$0xff]  ;;  %v452_v28 = vld [vmem:[#allocation2 + $0x208] sm:$0xff] }
  0xf3   : > { %515 = vadd.xlane.f32.xlu1 %v514_v25  ;;  %v529_v11 = vadd.f32 %v528_v59, %v422_v0  ;;  %v784_v12 = vadd.f32 %v783_v61, %v677_v60  ;;  %v683_v14 = vmul.f32 %v427_v62, %v427_v62  ;;  %v684_v15 = vmul.f32 %v428_v63, %v428_v63  ;;  %v7068_v59 = vld [vmem:[%s8376_s3 + $0x28] ss:$16 sps:$4 sm:$0xff]   ;;  %v442_v62 = vld [vmem:[#allocation2 + $0x1b8] sm:$0xff] }
  0xf4   : > { %v534_v17 = vadd.f32 %v533_v2, %v426_v1  ;;  %v542_v18 = vadd.f32 %v432_v7, %v431_v3  ;;  %v682_v20 = vmul.f32 %v426_v1, %v426_v1  ;;  %v789_v21 = vadd.f32 %v788_v6, %v681_v5  ;;  %2643 = vmatprep.subr.bf16.mxu0 %v7063_v36  ;;  %v444_v1 = vld [vmem:[#allocation2 + $0x1c8] sm:$0xff] }
  0xf5   : > { %766 = vadd.xlane.f32.xlu0 %v765_v31  ;;  %v687_v24 = vmul.f32 %v431_v3, %v431_v3  ;;  %v688_v25 = vmul.f32 %v432_v7, %v432_v7  ;;  %v538_v26 = vadd.f32 %v537_v9, %v429_v13  ;;  %v785_v29 = vadd.f32 %v784_v12, %v678_v8  ;;  %v447_v3 = vld [vmem:[#allocation2 + $0x1e0] sm:$0xff]  ;;  %v448_v8 = vld [vmem:[#allocation2 + $0x1e8] sm:$0xff] }
  0xf6   : > { %v685_v31 = vmul.f32 %v429_v13, %v429_v13  ;;  %v793_v32 = vadd.f32 %v684_v15, %v683_v14  ;;  %v543_v34 = vadd.f32 %v542_v18, %v433_v23  ;;  %v790_v37 = vadd.f32 %v789_v21, %v682_v20  ;;  %2965 = vmatprep.subr.bf16.mxu1 %v7065_v43  ;;  %v445_v14 = vld [vmem:[#allocation2 + $0x1d0] sm:$0xff]  ;;  %v7073_v20 = vld [vmem:[%s8376_s3 + $0x40] ss:$16 sps:$4 sm:$0xff]   ;;  %v7075_v36 = vld [vmem:[%s8376_s3 + $0x64] ss:$16 sps:$4 sm:$0xff]  }
  0xf7   : > { %771 = vadd.xlane.f32.xlu1 %v770_v38  ;;  %v689_v38 = vmul.f32 %v433_v23, %v433_v23  ;;  %v798_v39 = vadd.f32 %v688_v25, %v687_v24  ;;  %v539_v41 = vadd.f32 %v538_v26, %v430_v22  ;;  %v686_v42 = vmul.f32 %v430_v22, %v430_v22  ;;  %v449_v15 = vld [vmem:[#allocation2 + $0x1f0] sm:$0xff]  ;;  %v446_v23 = vld [vmem:[#allocation2 + $0x1d8] sm:$0xff]  ;;  %v451_v26 = vld [vmem:[#allocation2 + $0x200] sm:$0xff] }
  0xf8   : > { %v547_v46 = vadd.f32 %v436_v33, %v435_v27  ;;  %v691_v47 = vmul.f32 %v435_v27, %v435_v27  ;;  %v692_v48 = vmul.f32 %v436_v33, %v436_v33  ;;  %v544_v49 = vadd.f32 %v543_v34, %v434_v30  ;;  %2644 = vmatpush1.bf16.msra.mxu0 %v7067_v51  ;;  %v455_v34 = vld [vmem:[#allocation2 + $0x220] sm:$0xff]  ;;  %v453_v43 = vld [vmem:[#allocation2 + $0x210] sm:$0xff] }
  0xf9   : > { %520 = vadd.xlane.f32.xlu0 %v519_v44  ;;  %v794_v44 = vadd.f32 %v793_v32, %v685_v31  ;;  %v690_v52 = vmul.f32 %v434_v30, %v434_v30  ;;  %v799_v53 = vadd.f32 %v798_v39, %v689_v38  ;;  %v695_v55 = vmul.f32 %v439_v35, %v439_v35  ;;  %v450_v31 = vld [vmem:[#allocation2 + $0x1f8] sm:$0xff]  ;;  %v7077_v38 = vld [vmem:[%s8376_s3 + $0x6c] ss:$16 sps:$4 sm:$0xff]  }
  0xfa   : > { %v696_v56 = vmul.f32 %v440_v40, %v440_v40  ;;  %v548_v61 = vadd.f32 %v547_v46, %v437_v45  ;;  %v693_v63 = vmul.f32 %v437_v45, %v437_v45  ;;  %v803_v0 = vadd.f32 %v692_v48, %v691_v47  ;;  %2966 = vmatpush1.bf16.msra.mxu1 %v7068_v59  ;;  %v7079_v39 = vld [vmem:[%s8376_s3 + $0x60] ss:$16 sps:$4 sm:$0xff]   ;;  %v7080_v48 = vld [vmem:[%s8376_s3 + $0x68] ss:$16 sps:$4 sm:$0xff]  }
  0xfb   : > { %525 = vadd.xlane.f32.xlu1 %v524_v50  ;;  %v552_v50 = vadd.f32 %v440_v40, %v439_v35  ;;  %v795_v60 = vadd.f32 %v794_v44, %v686_v42  ;;  %v800_v5 = vadd.f32 %v799_v53, %v690_v52  ;;  %v697_v6 = vmul.f32 %v441_v54, %v441_v54  ;;  %v456_v35 = vld [vmem:[#allocation2 + $0x228] sm:$0xff]  ;;  %v7083_v53 = vld [vmem:[%s8376_s3 + $0x8c] ss:$16 sps:$4 sm:$0xff]   ;;  %v454_v59 = vld [vmem:[#allocation2 + $0x218] sm:$0xff] }
  0xfc   : > { %v808_v7 = vadd.f32 %v696_v56, %v695_v55  ;;  %v694_v9 = vmul.f32 %v438_v57, %v438_v57  ;;  %v549_v12 = vadd.f32 %v548_v61, %v438_v57  ;;  %v804_v13 = vadd.f32 %v803_v0, %v693_v63  ;;  %v7081_v44 = vld [vmem:[%s8376_s3 + $0x84] ss:$16 sps:$4 sm:$0xff]   ;;  %v7085_v57 = vld [vmem:[%s8376_s3 + $0x80] ss:$16 sps:$4 sm:$0xff]  }
  0xfd   : > { %776 = vadd.xlane.f32.xlu0 %v775_v58  ;;  %v443_v58 = vld [vmem:[#allocation2 + $0x1c0] sm:$0xff]  ;;  %v553_v2 = vadd.f32 %v552_v50, %v441_v54  ;;  %v562_v19 = vadd.f32 %v448_v8, %v447_v3  ;;  %v698_v21 = vmul.f32 %v442_v62, %v442_v62  ;;  %v703_v24 = vmul.f32 %v447_v3, %v447_v3  ;;  %v457_v50 = vld [vmem:[#allocation2 + $0x230] sm:$0xff]  ;;  %v7087_v63 = vld [vmem:[%s8376_s3 + $0xa4] ss:$16 sps:$4 sm:$0xff]  }
  0xfe   : > { %v557_v10 = vadd.f32 %v444_v1, %v443_v58  ;;  %v699_v16 = vmul.f32 %v443_v58, %v443_v58  ;;  %v809_v22 = vadd.f32 %v808_v7, %v697_v6  ;;  %v704_v25 = vmul.f32 %v448_v8, %v448_v8  ;;  %v463_v7 = vld [vmem:[#allocation2 + $0x260] sm:$0xff] }
  0xff   : > { %781 = vadd.xlane.f32.xlu1 %v780_v4  ;;  %v7069_v4 = vld [vmem:[%s8376_s3 + $0x44] ss:$16 sps:$4 sm:$0xff]   ;;  %v554_v18 = vadd.f32 %v553_v2, %v442_v62  ;;  %v805_v30 = vadd.f32 %v804_v13, %v694_v9  ;;  %v701_v32 = vmul.f32 %v445_v14, %v445_v14  ;;  %v702_v46 = vmul.f32 %v446_v23, %v446_v23  ;;  %v459_v62 = vld [vmem:[#allocation2 + $0x240] sm:$0xff] }
 0x100   : > { %2645 = vmatprep.subr.bf16.mxu0 %v7069_v4  ;;  %v558_v27 = vadd.f32 %v557_v10, %v445_v14  ;;  %v810_v40 = vadd.f32 %v809_v22, %v698_v21  ;;  %v818_v42 = vadd.f32 %v704_v25, %v703_v24  ;;  %v567_v47 = vadd.f32 %v452_v28, %v451_v26  ;;  %v7086_v2 = vld [vmem:[%s8376_s3 + $0x88] ss:$16 sps:$4 sm:$0xff]   ;;  %v458_v4 = vld [vmem:[#allocation2 + $0x238] sm:$0xff]  ;;  %v7089_v8 = vld [vmem:[%s8376_s3 + $0xac] ss:$16 sps:$4 sm:$0xff]  }
 0x101   : > { %530 = vadd.xlane.f32.xlu0 %v529_v11  ;;  %v7071_v11 = vld [vmem:[%s8376_s3 + $0x4c] ss:$16 sps:$4 sm:$0xff]   ;;  %2646 = vmatpush1.bf16.msra.mxu0 %v7073_v20  ;;  %v707_v51 = vmul.f32 %v451_v26, %v451_v26  ;;  %v708_v52 = vmul.f32 %v452_v28, %v452_v28  ;;  %v706_v55 = vmul.f32 %v450_v31, %v450_v31  ;;  %v7091_v10 = vld [vmem:[%s8376_s3 + $0xa0] ss:$16 sps:$4 sm:$0xff]  }
 0x102   : > { %2967 = vmatprep.subr.bf16.mxu1 %v7071_v11  ;;  %v559_v45 = vadd.f32 %v558_v27, %v446_v23  ;;  %2647 = vmatprep.subr.bf16.mxu0 %v7075_v36  ;;  %v572_v56 = vadd.f32 %v456_v35, %v455_v34  ;;  %v712_v61 = vmul.f32 %v456_v35, %v456_v35  ;;  %v464_v14 = vld [vmem:[#allocation2 + $0x268] sm:$0xff]  ;;  %v461_v21 = vld [vmem:[#allocation2 + $0x250] sm:$0xff] }
 0x103   : > { %535 = vadd.xlane.f32.xlu1 %v534_v17  ;;  %v700_v17 = vmul.f32 %v444_v1, %v444_v1  ;;  %v568_v0 = vadd.f32 %v567_v47, %v453_v43  ;;  %v460_v1 = vld [vmem:[#allocation2 + $0x248] sm:$0xff]  ;;  %v823_v6 = vadd.f32 %v708_v52, %v707_v51  ;;  %v465_v22 = vld [vmem:[#allocation2 + $0x270] sm:$0xff]  ;;  %v715_v23 = vmul.f32 %v459_v62, %v459_v62 }
 0x104   : > { %v573_v9 = vadd.f32 %v572_v56, %v457_v50  ;;  %v716_v24 = vmul.f32 %v460_v1, %v460_v1  ;;  %v7095_v25 = vld [vmem:[%s8376_s3 + $0xcc] ss:$16 sps:$4 sm:$0xff]   ;;  %v714_v27 = vmul.f32 %v458_v4, %v458_v4  ;;  %v582_v28 = vadd.f32 %v464_v14, %v463_v7  ;;  %v7099_v35 = vld [vmem:[%s8376_s3 + $0xe4] ss:$16 sps:$4 sm:$0xff]   ;;  %v7103_v47 = vld [vmem:[%s8376_s3 + $0xe0] ss:$16 sps:$4 sm:$0xff]  }
 0x105   : > { %786 = vadd.xlane.f32.xlu0 %v785_v29  ;;  %v7074_v29 = vld [vmem:[%s8376_s3 + $0x48] ss:$16 sps:$4 sm:$0xff]   ;;  %v813_v33 = vadd.f32 %v700_v17, %v699_v16  ;;  %2648 = vmatpush1.bf16.msra.mxu0 %v7079_v39  ;;  %v569_v16 = vadd.f32 %v568_v0, %v454_v59  ;;  %v710_v17 = vmul.f32 %v454_v59, %v454_v59  ;;  %v7105_v51 = vld [vmem:[%s8376_s3 + $0x104] ss:$16 sps:$4 sm:$0xff]  }
 0x106   : > { %2968 = vmatpush1.bf16.msra.mxu1 %v7074_v29  ;;  %2649 = vmatprep.subr.bf16.mxu0 %v7081_v44  ;;  %v574_v26 = vadd.f32 %v573_v9, %v458_v4  ;;  %v7097_v29 = vld [vmem:[%s8376_s3 + $0xc0] ss:$16 sps:$4 sm:$0xff]   ;;  %v7101_v44 = vld [vmem:[%s8376_s3 + $0xec] ss:$16 sps:$4 sm:$0xff]  }
 0x107   : > { %791 = vadd.xlane.f32.xlu1 %v790_v37  ;;  %v563_v37 = vadd.f32 %v562_v19, %v449_v15  ;;  %2969 = vmatprep.subr.bf16.mxu1 %v7077_v38  ;;  %v7092_v19 = vld [vmem:[%s8376_s3 + $0xa8] ss:$16 sps:$4 sm:$0xff]  }
 0x108   : > { %v7098_v38 = vld [vmem:[%s8376_s3 + $0xc8] ss:$16 sps:$4 sm:$0xff]  }
 0x109   : > { %540 = vadd.xlane.f32.xlu0 %v539_v41  ;;  %v705_v41 = vmul.f32 %v449_v15, %v449_v15  ;;  %v564_v54 = vadd.f32 %v563_v37, %v450_v31  ;;  %2650 = vmatpush1.bf16.msra.mxu0 %v7085_v57  ;;  %v7093_v15 = vld [vmem:[%s8376_s3 + $0xc4] ss:$16 sps:$4 sm:$0xff]   ;;  %v469_v57 = vld [vmem:[#allocation2 + $0x290] sm:$0xff] }
 0x10a   : > { %2970 = vmatpush1.bf16.msra.mxu1 %v7080_v48  ;;  %2651 = vmatprep.subr.bf16.mxu0 %v7087_v63  ;;  %v462_v31 = vld [vmem:[#allocation2 + $0x258] sm:$0xff]  ;;  %v468_v37 = vld [vmem:[#allocation2 + $0x288] sm:$0xff]  ;;  %v473_v63 = vld [vmem:[#allocation2 + $0x2b0] sm:$0xff] }
 0x10b   : > { %545 = vadd.xlane.f32.xlu1 %v544_v49  ;;  %v814_v49 = vadd.f32 %v813_v33, %v701_v32  ;;  %v819_v58 = vadd.f32 %v818_v42, %v705_v41  ;;  %2971 = vmatprep.subr.bf16.mxu1 %v7083_v53  ;;  %v719_v32 = vmul.f32 %v463_v7, %v463_v7  ;;  %v476_v7 = vld [vmem:[#allocation2 + $0x2c8] sm:$0xff] }
 0x10c   : > { %v720_v33 = vmul.f32 %v464_v14, %v464_v14  ;;  %v717_v41 = vmul.f32 %v461_v21, %v461_v21  ;;  %v833_v42 = vadd.f32 %v716_v24, %v715_v23  ;;  %v718_v53 = vmul.f32 %v462_v31, %v462_v31  ;;  %v477_v23 = vld [vmem:[#allocation2 + $0x2d0] sm:$0xff]  ;;  %v483_v24 = vld [vmem:[#allocation2 + $0x300] sm:$0xf] }
 0x10d   : > { %796 = vadd.xlane.f32.xlu0 %v795_v60  ;;  %v711_v60 = vmul.f32 %v455_v34, %v455_v34  ;;  %v815_v3 = vadd.f32 %v814_v49, %v702_v46  ;;  %v820_v11 = vadd.f32 %v819_v58, %v706_v55  ;;  %2652 = vmatpush1.bf16.msra.mxu0 %v7091_v10  ;;  %v467_v34 = vld [vmem:[#allocation2 + $0x280] sm:$0xff]  ;;  %v472_v46 = vld [vmem:[#allocation2 + $0x2a8] sm:$0xff] }
 0x10e   : > { %2972 = vmatpush1.bf16.msra.mxu1 %v7086_v2  ;;  %2653 = vmatprep.subr.bf16.mxu0 %v7093_v15  ;;  %v721_v49 = vmul.f32 %v465_v22, %v465_v22  ;;  %v7104_v55 = vld [vmem:[%s8376_s3 + $0xe8] ss:$16 sps:$4 sm:$0xff]   ;;  %v834_v56 = vadd.f32 %v833_v42, %v717_v41  ;;  %v723_v58 = vmul.f32 %v467_v34, %v467_v34 }
 0x10f   : > { %801 = vadd.xlane.f32.xlu1 %v800_v5  ;;  %v709_v5 = vmul.f32 %v453_v43, %v453_v43  ;;  %v828_v13 = vadd.f32 %v712_v61, %v711_v60  ;;  %2973 = vmatprep.subr.bf16.mxu1 %v7089_v8  ;;  %v471_v43 = vld [vmem:[#allocation2 + $0x2a0] sm:$0xff]  ;;  %v724_v59 = vmul.f32 %v468_v37, %v468_v37  ;;  %v7111_v8 = vld [vmem:[%s8376_s3 + $0x124] ss:$16 sps:$4 sm:$0xff]  }
 0x110   : > { %v7107_v60 = vld [vmem:[%s8376_s3 + $0x10c] ss:$16 sps:$4 sm:$0xff]   ;;  %v592_v0 = vadd.f32 %v472_v46, %v471_v43  ;;  %v727_v4 = vmul.f32 %v471_v43, %v471_v43  ;;  %v7110_v10 = vld [vmem:[%s8376_s3 + $0x108] ss:$16 sps:$4 sm:$0xff]  }
 0x111   : > { %550 = vadd.xlane.f32.xlu0 %v549_v12  ;;  %v713_v12 = vmul.f32 %v457_v50, %v457_v50  ;;  %v824_v20 = vadd.f32 %v823_v6, %v709_v5  ;;  %2654 = vmatpush1.bf16.msra.mxu0 %v7097_v29  ;;  %v838_v50 = vadd.f32 %v720_v33, %v719_v32  ;;  %v475_v6 = vld [vmem:[#allocation2 + $0x2c0] sm:$0xff]  ;;  %v485_v43 = vld [vmem:[#allocation2 + $0x310] sm:$0xf] }
 0x112   : > { %2974 = vmatpush1.bf16.msra.mxu1 %v7092_v19  ;;  %2655 = vmatprep.subr.bf16.mxu0 %v7099_v35  ;;  %v728_v5 = vmul.f32 %v472_v46, %v472_v46  ;;  %v843_v14 = vadd.f32 %v724_v59, %v723_v58  ;;  %v479_v15 = vld [vmem:[#allocation2 + $0x2e0] sm:$0xff]  ;;  %v7115_v19 = vld [vmem:[%s8376_s3 + $0x120] ss:$16 sps:$4 sm:$0xff]   ;;  %v597_v29 = vadd.f32 %v476_v7, %v475_v6 }
 0x113   : > { %555 = vadd.xlane.f32.xlu1 %v554_v18  ;;  %v577_v18 = vadd.f32 %v460_v1, %v459_v62  ;;  %v825_v39 = vadd.f32 %v824_v20, %v710_v17  ;;  %2975 = vmatprep.subr.bf16.mxu1 %v7095_v25  ;;  %v7109_v1 = vld [vmem:[%s8376_s3 + $0x100] ss:$16 sps:$4 sm:$0xff]   ;;  %v839_v2 = vadd.f32 %v838_v50, %v721_v49  ;;  %v7122_v49 = vld [vmem:[%s8376_s3 + $0x148] ss:$16 sps:$4 sm:$0xff]  }
 0x114   : > { %v593_v17 = vadd.f32 %v592_v0, %v473_v63  ;;  %v484_v25 = vld [vmem:[#allocation2 + $0x308] sm:$0xf]  ;;  %v731_v32 = vmul.f32 %v475_v6, %v475_v6  ;;  %v732_v33 = vmul.f32 %v476_v7, %v476_v7  ;;  %v735_v41 = vmul.f32 %v479_v15, %v479_v15  ;;  %v7129_v0 = vld [vmem:[%s8376_s3 + $0x184] ss:$16 sps:$4 sm:$0xff]  }
 0x115   : > { %806 = vadd.xlane.f32.xlu0 %v805_v30  ;;  %v829_v30 = vadd.f32 %v828_v13, %v713_v12  ;;  %v578_v36 = vadd.f32 %v577_v18, %v461_v21  ;;  %2656 = vmatpush1.bf16.msra.mxu0 %v7103_v47  ;;  %v474_v12 = vld [vmem:[#allocation2 + $0x2b8] sm:$0xff]  ;;  %v725_v13 = vmul.f32 %v469_v57, %v469_v57  ;;  %v480_v18 = vld [vmem:[#allocation2 + $0x2e8] sm:$0xff]  ;;  %v609_v58 = vsel %vm607_vm0, %v484_v25, 0.0 }
 0x116   : > { %2976 = vmatpush1.bf16.msra.mxu1 %v7098_v38  ;;  %2657 = vmatprep.subr.bf16.mxu0 %v7105_v51  ;;  %v729_v21 = vmul.f32 %v473_v63, %v473_v63  ;;  %v594_v35 = vadd.f32 %v593_v17, %v474_v12  ;;  %v602_v38 = vadd.f32 %v480_v18, %v479_v15  ;;  %v482_v51 = vld [vmem:[#allocation2 + $0x2f8] sm:$0xff] }
 0x117   : > { %811 = vadd.xlane.f32.xlu1 %v810_v40  ;;  %v466_v40 = vld [vmem:[#allocation2 + $0x278] sm:$0xff]  ;;  %v830_v48 = vadd.f32 %v829_v30, %v714_v27  ;;  %v579_v52 = vadd.f32 %v578_v36, %v462_v31  ;;  %2977 = vmatprep.subr.bf16.mxu1 %v7101_v44  ;;  %v7116_v30 = vld [vmem:[%s8376_s3 + $0x128] ss:$16 sps:$4 sm:$0xff]   ;;  %v844_v31 = vadd.f32 %v843_v14, %v725_v13  ;;  %v611_v13 = vsel %vm607_vm0, %v485_v43, 0.0 }
 0x118   : > { %v722_v62 = vmul.f32 %v466_v40, %v466_v40  ;;  %v730_v36 = vmul.f32 %v474_v12, %v474_v12  ;;  %v736_v42 = vmul.f32 %v480_v18, %v480_v18  ;;  %v7123_v44 = vld [vmem:[%s8376_s3 + $0x164] ss:$16 sps:$4 sm:$0xff]   ;;  %v598_v46 = vadd.f32 %v597_v29, %v477_v23  ;;  %v7127_v59 = vld [vmem:[%s8376_s3 + $0x160] ss:$16 sps:$4 sm:$0xff]   ;;  %v7134_v14 = vld [vmem:[%s8376_s3 + $0x188] ss:$16 sps:$4 sm:$0xff]  }
 0x119   : > { %560 = vadd.xlane.f32.xlu0 %v559_v45  ;;  %v583_v45 = vadd.f32 %v582_v28, %v465_v22  ;;  %2658 = vmatpush1.bf16.msra.mxu0 %v7109_v1  ;;  %v848_v22 = vadd.f32 %v728_v5, %v727_v4  ;;  %v739_v47 = vmul.f32 %v483_v24, %v483_v24  ;;  %v7131_v1 = vld [vmem:[%s8376_s3 + $0x18c] ss:$16 sps:$4 sm:$0xff]   ;;  %v7133_v6 = vld [vmem:[%s8376_s3 + $0x180] ss:$16 sps:$4 sm:$0xff]  }
 0x11a   : > { %2978 = vmatpush1.bf16.msra.mxu1 %v7104_v55  ;;  %v840_v20 = vadd.f32 %v839_v2, %v722_v62  ;;  %2659 = vmatprep.subr.bf16.mxu0 %v7111_v8  ;;  %v7125_v55 = vld [vmem:[%s8376_s3 + $0x16c] ss:$16 sps:$4 sm:$0xff]   ;;  %v858_v63 = vadd.f32 %v736_v42, %v735_v41  ;;  %v738_v12 = vmul.f32 %v482_v51, %v482_v51 }
 0x11b   : > { %565 = vadd.xlane.f32.xlu1 %v564_v54  ;;  %v587_v54 = vadd.f32 %v468_v37, %v467_v34  ;;  %v584_v61 = vadd.f32 %v583_v45, %v466_v40  ;;  %2979 = vmatprep.subr.bf16.mxu1 %v7107_v60  ;;  %v7119_v34 = vld [vmem:[%s8376_s3 + $0x14c] ss:$16 sps:$4 sm:$0xff]   ;;  %v849_v40 = vadd.f32 %v848_v22, %v729_v21  ;;  %v478_v45 = vld [vmem:[#allocation2 + $0x2d8] sm:$0xff]  ;;  %v7128_v60 = vld [vmem:[%s8376_s3 + $0x168] ss:$16 sps:$4 sm:$0xff]   ;;  %v863_v4 = vsel %vm607_vm0, %v739_v47, 0.0 }
 0x11c   : > { %v481_v37 = vld [vmem:[#allocation2 + $0x2f0] sm:$0xff]  ;;  %v734_v2 = vmul.f32 %v478_v45, %v478_v45  ;;  %v599_v7 = vadd.f32 %v598_v46, %v478_v45  ;;  %v7139_v22 = vld [vmem:[%s8376_s3 + $0x1a0] ss:$16 sps:$4 sm:$0xff]  }
 0x11d   : > { %816 = vadd.xlane.f32.xlu0 %v815_v3  ;;  %v470_v3 = vld [vmem:[#allocation2 + $0x298] sm:$0xff]  ;;  %v588_v9 = vadd.f32 %v587_v54, %v469_v57  ;;  %2660 = vmatpush1.bf16.msra.mxu0 %v7115_v19  ;;  %v608_v54 = vsel %vm607_vm0, %v483_v24, 0.0  ;;  %v737_v62 = vmul.f32 %v481_v37, %v481_v37  ;;  %v7137_v21 = vld [vmem:[%s8376_s3 + $0x1ac] ss:$16 sps:$4 sm:$0xff]  }
 0x11e   : > { %v726_v28 = vmul.f32 %v470_v3, %v470_v3  ;;  %2980 = vmatpush1.bf16.msra.mxu1 %v7110_v10  ;;  %v486_v57 = vld [vmem:[#allocation2 + $0x318] sm:$0xf]  ;;  %v7135_v10 = vld [vmem:[%s8376_s3 + $0x1a4] ss:$16 sps:$4 sm:$0xff]   ;;  %v7143_v29 = vld [vmem:[%s8376_s3 + $0x1cc] ss:$16 sps:$4 sm:$0xff]  }
 0x11f   : > { %821 = vadd.xlane.f32.xlu1 %v820_v11  ;;  %v835_v11 = vadd.f32 %v834_v56, %v718_v53  ;;  %v589_v27 = vadd.f32 %v588_v9, %v470_v3  ;;  %v853_v53 = vadd.f32 %v732_v33, %v731_v32  ;;  %v603_v56 = vadd.f32 %v602_v38, %v481_v37  ;;  %v7141_v24 = vld [vmem:[%s8376_s3 + $0x1c4] ss:$16 sps:$4 sm:$0xff]   ;;  %v7146_v33 = vld [vmem:[%s8376_s3 + $0x1c8] ss:$16 sps:$4 sm:$0xff]  }
 0x120   : > { %v845_v50 = vadd.f32 %v844_v31, %v726_v28  ;;  %v741_v3 = vmul.f32 %v485_v43, %v485_v43  ;;  %v610_v9 = vadd.f32 %v609_v58, %v608_v54  ;;  %v859_v15 = vadd.f32 %v858_v63, %v737_v62  ;;  %v7140_v28 = vld [vmem:[%s8376_s3 + $0x1a8] ss:$16 sps:$4 sm:$0xff]   ;;  %v7147_v32 = vld [vmem:[%s8376_s3 + $0x1e4] ss:$16 sps:$4 sm:$0xff]  }
 0x121   : > { %570 = vadd.xlane.f32.xlu0 %v569_v16  ;;  %v7113_v16 = vld [vmem:[%s8376_s3 + $0x12c] ss:$16 sps:$4 sm:$0xff]   ;;  %v7155_v37 = vld [vmem:[%s8376_s3 + $0x204] ss:$16 sps:$4 sm:$0xff]   ;;  %v7152_v38 = vld [vmem:[%s8376_s3 + $0x1e8] ss:$16 sps:$4 sm:$0xff]  }
 0x122   : > { %2981 = vmatprep.subr.bf16.mxu1 %v7113_v16  ;;  %v742_v16 = vmul.f32 %v486_v57, %v486_v57  ;;  %v866_v18 = vsel %vm607_vm0, %v741_v3, 0.0 }
 0x123   : > { %575 = vadd.xlane.f32.xlu1 %v574_v26  ;;  %v7117_v26 = vld [vmem:[%s8376_s3 + $0x144] ss:$16 sps:$4 sm:$0xff]   ;;  %2982 = vmatpush1.bf16.msra.mxu1 %v7116_v30  ;;  %v7145_v30 = vld [vmem:[%s8376_s3 + $0x1c0] ss:$16 sps:$4 sm:$0xff]  }
 0x124   : > { %2661 = vmatprep.subr.bf16.mxu0 %v7117_v26  ;;  %2983 = vmatprep.subr.bf16.mxu1 %v7119_v34 }
 0x125   : > { %826 = vadd.xlane.f32.xlu0 %v825_v39  ;;  %v7121_v39 = vld [vmem:[%s8376_s3 + $0x140] ss:$16 sps:$4 sm:$0xff]  }
 0x126   : > { %2662 = vmatpush1.bf16.msra.mxu0 %v7121_v39  ;;  %v7158_v39 = vld [vmem:[%s8376_s3 + $0x20c] ss:$16 sps:$4 sm:$0xff]  }
 0x127   : > { %831 = vadd.xlane.f32.xlu1 %v830_v48  ;;  %v740_v48 = vmul.f32 %v484_v25, %v484_v25  ;;  %2663 = vmatprep.subr.bf16.mxu0 %v7123_v44  ;;  %v860_v25 = vadd.f32 %v859_v15, %v738_v12  ;;  %v7691_v12 = vld [vmem:[#allocation2] sm:$0xff] }
 0x128   : > { %2984 = vmatpush1.bf16.msra.mxu1 %v7122_v49 }
 0x129   : > { %580 = vadd.xlane.f32.xlu0 %v579_v52  ;;  %v733_v52 = vmul.f32 %v477_v23, %v477_v23  ;;  %v864_v5 = vsel %vm607_vm0, %v740_v48, 0.0  ;;  %2985 = vmatprep.subr.bf16.mxu1 %v7125_v55  ;;  %v613_v23 = vsel %vm607_vm0, %v486_v57, 0.0 }
 0x12a   : > { %2664 = vmatpush1.bf16.msra.mxu0 %v7127_v59  ;;  %v865_v17 = vadd.f32 %v864_v5, %v863_v4 }
 0x12b   : > { %585 = vadd.xlane.f32.xlu1 %v584_v61  ;;  %v850_v61 = vadd.f32 %v849_v40, %v730_v36  ;;  %v854_v8 = vadd.f32 %v853_v53, %v733_v52  ;;  %2665 = vmatprep.subr.bf16.mxu0 %v7129_v0  ;;  %v7151_v36 = vld [vmem:[%s8376_s3 + $0x1e0] ss:$16 sps:$4 sm:$0xff]   ;;  %v1199_v40 = vlaneseq  ;;  %v1319_v52 = vld [vmem:[#allocation7] sm:$0xf] }
 0x12c   : > { %2986 = vmatpush1.bf16.msra.mxu1 %v7128_v60  ;;  %v867_v26 = vadd.f32 %v866_v18, %v865_v17  ;;  %v8507_v18 = vld [vmem:[#allocation2 + $0x10] sm:$0xff] }
 0x12d   : > { %836 = vadd.xlane.f32.xlu0 %v835_v11  ;;  %v604_v11 = vadd.f32 %v603_v56, %v482_v51  ;;  %v855_v19 = vadd.f32 %v854_v8, %v734_v2  ;;  %2987 = vmatprep.subr.bf16.mxu1 %v7131_v1  ;;  %v1200_v44 = vshrl.u32 %v1199_v40, 7  ;;  %v1197_v51 = vld [vmem:[#allocation5] sm:$0xf] }
 0x12e   : > { %2666 = vmatpush1.bf16.msra.mxu0 %v7133_v6 }
 0x12f   : > { %841 = vadd.xlane.f32.xlu1 %v840_v20  ;;  %v612_v20 = vadd.f32 %v611_v13, %v610_v9  ;;  %2667 = vmatprep.subr.bf16.mxu0 %v7135_v10  ;;  %v8465_v53 = vsub.s32 1, %v1200_v44  ;;  %v8467_v54 = vsub.s32 0, %v1200_v44  ;;  %v8473_v60 = vsub.s32 3, %v1200_v44 }
 0x130   : > { %2988 = vmatpush1.bf16.msra.mxu1 %v7134_v14  ;;  %v7692_v14 = vld [vmem:[#allocation2 + $0x8] sm:$0xff] }
 0x131   : > { %590 = vadd.xlane.f32.xlu0 %v589_v27  ;;  %v868_v27 = vsel %vm607_vm0, %v742_v16, 0.0  ;;  %v614_v31 = vadd.f32 %v613_v23, %v612_v20  ;;  %2989 = vmatprep.subr.bf16.mxu1 %v7137_v21  ;;  %12414 = vst [vmem:[#allocation26_spill] sm:$0xff] %v8465_v53  ;;  %12415 = vst [vmem:[#allocation27_spill] sm:$0xff] %v8467_v54  ;;  %v8478_v0 = vrot.slane %v1197_v51, %v8465_v53  ;;  %v7694_v23 = vld [vmem:[#allocation2 + $0x18] sm:$0xff] }
 0x132   : > { %2668 = vmatpush1.bf16.msra.mxu0 %v7139_v22  ;;  %v869_v34 = vadd.f32 %v868_v27, %v867_v26  ;;  %12416 = vst [vmem:[#allocation28_spill] sm:$0xff] %v8473_v60  ;;  %v8481_v1 = vrot.slane %v1319_v52, %v8465_v53  ;;  %v8484_v2 = vrot.slane %v1197_v51, %v8467_v54  ;;  %v7696_v27 = vld [vmem:[#allocation2 + $0x28] sm:$0xff]  ;;  %v7156_v53 = vld [vmem:[%s8376_s3 + $0x208] ss:$16 sps:$4 sm:$0xff]  }
 0x133   : > { %595 = vadd.xlane.f32.xlu1 %v594_v35  ;;  %2669 = vmatprep.subr.bf16.mxu0 %v7141_v24  ;;  %v7149_v35 = vld [vmem:[%s8376_s3 + $0x1ec] ss:$16 sps:$4 sm:$0xff]   ;;  %v8494_v9 = vrot.slane %v1197_v51, %v8473_v60  ;;  %v8497_v10 = vrot.slane %v1319_v52, %v8473_v60 }
 0x134   : > { %2990 = vmatpush1.bf16.msra.mxu1 %v7140_v28 }
 0x135   : > { %846 = vadd.xlane.f32.xlu0 %v845_v50  ;;  %2991 = vmatprep.subr.bf16.mxu1 %v7143_v29  ;;  %v8519_v29 = vld [vmem:[#allocation2 + $0x30] sm:$0xff] }
 0x136   : > { %2670 = vmatpush1.bf16.msra.mxu0 %v7145_v30 }
 0x137   : > { %851 = vadd.xlane.f32.xlu1 %v850_v61  ;;  %2671 = vmatprep.subr.bf16.mxu0 %v7147_v32  ;;  %v8475_v61 = vsub.s32 2, %v1200_v44  ;;  %v8523_v32 = vld [vmem:[#allocation2 + $0x38] sm:$0xff] }
 0x138   : > { %2992 = vmatpush1.bf16.msra.mxu1 %v7146_v33  ;;  %v8541_v44 = vld [vmem:[#allocation2 + $0x58] sm:$0xff] }
 0x139   : > { %600 = vadd.xlane.f32.xlu0 %v599_v7  ;;  %2993 = vmatprep.subr.bf16.mxu1 %v7149_v35  ;;  %12417 = vst [vmem:[#allocation29_spill] sm:$0xff] %v8475_v61  ;;  %v8491_v7 = vrot.slane %v1319_v52, %v8467_v54  ;;  %v8505_v17 = vrot.slane %v1319_v52, %v8475_v61 }
 0x13a   : > { %2672 = vmatpush1.bf16.msra.mxu0 %v7151_v36 }
 0x13b   : > { %605 = vadd.xlane.f32.xlu1 %v604_v11  ;;  %2802 = vmatprep.subr.bf16.mxu0 %v7155_v37  ;;  %v8500_v11 = vrot.slane %v1197_v51, %v8475_v61  ;;  %v8529_v37 = vld [vmem:[#allocation2 + $0x40] sm:$0xff]  ;;  %v8687_v61 = vld [vmem:[#allocation2 + $0xf0] sm:$0xff] }
 0x13c   : > { %2994 = vmatpush1.bf16.msra.mxu1 %v7152_v38  ;;  %v7153_v38 = vld [vmem:[%s8376_s3 + $0x200] ss:$16 sps:$4 sm:$0xff]   ;;  %12441 = vst [vmem:[#allocation52_spill] sm:$0xff] %v8687_v61 }
 0x13d   : > { %856 = vadd.xlane.f32.xlu0 %v855_v19  ;;  %3124 = vmatprep.subr.bf16.mxu1 %v7158_v39  ;;  %v8533_v39 = vld [vmem:[#allocation2 + $0x48] sm:$0xff] }
 0x13f   : > { %861 = vadd.xlane.f32.xlu1 %v860_v25  ;;  %v8514_v25 = vld [vmem:[#allocation2 + $0x20] sm:$0xff] }
 0x141   : > { %615 = vadd.xlane.f32.xlu0 %v614_v31 }
 0x143   : > { %870 = vadd.xlane.f32.xlu1 %v869_v34 }
 0x16e   : > { %v491_v41 = vpop.xlane.xlu0 %490 }
 0x16f   : > { %v8459_v42 = vmul.f32 0.001953125, %v491_v41  ;;  %v8537_v41 = vld [vmem:[#allocation2 + $0x50] sm:$0xff] }
 0x170   : > { %v747_v43 = vpop.xlane.xlu1 %746  ;;  %12420 = vst [vmem:[#allocation32_spill] sm:$0xff] %v8537_v41  ;;  %v7186_v41 = vld [vmem:[%s8376_s3 + $0x2a8] ss:$16 sps:$4 sm:$0xff]  }
 0x171   : > { %v872_v45 = vmul.f32 0.001953125, %v747_v43  ;;  %v897_v46 = vmul.f32 %v8459_v42, %v8459_v42  ;;  %v947_v13 = vsub.f32 %v7691_v12, %v8459_v42  ;;  %v948_v15 = vsub.f32 %v7692_v14, %v8459_v42  ;;  %v8565_v14 = vld [vmem:[#allocation2 + $0x80] sm:$0xff] }
 0x172   : > { %v496_v47 = vpop.xlane.xlu0 %495  ;;  %v949_v19 = vsub.f32 %v8507_v18, %v8459_v42  ;;  %v950_v24 = vsub.f32 %v7694_v23, %v8459_v42  ;;  %v8605_v23 = vld [vmem:[#allocation2 + $0xb0] sm:$0xff] }
 0x173   : > { %v8463_v48 = vmul.f32 0.001953125, %v496_v47  ;;  %v922_v49 = vsub.f32 %v872_v45, %v897_v46  ;;  %v8545_v47 = vld [vmem:[#allocation2 + $0x60] sm:$0xff]  ;;  %v8601_v45 = vld [vmem:[#allocation2 + $0xa8] sm:$0xff]  ;;  %12427 = vst [vmem:[#allocation39_spill] sm:$0xff] %v8605_v23 }
 0x174   : > { %v752_v50 = vpop.xlane.xlu1 %751 }
 0x175   : > { %v1047_v55 = vadd.f32 1e-06, %v922_v49  ;;  %v873_v56 = vmul.f32 0.001953125, %v752_v50  ;;  %v898_v57 = vmul.f32 %v8463_v48, %v8463_v48  ;;  %v951_v26 = vsub.f32 %v8514_v25, %v8463_v48  ;;  %v8549_v50 = vld [vmem:[#allocation2 + $0x68] sm:$0xff] }
 0x176   : > { %v501_v58 = vpop.xlane.xlu0 %500  ;;  %v952_v28 = vsub.f32 %v7696_v27, %v8463_v48  ;;  %v954_v33 = vsub.f32 %v8523_v32, %v8463_v48  ;;  %v8577_v27 = vld [vmem:[#allocation2 + $0x98] sm:$0xff]  ;;  %v8664_v49 = vld [vmem:[#allocation2 + $0xe8] sm:$0xff] }
 0x177   : > { %v8471_v59 = vmul.f32 0.001953125, %v501_v58  ;;  %7441 = vrsqrt.f32 %v1047_v55  ;;  %v923_v62 = vsub.f32 %v873_v56, %v898_v57  ;;  %v8553_v56 = vld [vmem:[#allocation2 + $0x70] sm:$0xff]  ;;  %v8557_v58 = vld [vmem:[#allocation2 + $0x78] sm:$0xff]  ;;  %12425 = vst [vmem:[#allocation37_spill] sm:$0xff] %v8577_v27 }
 0x178   : > { %v506_v63 = vpop.xlane.xlu1 %505  ;;  %12421 = vst [vmem:[#allocation33_spill] sm:$0xff] %v8553_v56  ;;  %12422 = vst [vmem:[#allocation34_spill] sm:$0xff] %v8557_v58  ;;  %v7182_v56 = vld [vmem:[%s8376_s3 + $0x28c] ss:$16 sps:$4 sm:$0xff]  }
 0x179   : > { %v1048_v3 = vadd.f32 1e-06, %v923_v62  ;;  %v8486_v4 = vmul.f32 0.001953125, %v506_v63  ;;  %v899_v5 = vmul.f32 %v8471_v59, %v8471_v59  ;;  %v956_v40 = vsub.f32 %v8533_v39, %v8471_v59  ;;  %v7164_v39 = vld [vmem:[%s8376_s3 + $0x22c] ss:$16 sps:$4 sm:$0xff]  }
 0x17a   : > { %v757_v6 = vpop.xlane.xlu0 %756 }
 0x17b   : > { %12418 = vst [vmem:[#allocation30_spill] sm:$0xff] %v8486_v4  ;;  %v874_v8 = vmul.f32 0.001953125, %v757_v6  ;;  %7443 = vrsqrt.f32 %v1048_v3  ;;  %v900_v21 = vmul.f32 %v8486_v4, %v8486_v4 }
 0x17c   : > { %v762_v16 = vpop.xlane.xlu1 %761 }
 0x17d   : > { %v924_v20 = vsub.f32 %v874_v8, %v899_v5  ;;  %v875_v22 = vmul.f32 0.001953125, %v762_v16 }
 0x17e   : > { %v511_v31 = vpop.xlane.xlu0 %510 }
 0x17f   : > { %v1049_v34 = vadd.f32 1e-06, %v924_v20  ;;  %v925_v35 = vsub.f32 %v875_v22, %v900_v21  ;;  %v8527_v36 = vmul.f32 0.001953125, %v511_v31  ;;  %v8569_v20 = vld [vmem:[#allocation2 + $0x88] sm:$0xff]  ;;  %v8573_v22 = vld [vmem:[#allocation2 + $0x90] sm:$0xff] }
 0x180   : > { %v516_v46 = vpop.xlane.xlu1 %515  ;;  %12424 = vst [vmem:[#allocation36_spill] sm:$0xff] %v8573_v22  ;;  %v7165_v22 = vld [vmem:[%s8376_s3 + $0x240] ss:$16 sps:$4 sm:$0xff]  }
 0x181   : > { %12419 = vst [vmem:[#allocation31_spill] sm:$0xff] %v8527_v36  ;;  %7445 = vrsqrt.f32 %v1049_v34  ;;  %v1050_v52 = vadd.f32 1e-06, %v925_v35  ;;  %v7442_v55 = vpop.eup %7441  ;;  %v8561_v63 = vmul.f32 0.001953125, %v516_v46  ;;  %v901_v3 = vmul.f32 %v8527_v36, %v8527_v36 }
 0x182   : > { %v767_v5 = vpop.xlane.xlu0 %766  ;;  %v1098_v8 = vmul.f32 %v7442_v55, %v948_v15  ;;  %v1097_v12 = vmul.f32 %v7442_v55, %v947_v13  ;;  %v8591_v62 = vmul.f32 %v7442_v55, %v950_v24 }
 0x183   : > { %12423 = vst [vmem:[#allocation35_spill] sm:$0xff] %v8561_v63  ;;  %7447 = vrsqrt.f32 %v1050_v52  ;;  %v876_v6 = vmul.f32 0.001953125, %v767_v5  ;;  %v902_v34 = vmul.f32 %v8561_v63, %v8561_v63  ;;  %v8586_v5 = vld [vmem:[#allocation2 + $0xa0] sm:$0xff] }
 0x184   : > { %v772_v15 = vpop.xlane.xlu1 %771  ;;  %v1220_v46 = vmul.f32 %v8478_v0, %v1098_v8  ;;  %v1219_v43 = vmul.f32 %v8484_v2, %v1097_v12  ;;  %v8609_v12 = vld [vmem:[#allocation2 + $0xb8] sm:$0xff] }
 0x185   : > { %v926_v31 = vsub.f32 %v876_v6, %v901_v3  ;;  %v877_v35 = vmul.f32 0.001953125, %v772_v15  ;;  %v8584_v52 = vpop.eup %7443  ;;  %v8596_v3 = vmul.f32 %v7442_v55, %v949_v19  ;;  %12428 = vst [vmem:[#allocation40_spill] sm:$0xff] %v8609_v12 }
 0x186   : > { %v521_v57 = vpop.xlane.xlu0 %520  ;;  %v1102_v13 = vmul.f32 %v8584_v52, %v952_v28  ;;  %v1101_v19 = vmul.f32 %v8584_v52, %v951_v26  ;;  %v8618_v55 = vadd.f32 %v8481_v1, %v1220_v46  ;;  %v8635_v26 = vmul.f32 %v8584_v52, %v954_v33  ;;  %v8649_v33 = vld [vmem:[#allocation2 + $0xd8] sm:$0xff] }
 0x187   : > { %v1051_v6 = vadd.f32 1e-06, %v926_v31  ;;  %v927_v15 = vsub.f32 %v877_v35, %v902_v34  ;;  %v8598_v8 = vmul.f32 0.001953125, %v521_v57  ;;  %v8621_v57 = vadd.f32 %v8491_v7, %v1219_v43  ;;  %v8623_v31 = vld [vmem:[#allocation2 + $0xc0] sm:$0xff]  ;;  %v8645_v34 = vld [vmem:[#allocation2 + $0xd0] sm:$0xff]  ;;  %12434 = vst [vmem:[#allocation46_spill] sm:$0xff] %v8649_v33 }
 0x188   : > { %v526_v18 = vpop.xlane.xlu1 %525  ;;  %12429 = vst [vmem:[#allocation41_spill] sm:$0xff] %v8618_v55  ;;  %12433 = vst [vmem:[#allocation45_spill] sm:$0xff] %v8645_v34  ;;  %v8759_v33 = vld [vmem:[#allocation2 + $0x128] sm:$0xff] }
 0x189   : > { %12426 = vst [vmem:[#allocation38_spill] sm:$0xff] %v8598_v8  ;;  %7449 = vrsqrt.f32 %v1051_v6  ;;  %v1052_v28 = vadd.f32 1e-06, %v927_v15  ;;  %12430 = vst [vmem:[#allocation42_spill] sm:$0xff] %v8621_v57  ;;  %v8627_v35 = vmul.f32 0.001953125, %v526_v18  ;;  %v903_v25 = vmul.f32 %v8598_v8, %v8598_v8  ;;  %v8641_v18 = vld [vmem:[#allocation2 + $0xc8] sm:$0xff] }
 0x18a   : > { %v777_v24 = vpop.xlane.xlu0 %776  ;;  %v1224_v6 = vmul.f32 %v8478_v0, %v1102_v13  ;;  %v1223_v15 = vmul.f32 %v8484_v2, %v1101_v19 }
 0x18b   : > { %12431 = vst [vmem:[#allocation43_spill] sm:$0xff] %v8627_v35  ;;  %v8637_v46 = vpop.eup %7445  ;;  %7451 = vrsqrt.f32 %v1052_v28  ;;  %v878_v43 = vmul.f32 0.001953125, %v777_v24  ;;  %v8653_v28 = vld [vmem:[#allocation2 + $0xe0] sm:$0xff]  ;;  %v904_v30 = vmul.f32 %v8627_v35, %v8627_v35 }
 0x18c   : > { %12432 = vst [vmem:[#allocation44_spill] sm:$0xff] %v8637_v46  ;;  %v782_v19 = vpop.xlane.xlu1 %781  ;;  %v8662_v32 = vadd.f32 %v8481_v1, %v1224_v6  ;;  %v8670_v51 = vadd.f32 %v8491_v7, %v1223_v15 }
 0x18d   : > { %v8657_v16 = vpop.eup %7447  ;;  %v928_v42 = vsub.f32 %v878_v43, %v903_v25  ;;  %v879_v21 = vmul.f32 0.001953125, %v782_v19  ;;  %v1106_v25 = vmul.f32 %v8637_v46, %v956_v40  ;;  %v12438_v43 = vsub.f32 %v8549_v50, %v8486_v4 }
 0x18e   : > { %12435 = vst [vmem:[#allocation47_spill] sm:$0xff] %v8657_v16  ;;  %12436 = vst [vmem:[#allocation48_spill] sm:$0xff] %v8662_v32  ;;  %v531_v13 = vpop.xlane.xlu0 %530  ;;  %v8682_v24 = vpack.c.bf16 %v8662_v32, %v8618_v55  ;;  %v8693_v40 = vpack.c.bf16 %v8670_v51, %v8621_v57  ;;  %v8713_v32 = vld [vmem:[#allocation2 + $0x100] sm:$0xff]  ;;  %v8725_v55 = vld [vmem:[#allocation2 + $0x108] sm:$0xff] }
 0x18f   : > { %12437 = vst [vmem:[#allocation49_spill] sm:$0xff] %v8670_v51  ;;  %v1110_v6 = vmul.f32 %v8657_v16, %v12438_v43  ;;  %v1053_v19 = vadd.f32 1e-06, %v928_v42  ;;  %v929_v60 = vsub.f32 %v879_v21, %v904_v30  ;;  %v8685_v15 = vmul.f32 0.001953125, %v531_v13  ;;  %v7161_v42 = vld [vmem:[%s8376_s3 + $0x224] ss:$16 sps:$4 sm:$0xff]  }
 0x190   : > { %12439 = vst [vmem:[#allocation50_spill] sm:$0xff] %v8682_v24  ;;  %12442 = vst [vmem:[#allocation53_spill] sm:$0xff] %v8693_v40  ;;  %v536_v50 = vpop.xlane.xlu1 %535  ;;  %v1228_v30 = vmul.f32 %v8478_v0, %v1106_v25  ;;  %v8698_v43 = vld [vmem:[#allocation2 + $0xf8] sm:$0xff]  ;;  %2673 = vmatprep.mubr.bf16.mxu0 %v8682_v24  ;;  %2995 = vmatprep.mubr.bf16.mxu1 %v8682_v24  ;;  %v12444_v51 = vsub.f32 %v8529_v37, %v8471_v59  ;;  %v8736_v24 = vld [vmem:[#allocation2 + $0x110] sm:$0xff] }
 0x191   : > { %12440 = vst [vmem:[#allocation51_spill] sm:$0xff] %v8685_v15  ;;  %v1232_v21 = vmul.f32 %v8478_v0, %v1110_v6  ;;  %12443 = vst [vmem:[#allocation54_spill] sm:$0xff] %v8698_v43  ;;  %v1054_v54 = vadd.f32 1e-06, %v929_v60  ;;  %v12445_v25 = vsub.f32 %v8545_v47, %v8486_v4  ;;  %7453 = vrsqrt.f32 %v1053_v19  ;;  %2674 = vmatmul.mubr.bf16.vlgmr.msra.gmra.mrb[0].mxu0 %v8693_v40  ;;  %v7159_v60 = vld [vmem:[%s8376_s3 + $0x220] ss:$16 sps:$4 sm:$0xff]  }
 0x192   : > { %v1105_v57 = vmul.f32 %v8637_v46, %v12444_v51  ;;  %2996 = vmatmul.mubr.bf16.vlgmr.msra.gmra.mrb[0].mxu1 %v8693_v40  ;;  %v8719_v13 = vmul.f32 0.001953125, %v536_v50  ;;  %v905_v37 = vmul.f32 %v8685_v15, %v8685_v15  ;;  %v787_v51 = vpop.xlane.xlu0 %786  ;;  %2803 = vmatpush1.bf16.msra.mxu0 %v7153_v38  ;;  %v8731_v40 = vadd.f32 %v8481_v1, %v1228_v30  ;;  %v8740_v19 = vld [vmem:[#allocation2 + $0x118] sm:$0xff]  ;;  %v8744_v38 = vld [vmem:[#allocation2 + $0x120] sm:$0xff] }
 0x193   : > { %v1109_v6 = vmul.f32 %v8657_v16, %v12445_v25  ;;  %v8723_v47 = vpop.eup %7449  ;;  %3125 = vmatpush1.bf16.msra.mxu1 %v7156_v53  ;;  %v880_v25 = vmul.f32 0.001953125, %v787_v51  ;;  %v8734_v50 = vadd.f32 %v8481_v1, %v1232_v21  ;;  %7455 = vrsqrt.f32 %v1054_v54  ;;  %12450 = vst [vmem:[#allocation59_spill] sm:$0xff] %v8736_v24  ;;  %12451 = vst [vmem:[#allocation60_spill] sm:$0xff] %v8740_v19  ;;  %v7162_v54 = vld [vmem:[%s8376_s3 + $0x228] ss:$16 sps:$4 sm:$0xff]  }
 0x194   : > { %12446 = vst [vmem:[#allocation55_spill] sm:$0xff] %v8719_v13  ;;  %12447 = vst [vmem:[#allocation56_spill] sm:$0xff] %v8723_v47  ;;  %v792_v21 = vpop.xlane.xlu1 %791  ;;  %2804 = vmatprep.subr.bf16.mxu0 %v7161_v42  ;;  %v906_v43 = vmul.f32 %v8719_v13, %v8719_v13  ;;  %3126 = vmatprep.subr.bf16.mxu1 %v7164_v39  ;;  %v7167_v24 = vld [vmem:[%s8376_s3 + $0x244] ss:$16 sps:$4 sm:$0xff]   ;;  %v7170_v19 = vld [vmem:[%s8376_s3 + $0x24c] ss:$16 sps:$4 sm:$0xff]   ;;  %v12456_v42 = vsub.f32 %v8601_v45, %v8561_v63 }
 0x195   : > { %12448 = vst [vmem:[#allocation57_spill] sm:$0xff] %v8731_v40  ;;  %12449 = vst [vmem:[#allocation58_spill] sm:$0xff] %v8734_v50  ;;  %v8749_v51 = vpop.eup %7451  ;;  %v930_v34 = vsub.f32 %v880_v25, %v905_v37  ;;  %v881_v61 = vmul.f32 0.001953125, %v792_v21  ;;  %v8755_v53 = vpack.c.bf16 %v8734_v50, %v8731_v40  ;;  %v1227_v37 = vmul.f32 %v8484_v2, %v1105_v57  ;;  %v8788_v45 = vld [vmem:[#allocation2 + $0x138] sm:$0xff] }
 0x196   : > { %12452 = vst [vmem:[#allocation61_spill] sm:$0xff] %v8749_v51  ;;  %v541_v30 = vpop.xlane.xlu0 %540  ;;  %v1231_v25 = vmul.f32 %v8484_v2, %v1109_v6  ;;  %v12454_v21 = vsub.f32 %v8569_v20, %v8527_v36  ;;  %2805 = vmatpush1.bf16.msra.mxu0 %v7159_v60  ;;  %v1118_v57 = vmul.f32 %v8749_v51, %v12456_v42  ;;  %v8777_v6 = vld [vmem:[#allocation2 + $0x130] sm:$0xff]  ;;  %12460 = vst [vmem:[#allocation67_spill] sm:$0xff] %v8788_v45  ;;  %v8799_v20 = vld [vmem:[#allocation2 + $0x140] sm:$0xff] }
 0x197   : > { %12453 = vst [vmem:[#allocation62_spill] sm:$0xff] %v8755_v53  ;;  %v1055_v23 = vadd.f32 1e-06, %v930_v34  ;;  %v931_v50 = vsub.f32 %v881_v61, %v906_v43  ;;  %2683 = vmatprep.mubr.bf16.mxu0 %v8755_v53  ;;  %v8770_v40 = vmul.f32 0.001953125, %v541_v30  ;;  %12457 = vst [vmem:[#allocation64_spill] sm:$0xff] %v8777_v6  ;;  %3005 = vmatprep.mubr.bf16.mxu1 %v8755_v53  ;;  %v8816_v53 = vld [vmem:[#allocation2 + $0x148] sm:$0xff] }
 0x198   : > { %v1114_v39 = vmul.f32 %v8723_v47, %v12454_v21  ;;  %3127 = vmatpush1.bf16.msra.mxu1 %v7162_v54  ;;  %v8783_v61 = vadd.f32 %v8491_v7, %v1227_v37  ;;  %v8786_v34 = vadd.f32 %v8491_v7, %v1231_v25  ;;  %v546_v43 = vpop.xlane.xlu1 %545  ;;  %2806 = vmatprep.subr.bf16.mxu0 %v7167_v24  ;;  %v7168_v42 = vld [vmem:[%s8376_s3 + $0x248] ss:$16 sps:$4 sm:$0xff]   ;;  %v7173_v21 = vld [vmem:[%s8376_s3 + $0x264] ss:$16 sps:$4 sm:$0xff]   ;;  %v7171_v60 = vld [vmem:[%s8376_s3 + $0x260] ss:$16 sps:$4 sm:$0xff]  }
 0x199   : > { %12455 = vst [vmem:[#allocation63_spill] sm:$0xff] %v8770_v40  ;;  %v1056_v30 = vadd.f32 1e-06, %v931_v50  ;;  %3128 = vmatprep.subr.bf16.mxu1 %v7170_v19  ;;  %v12461_v37 = vsub.f32 %v8565_v14, %v8527_v36  ;;  %7457 = vrsqrt.f32 %v1055_v23  ;;  %v8807_v19 = vmul.f32 0.001953125, %v546_v43  ;;  %v8831_v45 = vld [vmem:[#allocation2 + $0x160] sm:$0xff] }
 0x19a   : > { %12458 = vst [vmem:[#allocation65_spill] sm:$0xff] %v8783_v61  ;;  %12459 = vst [vmem:[#allocation66_spill] sm:$0xff] %v8786_v34  ;;  %v1236_v54 = vmul.f32 %v8478_v0, %v1114_v39  ;;  %v8805_v24 = vpack.c.bf16 %v8786_v34, %v8783_v61  ;;  %v797_v50 = vpop.xlane.xlu0 %796  ;;  %v7176_v39 = vld [vmem:[%s8376_s3 + $0x26c] ss:$16 sps:$4 sm:$0xff]   ;;  %v907_v14 = vmul.f32 %v8770_v40, %v8770_v40  ;;  %2807 = vmatpush1.bf16.msra.mxu0 %v7165_v22  ;;  %v8824_v61 = vld [vmem:[#allocation2 + $0x158] sm:$0xff] }
 0x19b   : > { %v1113_v25 = vmul.f32 %v8723_v47, %v12461_v37  ;;  %12463 = vst [vmem:[#allocation69_spill] sm:$0xff] %v8807_v19  ;;  %7459 = vrsqrt.f32 %v1056_v30  ;;  %v882_v37 = vmul.f32 0.001953125, %v797_v50  ;;  %v1240_v23 = vmul.f32 %v8478_v0, %v1118_v57  ;;  %v8814_v6 = vpop.eup %7453  ;;  %v8820_v34 = vld [vmem:[#allocation2 + $0x150] sm:$0xff]  ;;  %12466 = vst [vmem:[#allocation72_spill] sm:$0xff] %v8824_v61  ;;  %v7179_v50 = vld [vmem:[%s8376_s3 + $0x284] ss:$16 sps:$4 sm:$0xff]   ;;  %2808 = vmatprep.subr.bf16.mxu0 %v7173_v21 }
 0x19c   : > { %12462 = vst [vmem:[#allocation68_spill] sm:$0xff] %v8805_v24  ;;  %12464 = vst [vmem:[#allocation70_spill] sm:$0xff] %v8814_v6  ;;  %2684 = vmatmul.mubr.bf16.gmra.mrb[4].mxu0 %v8805_v24  ;;  %3006 = vmatmul.mubr.bf16.gmra.mrb[4].mxu1 %v8805_v24  ;;  %v802_v57 = vpop.xlane.xlu1 %801  ;;  %v908_v30 = vmul.f32 %v8807_v19, %v8807_v19  ;;  %v7174_v22 = vld [vmem:[%s8376_s3 + $0x268] ss:$16 sps:$4 sm:$0xff]   ;;  %v8841_v24 = vadd.f32 %v8481_v1, %v1236_v54 }
 0x19d   : > { %12465 = vst [vmem:[#allocation71_spill] sm:$0xff] %v8820_v34  ;;  %v932_v12 = vsub.f32 %v882_v37, %v907_v14  ;;  %v883_v34 = vmul.f32 0.001953125, %v802_v57  ;;  %3129 = vmatpush1.bf16.msra.mxu1 %v7168_v42  ;;  %v8838_v61 = vpop.eup %7455  ;;  %v8844_v47 = vadd.f32 %v8481_v1, %v1240_v23  ;;  %v12470_v14 = vsub.f32 %v8586_v5, %v8561_v63  ;;  %v7177_v42 = vld [vmem:[%s8376_s3 + $0x280] ss:$16 sps:$4 sm:$0xff]   ;;  %v7191_v63 = vld [vmem:[%s8376_s3 + $0x2c4] ss:$16 sps:$4 sm:$0xff]  }
 0x19e   : > { %12467 = vst [vmem:[#allocation73_spill] sm:$0xff] %v8838_v61  ;;  %12468 = vst [vmem:[#allocation74_spill] sm:$0xff] %v8841_v24  ;;  %v551_v36 = vpop.xlane.xlu0 %550  ;;  %v1235_v57 = vmul.f32 %v8484_v2, %v1113_v25  ;;  %3130 = vmatprep.subr.bf16.mxu1 %v7176_v39  ;;  %2809 = vmatpush1.bf16.msra.mxu0 %v7171_v60  ;;  %v12472_v54 = vsub.f32 %v8641_v18, %v8598_v8  ;;  %v8859_v5 = vld [vmem:[#allocation2 + $0x168] sm:$0xff]  ;;  %v8863_v39 = vld [vmem:[#allocation2 + $0x170] sm:$0xff] }
 0x19f   : > { %12469 = vst [vmem:[#allocation75_spill] sm:$0xff] %v8844_v47  ;;  %v1117_v37 = vmul.f32 %v8749_v51, %v12470_v14  ;;  %v1057_v21 = vadd.f32 1e-06, %v932_v12  ;;  %v933_v43 = vsub.f32 %v883_v34, %v908_v30  ;;  %v8852_v27 = vmul.f32 0.001953125, %v551_v36  ;;  %12473 = vst [vmem:[#allocation77_spill] sm:$0xff] %v8863_v39  ;;  %2810 = vmatprep.subr.bf16.mxu0 %v7179_v50  ;;  %v8873_v30 = vld [vmem:[#allocation2 + $0x178] sm:$0xff] }
 0x1a0   : > { %v1122_v23 = vmul.f32 %v8814_v6, %v12472_v54  ;;  %v8869_v36 = vpack.c.bf16 %v8844_v47, %v8841_v24  ;;  %v556_v34 = vpop.xlane.xlu1 %555  ;;  %v7185_v60 = vld [vmem:[%s8376_s3 + $0x2a4] ss:$16 sps:$4 sm:$0xff]   ;;  %12475 = vst [vmem:[#allocation79_spill] sm:$0xff] %v8873_v30  ;;  %v8878_v54 = vadd.f32 %v8491_v7, %v1235_v57  ;;  %v12477_v12 = vsub.f32 %v8664_v49, %v8627_v35  ;;  %v7180_v47 = vld [vmem:[%s8376_s3 + $0x288] ss:$16 sps:$4 sm:$0xff]  }
 0x1a1   : > { %12471 = vst [vmem:[#allocation76_spill] sm:$0xff] %v8852_v27  ;;  %v1239_v18 = vmul.f32 %v8484_v2, %v1117_v37  ;;  %7461 = vrsqrt.f32 %v1057_v21  ;;  %3131 = vmatpush1.bf16.msra.mxu1 %v7174_v22  ;;  %v1058_v37 = vadd.f32 1e-06, %v933_v43  ;;  %v8887_v50 = vld [vmem:[#allocation2 + $0x180] sm:$0xff]  ;;  %v8894_v21 = vmul.f32 0.001953125, %v556_v34  ;;  %v8907_v34 = vld [vmem:[#allocation2 + $0x190] sm:$0xff] }
 0x1a2   : > { %12474 = vst [vmem:[#allocation78_spill] sm:$0xff] %v8869_v36  ;;  %12476 = vst [vmem:[#allocation80_spill] sm:$0xff] %v8878_v54  ;;  %v1126_v25 = vmul.f32 %v8838_v61, %v12477_v12  ;;  %2693 = vmatprep.mubr.bf16.mxu0 %v8869_v36  ;;  %3015 = vmatprep.mubr.bf16.mxu1 %v8869_v36  ;;  %v807_v49 = vpop.xlane.xlu0 %806  ;;  %v8896_v12 = vld [vmem:[#allocation2 + $0x188] sm:$0xff]  ;;  %v909_v14 = vmul.f32 %v8852_v27, %v8852_v27  ;;  %v8911_v43 = vld [vmem:[#allocation2 + $0x198] sm:$0xff] }
 0x1a3   : > { %v8892_v22 = vadd.f32 %v8491_v7, %v1239_v18  ;;  %12479 = vst [vmem:[#allocation82_spill] sm:$0xff] %v8894_v21  ;;  %v884_v24 = vmul.f32 0.001953125, %v807_v49  ;;  %v1244_v36 = vmul.f32 %v8478_v0, %v1122_v23  ;;  %3132 = vmatprep.subr.bf16.mxu1 %v7182_v56  ;;  %2811 = vmatpush1.bf16.msra.mxu0 %v7177_v42  ;;  %v7183_v57 = vld [vmem:[%s8376_s3 + $0x2a0] ss:$16 sps:$4 sm:$0xff]   ;;  %v7188_v18 = vld [vmem:[%s8376_s3 + $0x2ac] ss:$16 sps:$4 sm:$0xff]   ;;  %v8905_v39 = vpop.eup %7457  ;;  %7463 = vrsqrt.f32 %v1058_v37 }
 0x1a4   : > { %12480 = vst [vmem:[#allocation83_spill] sm:$0xff] %v8905_v39  ;;  %12481 = vst [vmem:[#allocation84_spill] sm:$0xff] %v8907_v34  ;;  %v8919_v56 = vld [vmem:[#allocation2 + $0x1a0] sm:$0xff]  ;;  %v812_v51 = vpop.xlane.xlu1 %811  ;;  %2812 = vmatprep.subr.bf16.mxu0 %v7185_v60  ;;  %v8926_v34 = vld [vmem:[#allocation2 + $0x1a8] sm:$0xff]  ;;  %v1248_v60 = vmul.f32 %v8478_v0, %v1126_v25  ;;  %v12488_v37 = vsub.f32 %v8653_v28, %v8627_v35  ;;  %v12491_v28 = vsub.f32 %v8759_v33, %v8719_v13 }
 0x1a5   : > { %12478 = vst [vmem:[#allocation81_spill] sm:$0xff] %v8892_v22  ;;  %12482 = vst [vmem:[#allocation85_spill] sm:$0xff] %v8911_v43  ;;  %v8917_v23 = vpack.c.bf16 %v8892_v22, %v8878_v54  ;;  %v8924_v30 = vpop.eup %7459  ;;  %v934_v43 = vsub.f32 %v884_v24, %v909_v14  ;;  %v910_v22 = vmul.f32 %v8894_v21, %v8894_v21  ;;  %v885_v54 = vmul.f32 0.001953125, %v812_v51  ;;  %v7194_v51 = vld [vmem:[%s8376_s3 + $0x2cc] ss:$16 sps:$4 sm:$0xff]  }
 0x1a6   : > { %12484 = vst [vmem:[#allocation87_spill] sm:$0xff] %v8924_v30  ;;  %3133 = vmatpush1.bf16.msra.mxu1 %v7180_v47  ;;  %v8937_v42 = vadd.f32 %v8481_v1, %v1244_v36  ;;  %v561_v16 = vpop.xlane.xlu0 %560  ;;  %v12486_v24 = vsub.f32 %v8623_v31, %v8598_v8  ;;  %v7189_v25 = vld [vmem:[%s8376_s3 + $0x2c0] ss:$16 sps:$4 sm:$0xff]   ;;  %v8952_v36 = vadd.f32 %v8481_v1, %v1248_v60 }
 0x1a7   : > { %12483 = vst [vmem:[#allocation86_spill] sm:$0xff] %v8917_v23  ;;  %2694 = vmatmul.mubr.bf16.gmra.mrb[8].mxu0 %v8917_v23  ;;  %3016 = vmatmul.mubr.bf16.gmra.mrb[8].mxu1 %v8917_v23  ;;  %v1059_v47 = vadd.f32 1e-06, %v934_v43  ;;  %v935_v49 = vsub.f32 %v885_v54, %v910_v22  ;;  %v8944_v4 = vmul.f32 0.001953125, %v561_v16  ;;  %v1125_v23 = vmul.f32 %v8838_v61, %v12488_v37  ;;  %v8963_v43 = vld [vmem:[#allocation2 + $0x1b0] sm:$0xff]  ;;  %v9012_v61 = vld [vmem:[#allocation2 + $0x1e0] sm:$0xff] }
 0x1a8   : > { %12485 = vst [vmem:[#allocation88_spill] sm:$0xff] %v8937_v42  ;;  %v1121_v14 = vmul.f32 %v8814_v6, %v12486_v24  ;;  %3134 = vmatprep.subr.bf16.mxu1 %v7188_v18  ;;  %2813 = vmatpush1.bf16.msra.mxu0 %v7183_v57  ;;  %12489 = vst [vmem:[#allocation90_spill] sm:$0xff] %v8952_v36  ;;  %v566_v24 = vpop.xlane.xlu1 %565  ;;  %v12490_v54 = vsub.f32 %v8725_v55, %v8685_v15  ;;  %v8967_v18 = vld [vmem:[#allocation2 + $0x1b8] sm:$0xff]  ;;  %v7200_v57 = vld [vmem:[%s8376_s3 + $0x2ec] ss:$16 sps:$4 sm:$0xff]  }
 0x1a9   : > { %12487 = vst [vmem:[#allocation89_spill] sm:$0xff] %v8944_v4  ;;  %v1134_v22 = vmul.f32 %v8924_v30, %v12491_v28  ;;  %2814 = vmatprep.subr.bf16.mxu0 %v7191_v63  ;;  %12492 = vst [vmem:[#allocation91_spill] sm:$0xff] %v8963_v43  ;;  %7465 = vrsqrt.f32 %v1059_v47  ;;  %v1060_v60 = vadd.f32 1e-06, %v935_v49  ;;  %v8974_v33 = vpack.c.bf16 %v8952_v36, %v8937_v42  ;;  %v8976_v63 = vld [vmem:[#allocation2 + $0x1c0] sm:$0xff]  ;;  %v8989_v36 = vld [vmem:[#allocation2 + $0x1d0] sm:$0xff] }
 0x1aa   : > { %v1243_v31 = vmul.f32 %v8484_v2, %v1121_v14  ;;  %v1130_v16 = vmul.f32 %v8905_v39, %v12490_v54  ;;  %12493 = vst [vmem:[#allocation92_spill] sm:$0xff] %v8967_v18  ;;  %3135 = vmatpush1.bf16.msra.mxu1 %v7186_v41  ;;  %v7192_v14 = vld [vmem:[%s8376_s3 + $0x2c8] ss:$16 sps:$4 sm:$0xff]   ;;  %v8980_v54 = vld [vmem:[#allocation2 + $0x1c8] sm:$0xff]  ;;  %v1247_v47 = vmul.f32 %v8484_v2, %v1125_v23  ;;  %v817_v49 = vpop.xlane.xlu0 %816  ;;  %12496 = vst [vmem:[#allocation95_spill] sm:$0xff] %v8989_v36 }
 0x1ab   : > { %12494 = vst [vmem:[#allocation93_spill] sm:$0xff] %v8974_v33  ;;  %3136 = vmatprep.subr.bf16.mxu1 %v7194_v51  ;;  %v7197_v41 = vld [vmem:[%s8376_s3 + $0x2e4] ss:$16 sps:$4 sm:$0xff]   ;;  %v8987_v55 = vpop.eup %7461  ;;  %v8996_v43 = vmul.f32 0.001953125, %v566_v24  ;;  %v911_v28 = vmul.f32 %v8944_v4, %v8944_v4  ;;  %v7195_v23 = vld [vmem:[%s8376_s3 + $0x2e0] ss:$16 sps:$4 sm:$0xff]   ;;  %2703 = vmatprep.mubr.bf16.mxu0 %v8974_v33  ;;  %v1256_v24 = vmul.f32 %v8478_v0, %v1134_v22  ;;  %7467 = vrsqrt.f32 %v1060_v60 }
 0x1ac   : > { %12495 = vst [vmem:[#allocation94_spill] sm:$0xff] %v8987_v55  ;;  %v8994_v37 = vadd.f32 %v8491_v7, %v1243_v31  ;;  %2815 = vmatpush1.bf16.msra.mxu0 %v7189_v25  ;;  %3025 = vmatprep.mubr.bf16.mxu1 %v8974_v33  ;;  %v9004_v51 = vadd.f32 %v8491_v7, %v1247_v47  ;;  %v886_v18 = vmul.f32 0.001953125, %v817_v49  ;;  %v822_v42 = vpop.xlane.xlu1 %821  ;;  %v9008_v36 = vld [vmem:[#allocation2 + $0x1d8] sm:$0xff]  ;;  %v9016_v33 = vld [vmem:[#allocation2 + $0x1e8] sm:$0xff]  ;;  %v7198_v22 = vld [vmem:[%s8376_s3 + $0x2e8] ss:$16 sps:$4 sm:$0xff]  }
 0x1ad   : > { %12498 = vst [vmem:[#allocation97_spill] sm:$0xff] %v8996_v43  ;;  %v1252_v31 = vmul.f32 %v8478_v0, %v1130_v16  ;;  %12500 = vst [vmem:[#allocation99_spill] sm:$0xff] %v9008_v36  ;;  %v912_v25 = vmul.f32 %v8996_v43, %v8996_v43  ;;  %v887_v36 = vmul.f32 0.001953125, %v822_v42  ;;  %2816 = vmatprep.subr.bf16.mxu0 %v7197_v41  ;;  %v7203_v47 = vld [vmem:[%s8376_s3 + $0x304] ss:$16 sps:$4 sm:$0xff]   ;;  %v9041_v42 = vpop.eup %7463 }
 0x1ae   : > { %12497 = vst [vmem:[#allocation96_spill] sm:$0xff] %v8994_v37  ;;  %12499 = vst [vmem:[#allocation98_spill] sm:$0xff] %v9004_v51  ;;  %3137 = vmatpush1.bf16.msra.mxu1 %v7192_v14  ;;  %v9023_v60 = vpack.c.bf16 %v9004_v51, %v8994_v37  ;;  %v936_v49 = vsub.f32 %v886_v18, %v911_v28  ;;  %v571_v35 = vpop.xlane.xlu0 %570  ;;  %v7206_v6 = vld [vmem:[%s8376_s3 + $0x30c] ss:$16 sps:$4 sm:$0xff]   ;;  %v9033_v14 = vadd.f32 %v8481_v1, %v1256_v24  ;;  %v9054_v51 = vld [vmem:[#allocation2 + $0x1f8] sm:$0xff] }
 0x1af   : > { %3138 = vmatprep.subr.bf16.mxu1 %v7200_v57  ;;  %v9030_v8 = vadd.f32 %v8481_v1, %v1252_v31  ;;  %v9035_v16 = vmul.f32 0.001953125, %v571_v35  ;;  %v12504_v18 = vsub.f32 %v8713_v32, %v8685_v15  ;;  %12505 = vst [vmem:[#allocation103_spill] sm:$0xff] %v9041_v42  ;;  %v9045_v57 = vld [vmem:[#allocation2 + $0x1f0] sm:$0xff]  ;;  %v937_v31 = vsub.f32 %v887_v36, %v912_v25  ;;  %v9071_v37 = vld [vmem:[#allocation2 + $0x208] sm:$0xff] }
 0x1b0   : > { %12501 = vst [vmem:[#allocation100_spill] sm:$0xff] %v9023_v60  ;;  %12503 = vst [vmem:[#allocation102_spill] sm:$0xff] %v9033_v14  ;;  %2817 = vmatpush1.bf16.msra.mxu0 %v7195_v23  ;;  %3026 = vmatmul.mubr.bf16.gmra.mrb[12].mxu1 %v9023_v60  ;;  %v1061_v35 = vadd.f32 1e-06, %v936_v49  ;;  %v12507_v32 = vsub.f32 %v8744_v38, %v8719_v13  ;;  %v576_v23 = vpop.xlane.xlu1 %575  ;;  %v9062_v49 = vld [vmem:[#allocation2 + $0x200] sm:$0xff]  ;;  %v12510_v36 = vsub.f32 %v8816_v53, %v8770_v40 }
 0x1b1   : > { %12502 = vst [vmem:[#allocation101_spill] sm:$0xff] %v9030_v8  ;;  %v1129_v28 = vmul.f32 %v8905_v39, %v12504_v18  ;;  %2704 = vmatmul.mubr.bf16.gmra.mrb[12].mxu0 %v9023_v60  ;;  %12506 = vst [vmem:[#allocation104_spill] sm:$0xff] %v9045_v57  ;;  %v7201_v18 = vld [vmem:[%s8376_s3 + $0x300] ss:$16 sps:$4 sm:$0xff]   ;;  %v9060_v60 = vpack.c.bf16 %v9033_v14, %v9030_v8  ;;  %v1062_v41 = vadd.f32 1e-06, %v937_v31  ;;  %2818 = vmatprep.subr.bf16.mxu0 %v7203_v47 }
 0x1b2   : > { %v1133_v24 = vmul.f32 %v8924_v30, %v12507_v32  ;;  %12508 = vst [vmem:[#allocation105_spill] sm:$0xff] %v9054_v51  ;;  %v1138_v25 = vmul.f32 %v8987_v55, %v12510_v36  ;;  %3139 = vmatpush1.bf16.msra.mxu1 %v7198_v22  ;;  %v7204_v32 = vld [vmem:[%s8376_s3 + $0x308] ss:$16 sps:$4 sm:$0xff]   ;;  %7469 = vrsqrt.f32 %v1061_v35  ;;  %v827_v57 = vpop.xlane.xlu0 %826  ;;  %v7209_v38 = vld [vmem:[%s8376_s3 + $0x324] ss:$16 sps:$4 sm:$0xff]   ;;  %v9083_v35 = vmul.f32 0.001953125, %v576_v23 }
 0x1b3   : > { %12509 = vst [vmem:[#allocation106_spill] sm:$0xff] %v9060_v60  ;;  %v1251_v8 = vmul.f32 %v8484_v2, %v1129_v28  ;;  %3140 = vmatprep.subr.bf16.mxu1 %v7206_v6  ;;  %v7212_v51 = vld [vmem:[%s8376_s3 + $0x32c] ss:$16 sps:$4 sm:$0xff]   ;;  %v9078_v53 = vpop.eup %7465  ;;  %2713 = vmatprep.mubr.bf16.mxu0 %v9060_v60  ;;  %v913_v31 = vmul.f32 %v9035_v16, %v9035_v16  ;;  %v888_v28 = vmul.f32 0.001953125, %v827_v57  ;;  %7471 = vrsqrt.f32 %v1062_v41  ;;  %v9091_v36 = vld [vmem:[#allocation2 + $0x218] sm:$0xff] }
 0x1b4   : > { %12511 = vst [vmem:[#allocation107_spill] sm:$0xff] %v9078_v53  ;;  %3035 = vmatprep.mubr.bf16.mxu1 %v9060_v60  ;;  %v1255_v22 = vmul.f32 %v8484_v2, %v1133_v24  ;;  %v9087_v47 = vld [vmem:[#allocation2 + $0x210] sm:$0xff]  ;;  %12513 = vst [vmem:[#allocation109_spill] sm:$0xff] %v9091_v36  ;;  %v832_v60 = vpop.xlane.xlu1 %831  ;;  %v12514_v24 = vsub.f32 %v8859_v5, %v8807_v19  ;;  %2819 = vmatpush1.bf16.msra.mxu0 %v7201_v18  ;;  %v7207_v57 = vld [vmem:[%s8376_s3 + $0x320] ss:$16 sps:$4 sm:$0xff]  }
 0x1b5   : > { %12512 = vst [vmem:[#allocation108_spill] sm:$0xff] %v9087_v47  ;;  %v9101_v41 = vadd.f32 %v8491_v7, %v1251_v8  ;;  %v9106_v47 = vld [vmem:[#allocation2 + $0x220] sm:$0xff]  ;;  %v1260_v36 = vmul.f32 %v8478_v0, %v1138_v25  ;;  %v9111_v5 = vld [vmem:[#allocation2 + $0x228] sm:$0xff]  ;;  %v914_v8 = vmul.f32 %v9083_v35, %v9083_v35  ;;  %2820 = vmatprep.subr.bf16.mxu0 %v7209_v38  ;;  %v9119_v39 = vpop.eup %7467 }
 0x1b6   : > { %v1142_v23 = vmul.f32 %v9041_v42, %v12514_v24  ;;  %v9104_v6 = vadd.f32 %v8491_v7, %v1255_v22  ;;  %3141 = vmatpush1.bf16.msra.mxu1 %v7204_v32  ;;  %v938_v24 = vsub.f32 %v888_v28, %v913_v31  ;;  %v889_v22 = vmul.f32 0.001953125, %v832_v60  ;;  %v581_v30 = vpop.xlane.xlu0 %580  ;;  %v7210_v13 = vld [vmem:[%s8376_s3 + $0x328] ss:$16 sps:$4 sm:$0xff]   ;;  %v7215_v14 = vld [vmem:[%s8376_s3 + $0x344] ss:$16 sps:$4 sm:$0xff]   ;;  %12517 = vst [vmem:[#allocation112_spill] sm:$0xff] %v9119_v39 }
 0x1b7   : > { %12515 = vst [vmem:[#allocation110_spill] sm:$0xff] %v9101_v41  ;;  %3142 = vmatprep.subr.bf16.mxu1 %v7212_v51  ;;  %v9125_v32 = vld [vmem:[#allocation2 + $0x230] sm:$0xff]  ;;  %v9130_v60 = vmul.f32 0.001953125, %v581_v30  ;;  %v12520_v51 = vsub.f32 %v8799_v20, %v8770_v40  ;;  %v7213_v31 = vld [vmem:[%s8376_s3 + $0x340] ss:$16 sps:$4 sm:$0xff]  }
 0x1b8   : > { %12516 = vst [vmem:[#allocation111_spill] sm:$0xff] %v9104_v6  ;;  %v9123_v25 = vpack.c.bf16 %v9104_v6, %v9101_v41  ;;  %12519 = vst [vmem:[#allocation114_spill] sm:$0xff] %v9125_v32  ;;  %v1264_v28 = vmul.f32 %v8478_v0, %v1142_v23  ;;  %v7218_v38 = vld [vmem:[%s8376_s3 + $0x34c] ss:$16 sps:$4 sm:$0xff]   ;;  %v1063_v18 = vadd.f32 1e-06, %v938_v24  ;;  %v939_v15 = vsub.f32 %v889_v22, %v914_v8  ;;  %v586_v46 = vpop.xlane.xlu1 %585 }
 0x1b9   : > { %v1137_v58 = vmul.f32 %v8987_v55, %v12520_v51  ;;  %v12521_v6 = vsub.f32 %v8831_v45, %v8807_v19  ;;  %2821 = vmatpush1.bf16.msra.mxu0 %v7207_v57  ;;  %v9144_v30 = vld [vmem:[#allocation2 + $0x238] sm:$0xff]  ;;  %v9149_v23 = vadd.f32 %v8481_v1, %v1260_v36  ;;  %v9156_v24 = vld [vmem:[#allocation2 + $0x240] sm:$0xff]  ;;  %v9160_v22 = vld [vmem:[#allocation2 + $0x248] sm:$0xff]  ;;  %v915_v32 = vmul.f32 %v9130_v60, %v9130_v60 }
 0x1ba   : > { %12518 = vst [vmem:[#allocation113_spill] sm:$0xff] %v9123_v25  ;;  %2714 = vmatmul.mubr.bf16.gmra.mrb[16].mxu0 %v9123_v25  ;;  %3036 = vmatmul.mubr.bf16.gmra.mrb[16].mxu1 %v9123_v25  ;;  %12522 = vst [vmem:[#allocation115_spill] sm:$0xff] %v9144_v30  ;;  %v9152_v45 = vadd.f32 %v8481_v1, %v1264_v28  ;;  %7473 = vrsqrt.f32 %v1063_v18  ;;  %v1064_v57 = vadd.f32 1e-06, %v939_v15  ;;  %v837_v36 = vpop.xlane.xlu0 %836  ;;  %v7216_v28 = vld [vmem:[%s8376_s3 + $0x348] ss:$16 sps:$4 sm:$0xff]  }
 0x1bb   : > { %v1141_v41 = vmul.f32 %v9041_v42, %v12521_v6  ;;  %12523 = vst [vmem:[#allocation116_spill] sm:$0xff] %v9149_v23  ;;  %v9154_v6 = vmul.f32 0.001953125, %v586_v46  ;;  %3143 = vmatpush1.bf16.msra.mxu1 %v7210_v13  ;;  %2822 = vmatprep.subr.bf16.mxu0 %v7215_v14  ;;  %v7221_v20 = vld [vmem:[%s8376_s3 + $0x364] ss:$16 sps:$4 sm:$0xff]   ;;  %v9170_v15 = vld [vmem:[#allocation2 + $0x250] sm:$0xff]  ;;  %v1259_v8 = vmul.f32 %v8484_v2, %v1137_v58 }
 0x1bc   : > { %12524 = vst [vmem:[#allocation117_spill] sm:$0xff] %v9152_v45  ;;  %v9168_v46 = vpack.c.bf16 %v9152_v45, %v9149_v23  ;;  %12526 = vst [vmem:[#allocation119_spill] sm:$0xff] %v9170_v15  ;;  %3144 = vmatprep.subr.bf16.mxu1 %v7218_v38  ;;  %v7224_v51 = vld [vmem:[%s8376_s3 + $0x36c] ss:$16 sps:$4 sm:$0xff]   ;;  %v9177_v13 = vpop.eup %7469  ;;  %7475 = vrsqrt.f32 %v1064_v57  ;;  %v9179_v14 = vld [vmem:[#allocation2 + $0x258] sm:$0xff]  ;;  %v890_v15 = vmul.f32 0.001953125, %v837_v36 }
 0x1bd   : > { %v1263_v25 = vmul.f32 %v8484_v2, %v1141_v41  ;;  %12527 = vst [vmem:[#allocation120_spill] sm:$0xff] %v9177_v13  ;;  %12528 = vst [vmem:[#allocation121_spill] sm:$0xff] %v9179_v14  ;;  %v9183_v23 = vld [vmem:[#allocation2 + $0x260] sm:$0xff]  ;;  %v9187_v18 = vld [vmem:[#allocation2 + $0x268] sm:$0xff]  ;;  %v842_v41 = vpop.xlane.xlu1 %841  ;;  %2823 = vmatpush1.bf16.msra.mxu0 %v7213_v31  ;;  %v9195_v57 = vadd.f32 %v8491_v7, %v1259_v8  ;;  %v9202_v58 = vpop.eup %7471  ;;  %v916_v31 = vmul.f32 %v9154_v6, %v9154_v6 }
 0x1be   : > { %12525 = vst [vmem:[#allocation118_spill] sm:$0xff] %v9168_v46  ;;  %v7219_v38 = vld [vmem:[%s8376_s3 + $0x360] ss:$16 sps:$4 sm:$0xff]   ;;  %2723 = vmatprep.mubr.bf16.mxu0 %v9168_v46  ;;  %3045 = vmatprep.mubr.bf16.mxu1 %v9168_v46  ;;  %12531 = vst [vmem:[#allocation124_spill] sm:$0xff] %v9202_v58  ;;  %v891_v14 = vmul.f32 0.001953125, %v842_v41  ;;  %v12532_v46 = vsub.f32 %v8896_v12, %v8852_v27  ;;  %v591_v42 = vpop.xlane.xlu0 %590  ;;  %v940_v41 = vsub.f32 %v890_v15, %v915_v32 }
 0x1bf   : > { %12529 = vst [vmem:[#allocation122_spill] sm:$0xff] %v9195_v57  ;;  %v9198_v45 = vadd.f32 %v8491_v7, %v1263_v25  ;;  %v12533_v25 = vsub.f32 %v8926_v34, %v8894_v21  ;;  %3145 = vmatpush1.bf16.msra.mxu1 %v7216_v28  ;;  %2824 = vmatprep.subr.bf16.mxu0 %v7221_v20  ;;  %v7222_v36 = vld [vmem:[%s8376_s3 + $0x368] ss:$16 sps:$4 sm:$0xff]   ;;  %v7227_v19 = vld [vmem:[%s8376_s3 + $0x384] ss:$16 sps:$4 sm:$0xff]   ;;  %v9220_v40 = vmul.f32 0.001953125, %v591_v42 }
 0x1c0   : > { %v1146_v8 = vmul.f32 %v9078_v53, %v12532_v46  ;;  %v12535_v12 = vsub.f32 %v8887_v50, %v8852_v27  ;;  %3146 = vmatprep.subr.bf16.mxu1 %v7224_v51  ;;  %v7230_v46 = vld [vmem:[%s8376_s3 + $0x38c] ss:$16 sps:$4 sm:$0xff]   ;;  %v7225_v15 = vld [vmem:[%s8376_s3 + $0x380] ss:$16 sps:$4 sm:$0xff]  }
 0x1c1   : > { %12530 = vst [vmem:[#allocation123_spill] sm:$0xff] %v9198_v45  ;;  %v1150_v30 = vmul.f32 %v9119_v39, %v12533_v25  ;;  %v9218_v55 = vpack.c.bf16 %v9198_v45, %v9195_v57  ;;  %v941_v25 = vsub.f32 %v891_v14, %v916_v31  ;;  %v12536_v45 = vsub.f32 %v8919_v56, %v8894_v21  ;;  %v596_v42 = vpop.xlane.xlu1 %595  ;;  %v9236_v50 = vld [vmem:[#allocation2 + $0x270] sm:$0xff]  ;;  %v9240_v14 = vld [vmem:[#allocation2 + $0x278] sm:$0xff]  ;;  %v9244_v31 = vld [vmem:[#allocation2 + $0x280] sm:$0xff] }
 0x1c2   : > { %v1145_v34 = vmul.f32 %v9078_v53, %v12535_v12  ;;  %v1268_v20 = vmul.f32 %v8478_v0, %v1146_v8  ;;  %2825 = vmatpush1.bf16.msra.mxu0 %v7219_v38  ;;  %12537 = vst [vmem:[#allocation126_spill] sm:$0xff] %v9236_v50  ;;  %12538 = vst [vmem:[#allocation127_spill] sm:$0xff] %v9240_v14  ;;  %v1065_v56 = vadd.f32 1e-06, %v940_v41  ;;  %v7233_v38 = vld [vmem:[%s8376_s3 + $0x3a4] ss:$16 sps:$4 sm:$0xff]   ;;  %v847_v41 = vpop.xlane.xlu0 %846 }
 0x1c3   : > { %12534 = vst [vmem:[#allocation125_spill] sm:$0xff] %v9218_v55  ;;  %v1272_v28 = vmul.f32 %v8478_v0, %v1150_v30  ;;  %v1149_v32 = vmul.f32 %v9119_v39, %v12536_v45  ;;  %2724 = vmatmul.mubr.bf16.gmra.mrb[20].mxu0 %v9218_v55  ;;  %3046 = vmatmul.mubr.bf16.gmra.mrb[20].mxu1 %v9218_v55  ;;  %v1066_v8 = vadd.f32 1e-06, %v941_v25  ;;  %v9255_v51 = vld [vmem:[#allocation2 + $0x288] sm:$0xff]  ;;  %v9259_v55 = vld [vmem:[#allocation2 + $0x290] sm:$0xff]  ;;  %v9265_v45 = vmul.f32 0.001953125, %v596_v42 }
 0x1c4   : > { %v9250_v12 = vadd.f32 %v8481_v1, %v1268_v20  ;;  %3147 = vmatpush1.bf16.msra.mxu1 %v7222_v36  ;;  %2826 = vmatprep.subr.bf16.mxu0 %v7227_v19  ;;  %12541 = vst [vmem:[#allocation130_spill] sm:$0xff] %v9259_v55  ;;  %v1267_v20 = vmul.f32 %v8484_v2, %v1145_v34  ;;  %v7228_v50 = vld [vmem:[%s8376_s3 + $0x388] ss:$16 sps:$4 sm:$0xff]   ;;  %v9268_v14 = vpop.eup %7473  ;;  %7477 = vrsqrt.f32 %v1065_v56  ;;  %v892_v30 = vmul.f32 0.001953125, %v847_v41  ;;  %v7231_v34 = vld [vmem:[%s8376_s3 + $0x3a0] ss:$16 sps:$4 sm:$0xff]  }
 0x1c5   : > { %v9253_v57 = vadd.f32 %v8481_v1, %v1272_v28  ;;  %v1271_v28 = vmul.f32 %v8484_v2, %v1149_v32  ;;  %3148 = vmatprep.subr.bf16.mxu1 %v7230_v46  ;;  %v917_v36 = vmul.f32 %v9220_v40, %v9220_v40  ;;  %v852_v25 = vpop.xlane.xlu1 %851  ;;  %v7236_v55 = vld [vmem:[%s8376_s3 + $0x3ac] ss:$16 sps:$4 sm:$0xff]   ;;  %7479 = vrsqrt.f32 %v1066_v8  ;;  %v9278_v32 = vld [vmem:[#allocation2 + $0x298] sm:$0xff]  ;;  %v9296_v41 = vld [vmem:[#allocation2 + $0x2a8] sm:$0xff] }
 0x1c6   : > { %12539 = vst [vmem:[#allocation128_spill] sm:$0xff] %v9250_v12  ;;  %2827 = vmatpush1.bf16.msra.mxu0 %v7225_v15  ;;  %12543 = vst [vmem:[#allocation132_spill] sm:$0xff] %v9278_v32  ;;  %v9283_v42 = vadd.f32 %v8491_v7, %v1267_v20  ;;  %v9292_v15 = vld [vmem:[#allocation2 + $0x2a0] sm:$0xff]  ;;  %v893_v46 = vmul.f32 0.001953125, %v852_v25  ;;  %v12547_v8 = vsub.f32 %v8980_v54, %v8944_v4 }
 0x1c7   : > { %12540 = vst [vmem:[#allocation129_spill] sm:$0xff] %v9253_v57  ;;  %v9272_v19 = vpack.c.bf16 %v9253_v57, %v9250_v12  ;;  %v9286_v56 = vadd.f32 %v8491_v7, %v1271_v28  ;;  %2828 = vmatprep.subr.bf16.mxu0 %v7233_v38  ;;  %v9288_v57 = vpop.eup %7475  ;;  %v942_v28 = vsub.f32 %v892_v30, %v917_v36  ;;  %v601_v38 = vpop.xlane.xlu0 %600  ;;  %v7239_v12 = vld [vmem:[%s8376_s3 + $0x3c4] ss:$16 sps:$4 sm:$0xff]   ;;  %v7234_v25 = vld [vmem:[%s8376_s3 + $0x3a8] ss:$16 sps:$4 sm:$0xff]  }
 0x1c8   : > { %12544 = vst [vmem:[#allocation133_spill] sm:$0xff] %v9283_v42  ;;  %v1154_v39 = vmul.f32 %v9177_v13, %v12547_v8  ;;  %v12548_v20 = vsub.f32 %v9016_v33, %v8996_v43  ;;  %3149 = vmatpush1.bf16.msra.mxu1 %v7228_v50  ;;  %v9316_v21 = vmul.f32 0.001953125, %v601_v38  ;;  %v12550_v54 = vsub.f32 %v9012_v61, %v8996_v43  ;;  %v7242_v33 = vld [vmem:[%s8376_s3 + $0x3cc] ss:$16 sps:$4 sm:$0xff]  }
 0x1c9   : > { %12542 = vst [vmem:[#allocation131_spill] sm:$0xff] %v9272_v19  ;;  %12545 = vst [vmem:[#allocation134_spill] sm:$0xff] %v9286_v56  ;;  %2733 = vmatprep.mubr.bf16.mxu0 %v9272_v19  ;;  %3055 = vmatprep.mubr.bf16.mxu1 %v9272_v19  ;;  %v9303_v32 = vpack.c.bf16 %v9286_v56, %v9283_v42  ;;  %v918_v19 = vmul.f32 %v9265_v45, %v9265_v45  ;;  %v1067_v36 = vadd.f32 1e-06, %v942_v28  ;;  %v606_v53 = vpop.xlane.xlu1 %605  ;;  %v7237_v28 = vld [vmem:[%s8376_s3 + $0x3c0] ss:$16 sps:$4 sm:$0xff]  }
 0x1ca   : > { %v1158_v30 = vmul.f32 %v9202_v58, %v12548_v20  ;;  %v12549_v56 = vsub.f32 %v8976_v63, %v8944_v4  ;;  %v1157_v8 = vmul.f32 %v9202_v58, %v12550_v54  ;;  %3150 = vmatprep.subr.bf16.mxu1 %v7236_v55  ;;  %2829 = vmatpush1.bf16.msra.mxu0 %v7231_v34  ;;  %v9334_v61 = vld [vmem:[#allocation2 + $0x2b0] sm:$0xff]  ;;  %v9338_v34 = vld [vmem:[#allocation2 + $0x2b8] sm:$0xff]  ;;  %v9342_v54 = vld [vmem:[#allocation2 + $0x2c0] sm:$0xff] }
 0x1cb   : > { %12546 = vst [vmem:[#allocation135_spill] sm:$0xff] %v9303_v32  ;;  %2734 = vmatmul.mubr.bf16.gmra.mrb[24].mxu0 %v9303_v32  ;;  %3056 = vmatmul.mubr.bf16.gmra.mrb[24].mxu1 %v9303_v32  ;;  %v943_v50 = vsub.f32 %v893_v46, %v918_v19  ;;  %v1276_v20 = vmul.f32 %v8478_v0, %v1154_v39  ;;  %12551 = vst [vmem:[#allocation136_spill] sm:$0xff] %v9334_v61  ;;  %7481 = vrsqrt.f32 %v1067_v36  ;;  %v857_v19 = vpop.xlane.xlu0 %856  ;;  %v9353_v32 = vld [vmem:[#allocation2 + $0x2c8] sm:$0xff]  ;;  %v9357_v38 = vld [vmem:[#allocation2 + $0x2d0] sm:$0xff] }
 0x1cc   : > { %v1153_v42 = vmul.f32 %v9177_v13, %v12549_v56  ;;  %v1280_v63 = vmul.f32 %v8478_v0, %v1158_v30  ;;  %v9331_v56 = vmul.f32 0.001953125, %v606_v53  ;;  %12552 = vst [vmem:[#allocation137_spill] sm:$0xff] %v9338_v34  ;;  %2830 = vmatprep.subr.bf16.mxu0 %v7239_v12  ;;  %v7245_v53 = vld [vmem:[%s8376_s3 + $0x3e4] ss:$16 sps:$4 sm:$0xff]   ;;  %3151 = vmatpush1.bf16.msra.mxu1 %v7234_v25  ;;  %12555 = vst [vmem:[#allocation140_spill] sm:$0xff] %v9357_v38  ;;  %v9372_v36 = vld [vmem:[#allocation2 + $0x2e0] sm:$0xff] }
 0x1cd   : > { %v1068_v46 = vadd.f32 1e-06, %v943_v50  ;;  %v9348_v30 = vadd.f32 %v8481_v1, %v1276_v20  ;;  %v9361_v39 = vld [vmem:[#allocation2 + $0x2d8] sm:$0xff]  ;;  %v862_v61 = vpop.xlane.xlu1 %861  ;;  %v7240_v34 = vld [vmem:[%s8376_s3 + $0x3c8] ss:$16 sps:$4 sm:$0xff]   ;;  %3152 = vmatprep.subr.bf16.mxu1 %v7242_v33  ;;  %v9376_v38 = vld [vmem:[#allocation2 + $0x2e8] sm:$0xff] }
 0x1ce   : > { %v9351_v55 = vadd.f32 %v8481_v1, %v1280_v63  ;;  %12556 = vst [vmem:[#allocation141_spill] sm:$0xff] %v9361_v39  ;;  %v1275_v20 = vmul.f32 %v8484_v2, %v1153_v42  ;;  %v1279_v63 = vmul.f32 %v8484_v2, %v1157_v8  ;;  %2831 = vmatpush1.bf16.msra.mxu0 %v7237_v28  ;;  %v7248_v8 = vld [vmem:[%s8376_s3 + $0x3ec] ss:$16 sps:$4 sm:$0xff]   ;;  %v9381_v50 = vpop.eup %7477  ;;  %v894_v12 = vmul.f32 0.001953125, %v857_v19  ;;  %v7243_v58 = vld [vmem:[%s8376_s3 + $0x3e0] ss:$16 sps:$4 sm:$0xff]  }
 0x1cf   : > { %12553 = vst [vmem:[#allocation138_spill] sm:$0xff] %v9348_v30  ;;  %7483 = vrsqrt.f32 %v1068_v46  ;;  %2832 = vmatprep.subr.bf16.mxu0 %v7245_v53  ;;  %v9391_v42 = vpop.eup %7479  ;;  %v920_v28 = vmul.f32 %v9331_v56, %v9331_v56  ;;  %v12561_v19 = vsub.f32 %v9111_v5, %v9083_v35  ;;  %v7251_v4 = vld [vmem:[%s8369_s19 + $0x4] ss:$16 sps:$4 sm:$0xff]  }
 0x1d0   : > { %12554 = vst [vmem:[#allocation139_spill] sm:$0xff] %v9351_v55  ;;  %v9370_v25 = vpack.c.bf16 %v9351_v55, %v9348_v30  ;;  %v9384_v33 = vadd.f32 %v8491_v7, %v1275_v20  ;;  %v9387_v46 = vadd.f32 %v8491_v7, %v1279_v63  ;;  %v919_v55 = vmul.f32 %v9316_v21, %v9316_v21  ;;  %v616_v30 = vpop.xlane.xlu0 %615 }
 0x1d1   : > { %v895_v20 = vmul.f32 0.001953125, %v862_v61  ;;  %v12560_v63 = vsub.f32 %v9071_v37, %v9035_v16  ;;  %v1166_v53 = vmul.f32 %v9288_v57, %v12561_v19  ;;  %v9410_v13 = vmul.f32 0.001953125, %v616_v30  ;;  %3153 = vmatpush1.bf16.msra.mxu1 %v7240_v34  ;;  %v871_v30 = vpop.xlane.xlu1 %870 }
 0x1d2   : > { %12557 = vst [vmem:[#allocation142_spill] sm:$0xff] %v9370_v25  ;;  %12558 = vst [vmem:[#allocation143_spill] sm:$0xff] %v9384_v33  ;;  %2743 = vmatprep.mubr.bf16.mxu0 %v9370_v25  ;;  %3065 = vmatprep.mubr.bf16.mxu1 %v9370_v25  ;;  %v9408_v43 = vpack.c.bf16 %v9387_v46, %v9384_v33  ;;  %v944_v25 = vsub.f32 %v894_v12, %v919_v55  ;;  %v7254_v12 = vld [vmem:[%s8369_s19 + $0xc] ss:$16 sps:$4 sm:$0xff]   ;;  %v9445_v33 = vld [vmem:[#allocation2 + $0x308] sm:$0xf] }
 0x1d3   : > { %12559 = vst [vmem:[#allocation144_spill] sm:$0xff] %v9387_v46  ;;  %v1162_v39 = vmul.f32 %v9268_v14, %v12560_v63  ;;  %v12563_v61 = vsub.f32 %v9062_v49, %v9035_v16  ;;  %v7246_v63 = vld [vmem:[%s8376_s3 + $0x3e8] ss:$16 sps:$4 sm:$0xff]   ;;  %v945_v5 = vsub.f32 %v895_v20, %v920_v28  ;;  %v1288_v19 = vmul.f32 %v8478_v0, %v1166_v53 }
 0x1d4   : > { %12562 = vst [vmem:[#allocation145_spill] sm:$0xff] %v9408_v43  ;;  %v12564_v46 = vsub.f32 %v9106_v47, %v9083_v35  ;;  %3154 = vmatprep.subr.bf16.mxu1 %v7248_v8  ;;  %2744 = vmatmul.mubr.bf16.gmra.mrb[28].mxu0 %v9408_v43  ;;  %v9427_v49 = vld [vmem:[#allocation2 + $0x2f0] sm:$0xff]  ;;  %v1069_v47 = vadd.f32 1e-06, %v944_v25  ;;  %v9435_v20 = vld [vmem:[#allocation2 + $0x300] sm:$0xf] }
 0x1d5   : > { %v1161_v37 = vmul.f32 %v9268_v14, %v12563_v61  ;;  %v1284_v27 = vmul.f32 %v8478_v0, %v1162_v39  ;;  %3066 = vmatmul.mubr.bf16.gmra.mrb[28].mxu1 %v9408_v43  ;;  %v9431_v39 = vld [vmem:[#allocation2 + $0x2f8] sm:$0xff]  ;;  %v9443_v61 = vadd.f32 %v8481_v1, %v1288_v19  ;;  %2833 = vmatpush1.bf16.msra.mxu0 %v7243_v58  ;;  %v9449_v28 = vpop.eup %7481  ;;  %v12714_v43 = vld [vmem:[#allocation124_spill] sm:$0xff] }
 0x1d6   : > { %v1165_v55 = vmul.f32 %v9288_v57, %v12564_v46  ;;  %v1070_v46 = vadd.f32 1e-06, %v945_v5  ;;  %7485 = vrsqrt.f32 %v1069_v47  ;;  %v896_v5 = vmul.f32 0.001953125, %v871_v30  ;;  %3155 = vmatpush1.bf16.msra.mxu1 %v7246_v63  ;;  %3925 = vmatprep.subr.bf16.mxu0 %v7251_v4 }
 0x1d7   : > { %v9440_v53 = vadd.f32 %v8481_v1, %v1284_v27  ;;  %12566 = vst [vmem:[#allocation147_spill] sm:$0xff] %v9443_v61  ;;  %v1283_v25 = vmul.f32 %v8484_v2, %v1161_v37  ;;  %v921_v19 = vmul.f32 %v9410_v13, %v9410_v13  ;;  %v12568_v58 = vsub.f32 %v9160_v22, %v9130_v60 }
 0x1d8   : > { %v1287_v8 = vmul.f32 %v8484_v2, %v1165_v55  ;;  %7487 = vrsqrt.f32 %v1070_v46  ;;  %4247 = vmatprep.subr.bf16.mxu1 %v7254_v12  ;;  %v12571_v4 = vsub.f32 %v9187_v18, %v9154_v6  ;;  %v12572_v30 = vsub.f32 %v9156_v24, %v9130_v60 }
 0x1d9   : > { %12565 = vst [vmem:[#allocation146_spill] sm:$0xff] %v9440_v53  ;;  %v9455_v27 = vpack.c.bf16 %v9443_v61, %v9440_v53  ;;  %v1170_v47 = vmul.f32 %v9381_v50, %v12568_v58  ;;  %v9464_v37 = vadd.f32 %v8491_v7, %v1283_v25  ;;  %v9477_v22 = vpop.eup %7483  ;;  %v946_v12 = vsub.f32 %v896_v5, %v921_v19 }
 0x1da   : > { %v9467_v63 = vadd.f32 %v8491_v7, %v1287_v8  ;;  %v1174_v55 = vmul.f32 %v9391_v42, %v12571_v4  ;;  %v1169_v46 = vmul.f32 %v9381_v50, %v12572_v30  ;;  %v12573_v25 = vsub.f32 %v9183_v23, %v9154_v6 }
 0x1db   : > { %12567 = vst [vmem:[#allocation148_spill] sm:$0xff] %v9455_v27  ;;  %12569 = vst [vmem:[#allocation149_spill] sm:$0xff] %v9464_v37  ;;  %2753 = vmatprep.mubr.bf16.mxu0 %v9455_v27  ;;  %3075 = vmatprep.mubr.bf16.mxu1 %v9455_v27  ;;  %v1292_v8 = vmul.f32 %v8478_v0, %v1170_v47  ;;  %v12575_v30 = vsub.f32 %v9255_v51, %v9220_v40  ;;  %v1071_v19 = vadd.f32 1e-06, %v946_v12 }
 0x1dc   : > { %12570 = vst [vmem:[#allocation150_spill] sm:$0xff] %v9467_v63  ;;  %v1173_v18 = vmul.f32 %v9391_v42, %v12573_v25  ;;  %v9488_v58 = vpack.c.bf16 %v9467_v63, %v9464_v37  ;;  %v1296_v24 = vmul.f32 %v8478_v0, %v1174_v55  ;;  %v1291_v4 = vmul.f32 %v8484_v2, %v1169_v46  ;;  %v12611_v37 = vld [vmem:[#allocation33_spill] sm:$0xff] }
 0x1dd   : > { %v1178_v5 = vmul.f32 %v9449_v28, %v12575_v30  ;;  %v9497_v47 = vadd.f32 %v8481_v1, %v1292_v8  ;;  %v12577_v25 = vsub.f32 %v9296_v41, %v9265_v45  ;;  %7489 = vrsqrt.f32 %v1071_v19 }
 0x1de   : > { %12574 = vst [vmem:[#allocation151_spill] sm:$0xff] %v9488_v58  ;;  %v1295_v23 = vmul.f32 %v8484_v2, %v1173_v18  ;;  %2754 = vmatmul.mubr.bf16.gmra.mrb[32].mxu0 %v9488_v58  ;;  %3076 = vmatmul.mubr.bf16.gmra.mrb[32].mxu1 %v9488_v58  ;;  %v9507_v55 = vadd.f32 %v8481_v1, %v1296_v24  ;;  %v12710_v58 = vld [vmem:[#allocation120_spill] sm:$0xff] }
 0x1df   : > { %12576 = vst [vmem:[#allocation152_spill] sm:$0xff] %v9497_v47  ;;  %v1182_v34 = vmul.f32 %v9477_v22, %v12577_v25  ;;  %v9510_v51 = vadd.f32 %v8491_v7, %v1291_v4  ;;  %v1300_v46 = vmul.f32 %v8478_v0, %v1178_v5  ;;  %v12581_v8 = vsub.f32 %v9244_v31, %v9220_v40 }
 0x1e0   : > { %12578 = vst [vmem:[#allocation153_spill] sm:$0xff] %v9507_v55  ;;  %v9514_v12 = vadd.f32 %v8491_v7, %v1295_v23  ;;  %v9523_v24 = vpack.c.bf16 %v9507_v55, %v9497_v47  ;;  %v12584_v30 = vsub.f32 %v9292_v15, %v9265_v45  ;;  %v1226_v25 = vmul.f32 %v8494_v9, %v8635_v26  ;;  %v12608_v55 = vld [vmem:[#allocation47_spill] sm:$0xff] }
 0x1e1   : > { %12579 = vst [vmem:[#allocation154_spill] sm:$0xff] %v9510_v51  ;;  %v1304_v41 = vmul.f32 %v8478_v0, %v1182_v34  ;;  %v1177_v18 = vmul.f32 %v9449_v28, %v12581_v8  ;;  %v9526_v4 = vadd.f32 %v8481_v1, %v1300_v46  ;;  %v1222_v34 = vmul.f32 %v8494_v9, %v8591_v62  ;;  %v9544_v46 = vpop.eup %7485 }
 0x1e2   : > { %12580 = vst [vmem:[#allocation155_spill] sm:$0xff] %v9514_v12  ;;  %12582 = vst [vmem:[#allocation156_spill] sm:$0xff] %v9523_v24  ;;  %v1181_v5 = vmul.f32 %v9477_v22, %v12584_v30  ;;  %v9536_v31 = vpack.c.bf16 %v9514_v12, %v9510_v51  ;;  %2763 = vmatprep.mubr.bf16.mxu0 %v9523_v24  ;;  %3085 = vmatprep.mubr.bf16.mxu1 %v9523_v24  ;;  %v12606_v51 = vld [vmem:[#allocation30_spill] sm:$0xff] }
 0x1e3   : > { %12583 = vst [vmem:[#allocation157_spill] sm:$0xff] %v9526_v4  ;;  %v9539_v19 = vadd.f32 %v8481_v1, %v1304_v41  ;;  %v1299_v23 = vmul.f32 %v8484_v2, %v1177_v18  ;;  %v9550_v15 = vadd.f32 %v8497_v10, %v1222_v34  ;;  %v12588_v41 = vsub.f32 %v8519_v29, %v8463_v48  ;;  %v9556_v18 = vpop.eup %7487 }
 0x1e4   : > { %12585 = vst [vmem:[#allocation158_spill] sm:$0xff] %v9536_v31  ;;  %v1303_v62 = vmul.f32 %v8484_v2, %v1181_v5  ;;  %v12591_v5 = vsub.f32 %v9353_v32, %v9316_v21  ;;  %v12592_v12 = vsub.f32 %v9342_v54, %v9316_v21 }
 0x1e5   : > { %12586 = vst [vmem:[#allocation159_spill] sm:$0xff] %v9539_v19  ;;  %12587 = vst [vmem:[#allocation160_spill] sm:$0xff] %v9550_v15  ;;  %v1103_v8 = vmul.f32 %v8584_v52, %v12588_v41  ;;  %v9560_v26 = vpack.c.bf16 %v9539_v19, %v9526_v4  ;;  %v9563_v30 = vadd.f32 %v8491_v7, %v1299_v23  ;;  %v12605_v4 = vld [vmem:[#allocation34_spill] sm:$0xff] }
 0x1e6   : > { %v1186_v34 = vmul.f32 %v9544_v46, %v12591_v5  ;;  %v1185_v48 = vmul.f32 %v9544_v46, %v12592_v12  ;;  %v9574_v29 = vadd.f32 %v8491_v7, %v1303_v62  ;;  %v12594_v52 = vsub.f32 %v9376_v38, %v9331_v56  ;;  %v9592_v38 = vld [vmem:[#allocation2 + $0x310] sm:$0xf]  ;;  %2764 = vmatmul.mubr.bf16.gmra.mrb[36].mxu0 %v9536_v31 }
 0x1e7   : > { %12589 = vst [vmem:[#allocation161_spill] sm:$0xff] %v9560_v26  ;;  %12590 = vst [vmem:[#allocation162_spill] sm:$0xff] %v9563_v30  ;;  %v12595_v23 = vsub.f32 %v9372_v36, %v9331_v56  ;;  %v9585_v5 = vadd.f32 %v8497_v10, %v1226_v25  ;;  %v1221_v62 = vmul.f32 %v8500_v11, %v8596_v3  ;;  %3086 = vmatmul.mubr.bf16.gmra.mrb[36].mxu1 %v9536_v31  ;;  %v9625_v3 = vpop.eup %7489 }
 0x1e8   : > { %12593 = vst [vmem:[#allocation163_spill] sm:$0xff] %v9574_v29  ;;  %v1190_v41 = vmul.f32 %v9556_v18, %v12594_v52  ;;  %v1308_v54 = vmul.f32 %v8478_v0, %v1186_v34  ;;  %v1307_v12 = vmul.f32 %v8484_v2, %v1185_v48  ;;  %v1225_v19 = vmul.f32 %v8500_v11, %v1103_v8  ;;  %v9600_v34 = vld [vmem:[#allocation2 + $0x318] sm:$0xf] }
 0x1e9   : > { %v1189_v32 = vmul.f32 %v9556_v18, %v12595_v23  ;;  %12596 = vst [vmem:[#allocation164_spill] sm:$0xff] %v9585_v5  ;;  %2773 = vmatprep.mubr.bf16.mxu0 %v9560_v26  ;;  %3095 = vmatprep.mubr.bf16.mxu1 %v9560_v26  ;;  %v9608_v8 = vpack.c.bf16 %v9574_v29, %v9563_v30  ;;  %v12604_v30 = vld [vmem:[#allocation44_spill] sm:$0xff]  ;;  %v12684_v26 = vld [vmem:[#allocation103_spill] sm:$0xff] }
 0x1ea   : > { %v1312_v36 = vmul.f32 %v8478_v0, %v1190_v41  ;;  %v9611_v48 = vadd.f32 %v8481_v1, %v1308_v54  ;;  %v9617_v23 = vadd.f32 %v8491_v7, %v1307_v12  ;;  %v9623_v52 = vadd.f32 %v8505_v17, %v1225_v19  ;;  %v12609_v12 = vld [vmem:[#allocation32_spill] sm:$0xff] }
 0x1eb   : > { %v1311_v25 = vmul.f32 %v8484_v2, %v1189_v32  ;;  %12597 = vst [vmem:[#allocation165_spill] sm:$0xff] %v9608_v8  ;;  %v9620_v32 = vadd.f32 %v8505_v17, %v1221_v62  ;;  %v12603_v29 = vsub.f32 %v8541_v44, %v8471_v59  ;;  %v12610_v63 = vsub.f32 %v12609_v12, %v8471_v59  ;;  %v12619_v12 = vld [vmem:[#allocation31_spill] sm:$0xff] }
 0x1ec   : > { %12598 = vst [vmem:[#allocation166_spill] sm:$0xff] %v9611_v48  ;;  %v9614_v41 = vadd.f32 %v8481_v1, %v1312_v36  ;;  %12600 = vst [vmem:[#allocation168_spill] sm:$0xff] %v9617_v23  ;;  %v12607_v36 = vsub.f32 %v12605_v4, %v12606_v51  ;;  %v12612_v19 = vsub.f32 %v12611_v37, %v12606_v51 }
 0x1ed   : > { %12601 = vst [vmem:[#allocation169_spill] sm:$0xff] %v9620_v32  ;;  %12602 = vst [vmem:[#allocation170_spill] sm:$0xff] %v9623_v52  ;;  %v1108_v54 = vmul.f32 %v12604_v30, %v12603_v29  ;;  %v1107_v62 = vmul.f32 %v12604_v30, %v12610_v63  ;;  %v9644_v53 = vadd.f32 %v8491_v7, %v1311_v25 }
 0x1ee   : > { %12599 = vst [vmem:[#allocation167_spill] sm:$0xff] %v9614_v41  ;;  %v1112_v47 = vmul.f32 %v12608_v55, %v12607_v36  ;;  %v1111_v61 = vmul.f32 %v12608_v55, %v12612_v19  ;;  %v12614_v44 = vsub.f32 %v9445_v33, %v9410_v13  ;;  %v12615_v29 = vsub.f32 %v9435_v20, %v9410_v13  ;;  %v12618_v36 = vld [vmem:[#allocation37_spill] sm:$0xff] }
 0x1ef   : > { %12613 = vst [vmem:[#allocation44_spill] sm:$0xff] %v9644_v53  ;;  %v9656_v63 = vpack.c.bf16 %v9585_v5, %v9550_v15  ;;  %v9660_v37 = vpack.c.bf16 %v9614_v41, %v9611_v48  ;;  %v1230_v55 = vmul.f32 %v8494_v9, %v1108_v54  ;;  %v1229_v33 = vmul.f32 %v8500_v11, %v1107_v62  ;;  %v12625_v62 = vld [vmem:[#allocation40_spill] sm:$0xff]  ;;  %v12650_v41 = vld [vmem:[#allocation45_spill] sm:$0xff] }
 0x1f0   : > { %v1194_v4 = vmul.f32 %v9625_v3, %v12614_v44  ;;  %v1193_v59 = vmul.f32 %v9625_v3, %v12615_v29  ;;  %v1234_v51 = vmul.f32 %v8494_v9, %v1112_v47  ;;  %v1233_v25 = vmul.f32 %v8500_v11, %v1111_v61  ;;  %v12621_v44 = vld [vmem:[#allocation56_spill] sm:$0xff]  ;;  %2774 = vmatmul.mubr.bf16.gmra.mrb[40].mxu0 %v9608_v8 }
 0x1f1   : > { %12616 = vst [vmem:[#allocation34_spill] sm:$0xff] %v9656_v63  ;;  %12617 = vst [vmem:[#allocation30_spill] sm:$0xff] %v9660_v37  ;;  %v12620_v19 = vsub.f32 %v12618_v36, %v12619_v12  ;;  %v9673_v5 = vadd.f32 %v8497_v10, %v1230_v55  ;;  %v9679_v47 = vadd.f32 %v8505_v17, %v1229_v33  ;;  %3096 = vmatmul.mubr.bf16.gmra.mrb[40].mxu1 %v9608_v8 }
 0x1f2   : > { %v1316_v30 = vmul.f32 %v8478_v0, %v1194_v4  ;;  %v1315_v20 = vmul.f32 %v8484_v2, %v1193_v59  ;;  %v9676_v54 = vadd.f32 %v8497_v10, %v1234_v51  ;;  %v12626_v0 = vld [vmem:[#allocation35_spill] sm:$0xff]  ;;  %v12628_v2 = vld [vmem:[#allocation61_spill] sm:$0xff]  ;;  %v9689_v61 = vpack.c.bf16 %v9644_v53, %v9617_v23  ;;  %2783 = vmatprep.mubr.bf16.mxu0 %v9660_v37 }
 0x1f3   : > { %v1116_v29 = vmul.f32 %v12621_v44, %v12620_v19  ;;  %12622 = vst [vmem:[#allocation47_spill] sm:$0xff] %v9673_v5  ;;  %12624 = vst [vmem:[#allocation33_spill] sm:$0xff] %v9679_v47  ;;  %v12627_v4 = vsub.f32 %v12625_v62, %v12626_v0  ;;  %v9695_v51 = vadd.f32 %v8505_v17, %v1233_v25  ;;  %3105 = vmatprep.mubr.bf16.mxu1 %v9660_v37  ;;  %v12636_v25 = vld [vmem:[#allocation36_spill] sm:$0xff]  ;;  %v12658_v37 = vld [vmem:[#allocation83_spill] sm:$0xff] }
 0x1f4   : > { %12623 = vst [vmem:[#allocation32_spill] sm:$0xff] %v9676_v54  ;;  %12629 = vst [vmem:[#allocation37_spill] sm:$0xff] %v9689_v61  ;;  %v9692_v55 = vadd.f32 %v8481_v1, %v1316_v30  ;;  %v9700_v33 = vadd.f32 %v8491_v7, %v1315_v20  ;;  %v9710_v1 = vpack.c.bf16 %v9623_v52, %v9620_v32  ;;  %v12642_v32 = vld [vmem:[#allocation46_spill] sm:$0xff] }
 0x1f5   : > { %v1120_v59 = vmul.f32 %v12628_v2, %v12627_v4  ;;  %12631 = vst [vmem:[#allocation56_spill] sm:$0xff] %v9695_v51  ;;  %v1238_v36 = vmul.f32 %v8494_v9, %v1116_v29  ;;  %v9714_v30 = vpack.c.bf16 %v9676_v54, %v9673_v5  ;;  %v12637_v7 = vsub.f32 %v12636_v25, %v12619_v12  ;;  %v12645_v5 = vld [vmem:[#allocation70_spill] sm:$0xff] }
 0x1f6   : > { %12630 = vst [vmem:[#allocation31_spill] sm:$0xff] %v9692_v55  ;;  %12632 = vst [vmem:[#allocation40_spill] sm:$0xff] %v9700_v33  ;;  %v9706_v62 = vpack.c.bf16 %v9692_v55, %v9692_v55  ;;  %v12643_v55 = vld [vmem:[#allocation38_spill] sm:$0xff] }
 0x1f7   : > { %v1242_v19 = vmul.f32 %v8494_v9, %v1120_v59  ;;  %12634 = vst [vmem:[#allocation61_spill] sm:$0xff] %v9710_v1  ;;  %12635 = vst [vmem:[#allocation171_spill] sm:$0xff] %v9714_v30  ;;  %v1115_v20 = vmul.f32 %v12621_v44, %v12637_v7  ;;  %v9721_v29 = vadd.f32 %v8497_v10, %v1238_v36  ;;  %v12640_v59 = vld [vmem:[#allocation39_spill] sm:$0xff]  ;;  %v12646_v25 = vld [vmem:[#allocation54_spill] sm:$0xff] }
 0x1f8   : > { %12633 = vst [vmem:[#allocation35_spill] sm:$0xff] %v9706_v62  ;;  %v12641_v15 = vsub.f32 %v12640_v59, %v12626_v0  ;;  %v12644_v54 = vsub.f32 %v12642_v32, %v12643_v55  ;;  %v12647_v44 = vld [vmem:[#allocation43_spill] sm:$0xff]  ;;  %v12649_v36 = vld [vmem:[#allocation73_spill] sm:$0xff]  ;;  %v12652_v0 = vld [vmem:[#allocation52_spill] sm:$0xff]  ;;  %v9749_v32 = vpack.c.bf16 %v9700_v33, %v9700_v33  ;;  %2784 = vmatmul.mubr.bf16.gmra.mrb[44].mxu0 %v9689_v61 }
 0x1f9   : > { %12638 = vst [vmem:[#allocation36_spill] sm:$0xff] %v9721_v29  ;;  %v9724_v4 = vadd.f32 %v8497_v10, %v1242_v19  ;;  %v1237_v12 = vmul.f32 %v8500_v11, %v1115_v20  ;;  %v12648_v7 = vsub.f32 %v12646_v25, %v12647_v44  ;;  %v12651_v19 = vsub.f32 %v12650_v41, %v12643_v55  ;;  %v12655_v59 = vld [vmem:[#allocation60_spill] sm:$0xff]  ;;  %v12656_v25 = vld [vmem:[#allocation51_spill] sm:$0xff] }
 0x1fa   : > { %v1119_v52 = vmul.f32 %v12628_v2, %v12641_v15  ;;  %v1124_v53 = vmul.f32 %v12645_v5, %v12644_v54  ;;  %v12653_v15 = vsub.f32 %v12652_v0, %v12647_v44  ;;  %12654 = vst [vmem:[#allocation39_spill] sm:$0xff] %v9749_v32  ;;  %v12663_v0 = vld [vmem:[#allocation55_spill] sm:$0xff]  ;;  %3106 = vmatmul.mubr.bf16.gmra.mrb[44].mxu1 %v9689_v61  ;;  %v12677_v33 = vld [vmem:[#allocation72_spill] sm:$0xff] }
 0x1fb   : > { %12639 = vst [vmem:[#allocation172_spill] sm:$0xff] %v9724_v4  ;;  %v1128_v23 = vmul.f32 %v12649_v36, %v12648_v7  ;;  %v1123_v48 = vmul.f32 %v12645_v5, %v12651_v19  ;;  %v12657_v7 = vsub.f32 %v12655_v59, %v12656_v25  ;;  %v9758_v5 = vadd.f32 %v8505_v17, %v1237_v12  ;;  %v12665_v59 = vld [vmem:[#allocation87_spill] sm:$0xff] }
 0x1fc   : > { %v1127_v2 = vmul.f32 %v12649_v36, %v12653_v15  ;;  %v1241_v54 = vmul.f32 %v8500_v11, %v1119_v52  ;;  %v1246_v20 = vmul.f32 %v8494_v9, %v1124_v53  ;;  %v12662_v53 = vld [vmem:[#allocation67_spill] sm:$0xff]  ;;  %2793 = vmatprep.mubr.bf16.mxu0 %v9706_v62  ;;  %3115 = vmatprep.mubr.bf16.mxu1 %v9706_v62  ;;  %v12680_v62 = vld [vmem:[#allocation94_spill] sm:$0xff] }
 0x1fd   : > { %v1132_v41 = vmul.f32 %v12658_v37, %v12657_v7  ;;  %12659 = vst [vmem:[#allocation46_spill] sm:$0xff] %v9758_v5  ;;  %v1250_v55 = vmul.f32 %v8494_v9, %v1128_v23  ;;  %v1245_v44 = vmul.f32 %v8500_v11, %v1123_v48  ;;  %v12664_v15 = vsub.f32 %v12662_v53, %v12663_v0 }
 0x1fe   : > { %v1249_v36 = vmul.f32 %v8500_v11, %v1127_v2  ;;  %v9764_v19 = vadd.f32 %v8505_v17, %v1241_v54  ;;  %v9767_v52 = vadd.f32 %v8497_v10, %v1246_v20  ;;  %v9789_v54 = vpack.c.bf16 %v9695_v51, %v9679_v47  ;;  %v12674_v51 = vld [vmem:[#allocation64_spill] sm:$0xff] }
 0x1ff   : > { %v1136_v7 = vmul.f32 %v12665_v59, %v12664_v15  ;;  %v1254_v12 = vmul.f32 %v8494_v9, %v1132_v41  ;;  %v9777_v48 = vadd.f32 %v8497_v10, %v1250_v55  ;;  %v9780_v23 = vadd.f32 %v8505_v17, %v1245_v44 }
 0x200   : > { %12660 = vst [vmem:[#allocation38_spill] sm:$0xff] %v9764_v19  ;;  %12661 = vst [vmem:[#allocation70_spill] sm:$0xff] %v9767_v52  ;;  %v9783_v2 = vadd.f32 %v8505_v17, %v1249_v36  ;;  %v9797_v55 = vpack.c.bf16 %v9724_v4, %v9721_v29  ;;  %v9801_v44 = vpack.c.bf16 %v9764_v19, %v9758_v5  ;;  %v12672_v36 = vld [vmem:[#allocation59_spill] sm:$0xff]  ;;  %v12682_v5 = vld [vmem:[#allocation69_spill] sm:$0xff]  ;;  %2794 = vmatmul.mubr.bf16.gmra.mrb[48].mxu0 %v9749_v32 }
 0x201   : > { %12666 = vst [vmem:[#allocation54_spill] sm:$0xff] %v9777_v48  ;;  %12667 = vst [vmem:[#allocation43_spill] sm:$0xff] %v9780_v23  ;;  %v1258_v20 = vmul.f32 %v8494_v9, %v1136_v7  ;;  %v9793_v41 = vadd.f32 %v8497_v10, %v1254_v12  ;;  %v12673_v53 = vsub.f32 %v12672_v36, %v12656_v25  ;;  %v12678_v4 = vld [vmem:[#allocation63_spill] sm:$0xff]  ;;  %2834 = vmatprep.mubr.bf16.mxu0 %v9656_v63 }
 0x202   : > { %12668 = vst [vmem:[#allocation73_spill] sm:$0xff] %v9783_v2  ;;  %12669 = vst [vmem:[#allocation45_spill] sm:$0xff] %v9789_v54  ;;  %v12675_v47 = vsub.f32 %v12674_v51, %v12663_v0  ;;  %v12679_v29 = vsub.f32 %v12677_v33, %v12678_v4  ;;  %v12681_v19 = vld [vmem:[#allocation79_spill] sm:$0xff]  ;;  %3116 = vmatmul.mubr.bf16.gmra.mrb[48].mxu1 %v9749_v32 }
 0x203   : > { %12670 = vst [vmem:[#allocation52_spill] sm:$0xff] %v9793_v41  ;;  %12671 = vst [vmem:[#allocation60_spill] sm:$0xff] %v9797_v55  ;;  %v1131_v15 = vmul.f32 %v12658_v37, %v12673_v53  ;;  %v9812_v12 = vadd.f32 %v8497_v10, %v1258_v20  ;;  %v12683_v8 = vsub.f32 %v12681_v19, %v12682_v5  ;;  %v12685_v36 = vld [vmem:[#allocation71_spill] sm:$0xff]  ;;  %v12690_v53 = vld [vmem:[#allocation76_spill] sm:$0xff]  ;;  %3156 = vmatprep.mubr.bf16.mxu1 %v9656_v63 }
 0x204   : > { %v1135_v7 = vmul.f32 %v12665_v59, %v12675_v47  ;;  %v1140_v61 = vmul.f32 %v12680_v62, %v12679_v29  ;;  %v12686_v37 = vsub.f32 %v12685_v36, %v12678_v4  ;;  %v12687_v59 = vld [vmem:[#allocation77_spill] sm:$0xff]  ;;  %v12692_v19 = vld [vmem:[#allocation107_spill] sm:$0xff]  ;;  %v12693_v36 = vld [vmem:[#allocation92_spill] sm:$0xff] }
 0x205   : > { %12676 = vst [vmem:[#allocation51_spill] sm:$0xff] %v9812_v12  ;;  %v1144_v25 = vmul.f32 %v12684_v26, %v12683_v8  ;;  %v1253_v47 = vmul.f32 %v8500_v11, %v1131_v15  ;;  %v12688_v20 = vsub.f32 %v12687_v59, %v12682_v5  ;;  %v12689_v29 = vld [vmem:[#allocation85_spill] sm:$0xff]  ;;  %v9838_v8 = vpack.c.bf16 %v9777_v48, %v9767_v52  ;;  %v12696_v59 = vld [vmem:[#allocation112_spill] sm:$0xff]  ;;  %v12707_v63 = vld [vmem:[#allocation99_spill] sm:$0xff] }
 0x206   : > { %v1139_v51 = vmul.f32 %v12680_v62, %v12686_v37  ;;  %v1257_v0 = vmul.f32 %v8500_v11, %v1135_v7  ;;  %v12691_v31 = vsub.f32 %v12689_v29, %v12690_v53  ;;  %v1262_v62 = vmul.f32 %v8494_v9, %v1140_v61 }
 0x207   : > { %v1143_v33 = vmul.f32 %v12684_v26, %v12688_v20  ;;  %v1266_v4 = vmul.f32 %v8494_v9, %v1144_v25  ;;  %v9844_v7 = vadd.f32 %v8505_v17, %v1253_v47 }
 0x208   : > { %v1148_v24 = vmul.f32 %v12692_v19, %v12691_v31  ;;  %v1261_v15 = vmul.f32 %v8500_v11, %v1139_v51  ;;  %v9847_v26 = vadd.f32 %v8505_v17, %v1257_v0  ;;  %v12694_v31 = vld [vmem:[#allocation82_spill] sm:$0xff]  ;;  %v9855_v29 = vadd.f32 %v8497_v10, %v1262_v62  ;;  %2835 = vmatmul.mubr.bf16.vlgmr.msra.gmra.mrb[0].mxu0 %v9710_v1 }
 0x209   : > { %v1265_v5 = vmul.f32 %v8500_v11, %v1143_v33  ;;  %v12695_v37 = vsub.f32 %v12693_v36, %v12694_v31  ;;  %v9858_v61 = vadd.f32 %v8497_v10, %v1266_v4  ;;  %v12702_v4 = vld [vmem:[#allocation84_spill] sm:$0xff]  ;;  %2844 = vmatprep.mubr.bf16.mxu0 %v9714_v30 }
 0x20a   : > { %v9861_v25 = vadd.f32 %v8505_v17, %v1261_v15  ;;  %v1270_v51 = vmul.f32 %v8494_v9, %v1148_v24  ;;  %v9868_v47 = vpack.c.bf16 %v9847_v26, %v9844_v7  ;;  %v12703_v15 = vsub.f32 %v12702_v4, %v12690_v53  ;;  %v12712_v4 = vld [vmem:[#allocation97_spill] sm:$0xff]  ;;  %3157 = vmatmul.mubr.bf16.vlgmr.msra.gmra.mrb[0].mxu1 %v9710_v1 }
 0x20b   : > { %v1152_v20 = vmul.f32 %v12696_v59, %v12695_v37  ;;  %12697 = vst [vmem:[#allocation83_spill] sm:$0xff] %v9858_v61  ;;  %v9871_v0 = vadd.f32 %v8505_v17, %v1265_v5  ;;  %v9878_v24 = vpack.c.bf16 %v9858_v61, %v9855_v29  ;;  %3166 = vmatprep.mubr.bf16.mxu1 %v9714_v30 }
 0x20c   : > { %12698 = vst [vmem:[#allocation67_spill] sm:$0xff] %v9861_v25  ;;  %12699 = vst [vmem:[#allocation55_spill] sm:$0xff] %v9868_v47  ;;  %v9881_v62 = vadd.f32 %v8497_v10, %v1270_v51  ;;  %v1147_v5 = vmul.f32 %v12692_v19, %v12703_v15  ;;  %v12708_v51 = vld [vmem:[#allocation89_spill] sm:$0xff] }
 0x20d   : > { %12700 = vst [vmem:[#allocation87_spill] sm:$0xff] %v9871_v0  ;;  %v1274_v33 = vmul.f32 %v8494_v9, %v1152_v20  ;;  %12701 = vst [vmem:[#allocation59_spill] sm:$0xff] %v9878_v24  ;;  %v9889_v36 = vpack.c.bf16 %v9871_v0, %v9861_v25  ;;  %v12705_v20 = vld [vmem:[#allocation91_spill] sm:$0xff]  ;;  %v12709_v32 = vsub.f32 %v12707_v63, %v12708_v51  ;;  %v12711_v19 = vld [vmem:[#allocation105_spill] sm:$0xff] }
 0x20e   : > { %v12706_v48 = vsub.f32 %v12705_v20, %v12694_v31  ;;  %v1269_v53 = vmul.f32 %v8500_v11, %v1147_v5  ;;  %v12713_v15 = vsub.f32 %v12711_v19, %v12712_v4  ;;  %v12715_v25 = vld [vmem:[#allocation95_spill] sm:$0xff]  ;;  %v12717_v31 = vld [vmem:[#allocation104_spill] sm:$0xff]  ;;  %v12719_v20 = vld [vmem:[#allocation109_spill] sm:$0xff] }
 0x20f   : > { %12704 = vst [vmem:[#allocation64_spill] sm:$0xff] %v9889_v36  ;;  %v9892_v37 = vadd.f32 %v8497_v10, %v1274_v33  ;;  %v1156_v27 = vmul.f32 %v12710_v58, %v12709_v32  ;;  %v12716_v33 = vsub.f32 %v12715_v25, %v12708_v51  ;;  %v12720_v25 = vsub.f32 %v12719_v20, %v9035_v16  ;;  %v7249_v51 = vld [vmem:[%s8369_s19] ss:$16 sps:$4 sm:$0xff]   ;;  %v7252_v19 = vld [vmem:[%s8369_s19 + $0x8] ss:$16 sps:$4 sm:$0xff]  }
 0x210   : > { %v1151_v52 = vmul.f32 %v12696_v59, %v12706_v48  ;;  %v1160_v0 = vmul.f32 %v12714_v43, %v12713_v15  ;;  %v12718_v48 = vsub.f32 %v12717_v31, %v12712_v4  ;;  %v9928_v4 = vadd.f32 %v8505_v17, %v1269_v53  ;;  %v12722_v31 = vld [vmem:[#allocation115_spill] sm:$0xff]  ;;  %3926 = vmatpush1.bf16.msra.mxu0 %v7249_v51 }
 0x211   : > { %v1155_v61 = vmul.f32 %v12710_v58, %v12716_v33  ;;  %v9917_v32 = vpack.c.bf16 %v9892_v37, %v9881_v62  ;;  %v1278_v5 = vmul.f32 %v8494_v9, %v1156_v27  ;;  %v1164_v58 = vmul.f32 %v9268_v14, %v12720_v25  ;;  %v7260_v25 = vld [vmem:[%s8369_s19 + $0x2c] ss:$16 sps:$4 sm:$0xff]   ;;  %4248 = vmatpush1.bf16.msra.mxu1 %v7252_v19  ;;  %v9990_v51 = vld [vmem:[%s8369_s19 + $0x44] ss:$16 sps:$4 sm:$0xff]  }
 0x212   : > { %v1159_v63 = vmul.f32 %v12714_v43, %v12718_v48  ;;  %v1273_v59 = vmul.f32 %v8500_v11, %v1151_v52  ;;  %v1282_v43 = vmul.f32 %v8494_v9, %v1160_v0  ;;  %v12723_v48 = vsub.f32 %v12722_v31, %v9083_v35  ;;  %v7257_v0 = vld [vmem:[%s8369_s19 + $0x24] ss:$16 sps:$4 sm:$0xff]   ;;  %12733 = vst [vmem:[#allocation71_spill] sm:$0xff] %v9990_v51  ;;  %v9993_v19 = vld [vmem:[%s8369_s19 + $0x4c] ss:$16 sps:$4 sm:$0xff]  }
 0x213   : > { %v1277_v15 = vmul.f32 %v8500_v11, %v1155_v61  ;;  %v9937_v27 = vadd.f32 %v8497_v10, %v1278_v5  ;;  %v1286_v53 = vmul.f32 %v8494_v9, %v1164_v58  ;;  %v12727_v5 = vld [vmem:[#allocation108_spill] sm:$0xff]  ;;  %12734 = vst [vmem:[#allocation77_spill] sm:$0xff] %v9993_v19  ;;  %3927 = vmatprep.subr.bf16.mxu0 %v7257_v0 }
 0x214   : > { %v1281_v33 = vmul.f32 %v8500_v11, %v1159_v63  ;;  %v9934_v52 = vadd.f32 %v8505_v17, %v1273_v59  ;;  %v1168_v20 = vmul.f32 %v9288_v57, %v12723_v48  ;;  %v9947_v61 = vadd.f32 %v8497_v10, %v1282_v43  ;;  %4249 = vmatprep.subr.bf16.mxu1 %v7260_v25 }
 0x215   : > { %12721 = vst [vmem:[#allocation72_spill] sm:$0xff] %v9937_v27  ;;  %v9950_v63 = vadd.f32 %v8505_v17, %v1277_v15  ;;  %v12728_v31 = vsub.f32 %v12727_v5, %v9035_v16  ;;  %v9967_v15 = vadd.f32 %v8497_v10, %v1286_v53  ;;  %v9970_v16 = vld [vmem:[%s8369_s19 + $0x20] ss:$16 sps:$4 sm:$0xff]   ;;  %2845 = vmatmul.mubr.bf16.gmra.mrb[4].mxu0 %v9789_v54 }
 0x216   : > { %12724 = vst [vmem:[#allocation63_spill] sm:$0xff] %v9947_v61  ;;  %v9953_v59 = vadd.f32 %v8505_v17, %v1281_v33  ;;  %v9963_v58 = vpack.c.bf16 %v9934_v52, %v9928_v4  ;;  %v1290_v43 = vmul.f32 %v8494_v9, %v1168_v20  ;;  %12729 = vst [vmem:[#allocation69_spill] sm:$0xff] %v9970_v16  ;;  %v9973_v33 = vld [vmem:[%s8369_s19 + $0x28] ss:$16 sps:$4 sm:$0xff]   ;;  %3928 = vmatpush1.bf16.msra.mxu0 %v9970_v16 }
 0x217   : > { %12725 = vst [vmem:[#allocation94_spill] sm:$0xff] %v9950_v63  ;;  %v1163_v48 = vmul.f32 %v9268_v14, %v12728_v31  ;;  %12730 = vst [vmem:[#allocation103_spill] sm:$0xff] %v9973_v33  ;;  %v9977_v14 = vpack.c.bf16 %v9947_v61, %v9937_v27  ;;  %v12731_v31 = vld [vmem:[#allocation114_spill] sm:$0xff]  ;;  %4250 = vmatpush1.bf16.msra.mxu1 %v9973_v33  ;;  %3929 = vmatprep.subr.bf16.mxu0 %v9990_v51 }
 0x218   : > { %12726 = vst [vmem:[#allocation79_spill] sm:$0xff] %v9953_v59  ;;  %v9981_v5 = vpack.c.bf16 %v9953_v59, %v9950_v63  ;;  %v12732_v20 = vsub.f32 %v12731_v31, %v9083_v35  ;;  %v9996_v1 = vadd.f32 %v8497_v10, %v1290_v43  ;;  %v12735_v59 = vld [vmem:[#allocation121_spill] sm:$0xff]  ;;  %v12737_v31 = vld [vmem:[#allocation127_spill] sm:$0xff]  ;;  %4251 = vmatprep.subr.bf16.mxu1 %v9993_v19 }
 0x219   : > { %v1285_v61 = vmul.f32 %v8500_v11, %v1163_v48  ;;  %v12736_v63 = vsub.f32 %v12735_v59, %v9130_v60  ;;  %v12739_v43 = vld [vmem:[#allocation119_spill] sm:$0xff]  ;;  %3167 = vmatmul.mubr.bf16.gmra.mrb[4].mxu1 %v9789_v54  ;;  %2854 = vmatprep.mubr.bf16.mxu0 %v9797_v55 }
 0x21a   : > { %v1167_v53 = vmul.f32 %v9288_v57, %v12732_v20  ;;  %v12738_v20 = vsub.f32 %v12737_v31, %v9154_v6  ;;  %v12740_v27 = vsub.f32 %v12739_v43, %v9130_v60  ;;  %v10014_v59 = vpack.c.bf16 %v9996_v1, %v9967_v15  ;;  %v10048_v43 = vld [vmem:[%s8369_s19 + $0x64] ss:$16 sps:$4 sm:$0xff]   ;;  %3176 = vmatprep.mubr.bf16.mxu1 %v9797_v55  ;;  %v12758_v55 = vld [vmem:[#allocation140_spill] sm:$0xff] }
 0x21b   : > { %v1172_v35 = vmul.f32 %v9381_v50, %v12736_v63  ;;  %v10017_v0 = vadd.f32 %v8505_v17, %v1285_v61  ;;  %v12741_v63 = vld [vmem:[#allocation126_spill] sm:$0xff]  ;;  %v10032_v61 = vld [vmem:[%s8369_s19 + $0x40] ss:$16 sps:$4 sm:$0xff]   ;;  %12747 = vst [vmem:[#allocation107_spill] sm:$0xff] %v10048_v43  ;;  %v12759_v16 = vsub.f32 %v12758_v55, %v9316_v21 }
 0x21c   : > { %v1289_v57 = vmul.f32 %v8500_v11, %v1167_v53  ;;  %v1176_v30 = vmul.f32 %v9391_v42, %v12738_v20  ;;  %v1171_v48 = vmul.f32 %v9381_v50, %v12740_v27  ;;  %v12742_v53 = vsub.f32 %v12741_v63, %v9154_v6  ;;  %12743 = vst [vmem:[#allocation85_spill] sm:$0xff] %v10032_v61  ;;  %v12745_v20 = vld [vmem:[#allocation132_spill] sm:$0xff] }
 0x21d   : > { %v1294_v25 = vmul.f32 %v8494_v9, %v1172_v35  ;;  %v10036_v35 = vld [vmem:[%s8369_s19 + $0x48] ss:$16 sps:$4 sm:$0xff]   ;;  %3930 = vmatpush1.bf16.msra.mxu0 %v10032_v61 }
 0x21e   : > { %v1175_v31 = vmul.f32 %v9391_v42, %v12742_v53  ;;  %v10027_v60 = vadd.f32 %v8505_v17, %v1289_v57  ;;  %v1298_v50 = vmul.f32 %v8494_v9, %v1176_v30  ;;  %v1293_v27 = vmul.f32 %v8500_v11, %v1171_v48  ;;  %12744 = vst [vmem:[#allocation76_spill] sm:$0xff] %v10036_v35  ;;  %v10051_v48 = vld [vmem:[%s8369_s19 + $0x6c] ss:$16 sps:$4 sm:$0xff]  }
 0x21f   : > { %v10040_v6 = vadd.f32 %v8497_v10, %v1294_v25  ;;  %v12746_v57 = vsub.f32 %v12745_v20, %v9220_v40  ;;  %12748 = vst [vmem:[#allocation92_spill] sm:$0xff] %v10051_v48  ;;  %4252 = vmatpush1.bf16.msra.mxu1 %v10036_v35  ;;  %3931 = vmatprep.subr.bf16.mxu0 %v10048_v43  ;;  %v12755_v35 = vld [vmem:[#allocation141_spill] sm:$0xff] }
 0x220   : > { %v1297_v42 = vmul.f32 %v8500_v11, %v1175_v31  ;;  %v10055_v63 = vpack.c.bf16 %v10027_v60, %v10017_v0  ;;  %v10058_v53 = vadd.f32 %v8497_v10, %v1298_v50  ;;  %v10061_v25 = vadd.f32 %v8505_v17, %v1293_v27  ;;  %v12749_v31 = vld [vmem:[#allocation137_spill] sm:$0xff]  ;;  %v12751_v50 = vld [vmem:[#allocation130_spill] sm:$0xff]  ;;  %4253 = vmatprep.subr.bf16.mxu1 %v10051_v48 }
 0x221   : > { %v1180_v30 = vmul.f32 %v9449_v28, %v12746_v57  ;;  %v12750_v20 = vsub.f32 %v12749_v31, %v9265_v45  ;;  %v12752_v33 = vsub.f32 %v12751_v50, %v9220_v40  ;;  %v10091_v40 = vld [vmem:[%s8369_s19 + $0x60] ss:$16 sps:$4 sm:$0xff]   ;;  %v12757_v48 = vsub.f32 %v9431_v39, %v9331_v56  ;;  %2855 = vmatmul.mubr.bf16.gmra.mrb[8].mxu0 %v9801_v44 }
 0x222   : > { %v10070_v19 = vadd.f32 %v8505_v17, %v1297_v42  ;;  %v10081_v31 = vpack.c.bf16 %v10058_v53, %v10040_v6  ;;  %3932 = vmatpush1.bf16.msra.mxu0 %v10091_v40  ;;  %3177 = vmatmul.mubr.bf16.gmra.mrb[8].mxu1 %v9801_v44 }
 0x223   : > { %v1184_v57 = vmul.f32 %v9477_v22, %v12750_v20  ;;  %v1302_v51 = vmul.f32 %v8494_v9, %v1180_v30  ;;  %v1179_v27 = vmul.f32 %v9449_v28, %v12752_v33  ;;  %v12753_v20 = vld [vmem:[#allocation136_spill] sm:$0xff]  ;;  %v1192_v61 = vmul.f32 %v9556_v18, %v12757_v48  ;;  %2864 = vmatprep.mubr.bf16.mxu0 %v9838_v8 }
 0x224   : > { %v12754_v30 = vsub.f32 %v12753_v20, %v9265_v45  ;;  %v10094_v28 = vld [vmem:[%s8369_s19 + $0x68] ss:$16 sps:$4 sm:$0xff]   ;;  %v10098_v33 = vpack.c.bf16 %v10070_v19, %v10061_v25  ;;  %v10107_v45 = vld [vmem:[%s8369_s19 + $0x84] ss:$16 sps:$4 sm:$0xff]   ;;  %3186 = vmatprep.mubr.bf16.mxu1 %v9838_v8 }
 0x225   : > { %v1306_v42 = vmul.f32 %v8494_v9, %v1184_v57  ;;  %v10101_v50 = vadd.f32 %v8497_v10, %v1302_v51  ;;  %v1301_v57 = vmul.f32 %v8500_v11, %v1179_v27  ;;  %v12756_v51 = vsub.f32 %v12755_v35, %v9316_v21  ;;  %4254 = vmatpush1.bf16.msra.mxu1 %v10094_v28 }
 0x226   : > { %v1183_v54 = vmul.f32 %v9477_v22, %v12754_v30  ;;  %v10110_v22 = vld [vmem:[%s8369_s19 + $0x8c] ss:$16 sps:$4 sm:$0xff]   ;;  %v12761_v21 = vsub.f32 %v9600_v34, %v9410_v13  ;;  %3933 = vmatprep.subr.bf16.mxu0 %v10107_v45  ;;  %v10161_v34 = vld [vmem:[%s8369_s19 + $0xa4] ss:$16 sps:$4 sm:$0xff]  }
 0x227   : > { %v10113_v20 = vadd.f32 %v8497_v10, %v1306_v42  ;;  %v1188_v27 = vmul.f32 %v9544_v46, %v12756_v51  ;;  %v10121_v43 = vadd.f32 %v8505_v17, %v1301_v57  ;;  %v1187_v42 = vmul.f32 %v9544_v46, %v12759_v16  ;;  %4255 = vmatprep.subr.bf16.mxu1 %v10110_v22 }
 0x228   : > { %v1305_v30 = vmul.f32 %v8500_v11, %v1183_v54  ;;  %v12760_v54 = vsub.f32 %v9427_v49, %v9331_v56  ;;  %v1196_v46 = vmul.f32 %v9625_v3, %v12761_v21  ;;  %v10150_v56 = vld [vmem:[%s8369_s19 + $0x80] ss:$16 sps:$4 sm:$0xff]   ;;  %v10153_v49 = vld [vmem:[%s8369_s19 + $0x88] ss:$16 sps:$4 sm:$0xff]   ;;  %12762 = vst [vmem:[#allocation82_spill] sm:$0xff] %v10161_v34 }
 0x229   : > { %v10137_v57 = vpack.c.bf16 %v10113_v20, %v10101_v50  ;;  %v1310_v48 = vmul.f32 %v8494_v9, %v1188_v27  ;;  %v1309_v55 = vmul.f32 %v8500_v11, %v1187_v42  ;;  %3934 = vmatpush1.bf16.msra.mxu0 %v10150_v56  ;;  %4256 = vmatpush1.bf16.msra.mxu1 %v10153_v49 }
 0x22a   : > { %v1191_v35 = vmul.f32 %v9556_v18, %v12760_v54  ;;  %v10140_v39 = vadd.f32 %v8505_v17, %v1305_v30  ;;  %v1314_v18 = vmul.f32 %v8494_v9, %v1192_v61  ;;  %v10164_v30 = vld [vmem:[%s8369_s19 + $0xac] ss:$16 sps:$4 sm:$0xff]   ;;  %v1318_v27 = vmul.f32 %v8494_v9, %v1196_v46  ;;  %v10197_v46 = vld [vmem:[%s8369_s19 + $0xa0] ss:$16 sps:$4 sm:$0xff]   ;;  %3935 = vmatprep.subr.bf16.mxu0 %v10161_v34 }
 0x22b   : > { %12763 = vst [vmem:[#allocation112_spill] sm:$0xff] %v10164_v30  ;;  %v10171_v61 = vadd.f32 %v8497_v10, %v1310_v48  ;;  %v10180_v54 = vadd.f32 %v8505_v17, %v1309_v55  ;;  %v12765_v48 = vsub.f32 %v9592_v38, %v9410_v13  ;;  %12766 = vst [vmem:[#allocation91_spill] sm:$0xff] %v10197_v46  ;;  %4257 = vmatprep.subr.bf16.mxu1 %v10164_v30  ;;  %v10213_v13 = vld [vmem:[%s8369_s19 + $0xc4] ss:$16 sps:$4 sm:$0xff]   ;;  %v10216_v38 = vld [vmem:[%s8369_s19 + $0xcc] ss:$16 sps:$4 sm:$0xff]  }
 0x22c   : > { %v1313_v16 = vmul.f32 %v8500_v11, %v1191_v35  ;;  %v10168_v51 = vpack.c.bf16 %v10140_v39, %v10121_v43  ;;  %v10177_v42 = vadd.f32 %v8497_v10, %v1314_v18  ;;  %v10188_v9 = vadd.f32 %v8497_v10, %v1318_v27  ;;  %v10200_v18 = vld [vmem:[%s8369_s19 + $0xa8] ss:$16 sps:$4 sm:$0xff]   ;;  %12768 = vst [vmem:[#allocation89_spill] sm:$0xff] %v10213_v13  ;;  %v12811_v34 = vld [vmem:[#allocation87_spill] sm:$0xff] }
 0x22d   : > { %v1195_v21 = vmul.f32 %v9625_v3, %v12765_v48  ;;  %12767 = vst [vmem:[#allocation99_spill] sm:$0xff] %v10200_v18  ;;  %12769 = vst [vmem:[#allocation120_spill] sm:$0xff] %v10216_v38  ;;  %v10224_v27 = vpack.c.bf16 %v9783_v2, %v9780_v23  ;;  %3936 = vmatpush1.bf16.msra.mxu0 %v10197_v46  ;;  %4258 = vmatpush1.bf16.msra.mxu1 %v10200_v18  ;;  %v10229_v48 = vld [vmem:[%s8369_s19 + $0xc0] ss:$16 sps:$4 sm:$0xff]   ;;  %v10232_v30 = vld [vmem:[%s8369_s19 + $0xc8] ss:$16 sps:$4 sm:$0xff]  }
 0x22e   : > { %v10183_v35 = vadd.f32 %v8505_v17, %v1313_v16  ;;  %12764 = vst [vmem:[#allocation84_spill] sm:$0xff] %v10188_v9  ;;  %v10204_v55 = vpack.c.bf16 %v10177_v42, %v10171_v61  ;;  %12772 = vst [vmem:[#allocation124_spill] sm:$0xff] %v10229_v48  ;;  %3937 = vmatprep.subr.bf16.mxu0 %v10213_v13  ;;  %4259 = vmatprep.subr.bf16.mxu1 %v10216_v38  ;;  %v10264_v2 = vld [vmem:[%s8369_s19 + $0x10c] ss:$16 sps:$4 sm:$0xff]   ;;  %v10269_v23 = vld [vmem:[%s8369_s19 + $0x100] ss:$16 sps:$4 sm:$0xff]   ;;  %v1544_v38 = vunpack.c.l.bf16 %v9917_v32 }
 0x22f   : > { %v1317_v3 = vmul.f32 %v8500_v11, %v1195_v21  ;;  %12771 = vst [vmem:[#allocation97_spill] sm:$0xff] %v10224_v27  ;;  %12773 = vst [vmem:[#allocation95_spill] sm:$0xff] %v10232_v30  ;;  %v10236_v11 = vpack.c.bf16 %v9812_v12, %v9793_v41  ;;  %v10244_v21 = vld [vmem:[%s8369_s19 + $0xec] ss:$16 sps:$4 sm:$0xff]   ;;  %2865 = vmatmul.mubr.bf16.gmra.mrb[12].mxu0 %v10224_v27  ;;  %3187 = vmatmul.mubr.bf16.gmra.mrb[12].mxu1 %v10224_v27  ;;  %v10256_v12 = vld [vmem:[%s8369_s19 + $0xe8] ss:$16 sps:$4 sm:$0xff]   ;;  %v1548_v13 = vunpack.c.h.bf16 %v9917_v32 }
 0x230   : > { %v10208_v10 = vpack.c.bf16 %v10183_v35, %v10180_v54  ;;  %12776 = vst [vmem:[#allocation115_spill] sm:$0xff] %v10244_v21  ;;  %12778 = vst [vmem:[#allocation114_spill] sm:$0xff] %v10256_v12  ;;  %v10261_v41 = vld [vmem:[%s8369_s19 + $0x104] ss:$16 sps:$4 sm:$0xff]  }
 0x231   : > { %v10220_v16 = vadd.f32 %v8505_v17, %v1317_v3  ;;  %12774 = vst [vmem:[#allocation104_spill] sm:$0xff] %v10236_v11  ;;  %v10241_v17 = vld [vmem:[%s8369_s19 + $0xe4] ss:$16 sps:$4 sm:$0xff]   ;;  %2874 = vmatprep.mubr.bf16.mxu0 %v10236_v11  ;;  %3196 = vmatprep.mubr.bf16.mxu1 %v10236_v11  ;;  %v10253_v3 = vld [vmem:[%s8369_s19 + $0xe0] ss:$16 sps:$4 sm:$0xff]   ;;  %12779 = vst [vmem:[#allocation121_spill] sm:$0xff] %v10261_v41  ;;  %v1531_v11 = vunpack.c.h.bf16 %v9868_v47 }
 0x232   : > { %12775 = vst [vmem:[#allocation109_spill] sm:$0xff] %v10241_v17  ;;  %3938 = vmatpush1.bf16.msra.mxu0 %v10229_v48  ;;  %4260 = vmatpush1.bf16.msra.mxu1 %v10232_v30  ;;  %12777 = vst [vmem:[#allocation108_spill] sm:$0xff] %v10253_v3  ;;  %v10272_v30 = vld [vmem:[%s8369_s19 + $0x108] ss:$16 sps:$4 sm:$0xff]   ;;  %v1527_v48 = vunpack.c.l.bf16 %v9868_v47  ;;  %v12810_v18 = vld [vmem:[#allocation67_spill] sm:$0xff] }
 0x233   : > { %12770 = vst [vmem:[#allocation105_spill] sm:$0xff] %v10220_v16  ;;  %3939 = vmatprep.subr.bf16.mxu0 %v10241_v17  ;;  %4261 = vmatprep.subr.bf16.mxu1 %v10244_v21  ;;  %12780 = vst [vmem:[#allocation127_spill] sm:$0xff] %v10264_v2  ;;  %v10277_v21 = vld [vmem:[%s8369_s19 + $0x124] ss:$16 sps:$4 sm:$0xff]   ;;  %v10280_v17 = vld [vmem:[%s8369_s19 + $0x12c] ss:$16 sps:$4 sm:$0xff]  }
 0x234   : > { %12781 = vst [vmem:[#allocation119_spill] sm:$0xff] %v10269_v23  ;;  %12782 = vst [vmem:[#allocation126_spill] sm:$0xff] %v10272_v30  ;;  %v1627_v27 = vsub.f32 %v9844_v7, %v1527_v48  ;;  %v12808_v48 = vld [vmem:[#allocation83_spill] sm:$0xff] }
 0x235   : > { %12783 = vst [vmem:[#allocation132_spill] sm:$0xff] %v10277_v21  ;;  %12784 = vst [vmem:[#allocation137_spill] sm:$0xff] %v10280_v17 }
 0x236   : > { %3940 = vmatpush1.bf16.msra.mxu0 %v10253_v3  ;;  %4262 = vmatpush1.bf16.msra.mxu1 %v10256_v12  ;;  %v10297_v12 = vld [vmem:[%s8369_s19 + $0x144] ss:$16 sps:$4 sm:$0xff]   ;;  %v10300_v3 = vld [vmem:[%s8369_s19 + $0x14c] ss:$16 sps:$4 sm:$0xff]  }
 0x237   : > { %3941 = vmatprep.subr.bf16.mxu0 %v10261_v41  ;;  %4263 = vmatprep.subr.bf16.mxu1 %v10264_v2  ;;  %v10289_v2 = vld [vmem:[%s8369_s19 + $0x120] ss:$16 sps:$4 sm:$0xff]   ;;  %v10292_v41 = vld [vmem:[%s8369_s19 + $0x128] ss:$16 sps:$4 sm:$0xff]   ;;  %12787 = vst [vmem:[#allocation141_spill] sm:$0xff] %v10297_v12  ;;  %12788 = vst [vmem:[#allocation140_spill] sm:$0xff] %v10300_v3 }
 0x238   : > { %2875 = vmatmul.mubr.bf16.gmra.mrb[16].mxu0 %v9868_v47  ;;  %3197 = vmatmul.mubr.bf16.gmra.mrb[16].mxu1 %v9868_v47  ;;  %12785 = vst [vmem:[#allocation130_spill] sm:$0xff] %v10289_v2  ;;  %12786 = vst [vmem:[#allocation136_spill] sm:$0xff] %v10292_v41  ;;  %v1539_v47 = vunpack.c.h.bf16 %v9889_v36 }
 0x239   : > { %2884 = vmatprep.mubr.bf16.mxu0 %v9878_v24  ;;  %3206 = vmatprep.mubr.bf16.mxu1 %v9878_v24 }
 0x23a   : > { %3942 = vmatpush1.bf16.msra.mxu0 %v10269_v23  ;;  %4264 = vmatpush1.bf16.msra.mxu1 %v10272_v30  ;;  %v10305_v23 = vld [vmem:[%s8369_s19 + $0x140] ss:$16 sps:$4 sm:$0xff]   ;;  %v10308_v30 = vld [vmem:[%s8369_s19 + $0x148] ss:$16 sps:$4 sm:$0xff]  }
 0x23b   : > { %3943 = vmatprep.subr.bf16.mxu0 %v10277_v21  ;;  %4265 = vmatprep.subr.bf16.mxu1 %v10280_v17  ;;  %12789 = vst [vmem:[#allocation173_spill] sm:$0xff] %v10305_v23  ;;  %12790 = vst [vmem:[#allocation174_spill] sm:$0xff] %v10308_v30  ;;  %v10313_v17 = vld [vmem:[%s8369_s19 + $0x164] ss:$16 sps:$4 sm:$0xff]   ;;  %v10316_v21 = vld [vmem:[%s8369_s19 + $0x16c] ss:$16 sps:$4 sm:$0xff]  }
 0x23c   : > { %12791 = vst [vmem:[#allocation175_spill] sm:$0xff] %v10313_v17  ;;  %12792 = vst [vmem:[#allocation176_spill] sm:$0xff] %v10316_v21 }
 0x23e   : > { %3944 = vmatpush1.bf16.msra.mxu0 %v10289_v2  ;;  %4266 = vmatpush1.bf16.msra.mxu1 %v10292_v41  ;;  %v10333_v41 = vld [vmem:[%s8369_s19 + $0x184] ss:$16 sps:$4 sm:$0xff]   ;;  %v10336_v2 = vld [vmem:[%s8369_s19 + $0x18c] ss:$16 sps:$4 sm:$0xff]  }
 0x23f   : > { %3945 = vmatprep.subr.bf16.mxu0 %v10297_v12  ;;  %4267 = vmatprep.subr.bf16.mxu1 %v10300_v3  ;;  %v10325_v3 = vld [vmem:[%s8369_s19 + $0x160] ss:$16 sps:$4 sm:$0xff]   ;;  %v10328_v12 = vld [vmem:[%s8369_s19 + $0x168] ss:$16 sps:$4 sm:$0xff]   ;;  %12795 = vst [vmem:[#allocation179_spill] sm:$0xff] %v10333_v41  ;;  %12796 = vst [vmem:[#allocation180_spill] sm:$0xff] %v10336_v2 }
 0x240   : > { %2885 = vmatmul.mubr.bf16.gmra.mrb[20].mxu0 %v9889_v36  ;;  %3207 = vmatmul.mubr.bf16.gmra.mrb[20].mxu1 %v9889_v36  ;;  %12793 = vst [vmem:[#allocation177_spill] sm:$0xff] %v10325_v3  ;;  %12794 = vst [vmem:[#allocation178_spill] sm:$0xff] %v10328_v12 }
 0x241   : > { %2894 = vmatprep.mubr.bf16.mxu0 %v9917_v32  ;;  %3216 = vmatprep.mubr.bf16.mxu1 %v9917_v32 }
 0x242   : > { %3946 = vmatpush1.bf16.msra.mxu0 %v10305_v23  ;;  %4268 = vmatpush1.bf16.msra.mxu1 %v10308_v30  ;;  %v10341_v23 = vld [vmem:[%s8369_s19 + $0x180] ss:$16 sps:$4 sm:$0xff]   ;;  %v10344_v30 = vld [vmem:[%s8369_s19 + $0x188] ss:$16 sps:$4 sm:$0xff]  }
 0x243   : > { %3947 = vmatprep.subr.bf16.mxu0 %v10313_v17  ;;  %4269 = vmatprep.subr.bf16.mxu1 %v10316_v21  ;;  %12797 = vst [vmem:[#allocation181_spill] sm:$0xff] %v10341_v23  ;;  %12798 = vst [vmem:[#allocation182_spill] sm:$0xff] %v10344_v30  ;;  %v10349_v21 = vld [vmem:[%s8369_s19 + $0x1a4] ss:$16 sps:$4 sm:$0xff]   ;;  %v10352_v17 = vld [vmem:[%s8369_s19 + $0x1ac] ss:$16 sps:$4 sm:$0xff]  }
 0x244   : > { %12799 = vst [vmem:[#allocation183_spill] sm:$0xff] %v10349_v21  ;;  %12800 = vst [vmem:[#allocation184_spill] sm:$0xff] %v10352_v17 }
 0x246   : > { %3948 = vmatpush1.bf16.msra.mxu0 %v10325_v3  ;;  %4270 = vmatpush1.bf16.msra.mxu1 %v10328_v12  ;;  %v10369_v12 = vld [vmem:[%s8369_s19 + $0x1c4] ss:$16 sps:$4 sm:$0xff]   ;;  %v10372_v3 = vld [vmem:[%s8369_s19 + $0x1cc] ss:$16 sps:$4 sm:$0xff]  }
 0x247   : > { %3949 = vmatprep.subr.bf16.mxu0 %v10333_v41  ;;  %4271 = vmatprep.subr.bf16.mxu1 %v10336_v2  ;;  %v10361_v2 = vld [vmem:[%s8369_s19 + $0x1a0] ss:$16 sps:$4 sm:$0xff]   ;;  %v10364_v41 = vld [vmem:[%s8369_s19 + $0x1a8] ss:$16 sps:$4 sm:$0xff]   ;;  %12803 = vst [vmem:[#allocation187_spill] sm:$0xff] %v10369_v12  ;;  %12804 = vst [vmem:[#allocation188_spill] sm:$0xff] %v10372_v3 }
 0x248   : > { %2895 = vmatmul.mubr.bf16.gmra.mrb[24].mxu0 %v9963_v58  ;;  %3217 = vmatmul.mubr.bf16.gmra.mrb[24].mxu1 %v9963_v58  ;;  %12801 = vst [vmem:[#allocation185_spill] sm:$0xff] %v10361_v2  ;;  %12802 = vst [vmem:[#allocation186_spill] sm:$0xff] %v10364_v41 }
 0x249   : > { %2904 = vmatprep.mubr.bf16.mxu0 %v9977_v14  ;;  %3226 = vmatprep.mubr.bf16.mxu1 %v9977_v14 }
 0x24a   : > { %3950 = vmatpush1.bf16.msra.mxu0 %v10341_v23  ;;  %4272 = vmatpush1.bf16.msra.mxu1 %v10344_v30  ;;  %v10378_v30 = vld [vmem:[%s8369_s19 + $0x1c0] ss:$16 sps:$4 sm:$0xff]   ;;  %v10381_v23 = vld [vmem:[%s8369_s19 + $0x1c8] ss:$16 sps:$4 sm:$0xff]  }
 0x24b   : > { %3951 = vmatprep.subr.bf16.mxu0 %v10349_v21  ;;  %4273 = vmatprep.subr.bf16.mxu1 %v10352_v17  ;;  %12805 = vst [vmem:[#allocation189_spill] sm:$0xff] %v10378_v30  ;;  %12806 = vst [vmem:[#allocation190_spill] sm:$0xff] %v10381_v23  ;;  %v10387_v17 = vld [vmem:[%s8369_s19 + $0x1e4] ss:$16 sps:$4 sm:$0xff]   ;;  %v10390_v21 = vld [vmem:[%s8369_s19 + $0x1ec] ss:$16 sps:$4 sm:$0xff]  }
 0x24c   : > { %12807 = vst [vmem:[#allocation191_spill] sm:$0xff] %v10390_v21 }
 0x24e   : > { %3952 = vmatpush1.bf16.msra.mxu0 %v10361_v2  ;;  %4274 = vmatpush1.bf16.msra.mxu1 %v10364_v41  ;;  %v1536_v2 = vunpack.c.l.bf16 %v9878_v24  ;;  %v1540_v41 = vunpack.c.h.bf16 %v9878_v24 }
 0x24f   : > { %3953 = vmatprep.subr.bf16.mxu0 %v10369_v12  ;;  %4275 = vmatprep.subr.bf16.mxu1 %v10372_v3  ;;  %v1631_v12 = vsub.f32 %v9847_v26, %v1531_v11  ;;  %v1535_v3 = vunpack.c.l.bf16 %v9889_v36  ;;  %v10409_v26 = vld [vmem:[%s8369_s19 + $0x1e0] ss:$16 sps:$4 sm:$0xff]   ;;  %v10412_v11 = vld [vmem:[%s8369_s19 + $0x1e8] ss:$16 sps:$4 sm:$0xff]  }
 0x250   : > { %2905 = vmatmul.mubr.bf16.gmra.mrb[28].mxu0 %v9981_v5  ;;  %3227 = vmatmul.mubr.bf16.gmra.mrb[28].mxu1 %v9981_v5  ;;  %v1636_v7 = vsub.f32 %v9855_v29, %v1536_v2  ;;  %v1640_v24 = vsub.f32 %v12808_v48, %v1540_v41  ;;  %v1639_v2 = vsub.f32 %v12811_v34, %v1539_v47  ;;  %v1543_v41 = vunpack.c.l.bf16 %v9963_v58  ;;  %v10422_v29 = vld [vmem:[%s8369_s19 + $0x204] ss:$16 sps:$4 sm:$0xff]   ;;  %v10425_v48 = vld [vmem:[%s8369_s19 + $0x20c] ss:$16 sps:$4 sm:$0xff]  }
 0x251   : > { %2914 = vmatprep.mubr.bf16.mxu0 %v10014_v59  ;;  %3236 = vmatprep.mubr.bf16.mxu1 %v10014_v59  ;;  %v10414_v36 = vpack.c.bf16 %v1631_v12, %v1627_v27  ;;  %v1635_v46 = vsub.f32 %v12810_v18, %v1535_v3  ;;  %v1648_v12 = vsub.f32 %v9892_v37, %v1548_v13  ;;  %v1547_v18 = vunpack.c.h.bf16 %v9963_v58  ;;  %v12815_v37 = vld [vmem:[#allocation72_spill] sm:$0xff]  ;;  %v12816_v13 = vld [vmem:[#allocation63_spill] sm:$0xff] }
 0x252   : > { %3954 = vmatpush1.bf16.msra.mxu0 %v10378_v30  ;;  %4276 = vmatpush1.bf16.msra.mxu1 %v10381_v23  ;;  %v10427_v23 = vpack.c.bf16 %v1640_v24, %v1636_v7  ;;  %v1644_v30 = vsub.f32 %v9881_v62, %v1544_v38  ;;  %v1643_v47 = vsub.f32 %v9928_v4, %v1543_v41  ;;  %v1552_v34 = vunpack.c.l.bf16 %v9977_v14  ;;  %v12819_v41 = vld [vmem:[#allocation79_spill] sm:$0xff] }
 0x253   : > { %12809 = vst [vmem:[#allocation83_spill] sm:$0xff] %v10414_v36  ;;  %3955 = vmatprep.subr.bf16.mxu0 %v10387_v17  ;;  %4277 = vmatprep.subr.bf16.mxu1 %v10390_v21  ;;  %v10432_v27 = vpack.c.bf16 %v1639_v2, %v1635_v46  ;;  %v1556_v3 = vunpack.c.h.bf16 %v9977_v14  ;;  %v1647_v21 = vsub.f32 %v9934_v52, %v1547_v18  ;;  %v1551_v24 = vunpack.c.l.bf16 %v9981_v5 }
 0x254   : > { %12812 = vst [vmem:[#allocation67_spill] sm:$0xff] %v10427_v23  ;;  %v10437_v36 = vpack.c.bf16 %v1648_v12, %v1644_v30  ;;  %v1555_v62 = vunpack.c.h.bf16 %v9981_v5  ;;  %v1652_v46 = vsub.f32 %v12815_v37, %v1552_v34  ;;  %v1560_v38 = vunpack.c.l.bf16 %v10014_v59  ;;  %v12818_v30 = vld [vmem:[#allocation94_spill] sm:$0xff] }
 0x255   : > { %12813 = vst [vmem:[#allocation87_spill] sm:$0xff] %v10432_v27  ;;  %v1656_v4 = vsub.f32 %v12816_v13, %v1556_v3  ;;  %v1564_v7 = vunpack.c.h.bf16 %v10014_v59  ;;  %v10450_v52 = vpack.c.bf16 %v1647_v21, %v1643_v47  ;;  %v1651_v2 = vsub.f32 %v12818_v30, %v1551_v24  ;;  %v12851_v27 = vld [vmem:[#allocation100_spill] sm:$0xff]  ;;  %v12852_v23 = vld [vmem:[#allocation106_spill] sm:$0xff] }
 0x256   : > { %12814 = vst [vmem:[#allocation192_spill] sm:$0xff] %v10437_v36  ;;  %3956 = vmatpush1.bf16.msra.mxu0 %v10409_v26  ;;  %4278 = vmatpush1.bf16.msra.mxu1 %v10412_v11  ;;  %v1655_v12 = vsub.f32 %v12819_v41, %v1555_v62  ;;  %v1559_v18 = vunpack.c.l.bf16 %v10055_v63  ;;  %v1660_v3 = vsub.f32 %v9967_v15, %v1560_v38  ;;  %v1563_v13 = vunpack.c.h.bf16 %v10055_v63  ;;  %v10650_v36 = vld [vmem:[%s8369_s19 + $0x2ec] ss:$16 sps:$4 sm:$0xff]  }
 0x257   : > { %4086 = vmatprep.subr.bf16.mxu0 %v10422_v29  ;;  %4408 = vmatprep.subr.bf16.mxu1 %v10425_v48  ;;  %12817 = vst [vmem:[#allocation72_spill] sm:$0xff] %v10450_v52  ;;  %v10457_v34 = vpack.c.bf16 %v1656_v4, %v1652_v46  ;;  %v1664_v37 = vsub.f32 %v9996_v1, %v1564_v7  ;;  %v1568_v24 = vunpack.c.l.bf16 %v10081_v31  ;;  %v1572_v62 = vunpack.c.h.bf16 %v10081_v31  ;;  %v10647_v52 = vld [vmem:[%s8369_s19 + $0x2e4] ss:$16 sps:$4 sm:$0xff]  }
 0x258   : > { %2915 = vmatmul.mubr.bf16.gmra.mrb[32].mxu0 %v10055_v63  ;;  %3237 = vmatmul.mubr.bf16.gmra.mrb[32].mxu1 %v10055_v63  ;;  %v10464_v21 = vpack.c.bf16 %v1655_v12, %v1651_v2  ;;  %v1659_v47 = vsub.f32 %v10017_v0, %v1559_v18  ;;  %v1663_v15 = vsub.f32 %v10027_v60, %v1563_v13  ;;  %v1567_v1 = vunpack.c.l.bf16 %v10098_v33 }
 0x259   : > { %12820 = vst [vmem:[#allocation63_spill] sm:$0xff] %v10457_v34  ;;  %2924 = vmatprep.mubr.bf16.mxu0 %v10081_v31  ;;  %3246 = vmatprep.mubr.bf16.mxu1 %v10081_v31  ;;  %v10469_v46 = vpack.c.bf16 %v1664_v37, %v1660_v3  ;;  %v1571_v4 = vunpack.c.h.bf16 %v10098_v33  ;;  %v1668_v38 = vsub.f32 %v10040_v6, %v1568_v24  ;;  %v1576_v30 = vunpack.c.l.bf16 %v10137_v57  ;;  %v10642_v34 = vld [vmem:[%s8369_s19 + $0x2c8] ss:$16 sps:$4 sm:$0xff]  }
 0x25a   : > { %12821 = vst [vmem:[#allocation94_spill] sm:$0xff] %v10464_v21  ;;  %v1672_v7 = vsub.f32 %v10058_v53, %v1572_v62  ;;  %v1580_v0 = vunpack.c.h.bf16 %v10137_v57  ;;  %v10478_v2 = vpack.c.bf16 %v1663_v15, %v1659_v47  ;;  %v1667_v41 = vsub.f32 %v10061_v25, %v1567_v1  ;;  %v10639_v21 = vld [vmem:[%s8369_s19 + $0x2c0] ss:$16 sps:$4 sm:$0xff]   ;;  %12848 = vst [vmem:[#allocation204_spill] sm:$0xff] %v10642_v34 }
 0x25b   : > { %12822 = vst [vmem:[#allocation79_spill] sm:$0xff] %v10469_v46  ;;  %v1671_v12 = vsub.f32 %v10070_v19, %v1571_v4  ;;  %v1575_v60 = vunpack.c.l.bf16 %v10168_v51  ;;  %v1676_v3 = vsub.f32 %v10101_v50, %v1576_v30  ;;  %v1579_v53 = vunpack.c.h.bf16 %v10168_v51  ;;  %v10539_v30 = vld [vmem:[%s8369_s19 + $0x224] ss:$16 sps:$4 sm:$0xff]   ;;  %v10634_v46 = vld [vmem:[%s8369_s19 + $0x2cc] ss:$16 sps:$4 sm:$0xff]   ;;  %12847 = vst [vmem:[#allocation203_spill] sm:$0xff] %v10639_v21 }
 0x25c   : > { %12823 = vst [vmem:[#allocation193_spill] sm:$0xff] %v10478_v2  ;;  %v10483_v18 = vpack.c.bf16 %v1672_v7, %v1668_v38  ;;  %v1680_v6 = vsub.f32 %v10113_v20, %v1580_v0  ;;  %v1584_v47 = vunpack.c.l.bf16 %v10204_v55  ;;  %v1588_v25 = vunpack.c.h.bf16 %v10204_v55  ;;  %v10536_v7 = vld [vmem:[%s8369_s19 + $0x208] ss:$16 sps:$4 sm:$0xff]   ;;  %v10542_v0 = vld [vmem:[%s8369_s19 + $0x22c] ss:$16 sps:$4 sm:$0xff]   ;;  %12846 = vst [vmem:[#allocation202_spill] sm:$0xff] %v10634_v46 }
 0x25d   : > { %v10488_v37 = vpack.c.bf16 %v1671_v12, %v1667_v41  ;;  %v1675_v13 = vsub.f32 %v10121_v43, %v1575_v60  ;;  %v1679_v19 = vsub.f32 %v10140_v39, %v1579_v53  ;;  %v1583_v62 = vunpack.c.l.bf16 %v10208_v10  ;;  %v12831_v41 = vld [vmem:[#allocation53_spill] sm:$0xff]  ;;  %v10552_v60 = vld [vmem:[%s8369_s19 + $0x228] ss:$16 sps:$4 sm:$0xff]   ;;  %v10560_v53 = vld [vmem:[%s8369_s19 + $0x24c] ss:$16 sps:$4 sm:$0xff]   ;;  %12849 = vst [vmem:[#allocation205_spill] sm:$0xff] %v10647_v52 }
 0x25e   : > { %12824 = vst [vmem:[#allocation194_spill] sm:$0xff] %v10483_v18  ;;  %v10493_v24 = vpack.c.bf16 %v1680_v6, %v1676_v3  ;;  %v1587_v50 = vunpack.c.h.bf16 %v10208_v10  ;;  %v1684_v20 = vsub.f32 %v10171_v61, %v1584_v47  ;;  %v1688_v43 = vsub.f32 %v10177_v42, %v1588_v25  ;;  %v10549_v12 = vld [vmem:[%s8369_s19 + $0x220] ss:$16 sps:$4 sm:$0xff]   ;;  %v12832_v3 = vld [vmem:[#allocation62_spill] sm:$0xff]  ;;  %v10557_v6 = vld [vmem:[%s8369_s19 + $0x244] ss:$16 sps:$4 sm:$0xff]  }
 0x25f   : > { %12825 = vst [vmem:[#allocation195_spill] sm:$0xff] %v10488_v37  ;;  %v10504_v15 = vpack.c.bf16 %v1679_v19, %v1675_v13  ;;  %v1683_v39 = vsub.f32 %v10180_v54, %v1583_v62  ;;  %v10518_v61 = vpack.c.bf16 %v10188_v9, %v10188_v9  ;;  %v10526_v42 = vpack.c.bf16 %v10220_v16, %v10220_v16  ;;  %v12830_v54 = vld [vmem:[#allocation50_spill] sm:$0xff]  ;;  %v10567_v13 = vld [vmem:[%s8369_s19 + $0x240] ss:$16 sps:$4 sm:$0xff]   ;;  %v10575_v25 = vld [vmem:[%s8369_s19 + $0x264] ss:$16 sps:$4 sm:$0xff]  }
 0x260   : > { %12826 = vst [vmem:[#allocation196_spill] sm:$0xff] %v10493_v24  ;;  %2925 = vmatmul.mubr.bf16.gmra.mrb[36].mxu0 %v10098_v33  ;;  %3247 = vmatmul.mubr.bf16.gmra.mrb[36].mxu1 %v10098_v33  ;;  %v1687_v1 = vsub.f32 %v10183_v35, %v1587_v50  ;;  %v10508_v4 = vpack.c.bf16 %v1688_v43, %v1684_v20  ;;  %v10533_v35 = vld [vmem:[%s8369_s19 + $0x200] ss:$16 sps:$4 sm:$0xff]   ;;  %v10571_v47 = vld [vmem:[%s8369_s19 + $0x248] ss:$16 sps:$4 sm:$0xff]   ;;  %12850 = vst [vmem:[#allocation206_spill] sm:$0xff] %v10650_v36 }
 0x261   : > { %2934 = vmatprep.mubr.bf16.mxu0 %v10137_v57  ;;  %3256 = vmatprep.mubr.bf16.mxu1 %v10137_v57  ;;  %12827 = vst [vmem:[#allocation197_spill] sm:$0xff] %v10504_v15  ;;  %v10578_v19 = vld [vmem:[%s8369_s19 + $0x26c] ss:$16 sps:$4 sm:$0xff]   ;;  %v10587_v20 = vld [vmem:[%s8369_s19 + $0x260] ss:$16 sps:$4 sm:$0xff]  }
 0x262   : > { %12828 = vst [vmem:[#allocation198_spill] sm:$0xff] %v10508_v4  ;;  %v10510_v38 = vpack.c.bf16 %v1687_v1, %v1683_v39  ;;  %v12833_v62 = vld [vmem:[#allocation68_spill] sm:$0xff]  ;;  %v12834_v50 = vld [vmem:[#allocation78_spill] sm:$0xff]  ;;  %v10595_v39 = vld [vmem:[%s8369_s19 + $0x284] ss:$16 sps:$4 sm:$0xff]  }
 0x263   : > { %v10590_v43 = vld [vmem:[%s8369_s19 + $0x268] ss:$16 sps:$4 sm:$0xff]   ;;  %12835 = vst [vmem:[#allocation50_spill] sm:$0xff] %v10595_v39  ;;  %v10598_v1 = vld [vmem:[%s8369_s19 + $0x28c] ss:$16 sps:$4 sm:$0xff]   ;;  %v12842_v24 = vld [vmem:[#allocation93_spill] sm:$0xff] }
 0x264   : > { %12829 = vst [vmem:[#allocation199_spill] sm:$0xff] %v10510_v38  ;;  %12836 = vst [vmem:[#allocation53_spill] sm:$0xff] %v10598_v1  ;;  %v10603_v16 = vld [vmem:[%s8369_s19 + $0x280] ss:$16 sps:$4 sm:$0xff]   ;;  %v10606_v38 = vld [vmem:[%s8369_s19 + $0x288] ss:$16 sps:$4 sm:$0xff]  }
 0x265   : > { %12837 = vst [vmem:[#allocation62_spill] sm:$0xff] %v10603_v16  ;;  %12838 = vst [vmem:[#allocation68_spill] sm:$0xff] %v10606_v38  ;;  %v10611_v9 = vld [vmem:[%s8369_s19 + $0x2a4] ss:$16 sps:$4 sm:$0xff]   ;;  %v10614_v4 = vld [vmem:[%s8369_s19 + $0x2ac] ss:$16 sps:$4 sm:$0xff]  }
 0x266   : > { %12839 = vst [vmem:[#allocation78_spill] sm:$0xff] %v10611_v9  ;;  %12840 = vst [vmem:[#allocation200_spill] sm:$0xff] %v10614_v4  ;;  %v12841_v15 = vld [vmem:[#allocation86_spill] sm:$0xff]  ;;  %v10623_v37 = vld [vmem:[%s8369_s19 + $0x2a0] ss:$16 sps:$4 sm:$0xff]  }
 0x267   : > { %12843 = vst [vmem:[#allocation86_spill] sm:$0xff] %v10623_v37  ;;  %v10626_v18 = vld [vmem:[%s8369_s19 + $0x2a8] ss:$16 sps:$4 sm:$0xff]   ;;  %v10631_v2 = vld [vmem:[%s8369_s19 + $0x2c4] ss:$16 sps:$4 sm:$0xff]  }
 0x268   : > { %2935 = vmatmul.mubr.bf16.gmra.mrb[40].mxu0 %v10168_v51  ;;  %3257 = vmatmul.mubr.bf16.gmra.mrb[40].mxu1 %v10168_v51  ;;  %12844 = vst [vmem:[#allocation93_spill] sm:$0xff] %v10626_v18  ;;  %12845 = vst [vmem:[#allocation201_spill] sm:$0xff] %v10631_v2 }
 0x269   : > { %2944 = vmatprep.mubr.bf16.mxu0 %v10204_v55  ;;  %3266 = vmatprep.mubr.bf16.mxu1 %v10204_v55 }
 0x270   : > { %2945 = vmatmul.mubr.bf16.gmra.mrb[44].mxu0 %v10208_v10  ;;  %3267 = vmatmul.mubr.bf16.gmra.mrb[44].mxu1 %v10208_v10 }
 0x271   : > { %2954 = vmatprep.mubr.bf16.mxu0 %v10518_v61  ;;  %3276 = vmatprep.mubr.bf16.mxu1 %v10518_v61 }
 0x278   : > { %2955 = vmatmul.mubr.bf16.gmra.mrb[52].mxu0 %v10526_v42  ;;  %3277 = vmatmul.mubr.bf16.gmra.mrb[52].mxu1 %v10526_v42 }
 0x279   : > { %3957 = vmatprep.mubr.bf16.mxu0 %v12830_v54  ;;  %4279 = vmatprep.mubr.bf16.mxu1 %v12830_v54 }
 0x280   : > { %3958 = vmatmul.mubr.bf16.vlgmr.msra.gmra.mrb[0].mxu0 %v12831_v41  ;;  %4280 = vmatmul.mubr.bf16.vlgmr.msra.gmra.mrb[0].mxu1 %v12831_v41 }
 0x281   : > { %4087 = vmatpush1.bf16.msra.mxu0 %v10533_v35  ;;  %4409 = vmatpush1.bf16.msra.mxu1 %v10536_v7 }
 0x282   : > { %3967 = vmatprep.mubr.bf16.mxu0 %v12832_v3  ;;  %4289 = vmatprep.mubr.bf16.mxu1 %v12832_v3 }
 0x283   : > { %4088 = vmatprep.subr.bf16.mxu0 %v10539_v30  ;;  %4410 = vmatprep.subr.bf16.mxu1 %v10542_v0 }
 0x285   : > { %4089 = vmatpush1.bf16.msra.mxu0 %v10549_v12  ;;  %4411 = vmatpush1.bf16.msra.mxu1 %v10552_v60 }
 0x286   : > { %4090 = vmatprep.subr.bf16.mxu0 %v10557_v6  ;;  %4412 = vmatprep.subr.bf16.mxu1 %v10560_v53 }
 0x288   : > { %3968 = vmatmul.mubr.bf16.gmra.mrb[4].mxu0 %v12833_v62  ;;  %4290 = vmatmul.mubr.bf16.gmra.mrb[4].mxu1 %v12833_v62 }
 0x289   : > { %3977 = vmatprep.mubr.bf16.mxu0 %v12834_v50  ;;  %4299 = vmatprep.mubr.bf16.mxu1 %v12834_v50 }
 0x28a   : > { %4091 = vmatpush1.bf16.msra.mxu0 %v10567_v13  ;;  %4413 = vmatpush1.bf16.msra.mxu1 %v10571_v47 }
 0x28b   : > { %4092 = vmatprep.subr.bf16.mxu0 %v10575_v25  ;;  %4414 = vmatprep.subr.bf16.mxu1 %v10578_v19 }
 0x28e   : > { %4093 = vmatpush1.bf16.msra.mxu0 %v10587_v20  ;;  %4415 = vmatpush1.bf16.msra.mxu1 %v10590_v43 }
 0x28f   : > { %4094 = vmatprep.subr.bf16.mxu0 %v10595_v39  ;;  %4416 = vmatprep.subr.bf16.mxu1 %v10598_v1  ;;  %v7795_v1 = vld [vmem:[%s8369_s19 + $0x24] ss:$16 sps:$4 sm:$0xff]   ;;  %v7796_v39 = vld [vmem:[%s8369_s19 + $0x2c] ss:$16 sps:$4 sm:$0xff]  }
 0x290   : > { %3978 = vmatmul.mubr.bf16.gmra.mrb[8].mxu0 %v12841_v15  ;;  %4300 = vmatmul.mubr.bf16.gmra.mrb[8].mxu1 %v12841_v15 }
 0x291   : > { %3987 = vmatprep.mubr.bf16.mxu0 %v12842_v24  ;;  %4309 = vmatprep.mubr.bf16.mxu1 %v12842_v24 }
 0x292   : > { %4095 = vmatpush1.bf16.msra.mxu0 %v10603_v16  ;;  %4417 = vmatpush1.bf16.msra.mxu1 %v10606_v38  ;;  %v12905_v38 = vld [vmem:[#allocation61_spill] sm:$0xff]  ;;  %v12906_v16 = vld [vmem:[#allocation171_spill] sm:$0xff] }
 0x293   : > { %4096 = vmatprep.subr.bf16.mxu0 %v10611_v9  ;;  %4418 = vmatprep.subr.bf16.mxu1 %v10614_v4  ;;  %v12861_v4 = vld [vmem:[#allocation113_spill] sm:$0xff] }
 0x296   : > { %4097 = vmatpush1.bf16.msra.mxu0 %v10623_v37  ;;  %4419 = vmatpush1.bf16.msra.mxu1 %v10626_v18  ;;  %v10667_v18 = vld [vmem:[%s8369_s19 + $0x304] ss:$16 sps:$4 sm:$0xff]   ;;  %v10670_v37 = vld [vmem:[%s8369_s19 + $0x30c] ss:$16 sps:$4 sm:$0xff]  }
 0x297   : > { %4098 = vmatprep.subr.bf16.mxu0 %v10631_v2  ;;  %4420 = vmatprep.subr.bf16.mxu1 %v10634_v46  ;;  %v10659_v46 = vld [vmem:[%s8369_s19 + $0x2e0] ss:$16 sps:$4 sm:$0xff]   ;;  %v10662_v2 = vld [vmem:[%s8369_s19 + $0x2e8] ss:$16 sps:$4 sm:$0xff]   ;;  %12855 = vst [vmem:[#allocation207_spill] sm:$0xff] %v10667_v18  ;;  %12856 = vst [vmem:[#allocation208_spill] sm:$0xff] %v10670_v37 }
 0x298   : > { %3988 = vmatmul.mubr.bf16.gmra.mrb[12].mxu0 %v12851_v27  ;;  %4310 = vmatmul.mubr.bf16.gmra.mrb[12].mxu1 %v12851_v27  ;;  %12853 = vst [vmem:[#allocation100_spill] sm:$0xff] %v10659_v46  ;;  %12854 = vst [vmem:[#allocation106_spill] sm:$0xff] %v10662_v2 }
 0x299   : > { %3997 = vmatprep.mubr.bf16.mxu0 %v12852_v23  ;;  %4319 = vmatprep.mubr.bf16.mxu1 %v12852_v23 }
 0x29a   : > { %4099 = vmatpush1.bf16.msra.mxu0 %v10639_v21  ;;  %4421 = vmatpush1.bf16.msra.mxu1 %v10642_v34  ;;  %v10675_v21 = vld [vmem:[%s8369_s19 + $0x300] ss:$16 sps:$4 sm:$0xff]   ;;  %v10678_v34 = vld [vmem:[%s8369_s19 + $0x308] ss:$16 sps:$4 sm:$0xff]  }
 0x29b   : > { %4100 = vmatprep.subr.bf16.mxu0 %v10647_v52  ;;  %4422 = vmatprep.subr.bf16.mxu1 %v10650_v36  ;;  %12857 = vst [vmem:[#allocation209_spill] sm:$0xff] %v10675_v21  ;;  %12858 = vst [vmem:[#allocation210_spill] sm:$0xff] %v10678_v34  ;;  %v10683_v36 = vld [vmem:[%s8369_s19 + $0x324] ss:$16 sps:$4 sm:$0xff]   ;;  %v10686_v52 = vld [vmem:[%s8369_s19 + $0x32c] ss:$16 sps:$4 sm:$0xff]  }
 0x29c   : > { %12859 = vst [vmem:[#allocation211_spill] sm:$0xff] %v10683_v36  ;;  %12860 = vst [vmem:[#allocation212_spill] sm:$0xff] %v10686_v52 }
 0x29e   : > { %4101 = vmatpush1.bf16.msra.mxu0 %v10659_v46  ;;  %4423 = vmatpush1.bf16.msra.mxu1 %v10662_v2  ;;  %v12862_v2 = vld [vmem:[#allocation118_spill] sm:$0xff]  ;;  %v10703_v46 = vld [vmem:[%s8369_s19 + $0x344] ss:$16 sps:$4 sm:$0xff]  }
 0x29f   : > { %4102 = vmatprep.subr.bf16.mxu0 %v10667_v18  ;;  %4424 = vmatprep.subr.bf16.mxu1 %v10670_v37  ;;  %v10695_v37 = vld [vmem:[%s8369_s19 + $0x320] ss:$16 sps:$4 sm:$0xff]   ;;  %v10698_v18 = vld [vmem:[%s8369_s19 + $0x328] ss:$16 sps:$4 sm:$0xff]   ;;  %12865 = vst [vmem:[#allocation215_spill] sm:$0xff] %v10703_v46 }
 0x2a0   : > { %3998 = vmatmul.mubr.bf16.gmra.mrb[16].mxu0 %v12861_v4  ;;  %4320 = vmatmul.mubr.bf16.gmra.mrb[16].mxu1 %v12861_v4  ;;  %12863 = vst [vmem:[#allocation213_spill] sm:$0xff] %v10695_v37  ;;  %12864 = vst [vmem:[#allocation214_spill] sm:$0xff] %v10698_v18  ;;  %v10706_v4 = vld [vmem:[%s8369_s19 + $0x34c] ss:$16 sps:$4 sm:$0xff]  }
 0x2a1   : > { %4007 = vmatprep.mubr.bf16.mxu0 %v12862_v2  ;;  %4329 = vmatprep.mubr.bf16.mxu1 %v12862_v2  ;;  %12866 = vst [vmem:[#allocation216_spill] sm:$0xff] %v10706_v4  ;;  %v12871_v2 = vld [vmem:[#allocation125_spill] sm:$0xff] }
 0x2a2   : > { %4103 = vmatpush1.bf16.msra.mxu0 %v10675_v21  ;;  %4425 = vmatpush1.bf16.msra.mxu1 %v10678_v34  ;;  %v10711_v21 = vld [vmem:[%s8369_s19 + $0x340] ss:$16 sps:$4 sm:$0xff]   ;;  %v10714_v34 = vld [vmem:[%s8369_s19 + $0x348] ss:$16 sps:$4 sm:$0xff]  }
 0x2a3   : > { %4104 = vmatprep.subr.bf16.mxu0 %v10683_v36  ;;  %4426 = vmatprep.subr.bf16.mxu1 %v10686_v52  ;;  %12867 = vst [vmem:[#allocation217_spill] sm:$0xff] %v10711_v21  ;;  %12868 = vst [vmem:[#allocation218_spill] sm:$0xff] %v10714_v34  ;;  %v10719_v52 = vld [vmem:[%s8369_s19 + $0x364] ss:$16 sps:$4 sm:$0xff]   ;;  %v10722_v36 = vld [vmem:[%s8369_s19 + $0x36c] ss:$16 sps:$4 sm:$0xff]  }
 0x2a4   : > { %12869 = vst [vmem:[#allocation219_spill] sm:$0xff] %v10719_v52  ;;  %12870 = vst [vmem:[#allocation220_spill] sm:$0xff] %v10722_v36 }
 0x2a6   : > { %4105 = vmatpush1.bf16.msra.mxu0 %v10695_v37  ;;  %4427 = vmatpush1.bf16.msra.mxu1 %v10698_v18  ;;  %v12872_v18 = vld [vmem:[#allocation131_spill] sm:$0xff] }
 0x2a7   : > { %4106 = vmatprep.subr.bf16.mxu0 %v10703_v46  ;;  %4428 = vmatprep.subr.bf16.mxu1 %v10706_v4  ;;  %v10731_v4 = vld [vmem:[%s8369_s19 + $0x360] ss:$16 sps:$4 sm:$0xff]   ;;  %v10734_v46 = vld [vmem:[%s8369_s19 + $0x368] ss:$16 sps:$4 sm:$0xff]   ;;  %v10739_v37 = vld [vmem:[%s8369_s19 + $0x384] ss:$16 sps:$4 sm:$0xff]  }
 0x2a8   : > { %4008 = vmatmul.mubr.bf16.gmra.mrb[20].mxu0 %v12871_v2  ;;  %4330 = vmatmul.mubr.bf16.gmra.mrb[20].mxu1 %v12871_v2  ;;  %12873 = vst [vmem:[#allocation221_spill] sm:$0xff] %v10731_v4  ;;  %12874 = vst [vmem:[#allocation222_spill] sm:$0xff] %v10734_v46  ;;  %v10742_v2 = vld [vmem:[%s8369_s19 + $0x38c] ss:$16 sps:$4 sm:$0xff]  }
 0x2a9   : > { %4017 = vmatprep.mubr.bf16.mxu0 %v12872_v18  ;;  %4339 = vmatprep.mubr.bf16.mxu1 %v12872_v18  ;;  %12875 = vst [vmem:[#allocation223_spill] sm:$0xff] %v10739_v37  ;;  %12876 = vst [vmem:[#allocation224_spill] sm:$0xff] %v10742_v2  ;;  %v12881_v18 = vld [vmem:[#allocation135_spill] sm:$0xff] }
 0x2aa   : > { %4107 = vmatpush1.bf16.msra.mxu0 %v10711_v21  ;;  %4429 = vmatpush1.bf16.msra.mxu1 %v10714_v34  ;;  %v10747_v21 = vld [vmem:[%s8369_s19 + $0x380] ss:$16 sps:$4 sm:$0xff]   ;;  %v10750_v34 = vld [vmem:[%s8369_s19 + $0x388] ss:$16 sps:$4 sm:$0xff]  }
 0x2ab   : > { %4108 = vmatprep.subr.bf16.mxu0 %v10719_v52  ;;  %4430 = vmatprep.subr.bf16.mxu1 %v10722_v36  ;;  %12877 = vst [vmem:[#allocation225_spill] sm:$0xff] %v10747_v21  ;;  %12878 = vst [vmem:[#allocation226_spill] sm:$0xff] %v10750_v34  ;;  %v10755_v36 = vld [vmem:[%s8369_s19 + $0x3a4] ss:$16 sps:$4 sm:$0xff]   ;;  %v10758_v52 = vld [vmem:[%s8369_s19 + $0x3ac] ss:$16 sps:$4 sm:$0xff]  }
 0x2ac   : > { %12879 = vst [vmem:[#allocation227_spill] sm:$0xff] %v10755_v36  ;;  %12880 = vst [vmem:[#allocation228_spill] sm:$0xff] %v10758_v52 }
 0x2ae   : > { %4109 = vmatpush1.bf16.msra.mxu0 %v10731_v4  ;;  %4431 = vmatpush1.bf16.msra.mxu1 %v10734_v46  ;;  %v12882_v46 = vld [vmem:[#allocation142_spill] sm:$0xff]  ;;  %v10775_v4 = vld [vmem:[%s8369_s19 + $0x3c4] ss:$16 sps:$4 sm:$0xff]  }
 0x2af   : > { %4110 = vmatprep.subr.bf16.mxu0 %v10739_v37  ;;  %4432 = vmatprep.subr.bf16.mxu1 %v10742_v2  ;;  %v10767_v2 = vld [vmem:[%s8369_s19 + $0x3a0] ss:$16 sps:$4 sm:$0xff]   ;;  %v10770_v37 = vld [vmem:[%s8369_s19 + $0x3a8] ss:$16 sps:$4 sm:$0xff]   ;;  %12885 = vst [vmem:[#allocation231_spill] sm:$0xff] %v10775_v4 }
 0x2b0   : > { %4018 = vmatmul.mubr.bf16.gmra.mrb[24].mxu0 %v12881_v18  ;;  %4340 = vmatmul.mubr.bf16.gmra.mrb[24].mxu1 %v12881_v18  ;;  %12883 = vst [vmem:[#allocation229_spill] sm:$0xff] %v10767_v2  ;;  %12884 = vst [vmem:[#allocation230_spill] sm:$0xff] %v10770_v37  ;;  %v10778_v18 = vld [vmem:[%s8369_s19 + $0x3cc] ss:$16 sps:$4 sm:$0xff]  }
 0x2b1   : > { %4027 = vmatprep.mubr.bf16.mxu0 %v12882_v46  ;;  %4349 = vmatprep.mubr.bf16.mxu1 %v12882_v46  ;;  %12886 = vst [vmem:[#allocation232_spill] sm:$0xff] %v10778_v18  ;;  %v12891_v46 = vld [vmem:[#allocation145_spill] sm:$0xff] }
 0x2b2   : > { %4111 = vmatpush1.bf16.msra.mxu0 %v10747_v21  ;;  %4433 = vmatpush1.bf16.msra.mxu1 %v10750_v34  ;;  %v10783_v21 = vld [vmem:[%s8369_s19 + $0x3c0] ss:$16 sps:$4 sm:$0xff]   ;;  %v10786_v34 = vld [vmem:[%s8369_s19 + $0x3c8] ss:$16 sps:$4 sm:$0xff]  }
 0x2b3   : > { %4112 = vmatprep.subr.bf16.mxu0 %v10755_v36  ;;  %4434 = vmatprep.subr.bf16.mxu1 %v10758_v52  ;;  %12887 = vst [vmem:[#allocation233_spill] sm:$0xff] %v10783_v21  ;;  %12888 = vst [vmem:[#allocation234_spill] sm:$0xff] %v10786_v34  ;;  %v10791_v52 = vld [vmem:[%s8369_s19 + $0x3e4] ss:$16 sps:$4 sm:$0xff]   ;;  %v10794_v36 = vld [vmem:[%s8369_s19 + $0x3ec] ss:$16 sps:$4 sm:$0xff]  }
 0x2b4   : > { %12889 = vst [vmem:[#allocation235_spill] sm:$0xff] %v10791_v52  ;;  %12890 = vst [vmem:[#allocation236_spill] sm:$0xff] %v10794_v36 }
 0x2b6   : > { %4113 = vmatpush1.bf16.msra.mxu0 %v10767_v2  ;;  %4435 = vmatpush1.bf16.msra.mxu1 %v10770_v37  ;;  %v12892_v2 = vld [vmem:[#allocation148_spill] sm:$0xff]  ;;  %v7791_v37 = vld [vmem:[%s8369_s19 + $0x4] ss:$16 sps:$4 sm:$0xff]  }
 0x2b7   : > { %4114 = vmatprep.subr.bf16.mxu0 %v10775_v4  ;;  %4436 = vmatprep.subr.bf16.mxu1 %v10778_v18  ;;  %v10803_v4 = vld [vmem:[%s8369_s19 + $0x3e0] ss:$16 sps:$4 sm:$0xff]   ;;  %v10806_v18 = vld [vmem:[%s8369_s19 + $0x3e8] ss:$16 sps:$4 sm:$0xff]  }
 0x2b8   : > { %4028 = vmatmul.mubr.bf16.gmra.mrb[28].mxu0 %v12891_v46  ;;  %4350 = vmatmul.mubr.bf16.gmra.mrb[28].mxu1 %v12891_v46  ;;  %12893 = vst [vmem:[#allocation237_spill] sm:$0xff] %v10803_v4  ;;  %12894 = vst [vmem:[#allocation238_spill] sm:$0xff] %v10806_v18  ;;  %v7792_v46 = vld [vmem:[%s8369_s19 + $0xc] ss:$16 sps:$4 sm:$0xff]  }
 0x2b9   : > { %4037 = vmatprep.mubr.bf16.mxu0 %v12892_v2  ;;  %4359 = vmatprep.mubr.bf16.mxu1 %v12892_v2  ;;  %v12895_v2 = vld [vmem:[#allocation151_spill] sm:$0xff] }
 0x2ba   : > { %4115 = vmatpush1.bf16.msra.mxu0 %v10783_v21  ;;  %4437 = vmatpush1.bf16.msra.mxu1 %v10786_v34  ;;  %v12896_v34 = vld [vmem:[#allocation156_spill] sm:$0xff]  ;;  %v12897_v21 = vld [vmem:[#allocation158_spill] sm:$0xff] }
 0x2bb   : > { %4116 = vmatprep.subr.bf16.mxu0 %v10791_v52  ;;  %4438 = vmatprep.subr.bf16.mxu1 %v10794_v36  ;;  %v12898_v36 = vld [vmem:[#allocation161_spill] sm:$0xff] }
 0x2be   : > { %4117 = vmatpush1.bf16.msra.mxu0 %v10803_v4  ;;  %4439 = vmatpush1.bf16.msra.mxu1 %v10806_v18  ;;  %v12899_v18 = vld [vmem:[#allocation165_spill] sm:$0xff]  ;;  %v12902_v4 = vld [vmem:[#allocation35_spill] sm:$0xff] }
 0x2bf   : > { %4569 = vmatprep.subr.bf16.mxu0 %v7791_v37  ;;  %4891 = vmatprep.subr.bf16.mxu1 %v7792_v46  ;;  %v12900_v46 = vld [vmem:[#allocation30_spill] sm:$0xff]  ;;  %v12901_v37 = vld [vmem:[#allocation37_spill] sm:$0xff] }
 0x2c0   : > { %4038 = vmatmul.mubr.bf16.gmra.mrb[32].mxu0 %v12895_v2  ;;  %4360 = vmatmul.mubr.bf16.gmra.mrb[32].mxu1 %v12895_v2 }
 0x2c1   : > { %4047 = vmatprep.mubr.bf16.mxu0 %v12896_v34  ;;  %4369 = vmatprep.mubr.bf16.mxu1 %v12896_v34 }
 0x2c8   : > { %4048 = vmatmul.mubr.bf16.gmra.mrb[36].mxu0 %v12897_v21  ;;  %4370 = vmatmul.mubr.bf16.gmra.mrb[36].mxu1 %v12897_v21  ;;  %v12903_v21 = vld [vmem:[#allocation39_spill] sm:$0xff] }
 0x2c9   : > { %4057 = vmatprep.mubr.bf16.mxu0 %v12898_v36  ;;  %4379 = vmatprep.mubr.bf16.mxu1 %v12898_v36  ;;  %v12904_v36 = vld [vmem:[#allocation34_spill] sm:$0xff] }
 0x2d0   : > { %4058 = vmatmul.mubr.bf16.gmra.mrb[40].mxu0 %v12899_v18  ;;  %4380 = vmatmul.mubr.bf16.gmra.mrb[40].mxu1 %v12899_v18 }
 0x2d1   : > { %4067 = vmatprep.mubr.bf16.mxu0 %v12900_v46  ;;  %4389 = vmatprep.mubr.bf16.mxu1 %v12900_v46 }
 0x2d3   : > { %v10834_v18 = vpop.f32.mrb[48].mxu0 }
 0x2d5   : > { %v10836_v46 = vpop.f32.mrb[48].mxu1 }
 0x2d6   : > { %v10840_v52 = vpop.f32.mrb[49].mxu1 }
 0x2d7   : > { %v3121_v34 = vpop.f32.mrb[50].mxu1 }
 0x2d8   : > { %4068 = vmatmul.mubr.bf16.gmra.mrb[44].mxu0 %v12901_v37  ;;  %4390 = vmatmul.mubr.bf16.gmra.mrb[44].mxu1 %v12901_v37  ;;  %v10838_v37 = vpop.f32.mrb[49].mxu0  ;;  %v3122_v9 = vpop.f32.mrb[51].mxu1  ;;  %v12908_v34 = vld [vmem:[#allocation103_spill] sm:$0xff] }
 0x2d9   : > { %4077 = vmatprep.mubr.bf16.mxu0 %v12902_v4  ;;  %4399 = vmatprep.mubr.bf16.mxu1 %v12902_v4  ;;  %v2799_v4 = vpop.f32.mrb[50].mxu0  ;;  %v12909_v9 = vld [vmem:[#allocation71_spill] sm:$0xff] }
 0x2da   : > { %v2800_v2 = vpop.f32.mrb[51].mxu0  ;;  %v12907_v4 = vld [vmem:[#allocation69_spill] sm:$0xff] }
 0x2db   : > { %v12910_v2 = vld [vmem:[#allocation77_spill] sm:$0xff] }
 0x2e0   : > { %4078 = vmatmul.mubr.bf16.gmra.mrb[56].mxu0 %v12903_v21  ;;  %4400 = vmatmul.mubr.bf16.gmra.mrb[56].mxu1 %v12903_v21  ;;  %v7793_v21 = vld [vmem:[%s8369_s19] ss:$16 sps:$4 sm:$0xff]  }
 0x2e1   : > { %4118 = vmatprep.mubr.bf16.mxu0 %v12904_v36  ;;  %4440 = vmatprep.mubr.bf16.mxu1 %v12904_v36  ;;  %v7794_v36 = vld [vmem:[%s8369_s19 + $0x8] ss:$16 sps:$4 sm:$0xff]  }
 0x2e8   : > { %4119 = vmatmul.mubr.bf16.vlgmr.msra.gmra.mrb[0].mxu0 %v12905_v38  ;;  %4441 = vmatmul.mubr.bf16.vlgmr.msra.gmra.mrb[0].mxu1 %v12905_v38  ;;  %v12911_v38 = vld [vmem:[#allocation45_spill] sm:$0xff] }
 0x2e9   : > { %4570 = vmatpush1.bf16.msra.mxu0 %v7793_v21  ;;  %4892 = vmatpush1.bf16.msra.mxu1 %v7794_v36  ;;  %v12912_v36 = vld [vmem:[#allocation60_spill] sm:$0xff]  ;;  %v12913_v21 = vld [vmem:[#allocation85_spill] sm:$0xff] }
 0x2ea   : > { %4128 = vmatprep.mubr.bf16.mxu0 %v12906_v16  ;;  %4450 = vmatprep.mubr.bf16.mxu1 %v12906_v16 }
 0x2eb   : > { %4571 = vmatprep.subr.bf16.mxu0 %v7795_v1  ;;  %4893 = vmatprep.subr.bf16.mxu1 %v7796_v39  ;;  %v12914_v1 = vld [vmem:[#allocation76_spill] sm:$0xff]  ;;  %v12915_v39 = vld [vmem:[#allocation107_spill] sm:$0xff] }
 0x2ed   : > { %4572 = vmatpush1.bf16.msra.mxu0 %v12907_v4  ;;  %4894 = vmatpush1.bf16.msra.mxu1 %v12908_v34  ;;  %v12916_v4 = vld [vmem:[#allocation92_spill] sm:$0xff]  ;;  %v12917_v34 = vld [vmem:[#allocation82_spill] sm:$0xff] }
 0x2ee   : > { %4573 = vmatprep.subr.bf16.mxu0 %v12909_v9  ;;  %4895 = vmatprep.subr.bf16.mxu1 %v12910_v2  ;;  %v12922_v9 = vld [vmem:[#allocation120_spill] sm:$0xff]  ;;  %v12923_v2 = vld [vmem:[#allocation97_spill] sm:$0xff] }
 0x2f0   : > { %4129 = vmatmul.mubr.bf16.gmra.mrb[4].mxu0 %v12911_v38  ;;  %4451 = vmatmul.mubr.bf16.gmra.mrb[4].mxu1 %v12911_v38 }
 0x2f1   : > { %4138 = vmatprep.mubr.bf16.mxu0 %v12912_v36  ;;  %4460 = vmatprep.mubr.bf16.mxu1 %v12912_v36 }
 0x2f2   : > { %4574 = vmatpush1.bf16.msra.mxu0 %v12913_v21  ;;  %4896 = vmatpush1.bf16.msra.mxu1 %v12914_v1  ;;  %v12924_v21 = vld [vmem:[#allocation104_spill] sm:$0xff]  ;;  %v12927_v1 = vld [vmem:[#allocation109_spill] sm:$0xff] }
 0x2f3   : > { %4575 = vmatprep.subr.bf16.mxu0 %v12915_v39  ;;  %4897 = vmatprep.subr.bf16.mxu1 %v12916_v4  ;;  %v12928_v39 = vld [vmem:[#allocation115_spill] sm:$0xff]  ;;  %v12929_v4 = vld [vmem:[#allocation108_spill] sm:$0xff] }
 0x2f6   : > { %4576 = vmatpush1.bf16.msra.mxu0 %v10091_v40  ;;  %4898 = vmatpush1.bf16.msra.mxu1 %v10094_v28  ;;  %v12918_v40 = vld [vmem:[#allocation112_spill] sm:$0xff]  ;;  %v12919_v28 = vld [vmem:[#allocation91_spill] sm:$0xff] }
 0x2f7   : > { %4577 = vmatprep.subr.bf16.mxu0 %v10107_v45  ;;  %4899 = vmatprep.subr.bf16.mxu1 %v10110_v22  ;;  %v12920_v45 = vld [vmem:[#allocation99_spill] sm:$0xff]  ;;  %v12921_v22 = vld [vmem:[#allocation89_spill] sm:$0xff] }
 0x2f8   : > { %4139 = vmatmul.mubr.bf16.gmra.mrb[8].mxu0 %v9801_v44  ;;  %4461 = vmatmul.mubr.bf16.gmra.mrb[8].mxu1 %v9801_v44 }
 0x2f9   : > { %4148 = vmatprep.mubr.bf16.mxu0 %v9838_v8  ;;  %4470 = vmatprep.mubr.bf16.mxu1 %v9838_v8 }
 0x2fa   : > { %4578 = vmatpush1.bf16.msra.mxu0 %v10150_v56  ;;  %4900 = vmatpush1.bf16.msra.mxu1 %v10153_v49  ;;  %v12925_v56 = vld [vmem:[#allocation124_spill] sm:$0xff]  ;;  %v12926_v49 = vld [vmem:[#allocation95_spill] sm:$0xff] }
 0x2fb   : > { %4579 = vmatprep.subr.bf16.mxu0 %v12917_v34  ;;  %4901 = vmatprep.subr.bf16.mxu1 %v12918_v40  ;;  %v12930_v34 = vld [vmem:[#allocation114_spill] sm:$0xff]  ;;  %v12931_v40 = vld [vmem:[#allocation121_spill] sm:$0xff] }
 0x2fe   : > { %4580 = vmatpush1.bf16.msra.mxu0 %v12919_v28  ;;  %4902 = vmatpush1.bf16.msra.mxu1 %v12920_v45  ;;  %v12932_v28 = vld [vmem:[#allocation127_spill] sm:$0xff] }
 0x2ff   : > { %4581 = vmatprep.subr.bf16.mxu0 %v12921_v22  ;;  %4903 = vmatprep.subr.bf16.mxu1 %v12922_v9  ;;  %v12933_v45 = vld [vmem:[#allocation55_spill] sm:$0xff] }
 0x300   : > { %4149 = vmatmul.mubr.bf16.gmra.mrb[12].mxu0 %v12923_v2  ;;  %4471 = vmatmul.mubr.bf16.gmra.mrb[12].mxu1 %v12923_v2  ;;  %v12934_v22 = vld [vmem:[#allocation59_spill] sm:$0xff] }
 0x301   : > { %4158 = vmatprep.mubr.bf16.mxu0 %v12924_v21  ;;  %4480 = vmatprep.mubr.bf16.mxu1 %v12924_v21  ;;  %v12935_v9 = vld [vmem:[#allocation119_spill] sm:$0xff] }
 0x302   : > { %4582 = vmatpush1.bf16.msra.mxu0 %v12925_v56  ;;  %4904 = vmatpush1.bf16.msra.mxu1 %v12926_v49  ;;  %v12936_v56 = vld [vmem:[#allocation126_spill] sm:$0xff]  ;;  %v12937_v49 = vld [vmem:[#allocation132_spill] sm:$0xff] }
 0x303   : > { %4583 = vmatprep.subr.bf16.mxu0 %v12927_v1  ;;  %4905 = vmatprep.subr.bf16.mxu1 %v12928_v39  ;;  %v12938_v1 = vld [vmem:[#allocation137_spill] sm:$0xff]  ;;  %v12939_v39 = vld [vmem:[#allocation130_spill] sm:$0xff] }
 0x306   : > { %4584 = vmatpush1.bf16.msra.mxu0 %v12929_v4  ;;  %4906 = vmatpush1.bf16.msra.mxu1 %v12930_v34  ;;  %v12940_v4 = vld [vmem:[#allocation136_spill] sm:$0xff]  ;;  %v12941_v34 = vld [vmem:[#allocation141_spill] sm:$0xff] }
 0x307   : > { %4585 = vmatprep.subr.bf16.mxu0 %v12931_v40  ;;  %4907 = vmatprep.subr.bf16.mxu1 %v12932_v28  ;;  %v12942_v40 = vld [vmem:[#allocation140_spill] sm:$0xff] }
 0x308   : > { %4159 = vmatmul.mubr.bf16.gmra.mrb[16].mxu0 %v12933_v45  ;;  %4481 = vmatmul.mubr.bf16.gmra.mrb[16].mxu1 %v12933_v45  ;;  %v12943_v28 = vld [vmem:[#allocation64_spill] sm:$0xff]  ;;  %v12944_v45 = vld [vmem:[#allocation173_spill] sm:$0xff] }
 0x309   : > { %4168 = vmatprep.mubr.bf16.mxu0 %v12934_v22  ;;  %4490 = vmatprep.mubr.bf16.mxu1 %v12934_v22  ;;  %v12945_v22 = vld [vmem:[#allocation174_spill] sm:$0xff] }
 0x30a   : > { %4586 = vmatpush1.bf16.msra.mxu0 %v12935_v9  ;;  %4908 = vmatpush1.bf16.msra.mxu1 %v12936_v56  ;;  %v12946_v9 = vld [vmem:[#allocation175_spill] sm:$0xff]  ;;  %v12947_v56 = vld [vmem:[#allocation176_spill] sm:$0xff] }
 0x30b   : > { %4587 = vmatprep.subr.bf16.mxu0 %v12937_v49  ;;  %4909 = vmatprep.subr.bf16.mxu1 %v12938_v1  ;;  %v12948_v49 = vld [vmem:[#allocation177_spill] sm:$0xff]  ;;  %v12949_v1 = vld [vmem:[#allocation178_spill] sm:$0xff] }
 0x30e   : > { %4588 = vmatpush1.bf16.msra.mxu0 %v12939_v39  ;;  %4910 = vmatpush1.bf16.msra.mxu1 %v12940_v4  ;;  %v12950_v39 = vld [vmem:[#allocation179_spill] sm:$0xff]  ;;  %v12951_v4 = vld [vmem:[#allocation180_spill] sm:$0xff] }
 0x30f   : > { %4589 = vmatprep.subr.bf16.mxu0 %v12941_v34  ;;  %4911 = vmatprep.subr.bf16.mxu1 %v12942_v40  ;;  %v12953_v34 = vld [vmem:[#allocation182_spill] sm:$0xff]  ;;  %v12954_v40 = vld [vmem:[#allocation183_spill] sm:$0xff] }
 0x310   : > { %4169 = vmatmul.mubr.bf16.gmra.mrb[20].mxu0 %v12943_v28  ;;  %4491 = vmatmul.mubr.bf16.gmra.mrb[20].mxu1 %v12943_v28  ;;  %v12955_v28 = vld [vmem:[#allocation184_spill] sm:$0xff] }
 0x311   : > { %4178 = vmatprep.mubr.bf16.mxu0 %v9917_v32  ;;  %4500 = vmatprep.mubr.bf16.mxu1 %v9917_v32  ;;  %v12952_v32 = vld [vmem:[#allocation181_spill] sm:$0xff] }
 0x312   : > { %4590 = vmatpush1.bf16.msra.mxu0 %v12944_v45  ;;  %4912 = vmatpush1.bf16.msra.mxu1 %v12945_v22  ;;  %v12956_v45 = vld [vmem:[#allocation185_spill] sm:$0xff]  ;;  %v12957_v22 = vld [vmem:[#allocation186_spill] sm:$0xff] }
 0x313   : > { %4591 = vmatprep.subr.bf16.mxu0 %v12946_v9  ;;  %4913 = vmatprep.subr.bf16.mxu1 %v12947_v56  ;;  %v12958_v9 = vld [vmem:[#allocation187_spill] sm:$0xff]  ;;  %v12959_v56 = vld [vmem:[#allocation188_spill] sm:$0xff] }
 0x316   : > { %4592 = vmatpush1.bf16.msra.mxu0 %v12948_v49  ;;  %4914 = vmatpush1.bf16.msra.mxu1 %v12949_v1  ;;  %v12962_v49 = vld [vmem:[#allocation191_spill] sm:$0xff] }
 0x317   : > { %4593 = vmatprep.subr.bf16.mxu0 %v12950_v39  ;;  %4915 = vmatprep.subr.bf16.mxu1 %v12951_v4 }
 0x318   : > { %4179 = vmatmul.mubr.bf16.gmra.mrb[24].mxu0 %v9963_v58  ;;  %4501 = vmatmul.mubr.bf16.gmra.mrb[24].mxu1 %v9963_v58  ;;  %v12960_v58 = vld [vmem:[#allocation189_spill] sm:$0xff] }
 0x319   : > { %4188 = vmatprep.mubr.bf16.mxu0 %v9977_v14  ;;  %4510 = vmatprep.mubr.bf16.mxu1 %v9977_v14  ;;  %v12961_v14 = vld [vmem:[#allocation190_spill] sm:$0xff] }
 0x31a   : > { %4594 = vmatpush1.bf16.msra.mxu0 %v12952_v32  ;;  %4916 = vmatpush1.bf16.msra.mxu1 %v12953_v34 }
 0x31b   : > { %4595 = vmatprep.subr.bf16.mxu0 %v12954_v40  ;;  %4917 = vmatprep.subr.bf16.mxu1 %v12955_v28  ;;  %v12967_v40 = vld [vmem:[#allocation57_spill] sm:$0xff] }
 0x31e   : > { %4596 = vmatpush1.bf16.msra.mxu0 %v12956_v45  ;;  %4918 = vmatpush1.bf16.msra.mxu1 %v12957_v22  ;;  %v12968_v45 = vld [vmem:[#allocation58_spill] sm:$0xff] }
 0x31f   : > { %4597 = vmatprep.subr.bf16.mxu0 %v12958_v9  ;;  %4919 = vmatprep.subr.bf16.mxu1 %v12959_v56 }
 0x320   : > { %4189 = vmatmul.mubr.bf16.gmra.mrb[28].mxu0 %v9981_v5  ;;  %4511 = vmatmul.mubr.bf16.gmra.mrb[28].mxu1 %v9981_v5  ;;  %v1494_v5 = vunpack.c.l.bf16 %v12830_v54 }
 0x321   : > { %4198 = vmatprep.mubr.bf16.mxu0 %v10014_v59  ;;  %4520 = vmatprep.mubr.bf16.mxu1 %v10014_v59  ;;  %v1498_v59 = vunpack.c.h.bf16 %v12830_v54 }
 0x322   : > { %4598 = vmatpush1.bf16.msra.mxu0 %v12960_v58  ;;  %4920 = vmatpush1.bf16.msra.mxu1 %v12961_v14 }
 0x323   : > { %4599 = vmatprep.subr.bf16.mxu0 %v10387_v17  ;;  %4921 = vmatprep.subr.bf16.mxu1 %v12962_v49 }
 0x326   : > { %4600 = vmatpush1.bf16.msra.mxu0 %v10409_v26  ;;  %4922 = vmatpush1.bf16.msra.mxu1 %v10412_v11  ;;  %v1502_v26 = vunpack.c.l.bf16 %v12832_v3  ;;  %v12965_v11 = vld [vmem:[#allocation42_spill] sm:$0xff] }
 0x327   : > { %4730 = vmatprep.subr.bf16.mxu0 %v10422_v29  ;;  %5052 = vmatprep.subr.bf16.mxu1 %v10425_v48  ;;  %v12966_v48 = vld [vmem:[#allocation49_spill] sm:$0xff] }
 0x328   : > { %4199 = vmatmul.mubr.bf16.gmra.mrb[32].mxu0 %v10055_v63  ;;  %4521 = vmatmul.mubr.bf16.gmra.mrb[32].mxu1 %v10055_v63  ;;  %v12963_v63 = vld [vmem:[#allocation41_spill] sm:$0xff]  ;;  %v1602_v28 = vsub.f32 %v12967_v40, %v1502_v26  ;;  %v1522_v26 = vunpack.c.h.bf16 %v12842_v24 }
 0x329   : > { %4208 = vmatprep.mubr.bf16.mxu0 %v10081_v31  ;;  %4530 = vmatprep.mubr.bf16.mxu1 %v10081_v31  ;;  %v1594_v31 = vsub.f32 %v12963_v63, %v1494_v5  ;;  %v1505_v5 = vunpack.c.h.bf16 %v12833_v62  ;;  %v1514_v63 = vunpack.c.h.bf16 %v12834_v50  ;;  %v12983_v40 = vld [vmem:[#allocation101_spill] sm:$0xff] }
 0x330   : > { %4209 = vmatmul.mubr.bf16.gmra.mrb[36].mxu0 %v10098_v33  ;;  %4531 = vmatmul.mubr.bf16.gmra.mrb[36].mxu1 %v10098_v33  ;;  %v12964_v33 = vld [vmem:[#allocation48_spill] sm:$0xff] }
 0x331   : > { %4218 = vmatprep.mubr.bf16.mxu0 %v10137_v57  ;;  %4540 = vmatprep.mubr.bf16.mxu1 %v10137_v57  ;;  %v1598_v57 = vsub.f32 %v12964_v33, %v1498_v59  ;;  %v1510_v59 = vunpack.c.l.bf16 %v12834_v50  ;;  %v12970_v33 = vld [vmem:[#allocation66_spill] sm:$0xff]  ;;  %v12972_v50 = vld [vmem:[#allocation75_spill] sm:$0xff] }
 0x333   : > { %v1694_v17 = vpack.c.bf16 %v1598_v57, %v1594_v31  ;;  %v1605_v57 = vsub.f32 %v12970_v33, %v1505_v5  ;;  %v12989_v5 = vld [vmem:[#allocation93_spill] sm:$0xff]  ;;  %v12992_v33 = vld [vmem:[#allocation202_spill] sm:$0xff] }
 0x338   : > { %4219 = vmatmul.mubr.bf16.gmra.mrb[40].mxu0 %v10168_v51  ;;  %4541 = vmatmul.mubr.bf16.gmra.mrb[40].mxu1 %v10168_v51  ;;  %v1493_v51 = vunpack.c.l.bf16 %v12831_v41 }
 0x339   : > { %4228 = vmatprep.mubr.bf16.mxu0 %v10204_v55  ;;  %4550 = vmatprep.mubr.bf16.mxu1 %v10204_v55  ;;  %v1497_v55 = vunpack.c.h.bf16 %v12831_v41 }
 0x33a   : > { %v1593_v29 = vsub.f32 %v12965_v11, %v1493_v51 }
 0x33b   : > { %v1597_v54 = vsub.f32 %v12966_v48, %v1497_v55  ;;  %v1614_v55 = vsub.f32 %v12972_v50, %v1514_v63  ;;  %v12990_v63 = vld [vmem:[#allocation118_spill] sm:$0xff] }
 0x33d   : > { %v1693_v49 = vpack.c.bf16 %v1597_v54, %v1593_v29  ;;  %v1526_v54 = vunpack.c.l.bf16 %v12852_v23 }
 0x340   : > { %4229 = vmatmul.mubr.bf16.gmra.mrb[44].mxu0 %v10208_v10  ;;  %4551 = vmatmul.mubr.bf16.gmra.mrb[44].mxu1 %v10208_v10  ;;  %v1506_v10 = vunpack.c.h.bf16 %v12832_v3 }
 0x341   : > { %4238 = vmatprep.mubr.bf16.mxu0 %v10518_v61  ;;  %4560 = vmatprep.mubr.bf16.mxu1 %v10518_v61 }
 0x342   : > { %v1606_v3 = vsub.f32 %v12968_v45, %v1506_v10  ;;  %v12975_v10 = vld [vmem:[#allocation88_spill] sm:$0xff]  ;;  %v12984_v45 = vld [vmem:[#allocation102_spill] sm:$0xff] }
 0x348   : > { %4239 = vmatmul.mubr.bf16.gmra.mrb[60].mxu0 %v10526_v42  ;;  %4561 = vmatmul.mubr.bf16.gmra.mrb[60].mxu1 %v10526_v42 }
 0x349   : > { %4601 = vmatprep.mubr.bf16.mxu0 %v1694_v17  ;;  %4923 = vmatprep.mubr.bf16.mxu1 %v1694_v17  ;;  %v1513_v17 = vunpack.c.h.bf16 %v12841_v15 }
 0x34b   : > { %v2956_v1 = vpop.f32.mrb[52].mxu0  ;;  %v3278_v39 = vpop.f32.mrb[52].mxu1 }
 0x34c   : > { %v10967_v4 = vadd.f32 %v2956_v1, %v10834_v18  ;;  %v10970_v41 = vadd.f32 %v3278_v39, %v10836_v46  ;;  %v2958_v32 = vpop.f32.mrb[53].mxu0  ;;  %v3280_v34 = vpop.f32.mrb[53].mxu1  ;;  %v1501_v46 = vunpack.c.l.bf16 %v12833_v62  ;;  %v12971_v62 = vld [vmem:[#allocation74_spill] sm:$0xff]  ;;  %v1530_v1 = vunpack.c.h.bf16 %v12852_v23 }
 0x34d   : > { %v10975_v22 = vadd.f32 %v2958_v32, %v10838_v37  ;;  %v10978_v9 = vadd.f32 %v3280_v34, %v10840_v52  ;;  %v2960_v56 = vpop.f32.mrb[54].mxu0  ;;  %v3282_v58 = vpop.f32.mrb[54].mxu1  ;;  %v1698_v37 = vpack.c.bf16 %v1606_v3, %v1602_v28  ;;  %v12969_v52 = vld [vmem:[#allocation65_spill] sm:$0xff]  ;;  %v1610_v51 = vsub.f32 %v12971_v62, %v1510_v59  ;;  %v12977_v39 = vld [vmem:[#allocation50_spill] sm:$0xff] }
 0x34e   : > { %v2961_v14 = vpop.f32.mrb[55].mxu0  ;;  %v3283_v18 = vpop.f32.mrb[55].mxu1  ;;  %v1601_v31 = vsub.f32 %v12969_v52, %v1501_v46  ;;  %v12978_v32 = vld [vmem:[#allocation53_spill] sm:$0xff]  ;;  %v12981_v34 = vld [vmem:[#allocation62_spill] sm:$0xff]  ;;  %v1626_v28 = vsub.f32 %v12983_v40, %v1526_v54  ;;  %v1630_v23 = vsub.f32 %v12984_v45, %v1530_v1  ;;  %v12986_v56 = vld [vmem:[#allocation200_spill] sm:$0xff]  ;;  %v1538_v52 = vunpack.c.h.bf16 %v12990_v63 }
 0x34f   : > { %v12985_v3 = vld [vmem:[#allocation78_spill] sm:$0xff]  ;;  %v12987_v14 = vld [vmem:[#allocation113_spill] sm:$0xff]  ;;  %v13006_v54 = vld [vmem:[#allocation208_spill] sm:$0xff] }
 0x350   : > { %4602 = vmatmul.mubr.bf16.vlgmr.msra.gmra.mrb[0].mxu0 %v1693_v49  ;;  %4924 = vmatmul.mubr.bf16.vlgmr.msra.gmra.mrb[0].mxu1 %v1693_v49  ;;  %v1525_v18 = vunpack.c.l.bf16 %v12987_v14  ;;  %v1529_v49 = vunpack.c.h.bf16 %v12987_v14  ;;  %v12988_v46 = vld [vmem:[#allocation86_spill] sm:$0xff]  ;;  %v1710_v59 = vpack.c.bf16 %v1630_v23, %v1626_v28  ;;  %v13013_v28 = vld [vmem:[#allocation211_spill] sm:$0xff]  ;;  %v13014_v45 = vld [vmem:[#allocation212_spill] sm:$0xff] }
 0x351   : > { %4731 = vmatpush1.bf16.msra.mxu0 %v10533_v35  ;;  %5053 = vmatpush1.bf16.msra.mxu1 %v10536_v7  ;;  %v1697_v35 = vpack.c.bf16 %v1605_v57, %v1601_v31  ;;  %v1509_v7 = vunpack.c.l.bf16 %v12841_v15  ;;  %v12976_v15 = vld [vmem:[#allocation90_spill] sm:$0xff]  ;;  %v12991_v31 = vld [vmem:[#allocation201_spill] sm:$0xff] }
 0x352   : > { %4611 = vmatprep.mubr.bf16.mxu0 %v1698_v37  ;;  %4933 = vmatprep.mubr.bf16.mxu1 %v1698_v37  ;;  %v1622_v29 = vsub.f32 %v12976_v15, %v1522_v26  ;;  %v1534_v37 = vunpack.c.l.bf16 %v12990_v63  ;;  %v12993_v57 = vld [vmem:[#allocation110_spill] sm:$0xff]  ;;  %v12999_v26 = vld [vmem:[#allocation205_spill] sm:$0xff]  ;;  %v13019_v63 = vld [vmem:[#allocation215_spill] sm:$0xff] }
 0x353   : > { %4732 = vmatprep.subr.bf16.mxu0 %v10539_v30  ;;  %5054 = vmatprep.subr.bf16.mxu1 %v10542_v0  ;;  %v1702_v30 = vpack.c.bf16 %v1614_v55, %v1610_v51  ;;  %v1518_v0 = vunpack.c.l.bf16 %v12842_v24  ;;  %v1625_v62 = vsub.f32 %v12993_v57, %v1525_v18  ;;  %v12994_v51 = vld [vmem:[#allocation111_spill] sm:$0xff]  ;;  %v13003_v15 = vld [vmem:[#allocation106_spill] sm:$0xff]  ;;  %v13016_v14 = vld [vmem:[#allocation213_spill] sm:$0xff] }
 0x354   : > { %v1629_v50 = vsub.f32 %v12994_v51, %v1529_v49  ;;  %v12995_v55 = vld [vmem:[#allocation203_spill] sm:$0xff]  ;;  %v13007_v1 = vld [vmem:[#allocation122_spill] sm:$0xff] }
 0x355   : > { %4733 = vmatpush1.bf16.msra.mxu0 %v10549_v12  ;;  %5055 = vmatpush1.bf16.msra.mxu1 %v10552_v60  ;;  %v12973_v12 = vld [vmem:[#allocation80_spill] sm:$0xff]  ;;  %v1618_v11 = vsub.f32 %v12975_v10, %v1518_v0  ;;  %v13017_v18 = vld [vmem:[#allocation214_spill] sm:$0xff] }
 0x356   : > { %4734 = vmatprep.subr.bf16.mxu0 %v10557_v6  ;;  %5056 = vmatprep.subr.bf16.mxu1 %v10560_v53  ;;  %v1609_v60 = vsub.f32 %v12973_v12, %v1509_v7  ;;  %v12974_v6 = vld [vmem:[#allocation81_spill] sm:$0xff]  ;;  %v12997_v7 = vld [vmem:[#allocation116_spill] sm:$0xff]  ;;  %v13000_v12 = vld [vmem:[#allocation206_spill] sm:$0xff] }
 0x357   : > { %v1613_v53 = vsub.f32 %v12974_v6, %v1513_v17  ;;  %v1706_v48 = vpack.c.bf16 %v1622_v29, %v1618_v11  ;;  %v1634_v17 = vsub.f32 %v12997_v7, %v1534_v37  ;;  %v13001_v6 = vld [vmem:[#allocation125_spill] sm:$0xff]  ;;  %v13002_v11 = vld [vmem:[#allocation100_spill] sm:$0xff]  ;;  %v13024_v51 = vld [vmem:[#allocation218_spill] sm:$0xff] }
 0x358   : > { %4612 = vmatmul.mubr.bf16.gmra.mrb[4].mxu0 %v1697_v35  ;;  %4934 = vmatmul.mubr.bf16.gmra.mrb[4].mxu1 %v1697_v35  ;;  %v12996_v35 = vld [vmem:[#allocation204_spill] sm:$0xff]  ;;  %v1537_v10 = vunpack.c.h.bf16 %v13001_v6 }
 0x359   : > { %4621 = vmatprep.mubr.bf16.mxu0 %v1702_v30  ;;  %4943 = vmatprep.mubr.bf16.mxu1 %v1702_v30  ;;  %v1701_v24 = vpack.c.bf16 %v1613_v53, %v1609_v60  ;;  %v12998_v30 = vld [vmem:[#allocation117_spill] sm:$0xff]  ;;  %v1709_v60 = vpack.c.bf16 %v1629_v50, %v1625_v62  ;;  %v1533_v53 = vunpack.c.l.bf16 %v13001_v6  ;;  %v13020_v37 = vld [vmem:[#allocation216_spill] sm:$0xff]  ;;  %v13025_v50 = vld [vmem:[#allocation138_spill] sm:$0xff] }
 0x35a   : > { %4735 = vmatpush1.bf16.msra.mxu0 %v10567_v13  ;;  %5057 = vmatpush1.bf16.msra.mxu1 %v10571_v47  ;;  %v1517_v13 = vunpack.c.l.bf16 %v12851_v27  ;;  %v1521_v47 = vunpack.c.h.bf16 %v12851_v27  ;;  %v12982_v27 = vld [vmem:[#allocation68_spill] sm:$0xff]  ;;  %v1638_v0 = vsub.f32 %v12998_v30, %v1538_v52  ;;  %v13021_v52 = vld [vmem:[#allocation133_spill] sm:$0xff] }
 0x35b   : > { %4736 = vmatprep.subr.bf16.mxu0 %v10575_v25  ;;  %5058 = vmatprep.subr.bf16.mxu1 %v10578_v19  ;;  %v12979_v25 = vld [vmem:[#allocation96_spill] sm:$0xff]  ;;  %v13023_v62 = vld [vmem:[#allocation217_spill] sm:$0xff] }
 0x35c   : > { %v1617_v19 = vsub.f32 %v12979_v25, %v1517_v13  ;;  %v1714_v29 = vpack.c.bf16 %v1638_v0, %v1634_v17  ;;  %v13027_v17 = vld [vmem:[#allocation219_spill] sm:$0xff]  ;;  %v13028_v30 = vld [vmem:[#allocation220_spill] sm:$0xff]  ;;  %v13030_v6 = vld [vmem:[#allocation221_spill] sm:$0xff] }
 0x35e   : > { %4737 = vmatpush1.bf16.msra.mxu0 %v10587_v20  ;;  %5059 = vmatpush1.bf16.msra.mxu1 %v10590_v43  ;;  %v12980_v20 = vld [vmem:[#allocation98_spill] sm:$0xff] }
 0x35f   : > { %4738 = vmatprep.subr.bf16.mxu0 %v12977_v39  ;;  %5060 = vmatprep.subr.bf16.mxu1 %v12978_v32  ;;  %v1621_v43 = vsub.f32 %v12980_v20, %v1521_v47  ;;  %v1633_v39 = vsub.f32 %v13007_v1, %v1533_v53  ;;  %v13008_v32 = vld [vmem:[#allocation123_spill] sm:$0xff]  ;;  %v13010_v20 = vld [vmem:[#allocation210_spill] sm:$0xff] }
 0x360   : > { %4622 = vmatmul.mubr.bf16.gmra.mrb[8].mxu0 %v1701_v24  ;;  %4944 = vmatmul.mubr.bf16.gmra.mrb[8].mxu1 %v1701_v24  ;;  %v13004_v24 = vld [vmem:[#allocation131_spill] sm:$0xff]  ;;  %v1637_v25 = vsub.f32 %v13008_v32, %v1537_v10  ;;  %v13031_v53 = vld [vmem:[#allocation222_spill] sm:$0xff] }
 0x361   : > { %4631 = vmatprep.mubr.bf16.mxu0 %v1706_v48  ;;  %4953 = vmatprep.mubr.bf16.mxu1 %v1706_v48  ;;  %v1705_v58 = vpack.c.bf16 %v1621_v43, %v1617_v19  ;;  %v1542_v13 = vunpack.c.l.bf16 %v13004_v24  ;;  %v1546_v47 = vunpack.c.h.bf16 %v13004_v24  ;;  %v13005_v48 = vld [vmem:[#allocation207_spill] sm:$0xff]  ;;  %v13009_v19 = vld [vmem:[#allocation209_spill] sm:$0xff]  ;;  %v13011_v43 = vld [vmem:[#allocation128_spill] sm:$0xff] }
 0x362   : > { %4739 = vmatpush1.bf16.msra.mxu0 %v12981_v34  ;;  %5061 = vmatpush1.bf16.msra.mxu1 %v12982_v27  ;;  %v13012_v27 = vld [vmem:[#allocation129_spill] sm:$0xff]  ;;  %v1713_v23 = vpack.c.bf16 %v1637_v25, %v1633_v39  ;;  %v13033_v24 = vld [vmem:[#allocation223_spill] sm:$0xff]  ;;  %v13038_v32 = vld [vmem:[#allocation226_spill] sm:$0xff] }
 0x363   : > { %4740 = vmatprep.subr.bf16.mxu0 %v12985_v3  ;;  %5062 = vmatprep.subr.bf16.mxu1 %v12986_v56  ;;  %v1642_v34 = vsub.f32 %v13011_v43, %v1542_v13  ;;  %v1646_v40 = vsub.f32 %v13012_v27, %v1546_v47  ;;  %v13015_v3 = vld [vmem:[#allocation135_spill] sm:$0xff]  ;;  %v13034_v13 = vld [vmem:[#allocation224_spill] sm:$0xff]  ;;  %v13037_v39 = vld [vmem:[#allocation225_spill] sm:$0xff] }
 0x364   : > { %v1541_v56 = vunpack.c.l.bf16 %v13015_v3  ;;  %v13035_v47 = vld [vmem:[#allocation143_spill] sm:$0xff]  ;;  %v13039_v25 = vld [vmem:[#allocation146_spill] sm:$0xff]  ;;  %v13042_v27 = vld [vmem:[#allocation228_spill] sm:$0xff] }
 0x365   : > { %v1718_v49 = vpack.c.bf16 %v1646_v40, %v1642_v34  ;;  %v13041_v34 = vld [vmem:[#allocation227_spill] sm:$0xff] }
 0x366   : > { %4741 = vmatpush1.bf16.msra.mxu0 %v12988_v46  ;;  %5063 = vmatpush1.bf16.msra.mxu1 %v12989_v5  ;;  %v13018_v46 = vld [vmem:[#allocation142_spill] sm:$0xff] }
 0x367   : > { %4742 = vmatprep.subr.bf16.mxu0 %v12991_v31  ;;  %5064 = vmatprep.subr.bf16.mxu1 %v12992_v33  ;;  %v1550_v5 = vunpack.c.l.bf16 %v13018_v46  ;;  %v1641_v31 = vsub.f32 %v13021_v52, %v1541_v56  ;;  %v13022_v33 = vld [vmem:[#allocation134_spill] sm:$0xff] }
 0x368   : > { %4632 = vmatmul.mubr.bf16.gmra.mrb[12].mxu0 %v1705_v58  ;;  %4954 = vmatmul.mubr.bf16.gmra.mrb[12].mxu1 %v1705_v58  ;;  %v1545_v58 = vunpack.c.h.bf16 %v13015_v3  ;;  %v13044_v3 = vld [vmem:[#allocation229_spill] sm:$0xff]  ;;  %v13045_v56 = vld [vmem:[#allocation230_spill] sm:$0xff] }
 0x369   : > { %4641 = vmatprep.mubr.bf16.mxu0 %v1710_v59  ;;  %4963 = vmatprep.mubr.bf16.mxu1 %v1710_v59  ;;  %v1554_v59 = vunpack.c.h.bf16 %v13018_v46  ;;  %v13047_v46 = vld [vmem:[#allocation231_spill] sm:$0xff] }
 0x36a   : > { %4743 = vmatpush1.bf16.msra.mxu0 %v12995_v55  ;;  %5065 = vmatpush1.bf16.msra.mxu1 %v12996_v35  ;;  %v1645_v57 = vsub.f32 %v13022_v33, %v1545_v58  ;;  %v1650_v55 = vsub.f32 %v13025_v50, %v1550_v5  ;;  %v13026_v35 = vld [vmem:[#allocation139_spill] sm:$0xff]  ;;  %v13048_v5 = vld [vmem:[#allocation232_spill] sm:$0xff]  ;;  %v13052_v33 = vld [vmem:[#allocation234_spill] sm:$0xff] }
 0x36b   : > { %4744 = vmatprep.subr.bf16.mxu0 %v12999_v26  ;;  %5066 = vmatprep.subr.bf16.mxu1 %v13000_v12  ;;  %v1654_v7 = vsub.f32 %v13026_v35, %v1554_v59  ;;  %v13029_v26 = vld [vmem:[#allocation145_spill] sm:$0xff]  ;;  %v13056_v35 = vld [vmem:[#allocation236_spill] sm:$0xff] }
 0x36c   : > { %v1717_v0 = vpack.c.bf16 %v1645_v57, %v1641_v31  ;;  %v1549_v12 = vunpack.c.l.bf16 %v13029_v26  ;;  %v13049_v59 = vld [vmem:[#allocation149_spill] sm:$0xff]  ;;  %v13053_v57 = vld [vmem:[#allocation152_spill] sm:$0xff] }
 0x36d   : > { %v1722_v10 = vpack.c.bf16 %v1654_v7, %v1650_v55  ;;  %v13051_v31 = vld [vmem:[#allocation233_spill] sm:$0xff]  ;;  %v13055_v55 = vld [vmem:[#allocation235_spill] sm:$0xff] }
 0x36e   : > { %4745 = vmatpush1.bf16.msra.mxu0 %v13002_v11  ;;  %5067 = vmatpush1.bf16.msra.mxu1 %v13003_v15  ;;  %v13032_v11 = vld [vmem:[#allocation148_spill] sm:$0xff] }
 0x36f   : > { %4746 = vmatprep.subr.bf16.mxu0 %v13005_v48  ;;  %5068 = vmatprep.subr.bf16.mxu1 %v13006_v54  ;;  %v1558_v15 = vunpack.c.l.bf16 %v13032_v11  ;;  %v1649_v48 = vsub.f32 %v13035_v47, %v1549_v12  ;;  %v13036_v54 = vld [vmem:[#allocation144_spill] sm:$0xff]  ;;  %v13059_v12 = vld [vmem:[#allocation238_spill] sm:$0xff] }
 0x370   : > { %4642 = vmatmul.mubr.bf16.gmra.mrb[16].mxu0 %v1709_v60  ;;  %4964 = vmatmul.mubr.bf16.gmra.mrb[16].mxu1 %v1709_v60  ;;  %v1553_v60 = vunpack.c.h.bf16 %v13029_v26  ;;  %v13058_v26 = vld [vmem:[#allocation237_spill] sm:$0xff] }
 0x371   : > { %4651 = vmatprep.mubr.bf16.mxu0 %v1714_v29  ;;  %4973 = vmatprep.mubr.bf16.mxu1 %v1714_v29  ;;  %v1562_v29 = vunpack.c.h.bf16 %v13032_v11  ;;  %v13061_v11 = vld [vmem:[#allocation154_spill] sm:$0xff] }
 0x372   : > { %4747 = vmatpush1.bf16.msra.mxu0 %v13009_v19  ;;  %5069 = vmatpush1.bf16.msra.mxu1 %v13010_v20  ;;  %v1653_v1 = vsub.f32 %v13036_v54, %v1553_v60  ;;  %v1658_v19 = vsub.f32 %v13039_v25, %v1558_v15  ;;  %v13040_v20 = vld [vmem:[#allocation147_spill] sm:$0xff] }
 0x373   : > { %4748 = vmatprep.subr.bf16.mxu0 %v13013_v28  ;;  %5070 = vmatprep.subr.bf16.mxu1 %v13014_v45  ;;  %v1662_v43 = vsub.f32 %v13040_v20, %v1562_v29  ;;  %v13043_v28 = vld [vmem:[#allocation151_spill] sm:$0xff]  ;;  %v13066_v20 = vld [vmem:[#allocation30_spill] sm:$0xff] }
 0x374   : > { %v1721_v40 = vpack.c.bf16 %v1653_v1, %v1649_v48  ;;  %v1557_v45 = vunpack.c.l.bf16 %v13043_v28  ;;  %v13062_v29 = vld [vmem:[#allocation155_spill] sm:$0xff] }
 0x375   : > { %v1726_v58 = vpack.c.bf16 %v1662_v43, %v1658_v19  ;;  %v13064_v48 = vld [vmem:[#allocation159_spill] sm:$0xff]  ;;  %v1582_v43 = vunpack.c.l.bf16 %v13066_v20 }
 0x376   : > { %4749 = vmatpush1.bf16.msra.mxu0 %v13016_v14  ;;  %5071 = vmatpush1.bf16.msra.mxu1 %v13017_v18  ;;  %v13046_v14 = vld [vmem:[#allocation156_spill] sm:$0xff] }
 0x377   : > { %4750 = vmatprep.subr.bf16.mxu0 %v13019_v63  ;;  %5072 = vmatprep.subr.bf16.mxu1 %v13020_v37  ;;  %v1566_v18 = vunpack.c.l.bf16 %v13046_v14  ;;  %v1657_v63 = vsub.f32 %v13049_v59, %v1557_v45  ;;  %v13050_v37 = vld [vmem:[#allocation150_spill] sm:$0xff]  ;;  %v13072_v59 = vld [vmem:[#allocation35_spill] sm:$0xff] }
 0x378   : > { %4652 = vmatmul.mubr.bf16.gmra.mrb[20].mxu0 %v1713_v23  ;;  %4974 = vmatmul.mubr.bf16.gmra.mrb[20].mxu1 %v1713_v23  ;;  %v1561_v23 = vunpack.c.h.bf16 %v13043_v28  ;;  %v13068_v28 = vld [vmem:[#allocation163_spill] sm:$0xff] }
 0x379   : > { %4661 = vmatprep.mubr.bf16.mxu0 %v1718_v49  ;;  %4983 = vmatprep.mubr.bf16.mxu1 %v1718_v49  ;;  %v1570_v49 = vunpack.c.h.bf16 %v13046_v14 }
 0x37a   : > { %4751 = vmatpush1.bf16.msra.mxu0 %v13023_v62  ;;  %5073 = vmatpush1.bf16.msra.mxu1 %v13024_v51  ;;  %v1661_v52 = vsub.f32 %v13050_v37, %v1561_v23  ;;  %v1666_v62 = vsub.f32 %v13053_v57, %v1566_v18  ;;  %v13054_v51 = vld [vmem:[#allocation153_spill] sm:$0xff]  ;;  %v13069_v23 = vld [vmem:[#allocation166_spill] sm:$0xff]  ;;  %v13073_v37 = vld [vmem:[#allocation168_spill] sm:$0xff] }
 0x37b   : > { %4752 = vmatprep.subr.bf16.mxu0 %v13027_v17  ;;  %5074 = vmatprep.subr.bf16.mxu1 %v13028_v30  ;;  %v1670_v50 = vsub.f32 %v13054_v51, %v1570_v49  ;;  %v13057_v17 = vld [vmem:[#allocation158_spill] sm:$0xff]  ;;  %v13071_v18 = vld [vmem:[#allocation37_spill] sm:$0xff]  ;;  %v13075_v57 = vld [vmem:[#allocation31_spill] sm:$0xff] }
 0x37c   : > { %v1725_v7 = vpack.c.bf16 %v1661_v52, %v1657_v63  ;;  %v1565_v30 = vunpack.c.l.bf16 %v13057_v17  ;;  %v1581_v49 = vunpack.c.l.bf16 %v13071_v18  ;;  %v1590_v63 = vunpack.c.l.bf16 %v13072_v59  ;;  %v13087_v59 = vld [vmem:[#allocation56_spill] sm:$0xff] }
 0x37d   : > { %v1730_v60 = vpack.c.bf16 %v1670_v50, %v1666_v62  ;;  %v13076_v50 = vld [vmem:[#allocation39_spill] sm:$0xff] }
 0x37e   : > { %4753 = vmatpush1.bf16.msra.mxu0 %v13030_v6  ;;  %5075 = vmatpush1.bf16.msra.mxu1 %v13031_v53  ;;  %v13060_v6 = vld [vmem:[#allocation161_spill] sm:$0xff]  ;;  %v1665_v15 = vsub.f32 %v13061_v11, %v1565_v30  ;;  %v1681_v52 = vsub.f32 %v13073_v37, %v1581_v49  ;;  %v1690_v62 = vsub.f32 %v13075_v57, %v1590_v63  ;;  %v1503_v49 = vunpack.c.l.bf16 %v12911_v38  ;;  %v13088_v37 = vld [vmem:[#allocation36_spill] sm:$0xff] }
 0x37f   : > { %4754 = vmatprep.subr.bf16.mxu0 %v13033_v24  ;;  %5076 = vmatprep.subr.bf16.mxu1 %v13034_v13  ;;  %v1574_v53 = vunpack.c.l.bf16 %v13060_v6  ;;  %v13063_v13 = vld [vmem:[#allocation157_spill] sm:$0xff] }
 0x380   : > { %4662 = vmatmul.mubr.bf16.gmra.mrb[24].mxu0 %v1717_v0  ;;  %4984 = vmatmul.mubr.bf16.gmra.mrb[24].mxu1 %v1717_v0  ;;  %v1569_v0 = vunpack.c.h.bf16 %v13057_v17  ;;  %v13081_v11 = vld [vmem:[#allocation61_spill] sm:$0xff] }
 0x381   : > { %4671 = vmatprep.mubr.bf16.mxu0 %v1722_v10  ;;  %4993 = vmatprep.mubr.bf16.mxu1 %v1722_v10  ;;  %v1578_v10 = vunpack.c.h.bf16 %v13060_v6  ;;  %v1674_v47 = vsub.f32 %v13063_v13, %v1574_v53  ;;  %v13080_v6 = vld [vmem:[#allocation164_spill] sm:$0xff]  ;;  %v1504_v13 = vunpack.c.l.bf16 %v12906_v16 }
 0x382   : > { %4755 = vmatpush1.bf16.msra.mxu0 %v13037_v39  ;;  %5077 = vmatpush1.bf16.msra.mxu1 %v13038_v32  ;;  %v1669_v24 = vsub.f32 %v13062_v29, %v1569_v0  ;;  %v13065_v39 = vld [vmem:[#allocation165_spill] sm:$0xff]  ;;  %v13078_v0 = vld [vmem:[#allocation40_spill] sm:$0xff]  ;;  %v1499_v29 = vunpack.c.h.bf16 %v13081_v11 }
 0x383   : > { %4756 = vmatprep.subr.bf16.mxu0 %v13041_v34  ;;  %5078 = vmatprep.subr.bf16.mxu1 %v13042_v27  ;;  %v1678_v54 = vsub.f32 %v13064_v48, %v1578_v10  ;;  %v1573_v32 = vunpack.c.l.bf16 %v13065_v39  ;;  %v1577_v25 = vunpack.c.h.bf16 %v13065_v39  ;;  %v1586_v34 = vunpack.c.h.bf16 %v13066_v20  ;;  %v13067_v27 = vld [vmem:[#allocation162_spill] sm:$0xff]  ;;  %v13082_v48 = vld [vmem:[#allocation169_spill] sm:$0xff] }
 0x384   : > { %v1729_v1 = vpack.c.bf16 %v1669_v24, %v1665_v15  ;;  %v1495_v15 = vunpack.c.l.bf16 %v13081_v11  ;;  %v13094_v11 = vld [vmem:[#allocation43_spill] sm:$0xff] }
 0x385   : > { %v1734_v19 = vpack.c.bf16 %v1678_v54, %v1674_v47  ;;  %v1677_v45 = vsub.f32 %v13068_v28, %v1577_v25  ;;  %v1508_v47 = vunpack.c.h.bf16 %v12906_v16 }
 0x386   : > { %4757 = vmatpush1.bf16.msra.mxu0 %v13044_v3  ;;  %5079 = vmatpush1.bf16.msra.mxu1 %v13045_v56  ;;  %v1682_v3 = vsub.f32 %v13069_v23, %v1582_v43  ;;  %v13070_v56 = vld [vmem:[#allocation167_spill] sm:$0xff]  ;;  %v1595_v54 = vsub.f32 %v13082_v48, %v1495_v15  ;;  %v13085_v43 = vld [vmem:[#allocation32_spill] sm:$0xff] }
 0x387   : > { %4758 = vmatprep.subr.bf16.mxu0 %v13047_v46  ;;  %5080 = vmatprep.subr.bf16.mxu1 %v13048_v5  ;;  %v1585_v46 = vunpack.c.h.bf16 %v13071_v18  ;;  %v13097_v48 = vld [vmem:[#allocation51_spill] sm:$0xff] }
 0x388   : > { %4672 = vmatmul.mubr.bf16.gmra.mrb[28].mxu0 %v1721_v40  ;;  %4994 = vmatmul.mubr.bf16.gmra.mrb[28].mxu1 %v1721_v40  ;;  %v1673_v40 = vsub.f32 %v13067_v27, %v1573_v32 }
 0x389   : > { %4681 = vmatprep.mubr.bf16.mxu0 %v1726_v58  ;;  %5003 = vmatprep.mubr.bf16.mxu1 %v1726_v58  ;;  %v1686_v58 = vsub.f32 %v13070_v56, %v1586_v34  ;;  %v1608_v34 = vsub.f32 %v13085_v43, %v1508_v47  ;;  %v13104_v43 = vld [vmem:[#allocation94_spill] sm:$0xff] }
 0x38a   : > { %4759 = vmatpush1.bf16.msra.mxu0 %v13051_v31  ;;  %5081 = vmatpush1.bf16.msra.mxu1 %v13052_v33  ;;  %v1733_v14 = vpack.c.bf16 %v1677_v45, %v1673_v40  ;;  %v13074_v31 = vld [vmem:[#allocation44_spill] sm:$0xff] }
 0x38b   : > { %4760 = vmatprep.subr.bf16.mxu0 %v13055_v55  ;;  %5082 = vmatprep.subr.bf16.mxu1 %v13056_v35  ;;  %v1738_v5 = vpack.c.bf16 %v1686_v58, %v1682_v3  ;;  %v1685_v33 = vsub.f32 %v13074_v31, %v1585_v46  ;;  %v1589_v55 = vunpack.c.l.bf16 %v13076_v50  ;;  %v1742_v35 = vpack.c.bf16 %v1690_v62, %v1690_v62  ;;  %v13089_v31 = vld [vmem:[#allocation172_spill] sm:$0xff] }
 0x38c   : > { %v1515_v62 = vunpack.c.h.bf16 %v9801_v44  ;;  %v1524_v50 = vunpack.c.h.bf16 %v9838_v8 }
 0x38d   : > { %v1737_v51 = vpack.c.bf16 %v1685_v33, %v1681_v52 }
 0x38e   : > { %4761 = vmatpush1.bf16.msra.mxu0 %v13058_v26  ;;  %5083 = vmatpush1.bf16.msra.mxu1 %v13059_v12  ;;  %v1689_v26 = vsub.f32 %v13078_v0, %v1589_v55  ;;  %v13079_v12 = vld [vmem:[#allocation160_spill] sm:$0xff]  ;;  %v13090_v55 = vld [vmem:[#allocation46_spill] sm:$0xff] }
 0x390   : > { %4682 = vmatmul.mubr.bf16.gmra.mrb[32].mxu0 %v1725_v7  ;;  %5004 = vmatmul.mubr.bf16.gmra.mrb[32].mxu1 %v1725_v7  ;;  %v13077_v7 = vld [vmem:[#allocation34_spill] sm:$0xff]  ;;  %v1741_v10 = vpack.c.bf16 %v1689_v26, %v1689_v26 }
 0x391   : > { %4691 = vmatprep.mubr.bf16.mxu0 %v1730_v60  ;;  %5013 = vmatprep.mubr.bf16.mxu1 %v1730_v60  ;;  %v1496_v17 = vunpack.c.l.bf16 %v13077_v7  ;;  %v1500_v30 = vunpack.c.h.bf16 %v13077_v7  ;;  %v13091_v7 = vld [vmem:[#allocation38_spill] sm:$0xff] }
 0x392   : > { %v13093_v26 = vld [vmem:[#allocation54_spill] sm:$0xff] }
 0x393   : > { %v1596_v60 = vsub.f32 %v13079_v12, %v1496_v17  ;;  %v1600_v53 = vsub.f32 %v13080_v6, %v1500_v30  ;;  %v1615_v17 = vsub.f32 %v13091_v7, %v1515_v62  ;;  %v13092_v30 = vld [vmem:[#allocation70_spill] sm:$0xff]  ;;  %v1624_v12 = vsub.f32 %v13093_v26, %v1524_v50  ;;  %v13123_v26 = vld [vmem:[#allocation29_spill] sm:$0xff] }
 0x394   : > { %v1523_v6 = vunpack.c.h.bf16 %v12923_v2 }
 0x395   : > { %v1696_v24 = vpack.c.bf16 %v1600_v53, %v1596_v60 }
 0x398   : > { %4692 = vmatmul.mubr.bf16.gmra.mrb[36].mxu0 %v1729_v1  ;;  %5014 = vmatmul.mubr.bf16.gmra.mrb[36].mxu1 %v1729_v1  ;;  %v13083_v1 = vld [vmem:[#allocation170_spill] sm:$0xff] }
 0x399   : > { %4701 = vmatprep.mubr.bf16.mxu0 %v1734_v19  ;;  %5023 = vmatprep.mubr.bf16.mxu1 %v1734_v19  ;;  %v1599_v39 = vsub.f32 %v13083_v1, %v1499_v29  ;;  %v13084_v19 = vld [vmem:[#allocation47_spill] sm:$0xff]  ;;  %v13095_v29 = vld [vmem:[#allocation73_spill] sm:$0xff] }
 0x39a   : > { %v1604_v20 = vsub.f32 %v13084_v19, %v1504_v13  ;;  %v13096_v13 = vld [vmem:[#allocation52_spill] sm:$0xff] }
 0x39b   : > { %v1695_v18 = vpack.c.bf16 %v1599_v39, %v1595_v54  ;;  %v13102_v19 = vld [vmem:[#allocation72_spill] sm:$0xff] }
 0x39c   : > { %v1700_v46 = vpack.c.bf16 %v1608_v34, %v1604_v20  ;;  %v13103_v20 = vld [vmem:[#allocation63_spill] sm:$0xff] }
 0x39d   : > { %v13105_v34 = vld [vmem:[#allocation79_spill] sm:$0xff] }
 0x3a0   : > { %4702 = vmatmul.mubr.bf16.gmra.mrb[40].mxu0 %v1733_v14  ;;  %5024 = vmatmul.mubr.bf16.gmra.mrb[40].mxu1 %v1733_v14 }
 0x3a1   : > { %4711 = vmatprep.mubr.bf16.mxu0 %v1738_v5  ;;  %5033 = vmatprep.mubr.bf16.mxu1 %v1738_v5  ;;  %v1516_v5 = vunpack.c.h.bf16 %v12912_v36 }
 0x3a3   : > { %v1616_v33 = vsub.f32 %v13089_v31, %v1516_v5  ;;  %v13113_v5 = vld [vmem:[#allocation199_spill] sm:$0xff] }
 0x3a8   : > { %4712 = vmatmul.mubr.bf16.gmra.mrb[44].mxu0 %v1737_v51  ;;  %5034 = vmatmul.mubr.bf16.gmra.mrb[44].mxu1 %v1737_v51 }
 0x3a9   : > { %4721 = vmatprep.mubr.bf16.mxu0 %v1742_v35  ;;  %5043 = vmatprep.mubr.bf16.mxu1 %v1742_v35 }
 0x3b0   : > { %4722 = vmatmul.mubr.bf16.gmra.mrb[64].mxu0 %v1741_v10  ;;  %5044 = vmatmul.mubr.bf16.gmra.mrb[64].mxu1 %v1741_v10  ;;  %v1532_v10 = vunpack.c.h.bf16 %v12924_v21 }
 0x3b1   : > { %4762 = vmatprep.mubr.bf16.mxu0 %v1696_v24  ;;  %5084 = vmatprep.mubr.bf16.mxu1 %v1696_v24  ;;  %v1623_v24 = vsub.f32 %v13095_v29, %v1523_v6  ;;  %v13125_v6 = vld [vmem:[#allocation28_spill] sm:$0xff] }
 0x3b2   : > { %v1632_v54 = vsub.f32 %v13097_v48, %v1532_v10 }
 0x3b3   : > { %v4079_v32 = vpop.f32.mrb[56].mxu0  ;;  %v4401_v25 = vpop.f32.mrb[56].mxu1 }
 0x3b4   : > { %v11143_v27 = vadd.f32 %v4079_v32, %v10967_v4  ;;  %v11146_v40 = vadd.f32 %v4401_v25, %v10970_v41  ;;  %v4081_v16 = vpop.f32.mrb[57].mxu0  ;;  %v4403_v28 = vpop.f32.mrb[57].mxu1  ;;  %v1507_v4 = vunpack.c.h.bf16 %v12911_v38  ;;  %v1512_v41 = vunpack.c.l.bf16 %v12912_v36  ;;  %v13100_v32 = vld [vmem:[#allocation87_spill] sm:$0xff]  ;;  %v13101_v25 = vld [vmem:[#allocation192_spill] sm:$0xff] }
 0x3b5   : > { %v11149_v45 = vadd.f32 %v4081_v16, %v10975_v22  ;;  %v11152_v23 = vadd.f32 %v4403_v28, %v10978_v9  ;;  %v4083_v3 = vpop.f32.mrb[58].mxu0  ;;  %v4405_v56 = vpop.f32.mrb[58].mxu1  ;;  %v13086_v22 = vld [vmem:[#allocation33_spill] sm:$0xff]  ;;  %v1511_v38 = vunpack.c.l.bf16 %v9801_v44  ;;  %v1520_v36 = vunpack.c.l.bf16 %v9838_v8  ;;  %v13107_v28 = vld [vmem:[#allocation194_spill] sm:$0xff] }
 0x3b6   : > { %v4084_v58 = vpop.f32.mrb[59].mxu0  ;;  %v4406_v14 = vpop.f32.mrb[59].mxu1  ;;  %v1603_v9 = vsub.f32 %v13086_v22, %v1503_v49  ;;  %v1607_v63 = vsub.f32 %v13087_v59, %v1507_v4  ;;  %v1612_v52 = vsub.f32 %v13088_v37, %v1512_v41  ;;  %v1519_v44 = vunpack.c.l.bf16 %v12923_v2  ;;  %v13098_v2 = vld [vmem:[#allocation83_spill] sm:$0xff]  ;;  %v13106_v16 = vld [vmem:[#allocation193_spill] sm:$0xff]  ;;  %v13109_v56 = vld [vmem:[#allocation196_spill] sm:$0xff] }
 0x3b7   : > { %v1611_v35 = vsub.f32 %v13090_v55, %v1511_v38  ;;  %v1620_v0 = vsub.f32 %v13092_v30, %v1520_v36  ;;  %v1528_v8 = vunpack.c.l.bf16 %v12924_v21  ;;  %v13099_v21 = vld [vmem:[#allocation67_spill] sm:$0xff]  ;;  %v1592_v58 = vunpack.c.l.bf16 %v10518_v61  ;;  %v13110_v14 = vld [vmem:[#allocation197_spill] sm:$0xff]  ;;  %v13112_v49 = vld [vmem:[#allocation84_spill] sm:$0xff] }
 0x3b8   : > { %4763 = vmatmul.mubr.bf16.vlgmr.msra.gmra.mrb[0].mxu0 %v1695_v18  ;;  %5085 = vmatmul.mubr.bf16.vlgmr.msra.gmra.mrb[0].mxu1 %v1695_v18  ;;  %v1699_v57 = vpack.c.bf16 %v1607_v63, %v1603_v9  ;;  %v1704_v51 = vpack.c.bf16 %v1616_v33, %v1612_v52  ;;  %v1619_v15 = vsub.f32 %v13094_v11, %v1519_v44  ;;  %v13108_v3 = vld [vmem:[#allocation195_spill] sm:$0xff]  ;;  %v13111_v18 = vld [vmem:[#allocation198_spill] sm:$0xff]  ;;  %v13114_v61 = vld [vmem:[#allocation105_spill] sm:$0xff] }
 0x3b9   : > { %4772 = vmatprep.mubr.bf16.mxu0 %v1700_v46  ;;  %5094 = vmatprep.mubr.bf16.mxu1 %v1700_v46  ;;  %v1703_v60 = vpack.c.bf16 %v1615_v17, %v1611_v35  ;;  %v1708_v53 = vpack.c.bf16 %v1624_v12, %v1620_v0  ;;  %v1628_v47 = vsub.f32 %v13096_v13, %v1528_v8  ;;  %v1591_v46 = vunpack.c.l.bf16 %v10526_v42  ;;  %v5313_v17 = vld [vmem:[%s8379_s6] sm:$0xf]  ;;  %v13122_v0 = vld [vmem:[#allocation27_spill] sm:$0xff] }
 0x3ba   : > { %v1707_v1 = vpack.c.bf16 %v1623_v24, %v1619_v15  ;;  %v1692_v4 = vsub.f32 %v13112_v49, %v1592_v58  ;;  %v11237_v12 = vrot.slane %v5313_v17, %v13123_v26 }
 0x3bb   : > { %v1712_v39 = vpack.c.bf16 %v1632_v54, %v1628_v47  ;;  %v1691_v22 = vsub.f32 %v13114_v61, %v1591_v46 }
 0x3bc   : > { %v1744_v41 = vpack.c.bf16 %v1692_v4, %v1692_v4 }
 0x3bd   : > { %v1743_v9 = vpack.c.bf16 %v1691_v22, %v1691_v22 }
 0x3c0   : > { %4773 = vmatmul.mubr.bf16.gmra.mrb[4].mxu0 %v1699_v57  ;;  %5095 = vmatmul.mubr.bf16.gmra.mrb[4].mxu1 %v1699_v57 }
 0x3c1   : > { %4782 = vmatprep.mubr.bf16.mxu0 %v1704_v51  ;;  %5104 = vmatprep.mubr.bf16.mxu1 %v1704_v51 }
 0x3c8   : > { %4783 = vmatmul.mubr.bf16.gmra.mrb[8].mxu0 %v1703_v60  ;;  %5105 = vmatmul.mubr.bf16.gmra.mrb[8].mxu1 %v1703_v60  ;;  %v13124_v60 = vld [vmem:[#allocation26_spill] sm:$0xff] }
 0x3c9   : > { %4792 = vmatprep.mubr.bf16.mxu0 %v1708_v53  ;;  %5114 = vmatprep.mubr.bf16.mxu1 %v1708_v53  ;;  %v11240_v44 = vrot.slane %v5313_v17, %v13124_v60  ;;  %v11243_v53 = vrot.slane %v5313_v17, %v13125_v6 }
 0x3d0   : > { %4793 = vmatmul.mubr.bf16.gmra.mrb[12].mxu0 %v1707_v1  ;;  %5115 = vmatmul.mubr.bf16.gmra.mrb[12].mxu1 %v1707_v1 }
 0x3d1   : > { %4802 = vmatprep.mubr.bf16.mxu0 %v1712_v39  ;;  %5124 = vmatprep.mubr.bf16.mxu1 %v1712_v39 }
 0x3d8   : > { %4803 = vmatmul.mubr.bf16.gmra.mrb[16].mxu0 %v13098_v2  ;;  %5125 = vmatmul.mubr.bf16.gmra.mrb[16].mxu1 %v13098_v2 }
 0x3d9   : > { %4812 = vmatprep.mubr.bf16.mxu0 %v13099_v21  ;;  %5134 = vmatprep.mubr.bf16.mxu1 %v13099_v21 }
 0x3e0   : > { %4813 = vmatmul.mubr.bf16.gmra.mrb[20].mxu0 %v13100_v32  ;;  %5135 = vmatmul.mubr.bf16.gmra.mrb[20].mxu1 %v13100_v32 }
 0x3e1   : > { %4822 = vmatprep.mubr.bf16.mxu0 %v13101_v25  ;;  %5144 = vmatprep.mubr.bf16.mxu1 %v13101_v25 }
 0x3e8   : > { %4823 = vmatmul.mubr.bf16.gmra.mrb[24].mxu0 %v13102_v19  ;;  %5145 = vmatmul.mubr.bf16.gmra.mrb[24].mxu1 %v13102_v19 }
 0x3e9   : > { %4832 = vmatprep.mubr.bf16.mxu0 %v13103_v20  ;;  %5154 = vmatprep.mubr.bf16.mxu1 %v13103_v20 }
 0x3f0   : > { %4833 = vmatmul.mubr.bf16.gmra.mrb[28].mxu0 %v13104_v43  ;;  %5155 = vmatmul.mubr.bf16.gmra.mrb[28].mxu1 %v13104_v43 }
 0x3f1   : > { %4842 = vmatprep.mubr.bf16.mxu0 %v13105_v34  ;;  %5164 = vmatprep.mubr.bf16.mxu1 %v13105_v34 }
 0x3f8   : > { %4843 = vmatmul.mubr.bf16.gmra.mrb[32].mxu0 %v13106_v16  ;;  %5165 = vmatmul.mubr.bf16.gmra.mrb[32].mxu1 %v13106_v16 }
 0x3f9   : > { %4852 = vmatprep.mubr.bf16.mxu0 %v13107_v28  ;;  %5174 = vmatprep.mubr.bf16.mxu1 %v13107_v28 }
 0x400   : > { %4853 = vmatmul.mubr.bf16.gmra.mrb[36].mxu0 %v13108_v3  ;;  %5175 = vmatmul.mubr.bf16.gmra.mrb[36].mxu1 %v13108_v3 }
 0x401   : > { %4862 = vmatprep.mubr.bf16.mxu0 %v13109_v56  ;;  %5184 = vmatprep.mubr.bf16.mxu1 %v13109_v56 }
 0x408   : > { %4863 = vmatmul.mubr.bf16.gmra.mrb[40].mxu0 %v13110_v14  ;;  %5185 = vmatmul.mubr.bf16.gmra.mrb[40].mxu1 %v13110_v14 }
 0x409   : > { %4872 = vmatprep.mubr.bf16.mxu0 %v13111_v18  ;;  %5194 = vmatprep.mubr.bf16.mxu1 %v13111_v18 }
 0x410   : > { %4873 = vmatmul.mubr.bf16.gmra.mrb[44].mxu0 %v13113_v5  ;;  %5195 = vmatmul.mubr.bf16.gmra.mrb[44].mxu1 %v13113_v5 }
 0x411   : > { %4882 = vmatprep.mubr.bf16.mxu0 %v1744_v41  ;;  %5204 = vmatprep.mubr.bf16.mxu1 %v1744_v41 }
 0x418   : > { %4883 = vmatmul.mubr.bf16.gmra.mrb[68].mxu0 %v1743_v9  ;;  %5205 = vmatmul.mubr.bf16.gmra.mrb[68].mxu1 %v1743_v9 }
 0x41b   : > { %v4240_v59 = vpop.f32.mrb[60].mxu0  ;;  %v4562_v63 = vpop.f32.mrb[60].mxu1 }
 0x41c   : > { %v11213_v37 = vadd.f32 %v4240_v59, %v11143_v27  ;;  %v11216_v42 = vadd.f32 %v4562_v63, %v11146_v40  ;;  %v4242_v52 = vpop.f32.mrb[61].mxu0  ;;  %v4564_v31 = vpop.f32.mrb[61].mxu1 }
 0x41d   : > { %v11219_v33 = vadd.f32 %v4242_v52, %v11149_v45  ;;  %v11222_v57 = vadd.f32 %v4564_v31, %v11152_v23  ;;  %v4244_v38 = vpop.f32.mrb[62].mxu0  ;;  %v4566_v62 = vpop.f32.mrb[62].mxu1  ;;  %v11234_v23 = vrot.slane %v5313_v17, %v13122_v0 }
 0x41e   : > { %13115 = vst [vmem:[#allocation171_spill] sm:$0xff] %v11213_v37  ;;  %13116 = vst [vmem:[#allocation69_spill] sm:$0xff] %v11216_v42  ;;  %v4245_v51 = vpop.f32.mrb[63].mxu0  ;;  %v4567_v36 = vpop.f32.mrb[63].mxu1 }
 0x41f   : > { %13117 = vst [vmem:[#allocation103_spill] sm:$0xff] %v11219_v33  ;;  %13118 = vst [vmem:[#allocation71_spill] sm:$0xff] %v11222_v57 }
 0x483   : > { %v11224_v50 = vpop.f32.mrb[64].mxu0  ;;  %v11226_v27 = vpop.f32.mrb[64].mxu1 }
 0x484   : > { %13119 = vst [vmem:[#allocation77_spill] sm:$0xff] %v11226_v27  ;;  %v11228_v55 = vpop.f32.mrb[65].mxu0  ;;  %v11230_v40 = vpop.f32.mrb[65].mxu1 }
 0x485   : > { %13120 = vst [vmem:[#allocation45_spill] sm:$0xff] %v11228_v55  ;;  %13121 = vst [vmem:[#allocation60_spill] sm:$0xff] %v11230_v40  ;;  %v4727_v35 = vpop.f32.mrb[66].mxu0  ;;  %v5049_v7 = vpop.f32.mrb[66].mxu1 }
 0x486   : > { %v4728_v45 = vpop.f32.mrb[67].mxu0  ;;  %v5050_v30 = vpop.f32.mrb[67].mxu1 }
 0x48b   : > { %v4764_v8 = vpop.f32.mrb[0].mxu0  ;;  %v5086_v10 = vpop.f32.mrb[0].mxu1 }
 0x48c   : > { %v5335_v11 = vadd.f32 %v11234_v23, %v4764_v8  ;;  %v5337_v15 = vadd.f32 %v11237_v12, %v5086_v10  ;;  %v4766_v29 = vpop.f32.mrb[1].mxu0  ;;  %v5088_v24 = vpop.f32.mrb[1].mxu1 }
 0x48d   : > { %v5336_v13 = vadd.f32 %v11240_v44, %v4766_v29  ;;  %v5338_v47 = vadd.f32 %v11243_v53, %v5088_v24  ;;  %v4768_v48 = vpop.f32.mrb[2].mxu0  ;;  %v5090_v54 = vpop.f32.mrb[2].mxu1 }
 0x48e   : > { %v5535_v1 = vmul.f32 0.70710677, %v5335_v11  ;;  %v5537_v39 = vmul.f32 0.70710677, %v5337_v15  ;;  %v5339_v32 = vadd.f32 %v11234_v23, %v4768_v48  ;;  %v5341_v25 = vadd.f32 %v11237_v12, %v5090_v54  ;;  %v4770_v19 = vpop.f32.mrb[3].mxu0  ;;  %v5092_v20 = vpop.f32.mrb[3].mxu1 }
 0x48f   : > { %v5536_v2 = vmul.f32 0.70710677, %v5336_v13  ;;  %v5538_v21 = vmul.f32 0.70710677, %v5338_v47  ;;  %v5340_v43 = vadd.f32 %v11240_v44, %v4770_v19  ;;  %v5342_v34 = vadd.f32 %v11243_v53, %v5092_v20 }
 0x490   : > { %7491 = verf.f32 %v5535_v1  ;;  %v5539_v16 = vmul.f32 0.70710677, %v5339_v32  ;;  %v5541_v28 = vmul.f32 0.70710677, %v5341_v25  ;;  %v5435_v61 = vmul.f32 0.5, %v5335_v11 }
 0x491   : > { %7493 = verf.f32 %v5537_v39  ;;  %v5540_v3 = vmul.f32 0.70710677, %v5340_v43  ;;  %v5542_v58 = vmul.f32 0.70710677, %v5342_v34  ;;  %v5437_v52 = vmul.f32 0.5, %v5337_v15 }
 0x492   : > { %7495 = verf.f32 %v5536_v2  ;;  %v5436_v31 = vmul.f32 0.5, %v5336_v13  ;;  %v5438_v51 = vmul.f32 0.5, %v5338_v47  ;;  %v5439_v0 = vmul.f32 0.5, %v5339_v32 }
 0x493   : > { %7497 = verf.f32 %v5538_v21  ;;  %v4774_v56 = vpop.f32.mrb[4].mxu0  ;;  %v5096_v18 = vpop.f32.mrb[4].mxu1  ;;  %v5441_v26 = vmul.f32 0.5, %v5341_v25  ;;  %v5440_v60 = vmul.f32 0.5, %v5340_v43  ;;  %v5442_v47 = vmul.f32 0.5, %v5342_v34 }
 0x494   : > { %7499 = verf.f32 %v5539_v16  ;;  %v5343_v14 = vadd.f32 %v11234_v23, %v4774_v56  ;;  %v4776_v49 = vpop.f32.mrb[5].mxu0  ;;  %v5345_v4 = vadd.f32 %v11237_v12, %v5096_v18  ;;  %v5098_v41 = vpop.f32.mrb[5].mxu1 }
 0x495   : > { %7501 = verf.f32 %v5541_v28  ;;  %v11256_v46 = vadd.f32 %v11240_v44, %v4776_v49  ;;  %v4778_v5 = vpop.f32.mrb[6].mxu0  ;;  %v11259_v9 = vadd.f32 %v11243_v53, %v5098_v41  ;;  %v5100_v59 = vpop.f32.mrb[6].mxu1 }
 0x496   : > { %7503 = verf.f32 %v5540_v3  ;;  %v5543_v22 = vmul.f32 0.70710677, %v5343_v14  ;;  %v4780_v63 = vpop.f32.mrb[7].mxu0  ;;  %v5545_v38 = vmul.f32 0.70710677, %v5345_v4  ;;  %v5102_v62 = vpop.f32.mrb[7].mxu1  ;;  %v11265_v7 = vadd.f32 %v11234_v23, %v4778_v5 }
 0x497   : > { %7505 = verf.f32 %v5542_v58  ;;  %v5544_v36 = vmul.f32 0.70710677, %v11256_v46  ;;  %v5546_v35 = vmul.f32 0.70710677, %v11259_v9  ;;  %v11268_v17 = vadd.f32 %v11237_v12, %v5100_v59 }
 0x498   : > { %7507 = verf.f32 %v5543_v22  ;;  %v11271_v45 = vadd.f32 %v11240_v44, %v4780_v63  ;;  %v5547_v10 = vmul.f32 0.70710677, %v11265_v7  ;;  %v11275_v11 = vadd.f32 %v11243_v53, %v5102_v62 }
 0x499   : > { %7509 = verf.f32 %v5545_v38  ;;  %v5443_v48 = vmul.f32 0.5, %v5343_v14  ;;  %v5549_v54 = vmul.f32 0.70710677, %v11268_v17  ;;  %v5445_v28 = vmul.f32 0.5, %v5345_v4 }
 0x49a   : > { %v7492_v30 = vpop.eup %7491  ;;  %7511 = verf.f32 %v5544_v36  ;;  %v5548_v32 = vmul.f32 0.70710677, %v11271_v45  ;;  %v5550_v18 = vmul.f32 0.70710677, %v11275_v11  ;;  %v5444_v36 = vmul.f32 0.5, %v11256_v46 }
 0x49b   : > { %v7494_v6 = vpop.eup %7493  ;;  %v5735_v8 = vadd.f32 1.0, %v7492_v30  ;;  %7513 = verf.f32 %v5546_v35  ;;  %v4784_v15 = vpop.f32.mrb[8].mxu0 }
 0x49c   : > { %v5106_v29 = vpop.f32.mrb[8].mxu1  ;;  %v7496_v24 = vpop.eup %7495  ;;  %v5737_v13 = vadd.f32 1.0, %v7494_v6  ;;  %7515 = verf.f32 %v5547_v10 }
 0x49d   : > { %v4786_v1 = vpop.f32.mrb[9].mxu0  ;;  %v7498_v39 = vpop.eup %7497  ;;  %v5835_v2 = vmul.f32 %v5735_v8, %v5435_v61  ;;  %v5736_v21 = vadd.f32 1.0, %v7496_v24  ;;  %7517 = verf.f32 %v5549_v54  ;;  %v11293_v61 = vadd.f32 %v11234_v23, %v4784_v15 }
 0x49e   : > { %v5108_v25 = vpop.f32.mrb[9].mxu1  ;;  %v4788_v19 = vpop.f32.mrb[10].mxu0  ;;  %v5837_v43 = vmul.f32 %v5737_v13, %v5437_v52  ;;  %v5738_v16 = vadd.f32 1.0, %v7498_v39  ;;  %7519 = verf.f32 %v5548_v32  ;;  %v11296_v22 = vadd.f32 %v11237_v12, %v5106_v29 }
 0x49f   : > { %v7500_v20 = vpop.eup %7499  ;;  %v11279_v3 = vpop.f32.mrb[10].mxu1  ;;  %5935 = vst [vmem:[%s11285_s17] sm:$0xff] %v5835_v2  ;;  %v5836_v58 = vmul.f32 %v5736_v21, %v5436_v31  ;;  %7521 = verf.f32 %v5550_v18  ;;  %v11300_v31 = vadd.f32 %v11240_v44, %v4786_v1  ;;  %v5551_v35 = vmul.f32 0.70710677, %v11293_v61 }
 0x4a0   : > { %v11281_v34 = vpop.f32.mrb[11].mxu0  ;;  %v7502_v56 = vpop.eup %7501  ;;  %v5739_v14 = vadd.f32 1.0, %v7500_v20  ;;  %5937 = vst [vmem:[%s11285_s17 + $0x10] sm:$0xff] %v5837_v43  ;;  %v5838_v41 = vmul.f32 %v5738_v16, %v5438_v51  ;;  %v5553_v10 = vmul.f32 0.70710677, %v11296_v22  ;;  %v5447_v13 = vmul.f32 0.5, %v11265_v7 }
 0x4a1   : > { %v11289_v49 = vpop.f32.mrb[11].mxu1  ;;  %v7504_v4 = vpop.eup %7503  ;;  %v5741_v5 = vadd.f32 1.0, %v7502_v56  ;;  %5936 = vst [vmem:[%s11285_s17 + $0x8] sm:$0xff] %v5836_v58  ;;  %7523 = verf.f32 %v5551_v35  ;;  %v5552_v2 = vmul.f32 0.70710677, %v11300_v31  ;;  %v5354_v20 = vadd.f32 %v11243_v53, %v5108_v25 }
 0x4a2   : > { %v7506_v59 = vpop.eup %7505  ;;  %v5839_v63 = vmul.f32 %v5739_v14, %v5439_v0  ;;  %v5740_v52 = vadd.f32 1.0, %v7504_v4  ;;  %5938 = vst [vmem:[%s11285_s17 + $0x18] sm:$0xff] %v5838_v41  ;;  %v5446_v0 = vmul.f32 0.5, %v11259_v9  ;;  %7525 = verf.f32 %v5553_v10 }
 0x4a3   : > { %v7508_v38 = vpop.eup %7507  ;;  %v5841_v62 = vmul.f32 %v5741_v5, %v5441_v26  ;;  %v5742_v51 = vadd.f32 1.0, %v7506_v59  ;;  %v11308_v15 = vpop.f32.mrb[12].mxu0  ;;  %v5355_v43 = vadd.f32 %v11234_v23, %v4788_v19  ;;  %7527 = verf.f32 %v5552_v2 }
 0x4a4   : > { %v7510_v30 = vpop.eup %7509  ;;  %5939 = vst [vmem:[%s11285_s17 + $0x20] sm:$0xff] %v5839_v63  ;;  %v5840_v6 = vmul.f32 %v5740_v52, %v5440_v60  ;;  %v5743_v8 = vadd.f32 1.0, %v7508_v38  ;;  %v11310_v29 = vpop.f32.mrb[12].mxu1  ;;  %v5357_v14 = vadd.f32 %v11237_v12, %v11279_v3  ;;  %v5449_v4 = vmul.f32 0.5, %v11268_v17 }
 0x4a5   : > { %v7512_v24 = vpop.eup %7511  ;;  %5941 = vst [vmem:[%s11285_s17 + $0x30] sm:$0xff] %v5841_v62  ;;  %v5842_v26 = vmul.f32 %v5742_v51, %v5442_v47  ;;  %v5745_v46 = vadd.f32 1.0, %v7510_v30  ;;  %v4796_v54 = vpop.f32.mrb[13].mxu0  ;;  %v5554_v41 = vmul.f32 0.70710677, %v5354_v20  ;;  %v5448_v63 = vmul.f32 0.5, %v11271_v45 }
 0x4a6   : > { %v11314_v1 = vpop.f32.mrb[13].mxu1  ;;  %v7514_v60 = vpop.eup %7513  ;;  %5940 = vst [vmem:[%s11285_s17 + $0x28] sm:$0xff] %v5840_v6  ;;  %v5843_v9 = vmul.f32 %v5743_v8, %v5443_v48  ;;  %v5744_v39 = vadd.f32 1.0, %v7512_v24  ;;  %v5450_v52 = vmul.f32 0.5, %v11275_v11  ;;  %v5555_v3 = vmul.f32 0.70710677, %v5355_v43 }
 0x4a7   : > { %v11318_v21 = vpop.f32.mrb[14].mxu0  ;;  %v11320_v32 = vpop.f32.mrb[14].mxu1  ;;  %5942 = vst [vmem:[%s11285_s17 + $0x38] sm:$0xff] %v5842_v26  ;;  %v5845_v47 = vmul.f32 %v5745_v46, %v5445_v28  ;;  %v5746_v7 = vadd.f32 1.0, %v7514_v60  ;;  %v11334_v28 = vadd.f32 %v11240_v44, %v11281_v34  ;;  %7529 = verf.f32 %v5554_v41 }
 0x4a8   : > { %v11325_v16 = vpop.f32.mrb[15].mxu0  ;;  %v11327_v48 = vpop.f32.mrb[15].mxu1  ;;  %5943 = vst [vmem:[%s11285_s17 + $0x40] sm:$0xff] %v5843_v9  ;;  %v5844_v58 = vmul.f32 %v5744_v39, %v5444_v36  ;;  %v5557_v62 = vmul.f32 0.70710677, %v5357_v14  ;;  %v5451_v17 = vmul.f32 0.5, %v11293_v61  ;;  %7531 = verf.f32 %v5555_v3 }
 0x4a9   : > { %v7516_v56 = vpop.eup %7515  ;;  %5945 = vst [vmem:[%s11285_s17 + $0x50] sm:$0xff] %v5845_v47  ;;  %v5846_v19 = vmul.f32 %v5746_v7, %v5446_v0  ;;  %v5556_v35 = vmul.f32 0.70710677, %v11334_v28  ;;  %v5358_v8 = vadd.f32 %v11243_v53, %v11289_v49  ;;  %v5359_v61 = vadd.f32 %v11234_v23, %v11308_v15 }
 0x4aa   : > { %v7518_v25 = vpop.eup %7517  ;;  %v5747_v18 = vadd.f32 1.0, %v7516_v56  ;;  %5944 = vst [vmem:[%s11285_s17 + $0x48] sm:$0xff] %v5844_v58  ;;  %7533 = verf.f32 %v5557_v62  ;;  %v5361_v24 = vadd.f32 %v11237_v12, %v11310_v29  ;;  %v11359_v26 = vadd.f32 %v11240_v44, %v4796_v54 }
 0x4ab   : > { %v7520_v5 = vpop.eup %7519  ;;  %v5749_v59 = vadd.f32 1.0, %v7518_v25  ;;  %5946 = vst [vmem:[%s11285_s17 + $0x58] sm:$0xff] %v5846_v19  ;;  %v4804_v30 = vpop.f32.mrb[16].mxu0  ;;  %7535 = verf.f32 %v5556_v35  ;;  %v5453_v9 = vmul.f32 0.5, %v11296_v22  ;;  %v5558_v39 = vmul.f32 0.70710677, %v5358_v8 }
 0x4ac   : > { %v5847_v38 = vmul.f32 %v5747_v18, %v5447_v13  ;;  %v5748_v34 = vadd.f32 1.0, %v7520_v5  ;;  %v7522_v51 = vpop.eup %7521  ;;  %v11344_v6 = vpop.f32.mrb[16].mxu1  ;;  %v11369_v15 = vadd.f32 %v11243_v53, %v11314_v1  ;;  %v5452_v7 = vmul.f32 0.5, %v11300_v31 }
 0x4ad   : > { %v5849_v36 = vmul.f32 %v5749_v59, %v5449_v4  ;;  %v5750_v11 = vadd.f32 1.0, %v7522_v51  ;;  %v11349_v0 = vpop.f32.mrb[17].mxu0  ;;  %v11351_v10 = vpop.f32.mrb[17].mxu1  ;;  %v5454_v56 = vmul.f32 0.5, %v5354_v20  ;;  %v5559_v58 = vmul.f32 0.70710677, %v5359_v61 }
 0x4ae   : > { %5947 = vst [vmem:[%s11285_s17 + $0x60] sm:$0xff] %v5847_v38  ;;  %v5848_v45 = vmul.f32 %v5748_v34, %v5448_v63  ;;  %v11361_v46 = vpop.f32.mrb[18].mxu0  ;;  %v11363_v13 = vpop.f32.mrb[18].mxu1  ;;  %v5455_v19 = vmul.f32 0.5, %v5355_v43  ;;  %7537 = verf.f32 %v5558_v39  ;;  %v5561_v22 = vmul.f32 0.70710677, %v5361_v24 }
 0x4af   : > { %5949 = vst [vmem:[%s11285_s17 + $0x70] sm:$0xff] %v5849_v36  ;;  %v7524_v49 = vpop.eup %7523  ;;  %v5850_v60 = vmul.f32 %v5750_v11, %v5450_v52  ;;  %v11371_v2 = vpop.f32.mrb[19].mxu0  ;;  %v5457_v1 = vmul.f32 0.5, %v5357_v14  ;;  %7539 = verf.f32 %v5559_v58  ;;  %v5560_v41 = vmul.f32 0.70710677, %v11359_v26 }
 0x4b0   : > { %5948 = vst [vmem:[%s11285_s17 + $0x68] sm:$0xff] %v5848_v45  ;;  %v11373_v29 = vpop.f32.mrb[19].mxu1  ;;  %v7526_v54 = vpop.eup %7525  ;;  %v5751_v47 = vadd.f32 1.0, %v7524_v49  ;;  %7541 = verf.f32 %v5561_v22  ;;  %v5562_v31 = vmul.f32 0.70710677, %v11369_v15  ;;  %v5363_v20 = vadd.f32 %v11234_v23, %v11318_v21 }
 0x4b1   : > { %5950 = vst [vmem:[%s11285_s17 + $0x78] sm:$0xff] %v5850_v60  ;;  %v5753_v25 = vadd.f32 1.0, %v7526_v54  ;;  %v7528_v18 = vpop.eup %7527  ;;  %7543 = verf.f32 %v5560_v41  ;;  %v11384_v43 = vadd.f32 %v11237_v12, %v11320_v32  ;;  %v11388_v14 = vadd.f32 %v11240_v44, %v11325_v16 }
 0x4b2   : > { %v5851_v4 = vmul.f32 %v5751_v47, %v5451_v17  ;;  %v5752_v59 = vadd.f32 1.0, %v7528_v18  ;;  %v7530_v3 = vpop.eup %7529  ;;  %v5456_v34 = vmul.f32 0.5, %v11334_v28  ;;  %7545 = verf.f32 %v5562_v31 }
 0x4b3   : > { %v5853_v5 = vmul.f32 %v5753_v25, %v5453_v9  ;;  %v11390_v63 = vpop.f32.mrb[20].mxu0  ;;  %v11392_v52 = vpop.f32.mrb[20].mxu1  ;;  %v11398_v21 = vadd.f32 %v11243_v53, %v11327_v48  ;;  %v5754_v51 = vadd.f32 1.0, %v7530_v3  ;;  %v5458_v36 = vmul.f32 0.5, %v5358_v8 }
 0x4b4   : > { %5951 = vst [vmem:[%s11285_s17 + $0x80] sm:$0xff] %v5851_v4  ;;  %v5852_v38 = vmul.f32 %v5752_v59, %v5452_v7  ;;  %v11400_v32 = vpop.f32.mrb[21].mxu0  ;;  %v11402_v62 = vpop.f32.mrb[21].mxu1  ;;  %v5563_v17 = vmul.f32 0.70710677, %v5363_v20  ;;  %v11405_v35 = vadd.f32 %v11234_v23, %v4804_v30  ;;  %v5459_v49 = vmul.f32 0.5, %v5359_v61 }
 0x4b5   : > { %5953 = vst [vmem:[%s11285_s17 + $0x90] sm:$0xff] %v5853_v5  ;;  %v7532_v16 = vpop.eup %7531  ;;  %v11407_v45 = vpop.f32.mrb[22].mxu0  ;;  %v5565_v48 = vmul.f32 0.70710677, %v11384_v43  ;;  %v5564_v60 = vmul.f32 0.70710677, %v11388_v14  ;;  %v5854_v39 = vmul.f32 %v5754_v51, %v5454_v56  ;;  %v11427_v41 = vadd.f32 %v11240_v44, %v11349_v0 }
 0x4b6   : > { %v7534_v11 = vpop.eup %7533  ;;  %5952 = vst [vmem:[%s11285_s17 + $0x88] sm:$0xff] %v5852_v38  ;;  %v5755_v28 = vadd.f32 1.0, %v7532_v16  ;;  %v5461_v8 = vmul.f32 0.5, %v5361_v24  ;;  %7547 = verf.f32 %v5563_v17  ;;  %v11412_v47 = vpop.f32.mrb[22].mxu1  ;;  %v5566_v61 = vmul.f32 0.70710677, %v11398_v21 }
 0x4b7   : > { %v7536_v9 = vpop.eup %7535  ;;  %v5757_v54 = vadd.f32 1.0, %v7534_v11  ;;  %v11414_v30 = vpop.f32.mrb[23].mxu0  ;;  %7549 = verf.f32 %v5565_v48  ;;  %5954 = vst [vmem:[%s11285_s17 + $0x98] sm:$0xff] %v5854_v39  ;;  %v5460_v56 = vmul.f32 0.5, %v11359_v26  ;;  %v5567_v24 = vmul.f32 0.70710677, %v11405_v35 }
 0x4b8   : > { %v5855_v7 = vmul.f32 %v5755_v28, %v5455_v19  ;;  %v5756_v58 = vadd.f32 1.0, %v7536_v9  ;;  %v11417_v25 = vpop.f32.mrb[23].mxu1  ;;  %7551 = verf.f32 %v5564_v60  ;;  %v7538_v18 = vpop.eup %7537  ;;  %v5369_v19 = vadd.f32 %v11237_v12, %v11344_v6 }
 0x4b9   : > { %v5857_v22 = vmul.f32 %v5757_v54, %v5457_v1  ;;  %7553 = verf.f32 %v5566_v61  ;;  %v7540_v5 = vpop.eup %7539  ;;  %v5758_v1 = vadd.f32 1.0, %v7538_v18  ;;  %v5462_v26 = vmul.f32 0.5, %v11369_v15 }
 0x4ba   : > { %5955 = vst [vmem:[%s11285_s17 + $0xa0] sm:$0xff] %v5855_v7  ;;  %v5856_v4 = vmul.f32 %v5756_v58, %v5456_v34  ;;  %7555 = verf.f32 %v5567_v24  ;;  %v11433_v59 = vadd.f32 %v11243_v53, %v11351_v10  ;;  %v7542_v38 = vpop.eup %7541  ;;  %v5759_v6 = vadd.f32 1.0, %v7540_v5 }
 0x4bb   : > { %5957 = vst [vmem:[%s11285_s17 + $0xb0] sm:$0xff] %v5857_v22  ;;  %v11435_v31 = vpop.f32.mrb[24].mxu0  ;;  %v11437_v3 = vpop.f32.mrb[24].mxu1  ;;  %v5463_v34 = vmul.f32 0.5, %v5363_v20  ;;  %v5569_v0 = vmul.f32 0.70710677, %v5369_v19  ;;  %v11442_v16 = vadd.f32 %v11234_v23, %v11361_v46  ;;  %v5858_v17 = vmul.f32 %v5758_v1, %v5458_v36 }
 0x4bc   : > { %5956 = vst [vmem:[%s11285_s17 + $0xa8] sm:$0xff] %v5856_v4  ;;  %v11444_v15 = vpop.f32.mrb[25].mxu0  ;;  %v7544_v51 = vpop.eup %7543  ;;  %v5761_v10 = vadd.f32 1.0, %v7542_v38  ;;  %v5465_v11 = vmul.f32 0.5, %v11384_v43  ;;  %v5568_v28 = vmul.f32 0.70710677, %v11427_v41  ;;  %v5859_v9 = vmul.f32 %v5759_v6, %v5459_v49 }
 0x4bd   : > { %v11448_v48 = vpop.f32.mrb[25].mxu1  ;;  %v11450_v60 = vpop.f32.mrb[26].mxu0  ;;  %v5760_v39 = vadd.f32 1.0, %v7544_v51  ;;  %7557 = verf.f32 %v5569_v0  ;;  %v5570_v46 = vmul.f32 0.70710677, %v11433_v59  ;;  %5958 = vst [vmem:[%s11285_s17 + $0xb8] sm:$0xff] %v5858_v17  ;;  %v5373_v24 = vadd.f32 %v11237_v12, %v11363_v13 }
 0x4be   : > { %v7546_v20 = vpop.eup %7545  ;;  %v11453_v54 = vpop.f32.mrb[26].mxu1  ;;  %v5861_v43 = vmul.f32 %v5761_v10, %v5461_v8  ;;  %v5464_v58 = vmul.f32 0.5, %v11388_v14  ;;  %7559 = verf.f32 %v5568_v28  ;;  %5959 = vst [vmem:[%s11285_s17 + $0xc0] sm:$0xff] %v5859_v9  ;;  %v5571_v22 = vmul.f32 0.70710677, %v11442_v16 }
 0x4bf   : > { %v11455_v36 = vpop.f32.mrb[27].mxu0  ;;  %v5762_v7 = vadd.f32 1.0, %v7546_v20  ;;  %v11459_v61 = vpop.f32.mrb[27].mxu1  ;;  %v5860_v49 = vmul.f32 %v5760_v39, %v5460_v56  ;;  %7561 = verf.f32 %v5570_v46  ;;  %v5466_v8 = vmul.f32 0.5, %v11398_v21 }
 0x4c0   : > { %v7548_v18 = vpop.eup %7547  ;;  %5961 = vst [vmem:[%s11285_s17 + $0xd0] sm:$0xff] %v5861_v43  ;;  %v5372_v14 = vadd.f32 %v11240_v44, %v11371_v2  ;;  %v11471_v5 = vadd.f32 %v11243_v53, %v11373_v29  ;;  %7563 = verf.f32 %v5571_v22  ;;  %v5573_v38 = vmul.f32 0.70710677, %v5373_v24 }
 0x4c1   : > { %v5862_v4 = vmul.f32 %v5762_v7, %v5462_v26  ;;  %v7550_v56 = vpop.eup %7549  ;;  %5960 = vst [vmem:[%s11285_s17 + $0xc8] sm:$0xff] %v5860_v49  ;;  %v5763_v1 = vadd.f32 1.0, %v7548_v18  ;;  %v11476_v13 = vadd.f32 %v11234_v23, %v11390_v63  ;;  %v5467_v21 = vmul.f32 0.5, %v11405_v35 }
 0x4c2   : > { %v7552_v6 = vpop.eup %7551  ;;  %v5765_v26 = vadd.f32 1.0, %v7550_v56  ;;  %v5469_v0 = vmul.f32 0.5, %v5369_v19  ;;  %v5572_v2 = vmul.f32 0.70710677, %v5372_v14  ;;  %7565 = verf.f32 %v5573_v38 }
 0x4c3   : > { %5962 = vst [vmem:[%s11285_s17 + $0xd8] sm:$0xff] %v5862_v4  ;;  %v11480_v51 = vpop.f32.mrb[28].mxu0  ;;  %v7554_v29 = vpop.eup %7553  ;;  %v5863_v17 = vmul.f32 %v5763_v1, %v5463_v34  ;;  %v5764_v10 = vadd.f32 1.0, %v7552_v6  ;;  %v5574_v28 = vmul.f32 0.70710677, %v11471_v5  ;;  %v5468_v35 = vmul.f32 0.5, %v11427_v41 }
 0x4c4   : > { %v11483_v20 = vpop.f32.mrb[28].mxu1  ;;  %v11485_v63 = vpop.f32.mrb[29].mxu0  ;;  %v5865_v39 = vmul.f32 %v5765_v26, %v5465_v11  ;;  %v5766_v46 = vadd.f32 1.0, %v7554_v29  ;;  %7567 = verf.f32 %v5572_v2  ;;  %v5575_v49 = vmul.f32 0.70710677, %v11476_v13 }
 0x4c5   : > { %v7556_v9 = vpop.eup %7555  ;;  %v11488_v19 = vpop.f32.mrb[29].mxu1  ;;  %5963 = vst [vmem:[%s11285_s17 + $0xe0] sm:$0xff] %v5863_v17  ;;  %v5864_v34 = vmul.f32 %v5764_v10, %v5464_v58  ;;  %7569 = verf.f32 %v5574_v28  ;;  %v5377_v41 = vadd.f32 %v11237_v12, %v11392_v52  ;;  %v5376_v4 = vadd.f32 %v11240_v44, %v11400_v32 }
 0x4c6   : > { %v11490_v43 = vpop.f32.mrb[30].mxu0  ;;  %v5767_v7 = vadd.f32 1.0, %v7556_v9  ;;  %v11494_v22 = vpop.f32.mrb[30].mxu1  ;;  %5965 = vst [vmem:[%s11285_s17 + $0xf0] sm:$0xff] %v5865_v39  ;;  %v5866_v11 = vmul.f32 %v5766_v46, %v5466_v8  ;;  %v11505_v58 = vadd.f32 %v11243_v53, %v11402_v62  ;;  %v5470_v6 = vmul.f32 0.5, %v11433_v59 }
 0x4c7   : > { %v11496_v18 = vpop.f32.mrb[31].mxu0  ;;  %v11507_v56 = vpop.f32.mrb[31].mxu1  ;;  %5964 = vst [vmem:[%s11285_s17 + $0xe8] sm:$0xff] %v5864_v34  ;;  %7571 = verf.f32 %v5575_v49  ;;  %v11513_v8 = vadd.f32 %v11234_v23, %v11407_v45  ;;  %v5471_v26 = vmul.f32 0.5, %v11442_v16  ;;  %v5577_v2 = vmul.f32 0.70710677, %v5377_v41 }
 0x4c8   : > { %v7558_v1 = vpop.eup %7557  ;;  %v5867_v38 = vmul.f32 %v5767_v7, %v5467_v21  ;;  %5966 = vst [vmem:[%s11285_s17 + $0xf8] sm:$0xff] %v5866_v11  ;;  %v11519_v62 = vadd.f32 %v11237_v12, %v11412_v47  ;;  %v5473_v17 = vmul.f32 0.5, %v5373_v24  ;;  %v5576_v59 = vmul.f32 0.70710677, %v5376_v4 }
 0x4c9   : > { %v7560_v52 = vpop.eup %7559  ;;  %v5769_v32 = vadd.f32 1.0, %v7558_v1  ;;  %v5578_v10 = vmul.f32 0.70710677, %v11505_v58  ;;  %v5472_v9 = vmul.f32 0.5, %v5372_v14  ;;  %7573 = verf.f32 %v5577_v2 }
 0x4ca   : > { %v7562_v29 = vpop.eup %7561  ;;  %5967 = vst [vmem:[%s11285_s17 + $0x100] sm:$0xff] %v5867_v38  ;;  %v5768_v21 = vadd.f32 1.0, %v7560_v52  ;;  %v5474_v34 = vmul.f32 0.5, %v11471_v5  ;;  %7575 = verf.f32 %v5576_v59  ;;  %v5579_v24 = vmul.f32 0.70710677, %v11513_v8 }
 0x4cb   : > { %v5869_v45 = vmul.f32 %v5769_v32, %v5469_v0  ;;  %v5770_v28 = vadd.f32 1.0, %v7562_v29  ;;  %v11523_v39 = vpop.f32.mrb[32].mxu0  ;;  %v11525_v16 = vpop.f32.mrb[32].mxu1  ;;  %7577 = verf.f32 %v5578_v10  ;;  %v5581_v11 = vmul.f32 0.70710677, %v11519_v62 }
 0x4cc   : > { %v7564_v46 = vpop.eup %7563  ;;  %v5868_v47 = vmul.f32 %v5768_v21, %v5468_v35  ;;  %v11529_v7 = vpop.f32.mrb[33].mxu0  ;;  %7579 = verf.f32 %v5579_v24  ;;  %v5380_v5 = vadd.f32 %v11240_v44, %v11414_v30  ;;  %v5382_v52 = vadd.f32 %v11243_v53, %v11417_v25 }
 0x4cd   : > { %v11531_v49 = vpop.f32.mrb[33].mxu1  ;;  %5969 = vst [vmem:[%s11285_s17 + $0x110] sm:$0xff] %v5869_v45  ;;  %v5870_v14 = vmul.f32 %v5770_v28, %v5470_v6  ;;  %v5771_v0 = vadd.f32 1.0, %v7564_v46  ;;  %v11535_v1 = vpop.f32.mrb[34].mxu0  ;;  %v11546_v6 = vadd.f32 %v11234_v23, %v11435_v31  ;;  %7581 = verf.f32 %v5581_v11 }
 0x4ce   : > { %v11537_v38 = vpop.f32.mrb[34].mxu1  ;;  %v7566_v35 = vpop.eup %7565  ;;  %5968 = vst [vmem:[%s11285_s17 + $0x108] sm:$0xff] %v5868_v47  ;;  %v11555_v30 = vadd.f32 %v11237_v12, %v11437_v3  ;;  %v5475_v45 = vmul.f32 0.5, %v11476_v13  ;;  %v5477_v31 = vmul.f32 0.5, %v5377_v41  ;;  %v5580_v28 = vmul.f32 0.70710677, %v5380_v5 }
 0x4cf   : > { %v11548_v32 = vpop.f32.mrb[35].mxu0  ;;  %v11550_v2 = vpop.f32.mrb[35].mxu1  ;;  %5970 = vst [vmem:[%s11285_s17 + $0x118] sm:$0xff] %v5870_v14  ;;  %v5871_v21 = vmul.f32 %v5771_v0, %v5471_v26  ;;  %v5773_v59 = vadd.f32 1.0, %v7566_v35  ;;  %v5476_v24 = vmul.f32 0.5, %v5376_v4  ;;  %v5478_v11 = vmul.f32 0.5, %v11505_v58 }
 0x4d0   : > { %v7568_v29 = vpop.eup %7567  ;;  %v5582_v14 = vmul.f32 0.70710677, %v5382_v52  ;;  %7583 = verf.f32 %v5580_v28  ;;  %v5583_v3 = vmul.f32 0.70710677, %v11546_v6  ;;  %v5585_v13 = vmul.f32 0.70710677, %v11555_v30 }
 0x4d1   : > { %v7570_v10 = vpop.eup %7569  ;;  %v5772_v25 = vadd.f32 1.0, %v7568_v29  ;;  %5971 = vst [vmem:[%s11285_s17 + $0x120] sm:$0xff] %v5871_v21  ;;  %v5873_v46 = vmul.f32 %v5773_v59, %v5473_v17  ;;  %v11570_v4 = vadd.f32 %v11240_v44, %v11444_v15  ;;  %v11574_v58 = vadd.f32 %v11243_v53, %v11448_v48 }
 0x4d2   : > { %v5774_v47 = vadd.f32 1.0, %v7570_v10  ;;  %v7572_v26 = vpop.eup %7571  ;;  %7585 = verf.f32 %v5582_v14  ;;  %v11588_v15 = vadd.f32 %v11237_v12, %v11453_v54  ;;  %v5480_v14 = vmul.f32 0.5, %v5380_v5 }
 0x4d3   : > { %v5872_v0 = vmul.f32 %v5772_v25, %v5472_v9  ;;  %5973 = vst [vmem:[%s11285_s17 + $0x130] sm:$0xff] %v5873_v46  ;;  %v5775_v29 = vadd.f32 1.0, %v7572_v26  ;;  %v11563_v41 = vpop.f32.mrb[36].mxu0  ;;  %v11565_v17 = vpop.f32.mrb[36].mxu1  ;;  %7587 = verf.f32 %v5583_v3  ;;  %v11578_v9 = vadd.f32 %v11234_v23, %v11450_v60 }
 0x4d4   : > { %v5874_v35 = vmul.f32 %v5774_v47, %v5474_v34  ;;  %v11580_v34 = vpop.f32.mrb[37].mxu0  ;;  %v11582_v21 = vpop.f32.mrb[37].mxu1  ;;  %v5479_v25 = vmul.f32 0.5, %v11513_v8  ;;  %7589 = verf.f32 %v5585_v13  ;;  %v5481_v47 = vmul.f32 0.5, %v11519_v62 }
 0x4d5   : > { %5972 = vst [vmem:[%s11285_s17 + $0x128] sm:$0xff] %v5872_v0  ;;  %v7574_v59 = vpop.eup %7573  ;;  %v5875_v10 = vmul.f32 %v5775_v29, %v5475_v45  ;;  %v11590_v48 = vpop.f32.mrb[38].mxu0  ;;  %v5584_v26 = vmul.f32 0.70710677, %v11570_v4  ;;  %v5586_v54 = vmul.f32 0.70710677, %v11574_v58 }
 0x4d6   : > { %5974 = vst [vmem:[%s11285_s17 + $0x138] sm:$0xff] %v5874_v35  ;;  %v11592_v28 = vpop.f32.mrb[38].mxu1  ;;  %v7576_v60 = vpop.eup %7575  ;;  %v5777_v46 = vadd.f32 1.0, %v7574_v59  ;;  %v5587_v3 = vmul.f32 0.70710677, %v11578_v9  ;;  %v11603_v35 = vadd.f32 %v11240_v44, %v11455_v36  ;;  %v5482_v13 = vmul.f32 0.5, %v5382_v52 }
 0x4d7   : > { %v11596_v0 = vpop.f32.mrb[39].mxu0  ;;  %v7578_v45 = vpop.eup %7577  ;;  %5975 = vst [vmem:[%s11285_s17 + $0x140] sm:$0xff] %v5875_v10  ;;  %v5776_v8 = vadd.f32 1.0, %v7576_v60  ;;  %7591 = verf.f32 %v5584_v26  ;;  %v5589_v60 = vmul.f32 0.70710677, %v11588_v15  ;;  %v5483_v36 = vmul.f32 0.5, %v11546_v6 }
 0x4d8   : > { %v7580_v29 = vpop.eup %7579  ;;  %v5877_v62 = vmul.f32 %v5777_v46, %v5477_v31  ;;  %v5778_v5 = vadd.f32 1.0, %v7578_v45  ;;  %v11605_v59 = vpop.f32.mrb[39].mxu1  ;;  %7593 = verf.f32 %v5586_v54  ;;  %v5588_v52 = vmul.f32 0.70710677, %v11603_v35 }
 0x4d9   : > { %v7582_v57 = vpop.eup %7581  ;;  %v5876_v10 = vmul.f32 %v5776_v8, %v5476_v24  ;;  %v5779_v40 = vadd.f32 1.0, %v7580_v29  ;;  %7595 = verf.f32 %v5587_v3  ;;  %v5390_v24 = vadd.f32 %v11243_v53, %v11459_v61 }
 0x4da   : > { %5977 = vst [vmem:[%s11285_s17 + $0x150] sm:$0xff] %v5877_v62  ;;  %v5878_v33 = vmul.f32 %v5778_v5, %v5478_v11  ;;  %v5781_v42 = vadd.f32 1.0, %v7582_v57  ;;  %7597 = verf.f32 %v5589_v60  ;;  %v7584_v45 = vpop.eup %7583  ;;  %v5485_v6 = vmul.f32 0.5, %v11555_v30 }
 0x4db   : > { %5976 = vst [vmem:[%s11285_s17 + $0x148] sm:$0xff] %v5876_v10  ;;  %v5879_v31 = vmul.f32 %v5779_v40, %v5479_v25  ;;  %v11614_v46 = vpop.f32.mrb[40].mxu0  ;;  %v11616_v26 = vpop.f32.mrb[40].mxu1  ;;  %v11622_v11 = vadd.f32 %v11234_v23, %v11480_v51  ;;  %v11626_v40 = vadd.f32 %v11237_v12, %v11483_v20  ;;  %v5780_v54 = vadd.f32 1.0, %v7584_v45 }
 0x4dc   : > { %5978 = vst [vmem:[%s11285_s17 + $0x158] sm:$0xff] %v5878_v33  ;;  %v5881_v57 = vmul.f32 %v5781_v42, %v5481_v47  ;;  %v11628_v25 = vpop.f32.mrb[41].mxu0  ;;  %v11630_v61 = vpop.f32.mrb[41].mxu1  ;;  %7599 = verf.f32 %v5588_v52  ;;  %v5590_v33 = vmul.f32 0.70710677, %v5390_v24  ;;  %v11635_v42 = vadd.f32 %v11240_v44, %v11485_v63 }
 0x4dd   : > { %v7586_v8 = vpop.eup %7585  ;;  %5979 = vst [vmem:[%s11285_s17 + $0x160] sm:$0xff] %v5879_v31  ;;  %v11637_v30 = vpop.f32.mrb[42].mxu0  ;;  %v5484_v3 = vmul.f32 0.5, %v11570_v4  ;;  %v5486_v29 = vmul.f32 0.5, %v11574_v58  ;;  %v5591_v62 = vmul.f32 0.70710677, %v11622_v11  ;;  %v5880_v63 = vmul.f32 %v5780_v54, %v5480_v14 }
 0x4de   : > { %v11639_v51 = vpop.f32.mrb[42].mxu1  ;;  %v7588_v47 = vpop.eup %7587  ;;  %5981 = vst [vmem:[%s11285_s17 + $0x170] sm:$0xff] %v5881_v57  ;;  %v5782_v20 = vadd.f32 1.0, %v7586_v8  ;;  %7601 = verf.f32 %v5590_v33  ;;  %v5593_v31 = vmul.f32 0.70710677, %v11626_v40  ;;  %v5487_v4 = vmul.f32 0.5, %v11578_v9 }
 0x4df   : > { %v11645_v5 = vpop.f32.mrb[43].mxu0  ;;  %v7590_v10 = vpop.eup %7589  ;;  %v5783_v60 = vadd.f32 1.0, %v7588_v47  ;;  %7603 = verf.f32 %v5591_v62  ;;  %5980 = vst [vmem:[%s11285_s17 + $0x168] sm:$0xff] %v5880_v63  ;;  %v5592_v8 = vmul.f32 0.70710677, %v11635_v42  ;;  %v5394_v14 = vadd.f32 %v11243_v53, %v11488_v19 }
 0x4e0   : > { %v11648_v52 = vpop.f32.mrb[43].mxu1  ;;  %v5882_v45 = vmul.f32 %v5782_v20, %v5482_v13  ;;  %v5785_v57 = vadd.f32 1.0, %v7590_v10  ;;  %7605 = verf.f32 %v5593_v31  ;;  %v5489_v47 = vmul.f32 0.5, %v11588_v15 }
 0x4e1   : > { %v5883_v58 = vmul.f32 %v5783_v60, %v5483_v36  ;;  %v7592_v54 = vpop.eup %7591  ;;  %v11659_v13 = vadd.f32 %v11234_v23, %v11490_v43  ;;  %v11663_v9 = vadd.f32 %v11237_v12, %v11494_v22  ;;  %7607 = verf.f32 %v5592_v8 }
 0x4e2   : > { %5982 = vst [vmem:[%s11285_s17 + $0x178] sm:$0xff] %v5882_v45  ;;  %v5885_v33 = vmul.f32 %v5785_v57, %v5485_v6  ;;  %v7594_v36 = vpop.eup %7593  ;;  %v5784_v20 = vadd.f32 1.0, %v7592_v54  ;;  %v5594_v62 = vmul.f32 0.70710677, %v5394_v14  ;;  %v11668_v19 = vadd.f32 %v11240_v44, %v11496_v18 }
 0x4e3   : > { %5983 = vst [vmem:[%s11285_s17 + $0x180] sm:$0xff] %v5883_v58  ;;  %v11670_v6 = vpop.f32.mrb[44].mxu0  ;;  %v11672_v15 = vpop.f32.mrb[44].mxu1  ;;  %v5786_v43 = vadd.f32 1.0, %v7594_v36  ;;  %v5488_v63 = vmul.f32 0.5, %v11603_v35  ;;  %v5490_v22 = vmul.f32 0.5, %v5390_v24 }
 0x4e4   : > { %v7596_v10 = vpop.eup %7595  ;;  %5985 = vst [vmem:[%s11285_s17 + $0x190] sm:$0xff] %v5885_v33  ;;  %v5595_v60 = vmul.f32 0.70710677, %v11659_v13  ;;  %v11677_v31 = vpop.f32.mrb[45].mxu0  ;;  %v5884_v57 = vmul.f32 %v5784_v20, %v5484_v3  ;;  %7609 = verf.f32 %v5594_v62  ;;  %v5597_v18 = vmul.f32 0.70710677, %v11663_v9 }
 0x4e5   : > { %v7598_v45 = vpop.eup %7597  ;;  %v5787_v58 = vadd.f32 1.0, %v7596_v10  ;;  %v11680_v8 = vpop.f32.mrb[45].mxu1  ;;  %v5886_v33 = vmul.f32 %v5786_v43, %v5486_v29  ;;  %v5491_v35 = vmul.f32 0.5, %v11622_v11  ;;  %v5596_v62 = vmul.f32 0.70710677, %v11668_v19 }
 0x4e6   : > { %v11682_v54 = vpop.f32.mrb[46].mxu0  ;;  %v5789_v36 = vadd.f32 1.0, %v7598_v45  ;;  %7611 = verf.f32 %v5595_v60  ;;  %v11685_v24 = vpop.f32.mrb[46].mxu1  ;;  %5984 = vst [vmem:[%s11285_s17 + $0x188] sm:$0xff] %v5884_v57  ;;  %v5398_v10 = vadd.f32 %v11243_v53, %v11507_v56  ;;  %v5399_v60 = vadd.f32 %v11234_v23, %v11523_v39 }
 0x4e7   : > { %v11687_v37 = vpop.f32.mrb[47].mxu0  ;;  %v7600_v3 = vpop.eup %7599  ;;  %v5887_v20 = vmul.f32 %v5787_v58, %v5487_v4  ;;  %7613 = verf.f32 %v5597_v18  ;;  %5986 = vst [vmem:[%s11285_s17 + $0x198] sm:$0xff] %v5886_v33  ;;  %v11700_v45 = vadd.f32 %v11237_v12, %v11525_v16  ;;  %v5493_v57 = vmul.f32 0.5, %v11626_v40 }
 0x4e8   : > { %v11693_v29 = vpop.f32.mrb[47].mxu1  ;;  %v5889_v11 = vmul.f32 %v5789_v36, %v5489_v47  ;;  %v5788_v43 = vadd.f32 1.0, %v7600_v3  ;;  %v7602_v4 = vpop.eup %7601  ;;  %7615 = verf.f32 %v5596_v62  ;;  %v5598_v58 = vmul.f32 0.70710677, %v5398_v10 }
 0x4e9   : > { %5987 = vst [vmem:[%s11285_s17 + $0x1a0] sm:$0xff] %v5887_v20  ;;  %v11706_v56 = vadd.f32 %v11240_v44, %v11529_v7  ;;  %v7604_v47 = vpop.eup %7603  ;;  %v5790_v33 = vadd.f32 1.0, %v7602_v4  ;;  %v5492_v39 = vmul.f32 0.5, %v11635_v42  ;;  %v5599_v36 = vmul.f32 0.70710677, %v5399_v60 }
 0x4ea   : > { %5989 = vst [vmem:[%s11285_s17 + $0x1b0] sm:$0xff] %v5889_v11  ;;  %v5888_v18 = vmul.f32 %v5788_v43, %v5488_v63  ;;  %v7606_v16 = vpop.eup %7605  ;;  %v5791_v3 = vadd.f32 1.0, %v7604_v47  ;;  %v5494_v55 = vmul.f32 0.5, %v5394_v14  ;;  %7617 = verf.f32 %v5598_v58 }
 0x4eb   : > { %v5601_v40 = vmul.f32 0.70710677, %v11700_v45  ;;  %v11711_v20 = vpop.f32.mrb[68].mxu0  ;;  %v11713_v62 = vpop.f32.mrb[68].mxu1  ;;  %v5890_v7 = vmul.f32 %v5790_v33, %v5490_v22  ;;  %v5793_v27 = vadd.f32 1.0, %v7606_v16  ;;  %v5495_v63 = vmul.f32 0.5, %v11659_v13 }
 0x4ec   : > { %5988 = vst [vmem:[%s11285_s17 + $0x1a8] sm:$0xff] %v5888_v18  ;;  %7619 = verf.f32 %v5599_v36  ;;  %v11717_v11 = vpop.f32.mrb[69].mxu0  ;;  %v11719_v42 = vpop.f32.mrb[69].mxu1  ;;  %v5891_v43 = vmul.f32 %v5791_v3, %v5491_v35  ;;  %v5600_v4 = vmul.f32 0.70710677, %v11706_v56  ;;  %v5402_v58 = vadd.f32 %v11243_v53, %v11531_v49 }
 0x4ed   : > { %v7608_v14 = vpop.eup %7607  ;;  %7621 = verf.f32 %v5601_v40  ;;  %v4888_v47 = vpop.f32.mrb[70].mxu0  ;;  %5990 = vst [vmem:[%s11285_s17 + $0x1b8] sm:$0xff] %v5890_v7  ;;  %v5893_v18 = vmul.f32 %v5793_v27, %v5493_v57  ;;  %v5403_v33 = vadd.f32 %v11234_v23, %v11535_v1  ;;  %v11729_v36 = vadd.f32 %v11237_v12, %v11537_v38 }
 0x4ee   : > { %v5210_v22 = vpop.f32.mrb[70].mxu1  ;;  %v5792_v13 = vadd.f32 1.0, %v7608_v14  ;;  %v4889_v35 = vpop.f32.mrb[71].mxu0  ;;  %5991 = vst [vmem:[%s11285_s17 + $0x1c0] sm:$0xff] %v5891_v43  ;;  %v5497_v49 = vmul.f32 0.5, %v11663_v9  ;;  %7623 = verf.f32 %v5600_v4  ;;  %v11735_v27 = vadd.f32 %v11240_v44, %v11548_v32 }
 0x4ef   : > { %v5211_v16 = vpop.f32.mrb[71].mxu1  ;;  %v7610_v3 = vpop.eup %7609  ;;  %v5602_v40 = vmul.f32 0.70710677, %v5402_v58  ;;  %5993 = vst [vmem:[%s11285_s17 + $0x1d0] sm:$0xff] %v5893_v18  ;;  %v5496_v38 = vmul.f32 0.5, %v11668_v19  ;;  %v5498_v43 = vmul.f32 0.5, %v5398_v10 }
 0x4f0   : > { %v7612_v57 = vpop.eup %7611  ;;  %v5892_v1 = vmul.f32 %v5792_v13, %v5492_v39  ;;  %v5794_v7 = vadd.f32 1.0, %v7610_v3  ;;  %v5603_v14 = vmul.f32 0.70710677, %v5403_v33  ;;  %v5605_v9 = vmul.f32 0.70710677, %v11729_v36 }
 0x4f1   : > { %v7614_v47 = vpop.eup %7613  ;;  %v5795_v22 = vadd.f32 1.0, %v7612_v57  ;;  %7625 = verf.f32 %v5602_v40  ;;  %v5499_v32 = vmul.f32 0.5, %v5399_v60  ;;  %v5604_v19 = vmul.f32 0.70710677, %v11735_v27 }
 0x4f2   : > { %5992 = vst [vmem:[%s11285_s17 + $0x1c8] sm:$0xff] %v5892_v1  ;;  %v5894_v4 = vmul.f32 %v5794_v7, %v5494_v55  ;;  %v5797_v35 = vadd.f32 1.0, %v7614_v47  ;;  %7627 = verf.f32 %v5603_v14  ;;  %v7616_v16 = vpop.eup %7615  ;;  %v5406_v39 = vadd.f32 %v11243_v53, %v11550_v2 }
 0x4f3   : > { %v5895_v18 = vmul.f32 %v5795_v22, %v5495_v63  ;;  %7629 = verf.f32 %v5605_v9  ;;  %v5796_v13 = vadd.f32 1.0, %v7616_v16  ;;  %v5407_v3 = vadd.f32 %v11234_v23, %v11563_v41 }
 0x4f4   : > { %5994 = vst [vmem:[%s11285_s17 + $0x1d8] sm:$0xff] %v5894_v4  ;;  %v5897_v10 = vmul.f32 %v5797_v35, %v5497_v49  ;;  %v11749_v55 = vadd.f32 %v11237_v12, %v11565_v17  ;;  %v7618_v60 = vpop.eup %7617  ;;  %v5501_v63 = vmul.f32 0.5, %v11700_v45  ;;  %7631 = verf.f32 %v5604_v19 }
 0x4f5   : > { %5995 = vst [vmem:[%s11285_s17 + $0x1e0] sm:$0xff] %v5895_v18  ;;  %v5606_v40 = vmul.f32 0.70710677, %v5406_v39  ;;  %v11755_v2 = vadd.f32 %v11240_v44, %v11580_v34  ;;  %v5896_v57 = vmul.f32 %v5796_v13, %v5496_v38  ;;  %v5798_v1 = vadd.f32 1.0, %v7618_v60 }
 0x4f6   : > { %v7620_v49 = vpop.eup %7619  ;;  %5997 = vst [vmem:[%s11285_s17 + $0x1f0] sm:$0xff] %v5897_v10  ;;  %v5500_v41 = vmul.f32 0.5, %v11706_v56  ;;  %v5607_v7 = vmul.f32 0.70710677, %v5407_v3  ;;  %v5502_v47 = vmul.f32 0.5, %v5402_v58  ;;  %v5503_v34 = vmul.f32 0.5, %v5403_v33 }
 0x4f7   : > { %v7622_v17 = vpop.eup %7621  ;;  %v5799_v14 = vadd.f32 1.0, %v7620_v49  ;;  %7633 = verf.f32 %v5606_v40  ;;  %v5609_v45 = vmul.f32 0.70710677, %v11749_v55  ;;  %5996 = vst [vmem:[%s11285_s17 + $0x1e8] sm:$0xff] %v5896_v57  ;;  %v5898_v22 = vmul.f32 %v5798_v1, %v5498_v43 }
 0x4f8   : > { %v5801_v9 = vadd.f32 1.0, %v7622_v17  ;;  %7635 = verf.f32 %v5607_v7  ;;  %v7624_v4 = vpop.eup %7623  ;;  %v5608_v56 = vmul.f32 0.70710677, %v11755_v2  ;;  %v5410_v38 = vadd.f32 %v11243_v53, %v11582_v21 }
 0x4f9   : > { %v5899_v35 = vmul.f32 %v5799_v14, %v5499_v32  ;;  %7637 = verf.f32 %v5609_v45  ;;  %5998 = vst [vmem:[%s11285_s17 + $0x1f8] sm:$0xff] %v5898_v22  ;;  %v5800_v16 = vadd.f32 1.0, %v7624_v4  ;;  %v5411_v18 = vadd.f32 %v11234_v23, %v11590_v48 }
 0x4fa   : > { %v5901_v58 = vmul.f32 %v5801_v9, %v5501_v63  ;;  %v11769_v43 = vadd.f32 %v11237_v12, %v11592_v28  ;;  %v5505_v32 = vmul.f32 0.5, %v11729_v36  ;;  %7639 = verf.f32 %v5608_v56 }
 0x4fb   : > { %v7626_v33 = vpop.eup %7625  ;;  %5999 = vst [vmem:[%s11285_s17 + $0x200] sm:$0xff] %v5899_v35  ;;  %v5610_v19 = vmul.f32 0.70710677, %v5410_v38  ;;  %v11775_v21 = vadd.f32 %v11240_v44, %v11596_v0  ;;  %v5900_v13 = vmul.f32 %v5800_v16, %v5500_v41  ;;  %v5504_v48 = vmul.f32 0.5, %v11735_v27 }
 0x4fc   : > { %v7628_v10 = vpop.eup %7627  ;;  %6001 = vst [vmem:[%s11285_s17 + $0x210] sm:$0xff] %v5901_v58  ;;  %v5802_v60 = vadd.f32 1.0, %v7626_v33  ;;  %v5611_v63 = vmul.f32 0.70710677, %v5411_v18  ;;  %v5506_v49 = vmul.f32 0.5, %v5406_v39  ;;  %v5507_v0 = vmul.f32 0.5, %v5407_v3 }
 0x4fd   : > { %v7630_v28 = vpop.eup %7629  ;;  %v5803_v40 = vadd.f32 1.0, %v7628_v10  ;;  %7641 = verf.f32 %v5610_v19  ;;  %v5613_v36 = vmul.f32 0.70710677, %v11769_v43  ;;  %6000 = vst [vmem:[%s11285_s17 + $0x208] sm:$0xff] %v5900_v13  ;;  %v5612_v27 = vmul.f32 0.70710677, %v11775_v21 }
 0x4fe   : > { %v5902_v57 = vmul.f32 %v5802_v60, %v5502_v47  ;;  %v5805_v1 = vadd.f32 1.0, %v7630_v28  ;;  %7643 = verf.f32 %v5611_v63  ;;  %v7632_v7 = vpop.eup %7631  ;;  %v5414_v41 = vadd.f32 %v11243_v53, %v11605_v59 }
 0x4ff   : > { %v5903_v17 = vmul.f32 %v5803_v40, %v5503_v34  ;;  %7645 = verf.f32 %v5613_v36  ;;  %v5804_v14 = vadd.f32 1.0, %v7632_v7  ;;  %v5415_v45 = vadd.f32 %v11234_v23, %v11614_v46 }
 0x500   : > { %6002 = vst [vmem:[%s11285_s17 + $0x218] sm:$0xff] %v5902_v57  ;;  %v5905_v39 = vmul.f32 %v5805_v1, %v5505_v32  ;;  %v11789_v47 = vadd.f32 %v11237_v12, %v11616_v26  ;;  %v5509_v22 = vmul.f32 0.5, %v11749_v55  ;;  %7647 = verf.f32 %v5612_v27 }
 0x501   : > { %v7634_v3 = vpop.eup %7633  ;;  %6003 = vst [vmem:[%s11285_s17 + $0x220] sm:$0xff] %v5903_v17  ;;  %v5614_v9 = vmul.f32 0.70710677, %v5414_v41  ;;  %v11795_v59 = vadd.f32 %v11240_v44, %v11628_v25  ;;  %v5904_v4 = vmul.f32 %v5804_v14, %v5504_v48  ;;  %v5508_v46 = vmul.f32 0.5, %v11755_v2 }
 0x502   : > { %v7636_v34 = vpop.eup %7635  ;;  %6005 = vst [vmem:[%s11285_s17 + $0x230] sm:$0xff] %v5905_v39  ;;  %v5806_v35 = vadd.f32 1.0, %v7634_v3  ;;  %v5615_v56 = vmul.f32 0.70710677, %v5415_v45  ;;  %v5510_v16 = vmul.f32 0.5, %v5410_v38  ;;  %v5511_v25 = vmul.f32 0.5, %v5411_v18 }
 0x503   : > { %v7638_v26 = vpop.eup %7637  ;;  %v5807_v58 = vadd.f32 1.0, %v7636_v34  ;;  %7649 = verf.f32 %v5614_v9  ;;  %v5617_v55 = vmul.f32 0.70710677, %v11789_v47  ;;  %6004 = vst [vmem:[%s11285_s17 + $0x228] sm:$0xff] %v5904_v4  ;;  %v5616_v2 = vmul.f32 0.70710677, %v11795_v59 }
 0x504   : > { %v5906_v33 = vmul.f32 %v5806_v35, %v5506_v49  ;;  %v5809_v32 = vadd.f32 1.0, %v7638_v26  ;;  %7651 = verf.f32 %v5615_v56  ;;  %v7640_v19 = vpop.eup %7639  ;;  %v5418_v13 = vadd.f32 %v11243_v53, %v11630_v61 }
 0x505   : > { %v5907_v10 = vmul.f32 %v5807_v58, %v5507_v0  ;;  %7653 = verf.f32 %v5617_v55  ;;  %v5808_v60 = vadd.f32 1.0, %v7640_v19  ;;  %v5419_v48 = vadd.f32 %v11234_v23, %v11637_v30 }
 0x506   : > { %6006 = vst [vmem:[%s11285_s17 + $0x238] sm:$0xff] %v5906_v33  ;;  %v5909_v38 = vmul.f32 %v5809_v32, %v5509_v22  ;;  %v11809_v63 = vadd.f32 %v11237_v12, %v11639_v51  ;;  %v5513_v28 = vmul.f32 0.5, %v11769_v43  ;;  %7655 = verf.f32 %v5616_v2 }
 0x507   : > { %v7642_v18 = vpop.eup %7641  ;;  %6007 = vst [vmem:[%s11285_s17 + $0x240] sm:$0xff] %v5907_v10  ;;  %v5618_v40 = vmul.f32 0.70710677, %v5418_v13  ;;  %v11815_v61 = vadd.f32 %v11240_v44, %v11645_v5  ;;  %v5908_v36 = vmul.f32 %v5808_v60, %v5508_v46  ;;  %v5512_v30 = vmul.f32 0.5, %v11775_v21 }
 0x508   : > { %v7644_v49 = vpop.eup %7643  ;;  %6009 = vst [vmem:[%s11285_s17 + $0x250] sm:$0xff] %v5909_v38  ;;  %v5810_v57 = vadd.f32 1.0, %v7642_v18  ;;  %v5619_v1 = vmul.f32 0.70710677, %v5419_v48  ;;  %v5514_v7 = vmul.f32 0.5, %v5414_v41  ;;  %v5515_v5 = vmul.f32 0.5, %v5415_v45 }
 0x509   : > { %v7646_v51 = vpop.eup %7645  ;;  %v5811_v0 = vadd.f32 1.0, %v7644_v49  ;;  %7657 = verf.f32 %v5618_v40  ;;  %v5621_v43 = vmul.f32 0.70710677, %v11809_v63  ;;  %6008 = vst [vmem:[%s11285_s17 + $0x248] sm:$0xff] %v5908_v36  ;;  %v5620_v21 = vmul.f32 0.70710677, %v11815_v61 }
 0x50a   : > { %v5910_v17 = vmul.f32 %v5810_v57, %v5510_v16  ;;  %v5813_v27 = vadd.f32 1.0, %v7646_v51  ;;  %7659 = verf.f32 %v5619_v1  ;;  %v7648_v39 = vpop.eup %7647  ;;  %v5422_v3 = vadd.f32 %v11243_v53, %v11648_v52 }
 0x50b   : > { %v5911_v14 = vmul.f32 %v5811_v0, %v5511_v25  ;;  %7661 = verf.f32 %v5621_v43  ;;  %v5812_v22 = vadd.f32 1.0, %v7648_v39  ;;  %v5423_v9 = vadd.f32 %v11234_v23, %v11670_v6 }
 0x50c   : > { %6010 = vst [vmem:[%s11285_s17 + $0x258] sm:$0xff] %v5910_v17  ;;  %v5913_v41 = vmul.f32 %v5813_v27, %v5513_v28  ;;  %v11829_v34 = vadd.f32 %v11237_v12, %v11672_v15  ;;  %v5517_v4 = vmul.f32 0.5, %v11789_v47  ;;  %7663 = verf.f32 %v5620_v21 }
 0x50d   : > { %v7650_v45 = vpop.eup %7649  ;;  %6011 = vst [vmem:[%s11285_s17 + $0x260] sm:$0xff] %v5911_v14  ;;  %v5622_v35 = vmul.f32 0.70710677, %v5422_v3  ;;  %v11835_v52 = vadd.f32 %v11240_v44, %v11677_v31  ;;  %v5912_v56 = vmul.f32 %v5812_v22, %v5512_v30  ;;  %v5516_v6 = vmul.f32 0.5, %v11795_v59  ;;  %v13126_v14 = vld [vmem:[#allocation77_spill] sm:$0xff] }
 0x50e   : > { %v7652_v46 = vpop.eup %7651  ;;  %6013 = vst [vmem:[%s11285_s17 + $0x270] sm:$0xff] %v5913_v41  ;;  %v5814_v26 = vadd.f32 1.0, %v7650_v45  ;;  %v5623_v58 = vmul.f32 0.70710677, %v5423_v9  ;;  %v5518_v55 = vmul.f32 0.5, %v5418_v13  ;;  %v5519_v31 = vmul.f32 0.5, %v5419_v48 }
 0x50f   : > { %v7654_v15 = vpop.eup %7653  ;;  %v5815_v16 = vadd.f32 1.0, %v7652_v46  ;;  %7665 = verf.f32 %v5622_v35  ;;  %v5625_v47 = vmul.f32 0.70710677, %v11829_v34  ;;  %6012 = vst [vmem:[%s11285_s17 + $0x268] sm:$0xff] %v5912_v56  ;;  %v5624_v59 = vmul.f32 0.70710677, %v11835_v52 }
 0x510   : > { %v5914_v33 = vmul.f32 %v5814_v26, %v5514_v7  ;;  %v5817_v32 = vadd.f32 1.0, %v7654_v15  ;;  %7667 = verf.f32 %v5623_v58  ;;  %v7656_v25 = vpop.eup %7655  ;;  %v11844_v10 = vadd.f32 %v11243_v53, %v11680_v8  ;;  %v13128_v46 = vld [vmem:[#allocation171_spill] sm:$0xff]  ;;  %v13131_v58 = vld [vmem:[#allocation60_spill] sm:$0xff] }
 0x511   : > { %v5915_v19 = vmul.f32 %v5815_v16, %v5515_v5  ;;  %7669 = verf.f32 %v5625_v47  ;;  %v5816_v13 = vadd.f32 1.0, %v7656_v25  ;;  %v11849_v38 = vadd.f32 %v11234_v23, %v11682_v54  ;;  %v13132_v25 = vld [vmem:[#allocation71_spill] sm:$0xff] }
 0x512   : > { %6014 = vst [vmem:[%s11285_s17 + $0x278] sm:$0xff] %v5914_v33  ;;  %v5917_v2 = vmul.f32 %v5817_v32, %v5517_v4  ;;  %v11853_v60 = vadd.f32 %v11237_v12, %v11685_v24  ;;  %v5521_v18 = vmul.f32 0.5, %v11809_v63  ;;  %7671 = verf.f32 %v5624_v59 }
 0x513   : > { %v7658_v48 = vpop.eup %7657  ;;  %6015 = vst [vmem:[%s11285_s17 + $0x280] sm:$0xff] %v5915_v19  ;;  %v5626_v8 = vmul.f32 0.70710677, %v11844_v10  ;;  %v11860_v28 = vadd.f32 %v11240_v44, %v11687_v37  ;;  %v5916_v54 = vmul.f32 %v5816_v13, %v5516_v6  ;;  %v5520_v36 = vmul.f32 0.5, %v11815_v61  ;;  %v13130_v6 = vld [vmem:[#allocation103_spill] sm:$0xff] }
 0x514   : > { %v7660_v40 = vpop.eup %7659  ;;  %6017 = vst [vmem:[%s11285_s17 + $0x290] sm:$0xff] %v5917_v2  ;;  %v5818_v49 = vadd.f32 1.0, %v7658_v48  ;;  %v5627_v24 = vmul.f32 0.70710677, %v11849_v38  ;;  %v5522_v1 = vmul.f32 0.5, %v5422_v3  ;;  %v5523_v0 = vmul.f32 0.5, %v5423_v9 }
 0x515   : > { %v7662_v57 = vpop.eup %7661  ;;  %v5819_v30 = vadd.f32 1.0, %v7660_v40  ;;  %7673 = verf.f32 %v5626_v8  ;;  %v5629_v63 = vmul.f32 0.70710677, %v11853_v60  ;;  %6016 = vst [vmem:[%s11285_s17 + $0x288] sm:$0xff] %v5916_v54  ;;  %v5628_v61 = vmul.f32 0.70710677, %v11860_v28 }
 0x516   : > { %v5918_v51 = vmul.f32 %v5818_v49, %v5518_v55  ;;  %v5821_v37 = vadd.f32 1.0, %v7662_v57  ;;  %7675 = verf.f32 %v5627_v24  ;;  %v7664_v7 = vpop.eup %7663  ;;  %v11870_v17 = vadd.f32 %v11243_v53, %v11693_v29  ;;  %v13127_v9 = vld [vmem:[#allocation45_spill] sm:$0xff] }
 0x517   : > { %v5919_v43 = vmul.f32 %v5819_v30, %v5519_v31  ;;  %7677 = verf.f32 %v5629_v63  ;;  %v5820_v5 = vadd.f32 1.0, %v7664_v7  ;;  %v4885_v39 = vadd.f32 %v11711_v20, %v11224_v50  ;;  %v13129_v20 = vld [vmem:[#allocation69_spill] sm:$0xff] }
 0x518   : > { %6018 = vst [vmem:[%s11285_s17 + $0x298] sm:$0xff] %v5918_v51  ;;  %v5921_v27 = vmul.f32 %v5821_v37, %v5521_v18  ;;  %v5207_v21 = vadd.f32 %v11713_v62, %v13126_v14  ;;  %v5525_v41 = vmul.f32 0.5, %v11829_v34  ;;  %7679 = verf.f32 %v5628_v61 }
 0x519   : > { %v7666_v3 = vpop.eup %7665  ;;  %6019 = vst [vmem:[%s11285_s17 + $0x2a0] sm:$0xff] %v5919_v43  ;;  %v5630_v22 = vmul.f32 0.70710677, %v11870_v17  ;;  %v4887_v29 = vadd.f32 %v11717_v11, %v13127_v9  ;;  %v5920_v4 = vmul.f32 %v5820_v5, %v5520_v36  ;;  %v5309_v50 = vadd.f32 %v4885_v39, %v13128_v46 }
 0x51a   : > { %v7668_v45 = vpop.eup %7667  ;;  %6021 = vst [vmem:[%s11285_s17 + $0x2b0] sm:$0xff] %v5921_v27  ;;  %v5822_v35 = vadd.f32 1.0, %v7666_v3  ;;  %v5311_v62 = vadd.f32 %v5207_v21, %v13129_v20  ;;  %v5209_v15 = vadd.f32 %v11719_v42, %v13131_v58  ;;  %v5524_v2 = vmul.f32 0.5, %v11835_v52 }
 0x51b   : > { %v7670_v56 = vpop.eup %7669  ;;  %v5823_v26 = vadd.f32 1.0, %v7668_v45  ;;  %7681 = verf.f32 %v5630_v22  ;;  %v5310_v34 = vadd.f32 %v4887_v29, %v13130_v6  ;;  %6020 = vst [vmem:[%s11285_s17 + $0x2a8] sm:$0xff] %v5920_v4  ;;  %v5431_v55 = vadd.f32 %v11234_v23, %v5309_v50 }
 0x51c   : > { %v5922_v11 = vmul.f32 %v5822_v35, %v5522_v1  ;;  %v5825_v16 = vadd.f32 1.0, %v7670_v56  ;;  %v5433_v47 = vadd.f32 %v11237_v12, %v5311_v62  ;;  %v7672_v33 = vpop.eup %7671  ;;  %v5312_v19 = vadd.f32 %v5209_v15, %v13132_v25 }
 0x51d   : > { %v5923_v32 = vmul.f32 %v5823_v26, %v5523_v0  ;;  %v5432_v31 = vadd.f32 %v11240_v44, %v5310_v34  ;;  %v5824_v42 = vadd.f32 1.0, %v7672_v33  ;;  %v5631_v13 = vmul.f32 0.70710677, %v5431_v55 }
 0x51e   : > { %6022 = vst [vmem:[%s11285_s17 + $0x2b8] sm:$0xff] %v5922_v11  ;;  %v5925_v59 = vmul.f32 %v5825_v16, %v5525_v41  ;;  %v5526_v23 = vmul.f32 0.5, %v11844_v10  ;;  %v5633_v18 = vmul.f32 0.70710677, %v5433_v47  ;;  %v5434_v54 = vadd.f32 %v11243_v53, %v5312_v19 }
 0x51f   : > { %v7674_v48 = vpop.eup %7673  ;;  %6023 = vst [vmem:[%s11285_s17 + $0x2c0] sm:$0xff] %v5923_v32  ;;  %v5632_v12 = vmul.f32 0.70710677, %v5432_v31  ;;  %v5924_v40 = vmul.f32 %v5824_v42, %v5524_v2  ;;  %7683 = verf.f32 %v5631_v13  ;;  %v5527_v52 = vmul.f32 0.5, %v11849_v38 }
 0x520   : > { %v7676_v8 = vpop.eup %7675  ;;  %6025 = vst [vmem:[%s11285_s17 + $0x2d0] sm:$0xff] %v5925_v59  ;;  %v5826_v44 = vadd.f32 1.0, %v7674_v48  ;;  %7685 = verf.f32 %v5633_v18  ;;  %v5529_v10 = vmul.f32 0.5, %v11853_v60  ;;  %v5634_v63 = vmul.f32 0.70710677, %v5434_v54 }
 0x521   : > { %v7678_v49 = vpop.eup %7677  ;;  %v5827_v36 = vadd.f32 1.0, %v7676_v8  ;;  %6024 = vst [vmem:[%s11285_s17 + $0x2c8] sm:$0xff] %v5924_v40  ;;  %7687 = verf.f32 %v5632_v12  ;;  %v5528_v51 = vmul.f32 0.5, %v11860_v28  ;;  %v5530_v60 = vmul.f32 0.5, %v11870_v17 }
 0x522   : > { %v5926_v24 = vmul.f32 %v5826_v44, %v5526_v23  ;;  %v5829_v57 = vadd.f32 1.0, %v7678_v49  ;;  %v7680_v30 = vpop.eup %7679  ;;  %7689 = verf.f32 %v5634_v63  ;;  %v5531_v5 = vmul.f32 0.5, %v5431_v55 }
 0x523   : > { %v5927_v1 = vmul.f32 %v5827_v36, %v5527_v52  ;;  %v5828_v38 = vadd.f32 1.0, %v7680_v30  ;;  %v5533_v14 = vmul.f32 0.5, %v5433_v47  ;;  %v5532_v41 = vmul.f32 0.5, %v5432_v31 }
 0x524   : > { %6026 = vst [vmem:[%s11285_s17 + $0x2d8] sm:$0xff] %v5926_v24  ;;  %v5929_v53 = vmul.f32 %v5829_v57, %v5529_v10  ;;  %v5534_v45 = vmul.f32 0.5, %v5434_v54 }
 0x525   : > { %v7682_v37 = vpop.eup %7681  ;;  %6027 = vst [vmem:[%s11285_s17 + $0x2e0] sm:$0xff] %v5927_v1  ;;  %v5928_v0 = vmul.f32 %v5828_v38, %v5528_v51 }
 0x526   : > { %6029 = vst [vmem:[%s11285_s17 + $0x2f0] sm:$0xff] %v5929_v53  ;;  %v5830_v7 = vadd.f32 1.0, %v7682_v37 }
 0x527   : > { %6028 = vst [vmem:[%s11285_s17 + $0x2e8] sm:$0xff] %v5928_v0 }
 0x528   : > { %v5930_v43 = vmul.f32 %v5830_v7, %v5530_v60 }
 0x529   : > { %v7684_v61 = vpop.eup %7683 }
 0x52a   : > { %6030 = vst [vmem:[%s11285_s17 + $0x2f8] sm:$0xff] %v5930_v43  ;;  %v7686_v27 = vpop.eup %7685  ;;  %v5831_v28 = vadd.f32 1.0, %v7684_v61 }
 0x52b   : > { %v7688_v39 = vpop.eup %7687  ;;  %v5833_v21 = vadd.f32 1.0, %v7686_v27 }
 0x52c   : > { %v5931_v3 = vmul.f32 %v5831_v28, %v5531_v5  ;;  %v5832_v17 = vadd.f32 1.0, %v7688_v39  ;;  %v7690_v9 = vpop.eup %7689 }
 0x52d   : > { %v5933_v22 = vmul.f32 %v5833_v21, %v5533_v14  ;;  %v5834_v4 = vadd.f32 1.0, %v7690_v9 }
 0x52e   : > { %6031 = vst [vmem:[%s11285_s17 + $0x300] sm:$0xf] %v5931_v3  ;;  %v5932_v29 = vmul.f32 %v5832_v17, %v5532_v41 }
 0x52f   : > { %6033 = vst [vmem:[%s11285_s17 + $0x310] sm:$0xf] %v5933_v22  ;;  %v5934_v35 = vmul.f32 %v5834_v4, %v5534_v45 }
 0x530   : > { %6032 = vst [vmem:[%s11285_s17 + $0x308] sm:$0xf] %v5932_v29 }
 0x531   : > { %6034 = vst [vmem:[%s11285_s17 + $0x318] sm:$0xf] %v5934_v35 }
 0x532   : > { %7984 = shalt.err (!%p7981_p11)
}
 0x533   : > { %s7985_s7 = scalar_lea.hbm %s11916_s15, 12800  ;;  %s7989_s11 = scalar_lea.hbm %s13134_s18, 51200 }
 0x534   : > { %p7986_p4 = scmp.ne.s32.totalorder %s11916_s15, %s7985_s7  ;;  %p7990_p13 = scmp.lt.u32.totalorder %s11916_s15, %s13134_s18 }
 0x535   : > { %p7991_p3 = scmp.lt.u32.totalorder %s7989_s11, %s7985_s7  ;;  %p7993_p8 = scmp.lt.u32.totalorder %s7985_s7, %s11916_s15 }
 0x536   : > { %p7987_p0 = pnand %p7986_p4, %p13135_p6 }
 0x537   : > { %p7992_p9 = por %p7991_p3, %p7990_p13 }
 0x538   : > { %p7988_p7 = pneg %p7987_p0 }
 0x539   : > { %p7994_p2 = por %p7993_p8, %p7992_p9 }
 0x53b   : > { %p7995_p12 = pnand %p7994_p2, %p7988_p7 }
 0x53d   : > { %7998 = shalt.err (!%p7995_p12)
}
 0x53e   : > { %s8062_s20 = smov 512   ;;  %s8063_s3 = smov 2048  }
 0x53f   : > { %s8064_s10 = smov 32  }
 0x540   : > { %6981 = dma.vmem_to_hbm [thread:$0]  (%p13135_p6), %s11919_s27, 12800, %s11916_s15, %s6036_s25, %s8062_s20, %s8063_s3, %s8064_s10  }
 0x541 PF: > { %s13136_s6 = sld [smem:[#allocation19_spill]]  ;;  %s13137_s21 = sld [smem:[#allocation25_spill]] }
 0x542   : > { %p7014_p10 = scmp.ge.s32.totalorder %s8049_s24, 2 }
 0x547   : > { %s6064_s17 = sand.u32 1, %s13136_s6   ;;  %p13138_p1 = scmp.ne.s32.totalorder %s13137_s21, 0 }
 0x548   : > { %s6065_s29 = scalar_lea.sflag [#allocation4], %s6064_s17 }
 0x549   : > { %p7004_p5 = pnand %p7014_p10, %p13138_p1 }
 0x54b   : > { %8032 = dma.done.wait (!%p7004_p5), %s6065_s29, 12800  }
 0x54c   : > { %8034 = vsyncadd (!%p7004_p5), %s6065_s29, 4294954496  ;;  %s13139_s24 = sld [smem:[#allocation21_spill]]  ;;  %s13140_s23 = sld [smem:[#allocation20_spill]] }
 0x54d   : > { %s13141_s26 = sld [smem:[#allocation22_spill]]  ;;  %s13142_s21 = smov %s8041_s22 }
 0x552   : > { %p24_p11 = scmp.ge.s32.totalorder %s13139_s24, 6   ;;  %s13143_s22 = smov %s13140_s23 }
 0x553   : > { %s13144_s23 = smov %s13141_s26 }
 0x554   :  { %26 = sbr.rel (!%p24_p11) target bundleno = 13 (0xd), region = 126 }
 0x55b   :  { %6070 = vsyncpa [#allocation3], 1 }
 0x55c   :  { %6072 = vsyncpa [#allocation3 + $0x1], 1 }
 0x55d   :  { %6073 = vsyncpa [#allocation6], 1 }
 0x55e   :  { %6074 = vsyncpa [#allocation9], 1 }
 0x55f   :  { %6076 = vsyncpa [#allocation9 + $0x1], 1 }
 0x560   :  { %6077 = vsyncpa [#allocation12], 1 }
 0x561   :  { %6079 = vsyncpa [#allocation12 + $0x1], 1 }
 0x562   :  { %6080 = vsyncpa [#allocation4], 1 }
 0x563   :  { %6082 = vsyncpa [#allocation4 + $0x1], 1 }

</bundles_post_ra>
